<compile_context>
chip_gen: v5e
topology: v5e:2x2
jax: 0.10.0
libtpu: 0.0.40
codegen_flags: <defaults>
</compile_context>

<pallas_src>
import jax
import jax.numpy as jnp
from jax.experimental import pallas as pl
from jax.experimental.pallas import tpu as pltpu

CH = 16        # DFL bins per box side
BN_EPS = 1e-5  # BatchNorm eps


def _silu(x):
    return x * jax.nn.sigmoid(x)


# ---------------------------- Pallas kernels ----------------------------

def make_branch_kernel(H, W, Cin, c1, c2, nc):
    """Fused per-scale head kernel (one batch element per grid step).

    Inputs (refs, batch squeezed):
      xp   : (H+2, W+2, Cin) f32    zero-padded NHWC input
      w0   : (9*Cin, c2+c1) f32     fused box+cls layer-0 folded weights
      b0   : (1, c2+c1) f32         fused folded bias
      w1b  : (9*c2, c2) f32, b1b (1, c2) f32     box layer-1
      w1c  : (9*c1, c1) f32, b1c (1, c1) f32     cls layer-1
      w2b  : (c2, 4*CH) f32                      box 1x1 (bias-free)
      w2c  : (c1, nc) f32                        cls 1x1 (bias-free)
    Outputs:
      box  : (4*CH, H*W) f32   (channel-first)
      cls  : (nc,   H*W) f32   (channel-first)
    Scratch:
      padb : (H+2, W+2, c2) f32   zero-padded layer-0 box activation
      padc : (H+2, W+2, c1) f32   zero-padded layer-0 cls activation
    """
    HW = H * W

    def im2col(src_ref, C):
        # (HW, 9*C) slab in (ky, kx, cin) column order -> single big-K matmul.
        cols = []
        for ky in range(3):
            for kx in range(3):
                cols.append(src_ref[ky:ky + H, kx:kx + W, :].reshape(HW, C))
        return jnp.concatenate(cols, axis=-1)

    def kernel(xp_ref, w0_ref, b0_ref, w1b_ref, b1b_ref, w1c_ref, b1c_ref,
               w2b_ref, w2c_ref, box_ref, cls_ref, padb_ref, padc_ref):
        # ---- layer 0: fused box+cls 3x3 Conv + BN + SiLU (one matmul) ----
        slab0 = im2col(xp_ref, Cin)                               # (HW, 9*Cin)
        y0 = jnp.dot(slab0, w0_ref[...],
                     preferred_element_type=jnp.float32)
        a0 = _silu(y0 + b0_ref[...])                              # (HW, c2+c1)

        # materialize zero-padded intermediates once in VMEM scratch
        padb_ref[...] = jnp.zeros_like(padb_ref)
        padc_ref[...] = jnp.zeros_like(padc_ref)
        padb_ref[1:H + 1, 1:W + 1, :] = a0[:, :c2].reshape(H, W, c2)
        padc_ref[1:H + 1, 1:W + 1, :] = a0[:, c2:].reshape(H, W, c1)

        # ---- layer 1: per-branch 3x3 Conv + BN + SiLU (one matmul each) ----
        a1b = _silu(jnp.dot(im2col(padb_ref, c2), w1b_ref[...],
                            preferred_element_type=jnp.float32) + b1b_ref[...])
        a1c = _silu(jnp.dot(im2col(padc_ref, c1), w1c_ref[...],
                            preferred_element_type=jnp.float32) + b1c_ref[...])

        # ---- layer 2: bias-free 1x1 convs, store channel-first ----
        box2 = jnp.dot(a1b, w2b_ref[...],
                       preferred_element_type=jnp.float32)        # (HW, 4*CH)
        cls2 = jnp.dot(a1c, w2c_ref[...],
                       preferred_element_type=jnp.float32)        # (HW, nc)
        box_ref[...] = box2.T.astype(box_ref.dtype)               # (4*CH, HW)
        cls_ref[...] = cls2.T.astype(cls_ref.dtype)               # (nc, HW)

    return kernel


def dfl_decode_kernel(box_ref, cls_ref, anc_ref, str_ref, o_ref):
    """DFL softmax-expectation + dist2bbox decode + cls sigmoid.
    box: (4*CH, A), cls: (nc, A), anchors: (2, A) [x;y], strides: (1, A),
    out: (4+nc, A) = cat([cx, cy, w, h] * stride, sigmoid(cls))."""
    A = box_ref.shape[-1]
    bins = jax.lax.broadcasted_iota(jnp.int32, (CH, A), 0).astype(jnp.float32)
    d = []
    for g in range(4):
        logits = box_ref[g * CH:(g + 1) * CH, :]                  # (CH, A)
        m = jnp.max(logits, axis=0, keepdims=True)
        e = jnp.exp(logits - m)
        denom = jnp.sum(e, axis=0, keepdims=True)
        d.append(jnp.sum(e * bins, axis=0, keepdims=True) / denom)  # (1, A)
    lt_x, lt_y, rb_x, rb_y = d
    ax = anc_ref[0:1, :]
    ay = anc_ref[1:2, :]
    s = str_ref[...]
    x1 = ax - lt_x
    y1 = ay - lt_y
    x2 = ax + rb_x
    y2 = ay + rb_y
    box_rows = jnp.concatenate(
        [(x1 + x2) * 0.5, (y1 + y2) * 0.5, x2 - x1, y2 - y1], axis=0) * s
    out = jnp.concatenate([box_rows, jax.nn.sigmoid(cls_ref[...])], axis=0)
    o_ref[...] = out.astype(o_ref.dtype)                          # one store


# ---------------------------- wrappers ----------------------------

_VMEM_LIMIT = 32 * 1024 * 1024  # explicit; safe on v5e/v6e/v7x


def fused_branch(xp, p, H, W, Cin, c1, c2, nc):
    """Run both detection branches for one scale.  xp: (B, H+2, W+2, Cin) f32."""
    B = xp.shape[0]
    HW = H * W
    kernel = make_branch_kernel(H, W, Cin, c1, c2, nc)
    return pl.pallas_call(
        kernel,
        out_shape=(jax.ShapeDtypeStruct((B, 4 * CH, HW), jnp.float32),
                   jax.ShapeDtypeStruct((B, nc, HW), jnp.float32)),
        grid_spec=pltpu.PrefetchScalarGridSpec(
            num_scalar_prefetch=0,
            grid=(B,),
            in_specs=[
                pl.BlockSpec((None, H + 2, W + 2, Cin), lambda b: (b, 0, 0, 0)),
                pl.BlockSpec((9 * Cin, c2 + c1), lambda b: (0, 0)),
                pl.BlockSpec((1, c2 + c1), lambda b: (0, 0)),
                pl.BlockSpec((9 * c2, c2), lambda b: (0, 0)),
                pl.BlockSpec((1, c2), lambda b: (0, 0)),
                pl.BlockSpec((9 * c1, c1), lambda b: (0, 0)),
                pl.BlockSpec((1, c1), lambda b: (0, 0)),
                pl.BlockSpec((c2, 4 * CH), lambda b: (0, 0)),
                pl.BlockSpec((c1, nc), lambda b: (0, 0)),
            ],
            out_specs=(
                pl.BlockSpec((None, 4 * CH, HW), lambda b: (b, 0, 0)),
                pl.BlockSpec((None, nc, HW), lambda b: (b, 0, 0)),
            ),
            scratch_shapes=[pltpu.VMEM((H + 2, W + 2, c2), jnp.float32),
                            pltpu.VMEM((H + 2, W + 2, c1), jnp.float32)],
        ),
        compiler_params=pltpu.CompilerParams(
            dimension_semantics=("parallel",),
            vmem_limit_bytes=_VMEM_LIMIT),
    )(xp, p['w0'], p['b0'], p['w1b'], p['b1b'], p['w1c'], p['b1c'],
      p['w2b'], p['w2c'])


def dfl_decode(box, cls, anchors_t, strides_t):
    """box: (B, 4*CH, A), cls: (B, nc, A), anchors_t: (2, A), strides_t: (1, A)."""
    B, c4, A = box.shape
    nc = cls.shape[1]
    return pl.pallas_call(
        dfl_decode_kernel,
        out_shape=jax.ShapeDtypeStruct((B, 4 + nc, A), jnp.float32),
        grid_spec=pltpu.PrefetchScalarGridSpec(
            num_scalar_prefetch=0,
            grid=(B,),
            in_specs=[
                pl.BlockSpec((None, c4, A), lambda b: (b, 0, 0)),
                pl.BlockSpec((None, nc, A), lambda b: (b, 0, 0)),
                pl.BlockSpec((2, A), lambda b: (0, 0)),
                pl.BlockSpec((1, A), lambda b: (0, 0)),
            ],
            out_specs=pl.BlockSpec((None, 4 + nc, A), lambda b: (b, 0, 0)),
        ),
        compiler_params=pltpu.CompilerParams(
            dimension_semantics=("parallel",),
            vmem_limit_bytes=_VMEM_LIMIT),
    )(box, cls, anchors_t, strides_t)


def make_anchors(feat_shapes, strides, grid_cell_offset=0.5):
    """Matches the PyTorch make_anchors (anchor_points (A,2), stride (A,1))."""
    pts, sts = [], []
    for (h, w), s in zip(feat_shapes, strides):
        sx = jnp.arange(w, dtype=jnp.float32) + grid_cell_offset
        sy = jnp.arange(h, dtype=jnp.float32) + grid_cell_offset
        syg, sxg = jnp.meshgrid(sy, sx, indexing='ij')
        pts.append(jnp.stack((sxg, syg), -1).reshape(-1, 2))
        sts.append(jnp.full((h * w, 1), s, dtype=jnp.float32))
    return jnp.concatenate(pts, axis=0), jnp.concatenate(sts, axis=0)


# ---------------------------- parameters ----------------------------

def _fold_bn(w, gamma, beta, mean, var, eps=BN_EPS):
    """Fold BN into conv weights; return im2col-ordered (9*Cin, Cout) and bias."""
    scale = gamma / jnp.sqrt(var + eps)
    w_f = w * scale[:, None, None, None]                      # (Cout, Cin, 3, 3)
    b_f = beta - mean * scale
    w_col = jnp.transpose(w_f, (2, 3, 1, 0)).reshape(9 * w.shape[1], w.shape[0])
    return w_col, b_f


def _init_convbn(key, cin, cout):
    k = jax.random.split(key, 5)
    w = 0.1 * jax.random.normal(k[0], (cout, cin, 3, 3), jnp.float32)
    gamma = 1.0 + 0.1 * jax.random.normal(k[1], (cout,), jnp.float32)
    beta = 0.1 * jax.random.normal(k[2], (cout,), jnp.float32)
    mean = 0.1 * jax.random.normal(k[3], (cout,), jnp.float32)
    var = 1.0 + 0.1 * jnp.abs(jax.random.normal(k[4], (cout,), jnp.float32))
    return _fold_bn(w, gamma, beta, mean, var)


def _init_conv1x1(key, cin, cout):
    # TODO(synk): QBWConv2d's int8 weight quantization is not modeled; plain
    # float 1x1 conv (bias-free, matching the state-dict init signature).
    w = 0.1 * jax.random.normal(key, (cout, cin, 1, 1), jnp.float32)
    return jnp.transpose(w[:, :, 0, 0], (1, 0))               # (Cin, Cout)


def init_params(key, filters, nc, ch=CH):
    c1 = max(filters[0], nc)
    c2 = max(filters[0] // 4, ch * 4)
    params = []
    for f in filters:
        key, *ks = jax.random.split(key, 7)
        wb0, bb0 = _init_convbn(ks[0], f, c2)
        wb1, bb1 = _init_convbn(ks[1], c2, c2)
        w2b = _init_conv1x1(ks[2], c2, 4 * ch)
        wc0, bc0 = _init_convbn(ks[3], f, c1)
        wc1, bc1 = _init_convbn(ks[4], c1, c1)
        w2c = _init_conv1x1(ks[5], c1, nc)
        params.append({
            # layer-0 box+cls fused along Cout (shared im2col / single matmul)
            'w0': jnp.concatenate([wb0, wc0], axis=1).astype(jnp.float32),
            'b0': jnp.concatenate([bb0, bc0])[None, :].astype(jnp.float32),
            'w1b': wb1.astype(jnp.float32), 'b1b': bb1[None, :].astype(jnp.float32),
            'w1c': wc1.astype(jnp.float32), 'b1c': bc1[None, :].astype(jnp.float32),
            'w2b': w2b.astype(jnp.float32),
            'w2c': w2c.astype(jnp.float32),
        })
    return params, c1, c2


# ---------------------------- forward ----------------------------

def qbw_head_forward(xs_nchw, params, nc, strides, c1, c2):
    box_feats, cls_feats, shapes = [], [], []
    for i, x in enumerate(xs_nchw):
        x_nhwc = jnp.transpose(x, (0, 2, 3, 1)).astype(jnp.float32)
        B, H, W, Cin = x_nhwc.shape
        shapes.append((H, W))
        xp = jnp.pad(x_nhwc, ((0, 0), (1, 1), (1, 1), (0, 0)))  # once per scale
        box, cls = fused_branch(xp, params[i], H, W, Cin, c1, c2, nc)
        box_feats.append(box)                                   # (B, 4*CH, HW)
        cls_feats.append(cls)                                   # (B, nc, HW)
    box_cat = jnp.concatenate(box_feats, axis=2)                # (B, 4*CH, A)
    cls_cat = jnp.concatenate(cls_feats, axis=2)                # (B, nc, A)
    anchors, stride_t = make_anchors(shapes, strides)
    return dfl_decode(box_cat, cls_cat, anchors.T, stride_t.T)  # (B, 4+nc, A)


if __name__ == "__main__":
    key = jax.random.PRNGKey(0)
    nc = 16
    filters = (32, 64)
    B = 2
    # NOTE: QBWHead.stride defaults to zeros (set by the parent detector);
    # we use standard YOLO strides deterministically here.
    strides = (8.0, 16.0)

    kx0, kx1, kp = jax.random.split(key, 3)
    xs = [jax.random.normal(kx0, (B, filters[0], 16, 16), jnp.float32),
          jax.random.normal(kx1, (B, filters[1], 8, 8), jnp.float32)]
    params, c1, c2 = init_params(kp, filters, nc)

    out = qbw_head_forward(xs, params, nc=nc, strides=strides, c1=c1, c2=c2)
    out = jax.block_until_ready(out)
    A = 16 * 16 + 8 * 8
    assert out.shape == (B, 4 + nc, A), out.shape
    assert bool(jnp.all(jnp.isfinite(out)))
    print("KERNEL_OK")
</pallas_src>

<mosaic_0001>
module attributes {stable_mosaic.version = 11 : i64} {
  func.func @kernel(%arg0: i32, %arg1: memref<1x18x18x32xf32, #tpu.memory_space<vmem>>, %arg2: memref<288x96xf32, #tpu.memory_space<vmem>>, %arg3: memref<1x96xf32, #tpu.memory_space<vmem>>, %arg4: memref<576x64xf32, #tpu.memory_space<vmem>>, %arg5: memref<1x64xf32, #tpu.memory_space<vmem>>, %arg6: memref<288x32xf32, #tpu.memory_space<vmem>>, %arg7: memref<1x32xf32, #tpu.memory_space<vmem>>, %arg8: memref<64x64xf32, #tpu.memory_space<vmem>>, %arg9: memref<32x16xf32, #tpu.memory_space<vmem>>, %arg10: memref<1x64x256xf32, #tpu.memory_space<vmem>>, %arg11: memref<1x16x256xf32, #tpu.memory_space<vmem>>, %arg12: memref<18x18x64xf32, #tpu.memory_space<vmem>>, %arg13: memref<18x18x32xf32, #tpu.memory_space<vmem>>) attributes {dimension_semantics = [#tpu.dimension_semantics<parallel>], iteration_bounds = array<i64: 2>, scalar_prefetch = 0 : i64, scratch_operands = 2 : i64, tpu.core_type = #tpu.core_type<tc>, window_params = [{transform_indices = @transform_0, window_bounds = array<i64: 1, 18, 18, 32>}, {pipeline_mode = #tpu.pipeline_mode<synchronous>, transform_indices = @transform_1, window_bounds = array<i64: 288, 96>}, {pipeline_mode = #tpu.pipeline_mode<synchronous>, transform_indices = @transform_2, window_bounds = array<i64: 1, 96>}, {pipeline_mode = #tpu.pipeline_mode<synchronous>, transform_indices = @transform_3, window_bounds = array<i64: 576, 64>}, {pipeline_mode = #tpu.pipeline_mode<synchronous>, transform_indices = @transform_4, window_bounds = array<i64: 1, 64>}, {pipeline_mode = #tpu.pipeline_mode<synchronous>, transform_indices = @transform_5, window_bounds = array<i64: 288, 32>}, {pipeline_mode = #tpu.pipeline_mode<synchronous>, transform_indices = @transform_6, window_bounds = array<i64: 1, 32>}, {pipeline_mode = #tpu.pipeline_mode<synchronous>, transform_indices = @transform_7, window_bounds = array<i64: 64, 64>}, {pipeline_mode = #tpu.pipeline_mode<synchronous>, transform_indices = @transform_8, window_bounds = array<i64: 32, 16>}, {transform_indices = @transform_9, window_bounds = array<i64: 1, 64, 256>}, {transform_indices = @transform_10, window_bounds = array<i64: 1, 16, 256>}]} {
    %c0 = arith.constant 0 : index
    %c0_0 = arith.constant 0 : index
    %c0_1 = arith.constant 0 : index
    %c0_2 = arith.constant 0 : index
    %0 = vector.load %arg1[%c0, %c0_0, %c0_1, %c0_2] : memref<1x18x18x32xf32, #tpu.memory_space<vmem>>, vector<1x16x16x32xf32>
    %1 = vector.shape_cast %0 : vector<1x16x16x32xf32> to vector<16x16x32xf32>
    %2 = vector.shape_cast %1 : vector<16x16x32xf32> to vector<256x32xf32>
    %c0_3 = arith.constant 0 : index
    %c0_4 = arith.constant 0 : index
    %c1 = arith.constant 1 : index
    %c0_5 = arith.constant 0 : index
    %3 = vector.load %arg1[%c0_3, %c0_4, %c1, %c0_5] : memref<1x18x18x32xf32, #tpu.memory_space<vmem>>, vector<1x16x16x32xf32>
    %4 = vector.shape_cast %3 : vector<1x16x16x32xf32> to vector<16x16x32xf32>
    %5 = vector.shape_cast %4 : vector<16x16x32xf32> to vector<256x32xf32>
    %c0_6 = arith.constant 0 : index
    %c0_7 = arith.constant 0 : index
    %c2 = arith.constant 2 : index
    %c0_8 = arith.constant 0 : index
    %6 = vector.load %arg1[%c0_6, %c0_7, %c2, %c0_8] : memref<1x18x18x32xf32, #tpu.memory_space<vmem>>, vector<1x16x16x32xf32>
    %7 = vector.shape_cast %6 : vector<1x16x16x32xf32> to vector<16x16x32xf32>
    %8 = vector.shape_cast %7 : vector<16x16x32xf32> to vector<256x32xf32>
    %c0_9 = arith.constant 0 : index
    %c1_10 = arith.constant 1 : index
    %c0_11 = arith.constant 0 : index
    %c0_12 = arith.constant 0 : index
    %9 = vector.load %arg1[%c0_9, %c1_10, %c0_11, %c0_12] : memref<1x18x18x32xf32, #tpu.memory_space<vmem>>, vector<1x16x16x32xf32>
    %10 = vector.shape_cast %9 : vector<1x16x16x32xf32> to vector<16x16x32xf32>
    %11 = vector.shape_cast %10 : vector<16x16x32xf32> to vector<256x32xf32>
    %c0_13 = arith.constant 0 : index
    %c1_14 = arith.constant 1 : index
    %c1_15 = arith.constant 1 : index
    %c0_16 = arith.constant 0 : index
    %12 = vector.load %arg1[%c0_13, %c1_14, %c1_15, %c0_16] : memref<1x18x18x32xf32, #tpu.memory_space<vmem>>, vector<1x16x16x32xf32>
    %13 = vector.shape_cast %12 : vector<1x16x16x32xf32> to vector<16x16x32xf32>
    %14 = vector.shape_cast %13 : vector<16x16x32xf32> to vector<256x32xf32>
    %c0_17 = arith.constant 0 : index
    %c1_18 = arith.constant 1 : index
    %c2_19 = arith.constant 2 : index
    %c0_20 = arith.constant 0 : index
    %15 = vector.load %arg1[%c0_17, %c1_18, %c2_19, %c0_20] : memref<1x18x18x32xf32, #tpu.memory_space<vmem>>, vector<1x16x16x32xf32>
    %16 = vector.shape_cast %15 : vector<1x16x16x32xf32> to vector<16x16x32xf32>
    %17 = vector.shape_cast %16 : vector<16x16x32xf32> to vector<256x32xf32>
    %c0_21 = arith.constant 0 : index
    %c2_22 = arith.constant 2 : index
    %c0_23 = arith.constant 0 : index
    %c0_24 = arith.constant 0 : index
    %18 = vector.load %arg1[%c0_21, %c2_22, %c0_23, %c0_24] : memref<1x18x18x32xf32, #tpu.memory_space<vmem>>, vector<1x16x16x32xf32>
    %19 = vector.shape_cast %18 : vector<1x16x16x32xf32> to vector<16x16x32xf32>
    %20 = vector.shape_cast %19 : vector<16x16x32xf32> to vector<256x32xf32>
    %c0_25 = arith.constant 0 : index
    %c2_26 = arith.constant 2 : index
    %c1_27 = arith.constant 1 : index
    %c0_28 = arith.constant 0 : index
    %21 = vector.load %arg1[%c0_25, %c2_26, %c1_27, %c0_28] : memref<1x18x18x32xf32, #tpu.memory_space<vmem>>, vector<1x16x16x32xf32>
    %22 = vector.shape_cast %21 : vector<1x16x16x32xf32> to vector<16x16x32xf32>
    %23 = vector.shape_cast %22 : vector<16x16x32xf32> to vector<256x32xf32>
    %c0_29 = arith.constant 0 : index
    %c2_30 = arith.constant 2 : index
    %c2_31 = arith.constant 2 : index
    %c0_32 = arith.constant 0 : index
    %24 = vector.load %arg1[%c0_29, %c2_30, %c2_31, %c0_32] : memref<1x18x18x32xf32, #tpu.memory_space<vmem>>, vector<1x16x16x32xf32>
    %25 = vector.shape_cast %24 : vector<1x16x16x32xf32> to vector<16x16x32xf32>
    %26 = vector.shape_cast %25 : vector<16x16x32xf32> to vector<256x32xf32>
    %27 = tpu.concatenate %2, %5, %8, %11, %14, %17, %20, %23, %26 in 1 : vector<256x32xf32>, vector<256x32xf32>, vector<256x32xf32>, vector<256x32xf32>, vector<256x32xf32>, vector<256x32xf32>, vector<256x32xf32>, vector<256x32xf32>, vector<256x32xf32> -> vector<256x288xf32>
    %c0_33 = arith.constant 0 : index
    %c0_34 = arith.constant 0 : index
    %28 = vector.load %arg2[%c0_33, %c0_34] : memref<288x96xf32, #tpu.memory_space<vmem>>, vector<288x96xf32>
    %cst = arith.constant dense<0.000000e+00> : vector<256x96xf32>
    %29 = tpu.matmul %27, %28, %cst {dimension_numbers = #tpu.dot_dimension_numbers<[1], [0], [0], [1], [0, 0, 1, 1], [], []>} : vector<256x288xf32>, vector<288x96xf32>, vector<256x96xf32> -> vector<256x96xf32>
    %c0_35 = arith.constant 0 : index
    %c0_36 = arith.constant 0 : index
    %30 = vector.load %arg3[%c0_35, %c0_36] : memref<1x96xf32, #tpu.memory_space<vmem>>, vector<1x96xf32>
    %31 = vector.broadcast %30 : vector<1x96xf32> to vector<256x96xf32>
    %32 = arith.addf %29, %31 : vector<256x96xf32>
    %33 = arith.negf %32 : vector<256x96xf32>
    %34 = math.exp %33 : vector<256x96xf32>
    %cst_37 = arith.constant 1.000000e+00 : f32
    %35 = vector.broadcast %cst_37 : f32 to vector<256x96xf32>
    %36 = arith.addf %35, %34 : vector<256x96xf32>
    %37 = arith.divf %35, %36 : vector<256x96xf32>
    %38 = arith.mulf %32, %37 : vector<256x96xf32>
    %cst_38 = arith.constant 0.000000e+00 : f32
    %39 = vector.broadcast %cst_38 : f32 to vector<18x18x64xf32>
    %c0_39 = arith.constant 0 : index
    %c0_40 = arith.constant 0 : index
    %c0_41 = arith.constant 0 : index
    %40 = vector.load %arg12[%c0_39, %c0_40, %c0_41] : memref<18x18x64xf32, #tpu.memory_space<vmem>>, vector<18x18x64xf32>
    tpu.vector_store %arg12[%c0_39, %c0_40, %c0_41], %39 {strides = array<i32>} : memref<18x18x64xf32, #tpu.memory_space<vmem>>, vector<18x18x64xf32>,
    %cst_42 = arith.constant 0.000000e+00 : f32
    %41 = vector.broadcast %cst_42 : f32 to vector<18x18x32xf32>
    %c0_43 = arith.constant 0 : index
    %c0_44 = arith.constant 0 : index
    %c0_45 = arith.constant 0 : index
    %42 = vector.load %arg13[%c0_43, %c0_44, %c0_45] : memref<18x18x32xf32, #tpu.memory_space<vmem>>, vector<18x18x32xf32>
    tpu.vector_store %arg13[%c0_43, %c0_44, %c0_45], %41 {strides = array<i32>} : memref<18x18x32xf32, #tpu.memory_space<vmem>>, vector<18x18x32xf32>,
    %43 = vector.extract_strided_slice %38 {offsets = [0, 0], sizes = [256, 64], strides = [1, 1]} : vector<256x96xf32> to vector<256x64xf32>
    %44 = vector.shape_cast %43 : vector<256x64xf32> to vector<16x16x64xf32>
    %c1_46 = arith.constant 1 : index
    %c1_47 = arith.constant 1 : index
    %c0_48 = arith.constant 0 : index
    %45 = vector.load %arg12[%c1_46, %c1_47, %c0_48] : memref<18x18x64xf32, #tpu.memory_space<vmem>>, vector<16x16x64xf32>
    tpu.vector_store %arg12[%c1_46, %c1_47, %c0_48], %44 {strides = array<i32>} : memref<18x18x64xf32, #tpu.memory_space<vmem>>, vector<16x16x64xf32>,
    %46 = vector.extract_strided_slice %38 {offsets = [0, 64], sizes = [256, 32], strides = [1, 1]} : vector<256x96xf32> to vector<256x32xf32>
    %47 = vector.shape_cast %46 : vector<256x32xf32> to vector<16x16x32xf32>
    %c1_49 = arith.constant 1 : index
    %c1_50 = arith.constant 1 : index
    %c0_51 = arith.constant 0 : index
    %48 = vector.load %arg13[%c1_49, %c1_50, %c0_51] : memref<18x18x32xf32, #tpu.memory_space<vmem>>, vector<16x16x32xf32>
    tpu.vector_store %arg13[%c1_49, %c1_50, %c0_51], %47 {strides = array<i32>} : memref<18x18x32xf32, #tpu.memory_space<vmem>>, vector<16x16x32xf32>,
    %c0_52 = arith.constant 0 : index
    %c0_53 = arith.constant 0 : index
    %c0_54 = arith.constant 0 : index
    %49 = vector.load %arg12[%c0_52, %c0_53, %c0_54] : memref<18x18x64xf32, #tpu.memory_space<vmem>>, vector<16x16x64xf32>
    %50 = vector.shape_cast %49 : vector<16x16x64xf32> to vector<256x64xf32>
    %c0_55 = arith.constant 0 : index
    %c1_56 = arith.constant 1 : index
    %c0_57 = arith.constant 0 : index
    %51 = vector.load %arg12[%c0_55, %c1_56, %c0_57] : memref<18x18x64xf32, #tpu.memory_space<vmem>>, vector<16x16x64xf32>
    %52 = vector.shape_cast %51 : vector<16x16x64xf32> to vector<256x64xf32>
    %c0_58 = arith.constant 0 : index
    %c2_59 = arith.constant 2 : index
    %c0_60 = arith.constant 0 : index
    %53 = vector.load %arg12[%c0_58, %c2_59, %c0_60] : memref<18x18x64xf32, #tpu.memory_space<vmem>>, vector<16x16x64xf32>
    %54 = vector.shape_cast %53 : vector<16x16x64xf32> to vector<256x64xf32>
    %c1_61 = arith.constant 1 : index
    %c0_62 = arith.constant 0 : index
    %c0_63 = arith.constant 0 : index
    %55 = vector.load %arg12[%c1_61, %c0_62, %c0_63] : memref<18x18x64xf32, #tpu.memory_space<vmem>>, vector<16x16x64xf32>
    %56 = vector.shape_cast %55 : vector<16x16x64xf32> to vector<256x64xf32>
    %c1_64 = arith.constant 1 : index
    %c1_65 = arith.constant 1 : index
    %c0_66 = arith.constant 0 : index
    %57 = vector.load %arg12[%c1_64, %c1_65, %c0_66] : memref<18x18x64xf32, #tpu.memory_space<vmem>>, vector<16x16x64xf32>
    %58 = vector.shape_cast %57 : vector<16x16x64xf32> to vector<256x64xf32>
    %c1_67 = arith.constant 1 : index
    %c2_68 = arith.constant 2 : index
    %c0_69 = arith.constant 0 : index
    %59 = vector.load %arg12[%c1_67, %c2_68, %c0_69] : memref<18x18x64xf32, #tpu.memory_space<vmem>>, vector<16x16x64xf32>
    %60 = vector.shape_cast %59 : vector<16x16x64xf32> to vector<256x64xf32>
    %c2_70 = arith.constant 2 : index
    %c0_71 = arith.constant 0 : index
    %c0_72 = arith.constant 0 : index
    %61 = vector.load %arg12[%c2_70, %c0_71, %c0_72] : memref<18x18x64xf32, #tpu.memory_space<vmem>>, vector<16x16x64xf32>
    %62 = vector.shape_cast %61 : vector<16x16x64xf32> to vector<256x64xf32>
    %c2_73 = arith.constant 2 : index
    %c1_74 = arith.constant 1 : index
    %c0_75 = arith.constant 0 : index
    %63 = vector.load %arg12[%c2_73, %c1_74, %c0_75] : memref<18x18x64xf32, #tpu.memory_space<vmem>>, vector<16x16x64xf32>
    %64 = vector.shape_cast %63 : vector<16x16x64xf32> to vector<256x64xf32>
    %c2_76 = arith.constant 2 : index
    %c2_77 = arith.constant 2 : index
    %c0_78 = arith.constant 0 : index
    %65 = vector.load %arg12[%c2_76, %c2_77, %c0_78] : memref<18x18x64xf32, #tpu.memory_space<vmem>>, vector<16x16x64xf32>
    %66 = vector.shape_cast %65 : vector<16x16x64xf32> to vector<256x64xf32>
    %67 = tpu.concatenate %50, %52, %54, %56, %58, %60, %62, %64, %66 in 1 : vector<256x64xf32>, vector<256x64xf32>, vector<256x64xf32>, vector<256x64xf32>, vector<256x64xf32>, vector<256x64xf32>, vector<256x64xf32>, vector<256x64xf32>, vector<256x64xf32> -> vector<256x576xf32>
    %c0_79 = arith.constant 0 : index
    %c0_80 = arith.constant 0 : index
    %68 = vector.load %arg4[%c0_79, %c0_80] : memref<576x64xf32, #tpu.memory_space<vmem>>, vector<576x64xf32>
    %cst_81 = arith.constant dense<0.000000e+00> : vector<256x64xf32>
    %69 = tpu.matmul %67, %68, %cst_81 {dimension_numbers = #tpu.dot_dimension_numbers<[1], [0], [0], [1], [0, 0, 1, 1], [], []>} : vector<256x576xf32>, vector<576x64xf32>, vector<256x64xf32> -> vector<256x64xf32>
    %c0_82 = arith.constant 0 : index
    %c0_83 = arith.constant 0 : index
    %70 = vector.load %arg5[%c0_82, %c0_83] : memref<1x64xf32, #tpu.memory_space<vmem>>, vector<1x64xf32>
    %71 = vector.broadcast %70 : vector<1x64xf32> to vector<256x64xf32>
    %72 = arith.addf %69, %71 : vector<256x64xf32>
    %73 = arith.negf %72 : vector<256x64xf32>
    %74 = math.exp %73 : vector<256x64xf32>
    %cst_84 = arith.constant 1.000000e+00 : f32
    %75 = vector.broadcast %cst_84 : f32 to vector<256x64xf32>
    %76 = arith.addf %75, %74 : vector<256x64xf32>
    %77 = arith.divf %75, %76 : vector<256x64xf32>
    %78 = arith.mulf %72, %77 : vector<256x64xf32>
    %c0_85 = arith.constant 0 : index
    %c0_86 = arith.constant 0 : index
    %c0_87 = arith.constant 0 : index
    %79 = vector.load %arg13[%c0_85, %c0_86, %c0_87] : memref<18x18x32xf32, #tpu.memory_space<vmem>>, vector<16x16x32xf32>
    %80 = vector.shape_cast %79 : vector<16x16x32xf32> to vector<256x32xf32>
    %c0_88 = arith.constant 0 : index
    %c1_89 = arith.constant 1 : index
    %c0_90 = arith.constant 0 : index
    %81 = vector.load %arg13[%c0_88, %c1_89, %c0_90] : memref<18x18x32xf32, #tpu.memory_space<vmem>>, vector<16x16x32xf32>
    %82 = vector.shape_cast %81 : vector<16x16x32xf32> to vector<256x32xf32>
    %c0_91 = arith.constant 0 : index
    %c2_92 = arith.constant 2 : index
    %c0_93 = arith.constant 0 : index
    %83 = vector.load %arg13[%c0_91, %c2_92, %c0_93] : memref<18x18x32xf32, #tpu.memory_space<vmem>>, vector<16x16x32xf32>
    %84 = vector.shape_cast %83 : vector<16x16x32xf32> to vector<256x32xf32>
    %c1_94 = arith.constant 1 : index
    %c0_95 = arith.constant 0 : index
    %c0_96 = arith.constant 0 : index
    %85 = vector.load %arg13[%c1_94, %c0_95, %c0_96] : memref<18x18x32xf32, #tpu.memory_space<vmem>>, vector<16x16x32xf32>
    %86 = vector.shape_cast %85 : vector<16x16x32xf32> to vector<256x32xf32>
    %c1_97 = arith.constant 1 : index
    %c1_98 = arith.constant 1 : index
    %c0_99 = arith.constant 0 : index
    %87 = vector.load %arg13[%c1_97, %c1_98, %c0_99] : memref<18x18x32xf32, #tpu.memory_space<vmem>>, vector<16x16x32xf32>
    %88 = vector.shape_cast %87 : vector<16x16x32xf32> to vector<256x32xf32>
    %c1_100 = arith.constant 1 : index
    %c2_101 = arith.constant 2 : index
    %c0_102 = arith.constant 0 : index
    %89 = vector.load %arg13[%c1_100, %c2_101, %c0_102] : memref<18x18x32xf32, #tpu.memory_space<vmem>>, vector<16x16x32xf32>
    %90 = vector.shape_cast %89 : vector<16x16x32xf32> to vector<256x32xf32>
    %c2_103 = arith.constant 2 : index
    %c0_104 = arith.constant 0 : index
    %c0_105 = arith.constant 0 : index
    %91 = vector.load %arg13[%c2_103, %c0_104, %c0_105] : memref<18x18x32xf32, #tpu.memory_space<vmem>>, vector<16x16x32xf32>
    %92 = vector.shape_cast %91 : vector<16x16x32xf32> to vector<256x32xf32>
    %c2_106 = arith.constant 2 : index
    %c1_107 = arith.constant 1 : index
    %c0_108 = arith.constant 0 : index
    %93 = vector.load %arg13[%c2_106, %c1_107, %c0_108] : memref<18x18x32xf32, #tpu.memory_space<vmem>>, vector<16x16x32xf32>
    %94 = vector.shape_cast %93 : vector<16x16x32xf32> to vector<256x32xf32>
    %c2_109 = arith.constant 2 : index
    %c2_110 = arith.constant 2 : index
    %c0_111 = arith.constant 0 : index
    %95 = vector.load %arg13[%c2_109, %c2_110, %c0_111] : memref<18x18x32xf32, #tpu.memory_space<vmem>>, vector<16x16x32xf32>
    %96 = vector.shape_cast %95 : vector<16x16x32xf32> to vector<256x32xf32>
    %97 = tpu.concatenate %80, %82, %84, %86, %88, %90, %92, %94, %96 in 1 : vector<256x32xf32>, vector<256x32xf32>, vector<256x32xf32>, vector<256x32xf32>, vector<256x32xf32>, vector<256x32xf32>, vector<256x32xf32>, vector<256x32xf32>, vector<256x32xf32> -> vector<256x288xf32>
    %c0_112 = arith.constant 0 : index
    %c0_113 = arith.constant 0 : index
    %98 = vector.load %arg6[%c0_112, %c0_113] : memref<288x32xf32, #tpu.memory_space<vmem>>, vector<288x32xf32>
    %cst_114 = arith.constant dense<0.000000e+00> : vector<256x32xf32>
    %99 = tpu.matmul %97, %98, %cst_114 {dimension_numbers = #tpu.dot_dimension_numbers<[1], [0], [0], [1], [0, 0, 1, 1], [], []>} : vector<256x288xf32>, vector<288x32xf32>, vector<256x32xf32> -> vector<256x32xf32>
    %c0_115 = arith.constant 0 : index
    %c0_116 = arith.constant 0 : index
    %100 = vector.load %arg7[%c0_115, %c0_116] : memref<1x32xf32, #tpu.memory_space<vmem>>, vector<1x32xf32>
    %101 = vector.broadcast %100 : vector<1x32xf32> to vector<256x32xf32>
    %102 = arith.addf %99, %101 : vector<256x32xf32>
    %103 = arith.negf %102 : vector<256x32xf32>
    %104 = math.exp %103 : vector<256x32xf32>
    %cst_117 = arith.constant 1.000000e+00 : f32
    %105 = vector.broadcast %cst_117 : f32 to vector<256x32xf32>
    %106 = arith.addf %105, %104 : vector<256x32xf32>
    %107 = arith.divf %105, %106 : vector<256x32xf32>
    %108 = arith.mulf %102, %107 : vector<256x32xf32>
    %c0_118 = arith.constant 0 : index
    %c0_119 = arith.constant 0 : index
    %109 = vector.load %arg8[%c0_118, %c0_119] : memref<64x64xf32, #tpu.memory_space<vmem>>, vector<64x64xf32>
    %cst_120 = arith.constant dense<0.000000e+00> : vector<256x64xf32>
    %110 = tpu.matmul %78, %109, %cst_120 {dimension_numbers = #tpu.dot_dimension_numbers<[1], [0], [0], [1], [0, 0, 1, 1], [], []>} : vector<256x64xf32>, vector<64x64xf32>, vector<256x64xf32> -> vector<256x64xf32>
    %c0_121 = arith.constant 0 : index
    %c0_122 = arith.constant 0 : index
    %111 = vector.load %arg9[%c0_121, %c0_122] : memref<32x16xf32, #tpu.memory_space<vmem>>, vector<32x16xf32>
    %cst_123 = arith.constant dense<0.000000e+00> : vector<256x16xf32>
    %112 = tpu.matmul %108, %111, %cst_123 {dimension_numbers = #tpu.dot_dimension_numbers<[1], [0], [0], [1], [0, 0, 1, 1], [], []>} : vector<256x32xf32>, vector<32x16xf32>, vector<256x16xf32> -> vector<256x16xf32>
    %113 = tpu.transpose %110, [1, 0] : vector<256x64xf32> -> vector<64x256xf32>
    %c0_124 = arith.constant 0 : index
    %c0_125 = arith.constant 0 : index
    %c0_126 = arith.constant 0 : index
    %114 = vector.load %arg10[%c0_124, %c0_125, %c0_126] : memref<1x64x256xf32, #tpu.memory_space<vmem>>, vector<1x64x256xf32>
    %115 = vector.shape_cast %114 : vector<1x64x256xf32> to vector<64x256xf32>
    %116 = vector.shape_cast %113 : vector<64x256xf32> to vector<1x64x256xf32>
    tpu.vector_store %arg10[%c0_124, %c0_125, %c0_126], %116 {strides = array<i32>} : memref<1x64x256xf32, #tpu.memory_space<vmem>>, vector<1x64x256xf32>,
    %117 = tpu.transpose %112, [1, 0] : vector<256x16xf32> -> vector<16x256xf32>
    %c0_127 = arith.constant 0 : index
    %c0_128 = arith.constant 0 : index
    %c0_129 = arith.constant 0 : index
    %118 = vector.load %arg11[%c0_127, %c0_128, %c0_129] : memref<1x16x256xf32, #tpu.memory_space<vmem>>, vector<1x16x256xf32>
    %119 = vector.shape_cast %118 : vector<1x16x256xf32> to vector<16x256xf32>
    %120 = vector.shape_cast %117 : vector<16x256xf32> to vector<1x16x256xf32>
    tpu.vector_store %arg11[%c0_127, %c0_128, %c0_129], %120 {strides = array<i32>} : memref<1x16x256xf32, #tpu.memory_space<vmem>>, vector<1x16x256xf32>,
    return
  }
  func.func @transform_0(%arg0: i32) -> (i32, i32, i32, i32) {
    %c0_i32 = arith.constant 0 : i32
    %c0_i32_0 = arith.constant 0 : i32
    %c0_i32_1 = arith.constant 0 : i32
    %c0_i32_2 = arith.constant 0 : i32
    return %arg0, %c0_i32, %c0_i32_0, %c0_i32_1 : i32, i32, i32, i32
  }
  func.func @transform_1(%arg0: i32) -> (i32, i32) {
    %c0_i32 = arith.constant 0 : i32
    %c0_i32_0 = arith.constant 0 : i32
    %c0_i32_1 = arith.constant 0 : i32
    return %c0_i32, %c0_i32_0 : i32, i32
  }
  func.func @transform_2(%arg0: i32) -> (i32, i32) {
    %c0_i32 = arith.constant 0 : i32
    %c0_i32_0 = arith.constant 0 : i32
    %c0_i32_1 = arith.constant 0 : i32
    return %c0_i32, %c0_i32_0 : i32, i32
  }
  func.func @transform_3(%arg0: i32) -> (i32, i32) {
    %c0_i32 = arith.constant 0 : i32
    %c0_i32_0 = arith.constant 0 : i32
    %c0_i32_1 = arith.constant 0 : i32
    return %c0_i32, %c0_i32_0 : i32, i32
  }
  func.func @transform_4(%arg0: i32) -> (i32, i32) {
    %c0_i32 = arith.constant 0 : i32
    %c0_i32_0 = arith.constant 0 : i32
    %c0_i32_1 = arith.constant 0 : i32
    return %c0_i32, %c0_i32_0 : i32, i32
  }
  func.func @transform_5(%arg0: i32) -> (i32, i32) {
    %c0_i32 = arith.constant 0 : i32
    %c0_i32_0 = arith.constant 0 : i32
    %c0_i32_1 = arith.constant 0 : i32
    return %c0_i32, %c0_i32_0 : i32, i32
  }
  func.func @transform_6(%arg0: i32) -> (i32, i32) {
    %c0_i32 = arith.constant 0 : i32
    %c0_i32_0 = arith.constant 0 : i32
    %c0_i32_1 = arith.constant 0 : i32
    return %c0_i32, %c0_i32_0 : i32, i32
  }
  func.func @transform_7(%arg0: i32) -> (i32, i32) {
    %c0_i32 = arith.constant 0 : i32
    %c0_i32_0 = arith.constant 0 : i32
    %c0_i32_1 = arith.constant 0 : i32
    return %c0_i32, %c0_i32_0 : i32, i32
  }
  func.func @transform_8(%arg0: i32) -> (i32, i32) {
    %c0_i32 = arith.constant 0 : i32
    %c0_i32_0 = arith.constant 0 : i32
    %c0_i32_1 = arith.constant 0 : i32
    return %c0_i32, %c0_i32_0 : i32, i32
  }
  func.func @transform_9(%arg0: i32) -> (i32, i32, i32) {
    %c0_i32 = arith.constant 0 : i32
    %c0_i32_0 = arith.constant 0 : i32
    %c0_i32_1 = arith.constant 0 : i32
    return %arg0, %c0_i32, %c0_i32_0 : i32, i32, i32
  }
  func.func @transform_10(%arg0: i32) -> (i32, i32, i32) {
    %c0_i32 = arith.constant 0 : i32
    %c0_i32_0 = arith.constant 0 : i32
    %c0_i32_1 = arith.constant 0 : i32
    return %arg0, %c0_i32, %c0_i32_0 : i32, i32, i32
  }
}

</mosaic_0001>

<bundles_post_ra>
// kernel: tpu_custom_call.1
= control target key start
LH: loop header
LB: loop body
LE: loop exit
PB: predicated region body
PF: predicated region fallthrough
CT: control target
= control target key end

     0   :  { %s18096_s0 = inlined_call_operand.vmem [shape: f32[2,18,18,32], index: 0, kind: input, shape index: {}]   ;;  %s18097_s1 = inlined_call_operand.vmem [shape: f32[288,96], index: 1, kind: input, shape index: {}]   ;;  %s18098_s2 = inlined_call_operand.vmem [shape: f32[1,96], index: 2, kind: input, shape index: {}]   ;;  %s18099_s3 = inlined_call_operand.vmem [shape: f32[576,64], index: 3, kind: input, shape index: {}]   ;;  %s18100_s4 = inlined_call_operand.vmem [shape: f32[1,64], index: 4, kind: input, shape index: {}]   ;;  %s18101_s5 = inlined_call_operand.vmem [shape: f32[288,32], index: 5, kind: input, shape index: {}]   ;;  %s18102_s6 = inlined_call_operand.vmem [shape: f32[1,32], index: 6, kind: input, shape index: {}]   ;;  %s18103_s7 = inlined_call_operand.vmem [shape: f32[64,64], index: 7, kind: input, shape index: {}]   ;;  %s18104_s8 = inlined_call_operand.vmem [shape: f32[32,16], index: 8, kind: input, shape index: {}]   ;;  %s18105_s9 = inlined_call_operand.hbm [shape: f32[2,64,256], index: 9, kind: output, shape index: {0}]   ;;  %s18106_s10 = inlined_call_operand.hbm [shape: f32[2,16,256], index: 10, kind: output, shape index: {1}]  }
   0x1   :  { %18143 = sst [smem:[#allocation104_spill]] %s18096_s0 }
   0x2   :  { %18144 = sst [smem:[#allocation105_spill]] %s18097_s1 }
   0x3   :  { %18145 = sst [smem:[#allocation106_spill]] %s18098_s2 }
   0x4   :  { %18146 = sst [smem:[#allocation107_spill]] %s18099_s3 }
   0x5   :  { %18147 = sst [smem:[#allocation108_spill]] %s18100_s4 }
   0x6   :  { %16 = vsyncpa [#allocation5], 0 }
   0x7   :  { %18 = vsyncpa [#allocation5 + $0x1], 0 }
   0x8   :  { %19 = vsyncpa [#allocation7], 0 }
   0x9   :  { %21 = vsyncpa [#allocation7 + $0x1], 0  ;;  %s10774_s13 = smov 0   ;;  %s10776_s14 = smov 0  }
   0xa   :  { %s10778_s15 = smov 0   ;;  %s10780_s16 = smov 0  }
   0xb LB: > { %s10795_s17 = sadd.s32 4294967295, %s10711_s16   ;;  %s8422_s18 = sadd.s32 4294967294, %s10711_s16   ;;  %s10711_s16 = sphi %s10780_s16, %s18704_s16   ;;  %s10707_s15 = sphi %s10778_s15, %s18703_s15   ;;  %s10703_s14 = sphi %s10776_s14, %s18702_s14   ;;  %s10699_s13 = sphi %s10774_s13, %s18701_s13  }
   0xc   : > { %s10799_s19 = sadd.s32 1, %s10711_s16   ;;  %s228_s20 = sadd.s32 1, %s10707_s15 }
   0xd   : > { %s225_s21 = ssub.s32 %s10711_s16, %s10799_s19  ;;  %p238_p0 = scmp.ne.s32.totalorder %s10707_s15, %s10703_s14 }
   0xe   : > { %p226_p1 = scmp.eq.s32.totalorder %s225_s21, 0  ;;  %p239_p2 = scmp.eq.s32.totalorder %s10795_s17, 1 }
   0xf   : > { %p244_p3 = scmp.ne.s32.totalorder %s10703_s14, %s10699_s13  ;;  %p245_p4 = scmp.eq.s32.totalorder %s8422_s18, 1 }
  0x10   : > { %s10810_s22 = scalar_select %p226_p1, %s10707_s15, %s228_s20  }
  0x11   : > { %p10812_p5 = por %p239_p2, %p238_p0  ;;  %p10816_p6 = por %p245_p4, %p244_p3 }
  0x12   : > { %p8425_p7 = scmp.ge.s32.totalorder %s10711_s16, 1  ;;  %p321_p8 = scmp.lt.s32.totalorder %s10711_s16, 3 }
  0x14   : > { %p322_p9 = pnand %p8425_p7, %p321_p8 }
  0x16   : > { %325 = sbr.rel (%p322_p9) target bundleno = 1815 (0x717), region = 56 }
  0x1b   : > { %p364_p10 = scmp.lt.s32.totalorder %s10795_s17, 1  ;;  %s18150_s0 = sld [smem:[#allocation104_spill]]  ;;  %vm1427_vm0 = vcmask 261120   ;;  %vm1493_vm1 = vcmask 785408   ;;  %vm1460_vm2 = vcmask 523264   ;;  %vm2739_vm11 = vcmask 517120  }
  0x1c   : > { %s10713_s30 = smov 32   ;;  %s10714_s11 = smov 64  }
  0x1d   : > { %s365_s25 = scalar_select %p364_p10, %s10795_s17, 1 }
  0x1e   : > { %s10715_s12 = smov 96   ;;  %s18151_s1 = sld [smem:[#allocation105_spill]] }
  0x1f   : > { %s8923_s26 = smul.u32 432, %s365_s25  ;;  %s18182_s2 = sld [smem:[#allocation106_spill]] }
  0x20   : > { %s18193_s3 = sld [smem:[#allocation107_spill]] }
  0x21   : > { %s10827_s29 = scalar_lea.vmem %s18150_s0, %s8923_s26  ;;  %s18303_s4 = sld [smem:[#allocation108_spill]] }
  0x22   : > { %v409_v0 = vld [vmem:[%s10827_s29 + $0x61] sm:$0xff]  ;;  %v410_v1 = vld [vmem:[%s10827_s29 + $0x69] sm:$0xff]  ;;  %v405_v2 = vld [vmem:[%s10827_s29 + $0x31] sm:$0xff]  ;;  %s18013_s26 = sand.u32 1, %s10703_s14  }
  0x23   : > { %v8994_v3 = vpack.i.bf16 %v410_v1, %v409_v0  ;;  %v406_v4 = vld [vmem:[%s10827_s29 + $0x39] sm:$0xff]  ;;  %v401_v5 = vld [vmem:[%s10827_s29 + $0x1] sm:$0xff]  ;;  %v402_v6 = vld [vmem:[%s10827_s29 + $0x9] sm:$0xff]  ;;  %s8426_s27 = sshll.u32 %s18013_s26, 7 }
  0x24   : > { %v10835_v7 = vpack.i.bf16 %v406_v4, %v405_v2  ;;  %v8974_v8 = vpack.i.bf16 %v402_v6, %v401_v5  ;;  %v411_v9 = vld [vmem:[%s10827_s29 + $0x79] sm:$0xff]  ;;  %v412_v10 = vld [vmem:[%s10827_s29 + $0x81] sm:$0xff]  ;;  %v407_v11 = vld [vmem:[%s10827_s29 + $0x49] sm:$0xff] }
  0x25   : > { %8995 = vrot.lane.b32.xlu2 %v8994_v3, %s10713_s30  ;;  %v408_v12 = vld [vmem:[%s10827_s29 + $0x51] sm:$0xff]  ;;  %v403_v13 = vld [vmem:[%s10827_s29 + $0x19] sm:$0xff]  ;;  %v404_v14 = vld [vmem:[%s10827_s29 + $0x21] sm:$0xff]  ;;  %v8999_v15 = vpack.i.bf16 %v412_v10, %v411_v9 }
  0x26   : > { %8985 = vrot.lane.b32.xlu1 %v10835_v7, %s10713_s30  ;;  %8975 = vrot.lane.b32.xlu0 %v8974_v8, %s10713_s30  ;;  %v8989_v16 = vpack.i.bf16 %v408_v12, %v407_v11  ;;  %v8979_v17 = vpack.i.bf16 %v404_v14, %v403_v13  ;;  %v417_v18 = vld [vmem:[%s10827_s29 + $0xc1] sm:$0xff]  ;;  %v418_v19 = vld [vmem:[%s10827_s29 + $0xc9] sm:$0xff] }
  0x27   : > { %v415_v20 = vld [vmem:[%s10827_s29 + $0xa9] sm:$0xff]  ;;  %v416_v21 = vld [vmem:[%s10827_s29 + $0xb1] sm:$0xff]  ;;  %v414_v23 = vld [vmem:[%s10827_s29 + $0x99] sm:$0xff]  ;;  %v9014_v24 = vpack.i.bf16 %v418_v19, %v417_v18 }
  0x28   : > { %v413_v22 = vld [vmem:[%s10827_s29 + $0x91] sm:$0xff]  ;;  %v9009_v25 = vpack.i.bf16 %v416_v21, %v415_v20  ;;  %v423_v27 = vld [vmem:[%s10827_s29 + $0x109] sm:$0xff]  ;;  %v422_v30 = vld [vmem:[%s10827_s29 + $0xf9] sm:$0xff] }
  0x29   : > { %v9004_v26 = vpack.i.bf16 %v414_v23, %v413_v22  ;;  %v424_v28 = vld [vmem:[%s10827_s29 + $0x111] sm:$0xff]  ;;  %v419_v31 = vld [vmem:[%s10827_s29 + $0xd9] sm:$0xff]  ;;  %v420_v32 = vld [vmem:[%s10827_s29 + $0xe1] sm:$0xff] }
  0x2a   : > { %v421_v29 = vld [vmem:[%s10827_s29 + $0xf1] sm:$0xff]  ;;  %v9029_v33 = vpack.i.bf16 %v424_v28, %v423_v27  ;;  %v9019_v35 = vpack.i.bf16 %v420_v32, %v419_v31  ;;  %v430_v37 = vld [vmem:[%s10827_s29 + $0x159] sm:$0xff]  ;;  %v428_v39 = vld [vmem:[%s10827_s29 + $0x141] sm:$0xff] }
  0x2b   : > { %v9024_v34 = vpack.i.bf16 %v422_v30, %v421_v29  ;;  %v429_v36 = vld [vmem:[%s10827_s29 + $0x151] sm:$0xff]  ;;  %v427_v38 = vld [vmem:[%s10827_s29 + $0x139] sm:$0xff]  ;;  %v425_v40 = vld [vmem:[%s10827_s29 + $0x121] sm:$0xff] }
  0x2c   : > { %v426_v41 = vld [vmem:[%s10827_s29 + $0x129] sm:$0xff]  ;;  %v9044_v42 = vpack.i.bf16 %v430_v37, %v429_v36  ;;  %v9039_v43 = vpack.i.bf16 %v428_v39, %v427_v38  ;;  %v435_v45 = vld [vmem:[%s10827_s29 + $0x1a] sm:$0xff]  ;;  %v432_v50 = vld [vmem:[%s10827_s29 + $0x171] sm:$0xff] }
  0x2d   : > { %9000 = vrot.lane.b32.xlu2 %v8999_v15, %s10713_s30  ;;  %v9034_v44 = vpack.i.bf16 %v426_v41, %v425_v40  ;;  %v436_v46 = vld [vmem:[%s10827_s29 + $0x22] sm:$0xff]  ;;  %v434_v48 = vld [vmem:[%s10827_s29 + $0xa] sm:$0xff]  ;;  %v440_v57 = vld [vmem:[%s10827_s29 + $0x52] sm:$0xff] }
  0x2e   : > { %8990 = vrot.lane.b32.xlu1 %v8989_v16, %s10713_s30  ;;  %8980 = vrot.lane.b32.xlu0 %v8979_v17, %s10713_s30  ;;  %v433_v47 = vld [vmem:[%s10827_s29 + $0x2] sm:$0xff]  ;;  %v10883_v51 = vpack.i.bf16 %v436_v46, %v435_v45  ;;  %v442_v55 = vld [vmem:[%s10827_s29 + $0x6a] sm:$0xff] }
  0x2f   : > { %v431_v49 = vld [vmem:[%s10827_s29 + $0x169] sm:$0xff]  ;;  %v9054_v52 = vpack.i.bf16 %v434_v48, %v433_v47  ;;  %v437_v58 = vld [vmem:[%s10827_s29 + $0x32] sm:$0xff]  ;;  %v438_v59 = vld [vmem:[%s10827_s29 + $0x3a] sm:$0xff] }
  0x30   : > { %v9049_v53 = vpack.i.bf16 %v432_v50, %v431_v49  ;;  %v441_v54 = vld [vmem:[%s10827_s29 + $0x62] sm:$0xff]  ;;  %v439_v56 = vld [vmem:[%s10827_s29 + $0x4a] sm:$0xff]  ;;  %v10899_v62 = vpack.i.bf16 %v438_v59, %v437_v58  ;;  %v448_v0 = vld [vmem:[%s10827_s29 + $0xb2] sm:$0xff] }
  0x31   : > { %v10895_v60 = vpack.i.bf16 %v442_v55, %v441_v54  ;;  %v10897_v61 = vpack.i.bf16 %v440_v57, %v439_v56  ;;  %v447_v63 = vld [vmem:[%s10827_s29 + $0xaa] sm:$0xff]  ;;  %v445_v1 = vld [vmem:[%s10827_s29 + $0x92] sm:$0xff]  ;;  %v446_v2 = vld [vmem:[%s10827_s29 + $0x9a] sm:$0xff] }
  0x32   : > { %v443_v3 = vld [vmem:[%s10827_s29 + $0x7a] sm:$0xff]  ;;  %v444_v4 = vld [vmem:[%s10827_s29 + $0x82] sm:$0xff]  ;;  %v10913_v5 = vpack.i.bf16 %v448_v0, %v447_v63  ;;  %v10915_v6 = vpack.i.bf16 %v446_v2, %v445_v1  ;;  %v453_v9 = vld [vmem:[%s10827_s29 + $0xf2] sm:$0xff] }
  0x33   : > { %v10917_v8 = vpack.i.bf16 %v444_v4, %v443_v3  ;;  %v454_v10 = vld [vmem:[%s10827_s29 + $0xfa] sm:$0xff]  ;;  %v452_v12 = vld [vmem:[%s10827_s29 + $0xe2] sm:$0xff]  ;;  %v450_v14 = vld [vmem:[%s10827_s29 + $0xca] sm:$0xff] }
  0x34   : > { %v451_v11 = vld [vmem:[%s10827_s29 + $0xda] sm:$0xff]  ;;  %v449_v13 = vld [vmem:[%s10827_s29 + $0xc2] sm:$0xff]  ;;  %v10931_v15 = vpack.i.bf16 %v454_v10, %v453_v9  ;;  %v458_v21 = vld [vmem:[%s10827_s29 + $0x12a] sm:$0xff] }
  0x35   : > { %9015 = vrot.lane.b32.xlu2 %v9014_v24, %s10713_s30  ;;  %v10933_v16 = vpack.i.bf16 %v452_v12, %v451_v11  ;;  %v10935_v17 = vpack.i.bf16 %v450_v14, %v449_v13  ;;  %v459_v18 = vld [vmem:[%s10827_s29 + $0x13a] sm:$0xff]  ;;  %v460_v19 = vld [vmem:[%s10827_s29 + $0x142] sm:$0xff]  ;;  %v455_v22 = vld [vmem:[%s10827_s29 + $0x10a] sm:$0xff] }
  0x36   : > { %9010 = vrot.lane.b32.xlu1 %v9009_v25, %s10713_s30  ;;  %9005 = vrot.lane.b32.xlu0 %v9004_v26, %s10713_s30  ;;  %v457_v20 = vld [vmem:[%s10827_s29 + $0x122] sm:$0xff]  ;;  %v456_v23 = vld [vmem:[%s10827_s29 + $0x112] sm:$0xff]  ;;  %v10949_v24 = vpack.i.bf16 %v460_v19, %v459_v18 }
  0x37   : > { %v10951_v25 = vpack.i.bf16 %v458_v21, %v457_v20  ;;  %v10953_v26 = vpack.i.bf16 %v456_v23, %v455_v22  ;;  %v10958_v27 = vld [vmem:[%s10827_s29 + $0x18] sm:$0xff]  ;;  %v10965_v28 = vld [vmem:[%s10827_s29 + $0x20] sm:$0xff]  ;;  %v463_v29 = vld [vmem:[%s10827_s29 + $0x16a] sm:$0xff] }
  0x38   : > { %v464_v30 = vld [vmem:[%s10827_s29 + $0x172] sm:$0xff]  ;;  %v462_v32 = vld [vmem:[%s10827_s29 + $0x15a] sm:$0xff]  ;;  %v8436_v37 = vld [vmem:[%s10827_s29 + $0x68] sm:$0xff] }
  0x39   : > { %v461_v31 = vld [vmem:[%s10827_s29 + $0x152] sm:$0xff]  ;;  %v8435_v36 = vld [vmem:[%s10827_s29 + $0x60] sm:$0xff]  ;;  %v10985_v38 = vld [vmem:[%s10827_s29 + $0x48] sm:$0xff] }
  0x3a   : > { %v8434_v39 = vld [vmem:[%s10827_s29 + $0x50] sm:$0xff]  ;;  %v10992_v41 = vld [vmem:[%s10827_s29 + $0x38] sm:$0xff]  ;;  %v8441_v45 = vld [vmem:[%s10827_s29 + $0xa8] sm:$0xff] }
  0x3b   : > { %v10989_v40 = vld [vmem:[%s10827_s29 + $0x30] sm:$0xff]  ;;  %v8440_v49 = vld [vmem:[%s10827_s29 + $0x98] sm:$0xff]  ;;  %v11039_v63 = vld [vmem:[%s10827_s29 + $0xe0] sm:$0xff] }
  0x3c   : > { %v8442_v46 = vld [vmem:[%s10827_s29 + $0xb0] sm:$0xff]  ;;  %v8437_v50 = vld [vmem:[%s10827_s29 + $0x78] sm:$0xff]  ;;  %v8443_v0 = vld [vmem:[%s10827_s29 + $0xc0] sm:$0xff] }
  0x3d   : > { %9030 = vrot.lane.b32.xlu2 %v9029_v33, %s10713_s30  ;;  %v9134_v33 = vpack.i.bf16 %v10965_v28, %v10958_v27  ;;  %v8439_v47 = vld [vmem:[%s10827_s29 + $0x90] sm:$0xff]  ;;  %v11033_v57 = vld [vmem:[%s10827_s29 + $0xf8] sm:$0xff]  ;;  %v8444_v1 = vld [vmem:[%s10827_s29 + $0xc8] sm:$0xff] }
  0x3e   : > { %9025 = vrot.lane.b32.xlu1 %v9024_v34, %s10713_s30  ;;  %9020 = vrot.lane.b32.xlu0 %v9019_v35, %s10713_s30  ;;  %v10973_v34 = vpack.i.bf16 %v464_v30, %v463_v29  ;;  %v10975_v35 = vpack.i.bf16 %v462_v32, %v461_v31  ;;  %v11019_v54 = vpack.i.bf16 %v8440_v49, %v8439_v47  ;;  %v11026_v56 = vld [vmem:[%s10827_s29 + $0xf0] sm:$0xff]  ;;  %v8445_v58 = vld [vmem:[%s10827_s29 + $0xd8] sm:$0xff] }
  0x3f   : > { %v11045_v2 = vpack.i.bf16 %v11033_v57, %v11026_v56  ;;  %v11048_v3 = vpack.i.bf16 %v11039_v63, %v8445_v58  ;;  %v11050_v4 = vpack.i.bf16 %v8444_v1, %v8443_v0  ;;  %v8453_v9 = vld [vmem:[%s10827_s29 + $0x138] sm:$0xff]  ;;  %v11060_v10 = vld [vmem:[%s10827_s29 + $0x140] sm:$0xff]  ;;  %v8452_v13 = vld [vmem:[%s10827_s29 + $0x128] sm:$0xff] }
  0x40   : > { %v8451_v11 = vld [vmem:[%s10827_s29 + $0x120] sm:$0xff]  ;;  %v11067_v14 = vld [vmem:[%s10827_s29 + $0x108] sm:$0xff]  ;;  %v8450_v18 = vld [vmem:[%s10827_s29 + $0x110] sm:$0xff]  ;;  %v11071_v19 = vpack.i.bf16 %v11060_v10, %v8453_v9 }
  0x41   : > { %v1637_v20 = vld [vmem:[%s18151_s1 + $0x78] sm:$0xff]  ;;  %v11076_v21 = vpack.i.bf16 %v8452_v13, %v8451_v11  ;;  %v11079_v22 = vpack.i.bf16 %v8450_v18, %v11067_v14  ;;  %v8459_v23 = vld [vmem:[%s10827_s29 + $0x180] sm:$0xff]  ;;  %v8460_v29 = vld [vmem:[%s10827_s29 + $0x188] sm:$0xff] }
  0x42   : > { %1758 = vmatpush.msra.mxu0 %v1637_v20  ;;  %8887 = vmatpush.msra.mxu1 %v1637_v20  ;;  %v8457_v30 = vld [vmem:[%s10827_s29 + $0x168] sm:$0xff]  ;;  %v1636_v31 = vld [vmem:[%s18151_s1 + $0x70] sm:$0xff]  ;;  %v11109_v47 = vpack.i.bf16 %v8460_v29, %v8459_v23  ;;  %v1634_v49 = vld [vmem:[%s18151_s1 + $0x60] sm:$0xff] }
  0x43   : > { %8888 = vmatpush.msra.mxu3 %v1637_v20  ;;  %v1633_v58 = vld [vmem:[%s18151_s1 + $0x58] sm:$0xff]  ;;  %v1632_v0 = vld [vmem:[%s18151_s1 + $0x50] sm:$0xff]  ;;  %v1631_v13 = vld [vmem:[%s18151_s1 + $0x48] sm:$0xff] }
  0x44   : > { %1759 = vmatpush.msra.mxu0 %v1636_v31  ;;  %8889 = vmatpush.msra.mxu1 %v1636_v31  ;;  %v1630_v18 = vld [vmem:[%s18151_s1 + $0x40] sm:$0xff]  ;;  %v1629_v20 = vld [vmem:[%s18151_s1 + $0x38] sm:$0xff]  ;;  %v1628_v23 = vld [vmem:[%s18151_s1 + $0x30] sm:$0xff] }
  0x45   : > { %9045 = vrot.lane.b32.xlu2 %v9044_v42, %s10713_s30  ;;  %v10994_v42 = vpack.i.bf16 %v8436_v37, %v8435_v36  ;;  %v11097_v36 = vld [vmem:[%s10827_s29 + $0x150] sm:$0xff]  ;;  %v11100_v37 = vld [vmem:[%s10827_s29 + $0x158] sm:$0xff]  ;;  %8890 = vmatpush.msra.mxu3 %v1636_v31 }
  0x46   : > { %9040 = vrot.lane.b32.xlu1 %v9039_v43, %s10713_s30  ;;  %9035 = vrot.lane.b32.xlu0 %v9034_v44, %s10713_s30  ;;  %v10997_v43 = vpack.i.bf16 %v8434_v39, %v10985_v38  ;;  %v11001_v44 = vpack.i.bf16 %v10992_v41, %v10989_v40 }
  0x4d   : > { %9060 = vrot.lane.b32.xlu2 %v10883_v51, %s10714_s11 }
  0x4e   : > { %9055 = vrot.lane.b32.xlu1 %v9054_v52, %s10714_s11  ;;  %9050 = vrot.lane.b32.xlu0 %v9049_v53, %s10713_s30  ;;  %v8438_v52 = vld [vmem:[%s10827_s29 + $0x80] sm:$0xff]  ;;  %v11017_v53 = vpack.i.bf16 %v8442_v46, %v8441_v45  ;;  %v1635_v46 = vld [vmem:[%s18151_s1 + $0x68] sm:$0xff] }
  0x4f   : > { %v11021_v55 = vpack.i.bf16 %v8438_v52, %v8437_v50  ;;  %1760 = vmatpush.msra.mxu0 %v1635_v46  ;;  %8891 = vmatpush.msra.mxu1 %v1635_v46  ;;  %v11118_v52 = vpack.i.bf16 %v11100_v37, %v11097_v36 }
  0x50   : > { %8892 = vmatpush.msra.mxu3 %v1635_v46 }
  0x51   : > { %1761 = vmatpush.msra.mxu0 %v1634_v49  ;;  %8893 = vmatpush.msra.mxu1 %v1634_v49 }
  0x52   : > { %8894 = vmatpush.msra.mxu3 %v1634_v49 }
  0x53   : > { %1762 = vmatpush.msra.mxu0 %v1633_v58  ;;  %8895 = vmatpush.msra.mxu1 %v1633_v58 }
  0x54   : > { %8896 = vmatpush.msra.mxu3 %v1633_v58 }
  0x55   : > { %9075 = vrot.lane.b32.xlu2 %v10895_v60, %s10714_s11  ;;  %1763 = vmatpush.msra.mxu0 %v1632_v0 }
  0x56   : > { %9070 = vrot.lane.b32.xlu1 %v10897_v61, %s10714_s11  ;;  %9065 = vrot.lane.b32.xlu0 %v10899_v62, %s10714_s11 }
  0x57   : > { %1764 = vmatpush.msra.mxu0 %v1631_v13  ;;  %8897 = vmatpush.msra.mxu1 %v1632_v0 }
  0x58   : > { %8898 = vmatpush.msra.mxu3 %v1632_v0 }
  0x59   : > { %1765 = vmatpush.msra.mxu0 %v1630_v18  ;;  %8899 = vmatpush.msra.mxu1 %v1631_v13 }
  0x5a   : > { %8900 = vmatpush.msra.mxu3 %v1631_v13 }
  0x5b   : > { %1766 = vmatpush.msra.mxu0 %v1629_v20  ;;  %8901 = vmatpush.msra.mxu1 %v1630_v18 }
  0x5c   : > { %8902 = vmatpush.msra.mxu3 %v1630_v18  ;;  %v8524_v18 = vld [vmem:[%s10827_s29 + $0x18a] sm:$0xff] }
  0x5d   : > { %9090 = vrot.lane.b32.xlu2 %v10913_v5, %s10714_s11  ;;  %1767 = vmatpush.msra.mxu0 %v1628_v23 }
  0x5e   : > { %9085 = vrot.lane.b32.xlu1 %v10915_v6, %s10714_s11  ;;  %9080 = vrot.lane.b32.xlu0 %v10917_v8, %s10714_s11 }
  0x5f   : > { %8903 = vmatpush.msra.mxu1 %v1629_v20  ;;  %8904 = vmatpush.msra.mxu3 %v1629_v20 }
  0x61   : > { %8905 = vmatpush.msra.mxu1 %v1628_v23  ;;  %8906 = vmatpush.msra.mxu3 %v1628_v23 }
  0x65   : > { %9105 = vrot.lane.b32.xlu2 %v10931_v15, %s10714_s11 }
  0x66   : > { %9100 = vrot.lane.b32.xlu1 %v10933_v16, %s10714_s11  ;;  %9095 = vrot.lane.b32.xlu0 %v10935_v17, %s10714_s11 }
  0x6d   : > { %9120 = vrot.lane.b32.xlu2 %v10949_v24, %s10714_s11 }
  0x6e   : > { %9115 = vrot.lane.b32.xlu1 %v10951_v25, %s10714_s11  ;;  %9110 = vrot.lane.b32.xlu0 %v10953_v26, %s10714_s11 }
  0x75   : > { %9135 = vrot.lane.b32.xlu2 %v9134_v33, %s10715_s12  ;;  %v8458_v33 = vld [vmem:[%s10827_s29 + $0x170] sm:$0xff] }
  0x76   : > { %9130 = vrot.lane.b32.xlu1 %v10973_v34, %s10714_s11  ;;  %9125 = vrot.lane.b32.xlu0 %v10975_v35, %s10714_s11  ;;  %v11114_v50 = vpack.i.bf16 %v8458_v33, %v8457_v30  ;;  %v1624_v33 = vld [vmem:[%s18151_s1 + $0x10] sm:$0xff] }
  0x7d   : > { %9150 = vrot.lane.b32.xlu2 %v10994_v42, %s10715_s12 }
  0x7e   : > { %9145 = vrot.lane.b32.xlu1 %v10997_v43, %s10715_s12  ;;  %9140 = vrot.lane.b32.xlu0 %v11001_v44, %s10715_s12 }
  0x7f   : > { %v11012_v48 = vpop.permute.xlu2 %8995 }
  0x85   : > { %9165 = vrot.lane.b32.xlu2 %v11017_v53, %s10715_s12 }
  0x86   : > { %9160 = vrot.lane.b32.xlu1 %v11019_v54, %s10715_s12  ;;  %9155 = vrot.lane.b32.xlu0 %v11021_v55, %s10715_s12 }
  0x87   : > { %v11036_v59 = vpop.permute.xlu2 %9000 }
  0x8d   : > { %9180 = vrot.lane.b32.xlu2 %v11045_v2, %s10715_s12 }
  0x8e   : > { %9175 = vrot.lane.b32.xlu1 %v11048_v3, %s10715_s12  ;;  %9170 = vrot.lane.b32.xlu0 %v11050_v4, %s10715_s12 }
  0x8f   : > { %v11063_v12 = vpop.permute.xlu2 %9015 }
  0x95   : > { %9195 = vrot.lane.b32.xlu2 %v11071_v19, %s10715_s12 }
  0x96   : > { %9190 = vrot.lane.b32.xlu1 %v11076_v21, %s10715_s12  ;;  %9185 = vrot.lane.b32.xlu0 %v11079_v22, %s10715_s12 }
  0x97   : > { %v11093_v32 = vpop.permute.xlu2 %9030 }
  0x98   : > { %v11102_v39 = vpop.permute.xlu1 %8985  ;;  %v11104_v45 = vpop.permute.xlu0 %8975 }
  0x9d   : > { %9210 = vrot.lane.b32.xlu2 %v11109_v47, %s10715_s12 }
  0x9e   : > { %9205 = vrot.lane.b32.xlu1 %v11114_v50, %s10715_s12  ;;  %9200 = vrot.lane.b32.xlu0 %v11118_v52, %s10715_s12 }
  0x9f   : > { %v11132_v1 = vpop.permute.xlu2 %9045 }
  0xa0   : > { %v11134_v9 = vpop.permute.xlu1 %8990  ;;  %v11136_v11 = vpop.permute.xlu0 %8980 }
  0xa5   : > { %9225 = vrot.lane.b32.xlu2 %v10897_v61, %s10713_s30  ;;  %v1627_v61 = vld [vmem:[%s18151_s1 + $0x28] sm:$0xff] }
  0xa6   : > { %9220 = vrot.lane.b32.xlu1 %v10899_v62, %s10713_s30  ;;  %9215 = vrot.lane.b32.xlu0 %v10883_v51, %s10713_s30  ;;  %v1626_v51 = vld [vmem:[%s18151_s1 + $0x20] sm:$0xff]  ;;  %v1625_v62 = vld [vmem:[%s18151_s1 + $0x18] sm:$0xff] }
  0xa7   : > { %v11156_v29 = vpop.permute.xlu2 %9060  ;;  %1768 = vmatpush.msra.mxu0 %v1627_v61  ;;  %8907 = vmatpush.msra.mxu1 %v1627_v61 }
  0xa8   : > { %v11158_v30 = vpop.permute.xlu1 %9010  ;;  %v11160_v31 = vpop.permute.xlu0 %9005  ;;  %8908 = vmatpush.msra.mxu3 %v1627_v61  ;;  %v8977_v61 = vunpack.i.l.bf16 %v11104_v45 }
  0xa9   : > { %1769 = vmatpush.msra.mxu0 %v1626_v51  ;;  %8909 = vmatpush.msra.mxu1 %v1626_v51 }
  0xaa   : > { %8910 = vmatpush.msra.mxu3 %v1626_v51 }
  0xab   : > { %1770 = vmatpush.msra.mxu0 %v1625_v62  ;;  %8911 = vmatpush.msra.mxu1 %v1625_v62 }
  0xac   : > { %8912 = vmatpush.msra.mxu3 %v1625_v62 }
  0xad   : > { %9240 = vrot.lane.b32.xlu2 %v10915_v6, %s10713_s30  ;;  %1771 = vmatpush.msra.mxu0 %v1624_v33  ;;  %v1623_v6 = vld [vmem:[%s18151_s1 + $0x8] sm:$0xff] }
  0xae   : > { %9235 = vrot.lane.b32.xlu1 %v10917_v8, %s10713_s30  ;;  %9230 = vrot.lane.b32.xlu0 %v10895_v60, %s10713_s30  ;;  %v1622_v60 = vld [vmem:[%s18151_s1] sm:$0xff] }
  0xaf   : > { %v11180_v46 = vpop.permute.xlu2 %9075  ;;  %1772 = vmatpush.msra.mxu0 %v1623_v6  ;;  %8913 = vmatpush.msra.mxu1 %v1624_v33 }
  0xb0   : > { %v11182_v49 = vpop.permute.xlu1 %9025  ;;  %v11184_v58 = vpop.permute.xlu0 %9020  ;;  %8914 = vmatpush.msra.mxu3 %v1624_v33 }
  0xb1   : > { %1773 = vmatpush.msra.mxu0 %v1622_v60  ;;  %8915 = vmatpush.msra.mxu1 %v1623_v6 }
  0xb2   : > { %8916 = vmatpush.msra.mxu3 %v1623_v6 }
  0xb3   : > { %8917 = vmatpush.msra.mxu1 %v1622_v60 }
  0xb4   : > { %8918 = vmatpush.msra.mxu3 %v1622_v60 }
  0xb5   : > { %9255 = vrot.lane.b32.xlu2 %v10933_v16, %s10713_s30 }
  0xb6   : > { %9250 = vrot.lane.b32.xlu1 %v10935_v17, %s10713_s30  ;;  %9245 = vrot.lane.b32.xlu0 %v10913_v5, %s10713_s30 }
  0xb7   : > { %v11198_v8 = vpop.permute.xlu2 %9090 }
  0xb8   : > { %v11200_v0 = vpop.permute.xlu1 %9040  ;;  %v11202_v13 = vpop.permute.xlu0 %9035 }
  0xbd   : > { %9270 = vrot.lane.b32.xlu2 %v10951_v25, %s10713_s30 }
  0xbe   : > { %9265 = vrot.lane.b32.xlu1 %v10953_v26, %s10713_s30  ;;  %9260 = vrot.lane.b32.xlu0 %v10931_v15, %s10713_s30  ;;  %v8523_v26 = vld [vmem:[%s10827_s29 + $0x182] sm:$0xff] }
  0xbf   : > { %v11210_v5 = vpop.permute.xlu2 %9105  ;;  %v9289_v23 = vpack.i.bf16 %v8524_v18, %v8523_v26  ;;  %v370_v18 = vld [vmem:[%s10827_s29 + $0x8] sm:$0xff] }
  0xc0   : > { %v9056_v16 = vpop.permute.xlu1 %9055  ;;  %v11212_v17 = vpop.permute.xlu0 %9050 }
  0xc1   : > { %v9057_v51 = vunpack.i.l.bf16 %v9056_v16  ;;  %v9058_v26 = vunpack.i.h.bf16 %v9056_v16 }
  0xc5   : > { %9285 = vrot.lane.b32.xlu2 %v10973_v34, %s10713_s30  ;;  %v369_v34 = vld [vmem:[%s10827_s29] sm:$0xff] }
  0xc6   : > { %9280 = vrot.lane.b32.xlu1 %v10975_v35, %s10713_s30  ;;  %9275 = vrot.lane.b32.xlu0 %v10949_v24, %s10713_s30  ;;  %v1428_v6 = vsel %vm1427_vm0, %v369_v34, %v8977_v61 }
  0xc7   : > { %v11220_v25 = vpop.permute.xlu2 %9120 }
  0xc8   : > { %v11224_v15 = vpop.permute.xlu1 %9070  ;;  %v11226_v20 = vpop.permute.xlu0 %9065 }
  0xcd   : > { %9300 = vrot.lane.b32.xlu2 %v10997_v43, %s10714_s11  ;;  %v1461_v43 = vsel %vm1460_vm2, %v1428_v6, %v9057_v51 }
  0xce   : > { %9295 = vrot.lane.b32.xlu1 %v11001_v44, %s10714_s11  ;;  %9290 = vrot.lane.b32.xlu0 %v9289_v23, %s10713_s30  ;;  %v8978_v44 = vunpack.i.h.bf16 %v11104_v45 }
  0xcf   : > { %v9136_v24 = vpop.permute.xlu2 %9135 }
  0xd0   : > { %v9137_v35 = vunpack.i.l.bf16 %v9136_v24  ;;  %v11235_v62 = vpop.permute.xlu1 %9085  ;;  %v11237_v33 = vpop.permute.xlu0 %9080  ;;  %v9138_v23 = vunpack.i.h.bf16 %v9136_v24  ;;  %v1429_v45 = vsel %vm1427_vm0, %v370_v18, %v8978_v44  ;;  %v8982_v44 = vunpack.i.l.bf16 %v11136_v11  ;;  %v8556_v18 = vld [vmem:[%s10827_s29 + $0x1a0] sm:$0xff] }
  0xd1   : > { %v1462_v16 = vsel %vm1460_vm2, %v1429_v45, %v9058_v26  ;;  %v8555_v26 = vld [vmem:[%s10827_s29 + $0x198] sm:$0xff] }
  0xd2   : > { %v1494_v60 = vsel %vm1493_vm1, %v1461_v43, %v9137_v35  ;;  %v9023_v35 = vunpack.i.h.bf16 %v11184_v58 }
  0xd3   : > { %1774 = vmatmul.f32.vlgmr.msra.gmra.mxu0 %v1494_v60 }
  0xd4   : > { %v1447_v60 = vsel %vm1427_vm0, %v11039_v63, %v9023_v35  ;;  %v8983_v35 = vunpack.i.h.bf16 %v11136_v11  ;;  %v11327_v11 = vld [vmem:[%s10827_s29 + $0x69] sm:$0xff] }
  0xd5   : > { %9315 = vrot.lane.b32.xlu2 %v11019_v54, %s10714_s11  ;;  %v1495_v54 = vsel %vm1493_vm1, %v1462_v16, %v9138_v23  ;;  %18157 = vst [vmem:[#allocation15_spill] sm:$0xff] %v11327_v11 }
  0xd6   : > { %9310 = vrot.lane.b32.xlu1 %v11021_v55, %s10714_s11  ;;  %9305 = vrot.lane.b32.xlu0 %v10994_v42, %s10714_s11 }
  0xd7   : > { %v11250_v61 = vpop.permute.xlu2 %9150 }
  0xd8   : > { %v11252_v51 = vpop.permute.xlu1 %9100  ;;  %v11254_v34 = vpop.permute.xlu0 %9095 }
  0xd9   : > { %18152 = vst [vmem:[#allocation10_spill] sm:$0xff] %v11252_v51  ;;  %v9103_v6 = vunpack.i.h.bf16 %v11252_v51 }
  0xdb   : > { %1777 = vmatmul.f32.gmra.mxu0 %v1495_v54  ;;  %v9369_v54 = vpack.i.bf16 %v8556_v18, %v8555_v26 }
  0xdd   : > { %9330 = vrot.lane.b32.xlu2 %v11048_v3, %s10714_s11 }
  0xde   : > { %9325 = vrot.lane.b32.xlu1 %v11050_v4, %s10714_s11  ;;  %9320 = vrot.lane.b32.xlu0 %v11017_v53, %s10714_s11 }
  0xdf   : > { %v11265_v42 = vpop.permute.xlu2 %9165 }
  0xe0   : > { %v11267_v55 = vpop.permute.xlu1 %9115  ;;  %v11269_v24 = vpop.permute.xlu0 %9110 }
  0xe5   : > { %9345 = vrot.lane.b32.xlu2 %v11076_v21, %s10714_s11  ;;  %v1480_v21 = vsel %vm1460_vm2, %v1447_v60, %v9103_v6  ;;  %v11312_v6 = vld [vmem:[%s10827_s29 + $0x79] sm:$0xff]  ;;  %v11322_v60 = vld [vmem:[%s10827_s29 + $0x61] sm:$0xff] }
  0xe6   : > { %9340 = vrot.lane.b32.xlu1 %v11079_v22, %s10714_s11  ;;  %9335 = vrot.lane.b32.xlu0 %v11045_v2, %s10714_s11  ;;  %v9062_v2 = vunpack.i.l.bf16 %v11156_v29  ;;  %18154 = vst [vmem:[#allocation12_spill] sm:$0xff] %v11312_v6 }
  0xe7   : > { %v11279_v53 = vpop.permute.xlu2 %9180  ;;  %18156 = vst [vmem:[#allocation14_spill] sm:$0xff] %v11322_v60 }
  0xe8   : > { %18153 = vst [vmem:[#allocation11_spill] sm:$0xff] %v11279_v53  ;;  %v9183_v3 = vunpack.i.h.bf16 %v11279_v53  ;;  %v11282_v4 = vpop.permute.xlu1 %9130  ;;  %v11284_v43 = vpop.permute.xlu0 %9125  ;;  %v9043_v53 = vunpack.i.h.bf16 %v11200_v0 }
  0xea   : > { %v1513_v22 = vsel %vm1493_vm1, %v1480_v21, %v9183_v3  ;;  %v9063_v3 = vunpack.i.h.bf16 %v11156_v29 }
  0xeb   : > { %1831 = vmatmul.f32.vlgmr.msra.gmra.mxu1 %v1513_v22 }
  0xed   : > { %9360 = vrot.lane.b32.xlu2 %v11114_v50, %s10714_s11  ;;  %v1430_v50 = vsel %vm1427_vm0, %v10958_v27, %v8982_v44  ;;  %v11319_v27 = vld [vmem:[%s10827_s29 + $0x81] sm:$0xff]  ;;  %v11333_v44 = vld [vmem:[%s10827_s29 + $0x51] sm:$0xff] }
  0xee   : > { %9355 = vrot.lane.b32.xlu1 %v11118_v52, %s10714_s11  ;;  %9350 = vrot.lane.b32.xlu0 %v11071_v19, %s10714_s11  ;;  %v1463_v52 = vsel %vm1460_vm2, %v1430_v50, %v9062_v2  ;;  %18155 = vst [vmem:[#allocation13_spill] sm:$0xff] %v11319_v27  ;;  %v9389_v26 = vpack.i.bf16 %v11319_v27, %v11312_v6 }
  0xef   : > { %v11298_v63 = vpop.permute.xlu2 %9195  ;;  %18159 = vst [vmem:[#allocation17_spill] sm:$0xff] %v11333_v44 }
  0xf0   : > { %v11302_v23 = vpop.permute.xlu1 %9145  ;;  %v9141_v45 = vpop.permute.xlu0 %9140 }
  0xf1   : > { %v9142_v16 = vunpack.i.l.bf16 %v9141_v45  ;;  %v9143_v21 = vunpack.i.h.bf16 %v9141_v45  ;;  %v9384_v45 = vpack.i.bf16 %v11327_v11, %v11322_v60 }
  0xf3   : > { %v1496_v19 = vsel %vm1493_vm1, %v1463_v52, %v9142_v16  ;;  %v8987_v52 = vunpack.i.l.bf16 %v11102_v39 }
  0xf4   : > { %1780 = vmatmul.f32.gmra.mxu0 %v1496_v19  ;;  %v9067_v19 = vunpack.i.l.bf16 %v11226_v20 }
  0xf5   : > { %9375 = vrot.lane.b32.xlu2 %v10835_v7, %s10715_s12  ;;  %v11330_v7 = vld [vmem:[%s10827_s29 + $0x49] sm:$0xff] }
  0xf6   : > { %9370 = vrot.lane.b32.xlu1 %v9369_v54, %s10714_s11  ;;  %9365 = vrot.lane.b32.xlu0 %v11109_v47, %s10714_s11  ;;  %18158 = vst [vmem:[#allocation16_spill] sm:$0xff] %v11330_v7  ;;  %v1431_v47 = vsel %vm1427_vm0, %v10965_v28, %v8983_v35  ;;  %v9379_v16 = vpack.i.bf16 %v11333_v44, %v11330_v7  ;;  %v8569_v28 = vld [vmem:[%s10827_s29 + $0xc1] sm:$0xff]  ;;  %v1657_v54 = vld [vmem:[%s18151_s1 + $0x118] sm:$0xff]  ;;  %v9027_v7 = vunpack.i.l.bf16 %v11182_v49 }
  0xf7   : > { %v11324_v22 = vpop.permute.xlu2 %9210  ;;  %v1464_v18 = vsel %vm1460_vm2, %v1431_v47, %v9063_v3  ;;  %v8570_v35 = vld [vmem:[%s10827_s29 + $0xc9] sm:$0xff]  ;;  %1996 = vmatpush.msrb.mxu0 %v1657_v54  ;;  %8919 = vmatpush.msra.mxu2 %v1657_v54 }
  0xf8   : > { %v11335_v29 = vpop.permute.xlu1 %9160  ;;  %v11337_v2 = vpop.permute.xlu0 %9155  ;;  %v1497_v50 = vsel %vm1493_vm1, %v1464_v18, %v9143_v21  ;;  %v11360_v3 = vld [vmem:[%s10827_s29 + $0xa9] sm:$0xff]  ;;  %v9147_v21 = vunpack.i.l.bf16 %v11302_v23  ;;  %v8568_v18 = vld [vmem:[%s10827_s29 + $0xb1] sm:$0xff]  ;;  %v9404_v6 = vpack.i.bf16 %v8570_v35, %v8569_v28  ;;  %v9068_v35 = vunpack.i.h.bf16 %v11226_v20  ;;  %v8572_v20 = vld [vmem:[%s10827_s29 + $0xe1] sm:$0xff] }
  0xf9   : > { %18160 = vst [vmem:[#allocation18_spill] sm:$0xff] %v11360_v3  ;;  %v9399_v60 = vpack.i.bf16 %v8568_v18, %v11360_v3  ;;  %v1653_v28 = vld [vmem:[%s18151_s1 + $0xf8] sm:$0xff]  ;;  %v1448_v18 = vsel %vm1427_vm0, %v11026_v56, %v9027_v7  ;;  %v9028_v3 = vunpack.i.h.bf16 %v11182_v49 }
  0xfa   : > { %1871 = vmatpush.msrb.mxu1 %v1653_v28 }
  0xfc   : > { %1783 = vmatmul.f32.gmra.mxu0 %v1497_v50  ;;  %v11370_v50 = vld [vmem:[%s10827_s29 + $0x99] sm:$0xff] }
  0xfd   : > { %9390 = vrot.lane.b32.xlu2 %v9389_v26, %s10715_s12  ;;  %v11367_v26 = vld [vmem:[%s10827_s29 + $0x91] sm:$0xff]  ;;  %18163 = vst [vmem:[#allocation21_spill] sm:$0xff] %v11370_v50 }
  0xfe   : > { %9385 = vrot.lane.b32.xlu1 %v9384_v45, %s10715_s12  ;;  %9380 = vrot.lane.b32.xlu0 %v9379_v16, %s10715_s12  ;;  %18162 = vst [vmem:[#allocation20_spill] sm:$0xff] %v11367_v26  ;;  %v1432_v16 = vsel %vm1427_vm0, %v10989_v40, %v8987_v52  ;;  %v9394_v44 = vpack.i.bf16 %v11370_v50, %v11367_v26  ;;  %v8575_v40 = vld [vmem:[%s10827_s29 + $0x109] sm:$0xff]  ;;  %v8576_v52 = vld [vmem:[%s10827_s29 + $0x111] sm:$0xff] }
  0xff   : > { %v11363_v47 = vpop.permute.xlu2 %9225  ;;  %v1465_v11 = vsel %vm1460_vm2, %v1432_v16, %v9067_v19  ;;  %v9107_v19 = vunpack.i.l.bf16 %v11210_v5  ;;  %v8574_v16 = vld [vmem:[%s10827_s29 + $0xf9] sm:$0xff]  ;;  %v9419_v26 = vpack.i.bf16 %v8576_v52, %v8575_v40  ;;  %v8581_v40 = vld [vmem:[%s10827_s29 + $0x151] sm:$0xff] }
 0x100   : > { %18161 = vst [vmem:[#allocation19_spill] sm:$0xff] %v11363_v47  ;;  %v11372_v27 = vpop.permute.xlu1 %9175  ;;  %v11374_v45 = vpop.permute.xlu0 %9170  ;;  %v1498_v54 = vsel %vm1493_vm1, %v1465_v11, %v9147_v21  ;;  %v8988_v47 = vunpack.i.h.bf16 %v11102_v39  ;;  %v8573_v11 = vld [vmem:[%s10827_s29 + $0xf1] sm:$0xff]  ;;  %v8582_v52 = vld [vmem:[%s10827_s29 + $0x159] sm:$0xff] }
 0x101   : > { %v1652_v39 = vld [vmem:[%s18151_s1 + $0xf0] sm:$0xff]  ;;  %v1481_v7 = vsel %vm1460_vm2, %v1448_v18, %v9107_v19  ;;  %v1651_v19 = vld [vmem:[%s18151_s1 + $0xe8] sm:$0xff]  ;;  %v1455_v18 = vsel %vm1427_vm0, %v11060_v10, %v9043_v53 }
 0x102   : > { %1872 = vmatpush.msrb.mxu1 %v1652_v39 }
 0x104   : > { %1786 = vmatmul.f32.gmra.mxu0 %v1498_v54  ;;  %v11406_v54 = vld [vmem:[%s10827_s29 + $0xd9] sm:$0xff]  ;;  %1873 = vmatpush.msrb.mxu1 %v1651_v19 }
 0x105   : > { %9405 = vrot.lane.b32.xlu2 %v9404_v6, %s10715_s12  ;;  %v9148_v6 = vunpack.i.h.bf16 %v11302_v23  ;;  %18165 = vst [vmem:[#allocation23_spill] sm:$0xff] %v11406_v54  ;;  %v1433_v23 = vsel %vm1427_vm0, %v10992_v41, %v8988_v47  ;;  %v9409_v28 = vpack.i.bf16 %v8572_v20, %v11406_v54  ;;  %v8992_v41 = vunpack.i.l.bf16 %v11134_v9  ;;  %v8578_v20 = vld [vmem:[%s10827_s29 + $0x129] sm:$0xff] }
 0x106   : > { %9400 = vrot.lane.b32.xlu1 %v9399_v60, %s10715_s12  ;;  %9395 = vrot.lane.b32.xlu0 %v9394_v44, %s10715_s12  ;;  %v1466_v56 = vsel %vm1460_vm2, %v1433_v23, %v9068_v35  ;;  %v9108_v47 = vunpack.i.h.bf16 %v11210_v5  ;;  %v9123_v35 = vunpack.i.h.bf16 %v11220_v25  ;;  %v1449_v5 = vsel %vm1427_vm0, %v11033_v57, %v9028_v3 }
 0x107   : > { %v11400_v21 = vpop.permute.xlu2 %9240  ;;  %v1499_v49 = vsel %vm1493_vm1, %v1466_v56, %v9148_v6  ;;  %v1434_v56 = vsel %vm1427_vm0, %v10985_v38, %v8992_v41  ;;  %v376_v38 = vld [vmem:[%s10827_s29 + $0x50] sm:$0xff]  ;;  %v9032_v41 = vunpack.i.l.bf16 %v11093_v32 }
 0x108   : > { %18164 = vst [vmem:[#allocation22_spill] sm:$0xff] %v11400_v21  ;;  %v11409_v60 = vpop.permute.xlu1 %9190  ;;  %v9186_v44 = vpop.permute.xlu0 %9185  ;;  %v9414_v21 = vpack.i.bf16 %v8574_v16, %v8573_v11  ;;  %v9152_v11 = vunpack.i.l.bf16 %v11250_v61  ;;  %v8580_v16 = vld [vmem:[%s10827_s29 + $0x141] sm:$0xff]  ;;  %v1488_v53 = vsel %vm1460_vm2, %v1455_v18, %v9123_v35  ;;  %v8583_v18 = vld [vmem:[%s10827_s29 + $0x169] sm:$0xff] }
 0x109   : > { %v9187_v50 = vunpack.i.l.bf16 %v9186_v44  ;;  %v9188_v39 = vunpack.i.h.bf16 %v9186_v44  ;;  %v1482_v44 = vsel %vm1460_vm2, %v1449_v5, %v9108_v47  ;;  %v9047_v47 = vunpack.i.l.bf16 %v11132_v1  ;;  %v8588_v35 = vld [vmem:[%s10827_s29 + $0x1a1] sm:$0xff] }
 0x10a   : > { %v9112_v5 = vunpack.i.l.bf16 %v11269_v24 }
 0x10b   : > { %v1514_v51 = vsel %vm1493_vm1, %v1481_v7, %v9187_v50  ;;  %v9072_v50 = vunpack.i.l.bf16 %v11224_v15  ;;  %v9434_v7 = vpack.i.bf16 %v8582_v52, %v8581_v40  ;;  %v1515_v54 = vsel %vm1493_vm1, %v1482_v44, %v9188_v39  ;;  %v8587_v52 = vld [vmem:[%s10827_s29 + $0x199] sm:$0xff] }
 0x10c   : > { %1789 = vmatmul.f32.gmra.mxu0 %v1499_v49  ;;  %1834 = vmatmul.f32.gmra.mxu1 %v1514_v51  ;;  %v8579_v51 = vld [vmem:[%s10827_s29 + $0x139] sm:$0xff]  ;;  %v8993_v40 = vunpack.i.h.bf16 %v11134_v9  ;;  %v8585_v9 = vld [vmem:[%s10827_s29 + $0x181] sm:$0xff]  ;;  %v9192_v39 = vunpack.i.l.bf16 %v11409_v60  ;;  %v1456_v44 = vsel %vm1427_vm0, %v11097_v36, %v9047_v47  ;;  %v9033_v47 = vunpack.i.h.bf16 %v11093_v32 }
 0x10d   : > { %9420 = vrot.lane.b32.xlu2 %v9419_v26, %s10715_s12  ;;  %v1650_v26 = vld [vmem:[%s18151_s1 + $0xe0] sm:$0xff]  ;;  %v1467_v10 = vsel %vm1460_vm2, %v1434_v56, %v9072_v50  ;;  %v1649_v50 = vld [vmem:[%s18151_s1 + $0xd8] sm:$0xff]  ;;  %v1647_v36 = vld [vmem:[%s18151_s1 + $0xc8] sm:$0xff]  ;;  %v9128_v32 = vunpack.i.h.bf16 %v11284_v43 }
 0x10e   : > { %9415 = vrot.lane.b32.xlu1 %v9414_v21, %s10715_s12  ;;  %9410 = vrot.lane.b32.xlu0 %v9409_v28, %s10715_s12  ;;  %v8577_v21 = vld [vmem:[%s10827_s29 + $0x121] sm:$0xff]  ;;  %v9429_v28 = vpack.i.bf16 %v8580_v16, %v8579_v51  ;;  %v1500_v19 = vsel %vm1493_vm1, %v1467_v10, %v9152_v11  ;;  %v1648_v51 = vld [vmem:[%s18151_s1 + $0xd0] sm:$0xff]  ;;  %v9127_v11 = vunpack.i.l.bf16 %v11284_v43  ;;  %v1435_v56 = vsel %vm1427_vm0, %v376_v38, %v8993_v40 }
 0x10f   : > { %v11439_v6 = vpop.permute.xlu2 %9255  ;;  %1874 = vmatpush.msrb.mxu1 %v1650_v26  ;;  %v9424_v49 = vpack.i.bf16 %v8578_v20, %v8577_v21  ;;  %v9153_v26 = vunpack.i.h.bf16 %v11250_v61  ;;  %v8584_v16 = vld [vmem:[%s10827_s29 + $0x171] sm:$0xff]  ;;  %v1450_v61 = vsel %vm1427_vm0, %v11067_v14, %v9032_v41  ;;  %v8997_v41 = vunpack.i.l.bf16 %v11012_v48  ;;  %v377_v40 = vld [vmem:[%s10827_s29 + $0x60] sm:$0xff] }
 0x110   : > { %18166 = vst [vmem:[#allocation24_spill] sm:$0xff] %v11439_v6  ;;  %v11446_v23 = vpop.permute.xlu1 %9205  ;;  %v11448_v57 = vpop.permute.xlu0 %9200  ;;  %v1489_v38 = vsel %vm1460_vm2, %v1456_v44, %v9127_v11  ;;  %v1656_v43 = vld [vmem:[%s18151_s1 + $0x110] sm:$0xff] }
 0x111   : > { %v9203_v3 = vunpack.i.h.bf16 %v11448_v57  ;;  %1875 = vmatpush.msrb.mxu1 %v1649_v50  ;;  %v9207_v21 = vunpack.i.l.bf16 %v11446_v23  ;;  %1997 = vmatpush.msrb.mxu0 %v1656_v43 }
 0x112   : > { %8920 = vmatpush.msra.mxu2 %v1656_v43  ;;  %v1641_v43 = vld [vmem:[%s18151_s1 + $0x98] sm:$0xff] }
 0x113   : > { %v1521_v6 = vsel %vm1493_vm1, %v1488_v53, %v9203_v3  ;;  %1876 = vmatpush.msrb.mxu1 %v1648_v51  ;;  %v1483_v53 = vsel %vm1460_vm2, %v1450_v61, %v9112_v5  ;;  %v1522_v14 = vsel %vm1493_vm1, %v1489_v38, %v9207_v21  ;;  %v392_v5 = vld [vmem:[%s10827_s29 + $0x110] sm:$0xff]  ;;  %v9157_v51 = vunpack.i.l.bf16 %v11337_v2  ;;  %v393_v38 = vld [vmem:[%s10827_s29 + $0x120] sm:$0xff] }
 0x114   : > { %1792 = vmatmul.f32.gmra.mxu0 %v1500_v19  ;;  %1837 = vmatmul.f32.gmra.mxu1 %v1515_v54  ;;  %v9073_v54 = vunpack.i.h.bf16 %v11224_v15  ;;  %v8586_v15 = vld [vmem:[%s10827_s29 + $0x189] sm:$0xff]  ;;  %v1516_v50 = vsel %vm1493_vm1, %v1483_v53, %v9192_v39  ;;  %v9037_v53 = vunpack.i.l.bf16 %v11202_v13 }
 0x115   : > { %1855 = vmatmul.f32.vlgmr.msra.gmra.mxu3 %v1521_v6  ;;  %9435 = vrot.lane.b32.xlu2 %v9434_v7, %s10715_s12  ;;  %v9449_v7 = vpack.i.bf16 %v8588_v35, %v8587_v52  ;;  %v9048_v52 = vunpack.i.h.bf16 %v11132_v1  ;;  %v9077_v35 = vunpack.i.l.bf16 %v11180_v46 }
 0x116   : > { %9430 = vrot.lane.b32.xlu1 %v9429_v28, %s10715_s12  ;;  %9425 = vrot.lane.b32.xlu0 %v9424_v49, %s10715_s12  ;;  %v1468_v10 = vsel %vm1460_vm2, %v1435_v56, %v9073_v54  ;;  %v9444_v28 = vpack.i.bf16 %v8586_v15, %v8585_v9  ;;  %v9439_v49 = vpack.i.bf16 %v8584_v16, %v8583_v18  ;;  %v9113_v54 = vunpack.i.h.bf16 %v11269_v24  ;;  %v1646_v9 = vld [vmem:[%s18151_s1 + $0xc0] sm:$0xff] }
 0x117   : > { %v11480_v6 = vpop.permute.xlu2 %9270  ;;  %v1501_v19 = vsel %vm1493_vm1, %v1468_v10, %v9153_v26  ;;  %v9193_v26 = vunpack.i.h.bf16 %v11409_v60  ;;  %1877 = vmatpush.msrb.mxu1 %v1647_v36  ;;  %v9208_v24 = vunpack.i.h.bf16 %v11446_v23  ;;  %v1436_v15 = vsel %vm1427_vm0, %v377_v40, %v8997_v41 }
 0x118   : > { %v11486_v20 = vpop.permute.xlu1 %9220  ;;  %v11488_v3 = vpop.permute.xlu0 %9215  ;;  %v1451_v18 = vsel %vm1427_vm0, %v392_v5, %v9033_v47  ;;  %v1469_v60 = vsel %vm1460_vm2, %v1436_v15, %v9077_v35  ;;  %v1457_v23 = vsel %vm1427_vm0, %v11100_v37, %v9048_v52  ;;  %v1644_v37 = vld [vmem:[%s18151_s1 + $0xb0] sm:$0xff]  ;;  %v8998_v10 = vunpack.i.h.bf16 %v11012_v48  ;;  %v399_v48 = vld [vmem:[%s10827_s29 + $0x168] sm:$0xff] }
 0x119   : > { %1878 = vmatpush.msrb.mxu1 %v1646_v9  ;;  %v1484_v16 = vsel %vm1460_vm2, %v1451_v18, %v9113_v54  ;;  %v1502_v21 = vsel %vm1493_vm1, %v1469_v60, %v9157_v51  ;;  %v1490_v61 = vsel %vm1460_vm2, %v1457_v23, %v9128_v32  ;;  %v9197_v36 = vunpack.i.l.bf16 %v11298_v63  ;;  %v1643_v5 = vld [vmem:[%s18151_s1 + $0xa8] sm:$0xff]  ;;  %v1642_v51 = vld [vmem:[%s18151_s1 + $0xa0] sm:$0xff] }
 0x11a   : > { %v1517_v56 = vsel %vm1493_vm1, %v1484_v16, %v9193_v26  ;;  %v1523_v44 = vsel %vm1493_vm1, %v1490_v61, %v9208_v24  ;;  %v9158_v41 = vunpack.i.h.bf16 %v11337_v2  ;;  %v9212_v40 = vunpack.i.l.bf16 %v11324_v22  ;;  %v379_v61 = vld [vmem:[%s10827_s29 + $0x78] sm:$0xff] }
 0x11b   : > { %v1452_v54 = vsel %vm1427_vm0, %v393_v38, %v9037_v53  ;;  %v9002_v60 = vunpack.i.l.bf16 %v11036_v59  ;;  %v9038_v16 = vunpack.i.h.bf16 %v11202_v13  ;;  %v9053_v23 = vunpack.i.h.bf16 %v11212_v17 }
 0x11c   : > { %1795 = vmatmul.f32.gmra.mxu0 %v1501_v19  ;;  %1840 = vmatmul.f32.gmra.mxu1 %v1516_v50  ;;  %v9117_v19 = vunpack.i.l.bf16 %v11267_v55  ;;  %v378_v50 = vld [vmem:[%s10827_s29 + $0x68] sm:$0xff]  ;;  %v9162_v13 = vunpack.i.l.bf16 %v11335_v29 }
 0x11d   : > { %1858 = vmatmul.f32.gmra.mxu3 %v1522_v14  ;;  %9450 = vrot.lane.b32.xlu2 %v9449_v7, %s10715_s12  ;;  %v1645_v7 = vld [vmem:[%s18151_s1 + $0xb8] sm:$0xff]  ;;  %v9132_v14 = vunpack.i.l.bf16 %v11282_v4  ;;  %v1437_v35 = vsel %vm1427_vm0, %v378_v50, %v8998_v10  ;;  %v9198_v10 = vunpack.i.h.bf16 %v11298_v63 }
 0x11e   : > { %9445 = vrot.lane.b32.xlu1 %v9444_v28, %s10715_s12  ;;  %9440 = vrot.lane.b32.xlu0 %v9439_v49, %s10715_s12  ;;  %v9078_v28 = vunpack.i.h.bf16 %v11180_v46  ;;  %v9052_v49 = vunpack.i.l.bf16 %v11212_v17  ;;  %v1485_v9 = vsel %vm1460_vm2, %v1452_v54, %v9117_v19  ;;  %v9213_v17 = vunpack.i.h.bf16 %v11324_v22  ;;  %v395_v54 = vld [vmem:[%s10827_s29 + $0x138] sm:$0xff] }
 0x11f   : > { %v11520_v1 = vpop.permute.xlu2 %9285  ;;  %1879 = vmatpush.msrb.mxu1 %v1645_v7  ;;  %v1518_v24 = vsel %vm1493_vm1, %v1485_v9, %v9197_v36  ;;  %v1640_v7 = vld [vmem:[%s18151_s1 + $0x90] sm:$0xff]  ;;  %v1438_v19 = vsel %vm1427_vm0, %v379_v61, %v9002_v60  ;;  %v9042_v36 = vunpack.i.l.bf16 %v11200_v0  ;;  %v9083_v0 = vunpack.i.h.bf16 %v11237_v33  ;;  %v380_v9 = vld [vmem:[%s10827_s29 + $0x80] sm:$0xff] }
 0x120   : > { %v11523_v11 = vpop.permute.xlu1 %9235  ;;  %v11525_v39 = vpop.permute.xlu0 %9230  ;;  %v1470_v2 = vsel %vm1460_vm2, %v1437_v35, %v9078_v28  ;;  %v1458_v32 = vsel %vm1427_vm0, %v399_v48, %v9052_v49  ;;  %v400_v28 = vld [vmem:[%s10827_s29 + $0x170] sm:$0xff]  ;;  %v9087_v60 = vunpack.i.l.bf16 %v11235_v62 }
 0x121   : > { %1880 = vmatpush.msrb.mxu1 %v1644_v37  ;;  %v1503_v26 = vsel %vm1493_vm1, %v1470_v2, %v9158_v41  ;;  %v1491_v15 = vsel %vm1460_vm2, %v1458_v32, %v9132_v14  ;;  %v9133_v37 = vunpack.i.h.bf16 %v11282_v4  ;;  %v1639_v4 = vld [vmem:[%s18151_s1 + $0x88] sm:$0xff]  ;;  %v1459_v22 = vsel %vm1427_vm0, %v400_v28, %v9053_v23  ;;  %v1638_v14 = vld [vmem:[%s18151_s1 + $0x80] sm:$0xff] }
 0x122   : > { %v1524_v18 = vsel %vm1493_vm1, %v1491_v15, %v9212_v40  ;;  %v9122_v2 = vunpack.i.l.bf16 %v11220_v25  ;;  %v9163_v32 = vunpack.i.h.bf16 %v11335_v29  ;;  %v9167_v23 = vunpack.i.l.bf16 %v11265_v42 }
 0x123   : > { %1881 = vmatpush.msrb.mxu1 %v1643_v5  ;;  %v1492_v40 = vsel %vm1460_vm2, %v1459_v22, %v9133_v37  ;;  %v9003_v5 = vunpack.i.h.bf16 %v11036_v59  ;;  %v9088_v28 = vunpack.i.h.bf16 %v11235_v62  ;;  %v383_v62 = vld [vmem:[%s10827_s29 + $0xa8] sm:$0xff] }
 0x124   : > { %1798 = vmatmul.f32.gmra.mxu0 %v1502_v21  ;;  %1843 = vmatmul.f32.gmra.mxu1 %v1517_v56  ;;  %v9082_v21 = vunpack.i.l.bf16 %v11237_v33  ;;  %v9118_v56 = vunpack.i.h.bf16 %v11267_v55  ;;  %v1525_v35 = vsel %vm1493_vm1, %v1492_v40, %v9213_v17  ;;  %v382_v17 = vld [vmem:[%s10827_s29 + $0x98] sm:$0xff]  ;;  %v9172_v40 = vunpack.i.l.bf16 %v11374_v45 }
 0x125   : > { %1861 = vmatmul.f32.gmra.mxu3 %v1523_v44  ;;  %1882 = vmatpush.msrb.mxu1 %v1642_v51  ;;  %v394_v44 = vld [vmem:[%s10827_s29 + $0x128] sm:$0xff]  ;;  %v9202_v51 = vunpack.i.l.bf16 %v11448_v57  ;;  %v1439_v59 = vsel %vm1427_vm0, %v380_v9, %v9003_v5  ;;  %v9007_v57 = vunpack.i.l.bf16 %v11160_v31 }
 0x126   : > { %v1453_v50 = vsel %vm1427_vm0, %v394_v44, %v9038_v16  ;;  %v1471_v63 = vsel %vm1460_vm2, %v1438_v19, %v9082_v21  ;;  %v1472_v25 = vsel %vm1460_vm2, %v1439_v59, %v9083_v0  ;;  %v381_v16 = vld [vmem:[%s10827_s29 + $0x90] sm:$0xff]  ;;  %v9168_v19 = vunpack.i.h.bf16 %v11265_v42  ;;  %v8461_v42 = vld [vmem:[%s10827_s29 + $0x19] sm:$0xff] }
 0x127   : > { %v11556_v47 = vpop.permute.xlu2 %9300  ;;  %1883 = vmatpush.msrb.mxu1 %v1641_v43  ;;  %v1486_v38 = vsel %vm1460_vm2, %v1453_v50, %v9118_v56  ;;  %v1504_v41 = vsel %vm1493_vm1, %v1471_v63, %v9162_v13  ;;  %v1505_v43 = vsel %vm1493_vm1, %v1472_v25, %v9163_v32  ;;  %v1440_v44 = vsel %vm1427_vm0, %v381_v16, %v9007_v57  ;;  %v8462_v57 = vld [vmem:[%s10827_s29 + $0x21] sm:$0xff] }
 0x128   : > { %v11560_v52 = vpop.permute.xlu1 %9250  ;;  %v11562_v46 = vpop.permute.xlu0 %9245  ;;  %v1519_v48 = vsel %vm1493_vm1, %v1486_v38, %v9198_v10  ;;  %v1655_v10 = vld [vmem:[%s18151_s1 + $0x108] sm:$0xff]  ;;  %v9008_v13 = vunpack.i.h.bf16 %v11160_v31  ;;  %v9012_v31 = vunpack.i.l.bf16 %v11158_v30  ;;  %v9218_v25 = vunpack.i.h.bf16 %v11488_v3 }
 0x129   : > { %1884 = vmatpush.msrb.mxu1 %v1640_v7  ;;  %v1473_v7 = vsel %vm1460_vm2, %v1440_v44, %v9087_v60  ;;  %1998 = vmatpush.msrb.mxu0 %v1655_v10  ;;  %v9093_v60 = vunpack.i.h.bf16 %v11198_v8 }
 0x12a   : > { %v1506_v37 = vsel %vm1493_vm1, %v1473_v7, %v9167_v23  ;;  %8921 = vmatpush.msra.mxu2 %v1655_v10  ;;  %v1441_v63 = vsel %vm1427_vm0, %v382_v17, %v9008_v13  ;;  %v9173_v23 = vunpack.i.h.bf16 %v11374_v45  ;;  %v1527_v7 = vsel %vm1427_vm0, %v8462_v57, %v9218_v25  ;;  %v385_v17 = vld [vmem:[%s10827_s29 + $0xc0] sm:$0xff]  ;;  %v18168_v25 = vld [vmem:[#allocation11_spill] sm:$0xff] }
 0x12b   : > { %1885 = vmatpush.msrb.mxu1 %v1639_v4  ;;  %v1474_v22 = vsel %vm1460_vm2, %v1441_v63, %v9088_v28  ;;  %v9017_v45 = vunpack.i.l.bf16 %v11063_v12  ;;  %v9097_v13 = vunpack.i.l.bf16 %v11254_v34 }
 0x12c   : > { %1801 = vmatmul.f32.gmra.mxu0 %v1503_v26  ;;  %1846 = vmatmul.f32.gmra.mxu1 %v1518_v24  ;;  %v1454_v24 = vsel %vm1427_vm0, %v395_v54, %v9042_v36  ;;  %v9217_v36 = vunpack.i.l.bf16 %v11488_v3  ;;  %v1442_v54 = vsel %vm1427_vm0, %v383_v62, %v9012_v31  ;;  %v9018_v62 = vunpack.i.h.bf16 %v11063_v12 }
 0x12d   : > { %1864 = vmatmul.f32.gmra.mxu3 %v1524_v18  ;;  %1886 = vmatpush.msrb.mxu1 %v1638_v14  ;;  %v1487_v33 = vsel %vm1460_vm2, %v1454_v24, %v9122_v2  ;;  %v1507_v14 = vsel %vm1493_vm1, %v1474_v22, %v9168_v19  ;;  %v9013_v24 = vunpack.i.h.bf16 %v11158_v30  ;;  %v9177_v19 = vunpack.i.l.bf16 %v11372_v27 }
 0x12e   : > { %v1520_v29 = vsel %vm1493_vm1, %v1487_v33, %v9202_v51  ;;  %v1526_v0 = vsel %vm1427_vm0, %v8461_v42, %v9217_v36  ;;  %v1444_v31 = vsel %vm1427_vm0, %v385_v17, %v9017_v45  ;;  %v386_v42 = vld [vmem:[%s10827_s29 + $0xc8] sm:$0xff] }
 0x12f   : > { %v11595_v53 = vpop.permute.xlu2 %9315 }
 0x130   : > { %v11599_v49 = vpop.permute.xlu1 %9265  ;;  %v11601_v55 = vpop.permute.xlu0 %9260 }
 0x134   : > { %1804 = vmatmul.f32.gmra.mxu0 %v1504_v41  ;;  %1849 = vmatmul.f32.gmra.mxu1 %v1519_v48  ;;  %v9092_v48 = vunpack.i.l.bf16 %v11198_v8  ;;  %v1654_v8 = vld [vmem:[%s18151_s1 + $0x100] sm:$0xff] }
 0x135   : > { %1867 = vmatmul.f32.gmra.mxu3 %v1525_v35  ;;  %1999 = vmatpush.msrb.mxu0 %v1654_v8 }
 0x136   : > { %v1475_v32 = vsel %vm1460_vm2, %v1442_v54, %v9092_v48  ;;  %8922 = vmatpush.msra.mxu2 %v1654_v8  ;;  %v9178_v48 = vunpack.i.h.bf16 %v11372_v27  ;;  %v8464_v8 = vld [vmem:[%s10827_s29 + $0x39] sm:$0xff] }
 0x137   : > { %v11626_v26 = vpop.permute.xlu2 %9330  ;;  %v1508_v59 = vsel %vm1493_vm1, %v1475_v32, %v9172_v40  ;;  %v8463_v32 = vld [vmem:[%s10827_s29 + $0x31] sm:$0xff] }
 0x138   : > { %v11629_v15 = vpop.permute.xlu1 %9280  ;;  %v11631_v18 = vpop.permute.xlu0 %9275 }
 0x13c   : > { %1807 = vmatmul.f32.gmra.mxu0 %v1505_v43  ;;  %1852 = vmatmul.f32.gmra.mxu1 %v1520_v29  ;;  %v384_v43 = vld [vmem:[%s10827_s29 + $0xb0] sm:$0xff] }
 0x13d   : > { %v1443_v44 = vsel %vm1427_vm0, %v384_v43, %v9013_v24  ;;  %v9302_v24 = vunpack.i.l.bf16 %v11556_v47  ;;  %v9182_v43 = vunpack.i.l.bf16 %v18168_v25  ;;  %v8591_v25 = vld [vmem:[%s10827_s29 + $0x4a] sm:$0xff] }
 0x13f   : > { %v11642_v21 = vpop.permute.xlu2 %9345 }
 0x140   : > { %v9296_v56 = vpop.permute.xlu1 %9295  ;;  %v11644_v61 = vpop.permute.xlu0 %9290 }
 0x141   : > { %v9297_v41 = vunpack.i.l.bf16 %v9296_v56  ;;  %v9298_v29 = vunpack.i.h.bf16 %v9296_v56 }
 0x143   : > { %v1558_v9 = vsel %vm1460_vm2, %v1526_v0, %v9297_v41  ;;  %v1559_v3 = vsel %vm1460_vm2, %v1527_v7, %v9298_v29  ;;  %v9098_v41 = vunpack.i.h.bf16 %v11254_v34  ;;  %v9022_v34 = vunpack.i.l.bf16 %v11184_v58 }
 0x144   : > { %1810 = vmatmul.f32.gmra.mxu0 %v1506_v37  ;;  %v1476_v37 = vsel %vm1460_vm2, %v1443_v44, %v9093_v60 }
 0x145   : > { %v1509_v56 = vsel %vm1493_vm1, %v1476_v37, %v9173_v23 }
 0x147   : > { %v11656_v50 = vpop.permute.xlu2 %9360 }
 0x148   : > { %v11658_v4 = vpop.permute.xlu0 %9305  ;;  %v11661_v38 = vpop.permute.xlu1 %9310 }
 0x14c   : > { %1813 = vmatmul.f32.gmra.mxu0 %v1507_v14  ;;  %v1477_v14 = vsel %vm1460_vm2, %v1444_v31, %v9097_v13 }
 0x14d   : > { %v1510_v36 = vsel %vm1493_vm1, %v1477_v14, %v9177_v19  ;;  %v8589_v19 = vld [vmem:[%s10827_s29 + $0x32] sm:$0xff] }
 0x14f   : > { %v9376_v35 = vpop.permute.xlu2 %9375 }
 0x150   : > { %v9377_v5 = vunpack.i.l.bf16 %v9376_v35  ;;  %v11672_v2 = vpop.permute.xlu0 %9320  ;;  %v11681_v33 = vpop.permute.xlu1 %9325  ;;  %v9378_v16 = vunpack.i.h.bf16 %v9376_v35 }
 0x151   : > { %v11704_v63 = vpop.f32.mrf.mxu0 }
 0x152   : > { %v1590_v51 = vsel %vm1493_vm1, %v1558_v9, %v9377_v5  ;;  %v1591_v10 = vsel %vm1493_vm1, %v1559_v3, %v9378_v16  ;;  %v1445_v5 = vsel %vm1427_vm0, %v386_v42, %v9018_v62  ;;  %v9222_v9 = vunpack.i.l.bf16 %v11486_v20 }
 0x153   : > { %1887 = vmatmul.f32.vlgmr.msrb.gmra.mxu1 %v1590_v51  ;;  %v1478_v0 = vsel %vm1460_vm2, %v1445_v5, %v9098_v41  ;;  %v18167_v51 = vld [vmem:[#allocation10_spill] sm:$0xff]  ;;  %v9223_v3 = vunpack.i.h.bf16 %v11486_v20  ;;  %v9307_v41 = vunpack.i.l.bf16 %v11658_v4 }
 0x154   : > { %1816 = vmatmul.f32.gmra.mxu0 %v1508_v59  ;;  %v1511_v12 = vsel %vm1493_vm1, %v1478_v0, %v9178_v48  ;;  %v9102_v27 = vunpack.i.l.bf16 %v18167_v51  ;;  %v387_v59 = vld [vmem:[%s10827_s29 + $0xd8] sm:$0xff]  ;;  %v1528_v29 = vsel %vm1427_vm0, %v8463_v32, %v9222_v9  ;;  %v18170_v48 = vld [vmem:[#allocation16_spill] sm:$0xff] }
 0x155   : > { %v1446_v23 = vsel %vm1427_vm0, %v387_v59, %v9022_v34  ;;  %v1560_v7 = vsel %vm1460_vm2, %v1528_v29, %v9302_v24  ;;  %v1529_v13 = vsel %vm1427_vm0, %v8464_v8, %v9223_v3  ;;  %v8590_v0 = vld [vmem:[%s10827_s29 + $0x3a] sm:$0xff]  ;;  %v9308_v34 = vunpack.i.h.bf16 %v11658_v4 }
 0x156   : > { %v1479_v58 = vsel %vm1460_vm2, %v1446_v23, %v9102_v27  ;;  %v18171_v24 = vld [vmem:[#allocation17_spill] sm:$0xff]  ;;  %v9312_v4 = vunpack.i.l.bf16 %v11661_v38 }
 0x157   : > { %v1512_v37 = vsel %vm1493_vm1, %v1479_v58, %v9182_v43 }
 0x158   : > { %v11688_v30 = vpop.permute.xlu0 %9335  ;;  %v11700_v28 = vpop.permute.xlu1 %9340 }
 0x159   : > { %v11719_v54 = vpop.f32.mrf.mxu0 }
 0x15b   : > { %1890 = vmatmul.f32.gmra.mxu1 %v1591_v10 }
 0x15c   : > { %1819 = vmatmul.f32.gmra.mxu0 %v1509_v56  ;;  %v9303_v56 = vunpack.i.h.bf16 %v11556_v47 }
 0x15e   : > { %v1561_v31 = vsel %vm1460_vm2, %v1529_v13, %v9303_v56  ;;  %v9233_v56 = vunpack.i.h.bf16 %v11525_v39 }
 0x160   : > { %v11706_v22 = vpop.permute.xlu0 %9350  ;;  %v11715_v40 = vpop.permute.xlu1 %9355 }
 0x164   : > { %1822 = vmatmul.f32.gmra.mxu0 %v1510_v36  ;;  %v18169_v36 = vld [vmem:[#allocation19_spill] sm:$0xff] }
 0x165   : > { %v9227_v62 = vunpack.i.l.bf16 %v18169_v36  ;;  %v9228_v32 = vunpack.i.h.bf16 %v18169_v36  ;;  %v8593_v36 = vld [vmem:[%s10827_s29 + $0x62] sm:$0xff] }
 0x167   : > { %v1530_v5 = vsel %vm1427_vm0, %v18170_v48, %v9227_v62  ;;  %v1531_v59 = vsel %vm1427_vm0, %v18171_v24, %v9228_v32  ;;  %v8594_v32 = vld [vmem:[%s10827_s29 + $0x6a] sm:$0xff] }
 0x168   : > { %v11717_v35 = vpop.permute.xlu0 %9365  ;;  %v11735_v44 = vpop.permute.xlu1 %9370  ;;  %v1562_v9 = vsel %vm1460_vm2, %v1530_v5, %v9307_v41  ;;  %v1563_v43 = vsel %vm1460_vm2, %v1531_v59, %v9308_v34  ;;  %v9237_v41 = vunpack.i.l.bf16 %v11523_v11  ;;  %v18174_v5 = vld [vmem:[#allocation12_spill] sm:$0xff]  ;;  %v9318_v59 = vunpack.i.h.bf16 %v11595_v53 }
 0x16c   : > { %1825 = vmatmul.f32.gmra.mxu0 %v1511_v12 }
 0x170   : > { %v9381_v57 = vpop.permute.xlu0 %9380  ;;  %v9386_v14 = vpop.permute.xlu1 %9385 }
 0x171   : > { %v9382_v60 = vunpack.i.l.bf16 %v9381_v57  ;;  %v11732_v16 = vpop.f32.mrf.mxu0  ;;  %v9383_v45 = vunpack.i.h.bf16 %v9381_v57  ;;  %v9387_v47 = vunpack.i.l.bf16 %v9386_v14  ;;  %v9388_v51 = vunpack.i.h.bf16 %v9386_v14  ;;  %v9391_v57 = vpop.permute.xlu2 %9390 }
 0x172   : > { %v9392_v23 = vunpack.i.l.bf16 %v9391_v57  ;;  %v9393_v13 = vunpack.i.h.bf16 %v9391_v57 }
 0x173   : > { %v1592_v10 = vsel %vm1493_vm1, %v1560_v7, %v9382_v60  ;;  %v1593_v20 = vsel %vm1493_vm1, %v1561_v31, %v9383_v45  ;;  %v1594_v12 = vsel %vm1493_vm1, %v1562_v9, %v9387_v47  ;;  %v1595_v29 = vsel %vm1493_vm1, %v1563_v43, %v9388_v51  ;;  %v18172_v7 = vld [vmem:[#allocation14_spill] sm:$0xff]  ;;  %v18175_v43 = vld [vmem:[#allocation13_spill] sm:$0xff] }
 0x174   : > { %1828 = vmatmul.f32.gmra.mxu0 %v1512_v37  ;;  %1893 = vmatmul.f32.gmra.mxu1 %v1592_v10  ;;  %v9232_v60 = vunpack.i.l.bf16 %v11525_v39  ;;  %v8592_v37 = vld [vmem:[%s10827_s29 + $0x52] sm:$0xff]  ;;  %v9313_v45 = vunpack.i.h.bf16 %v11661_v38  ;;  %v9317_v39 = vunpack.i.l.bf16 %v11595_v53  ;;  %v9238_v51 = vunpack.i.h.bf16 %v11523_v11 }
 0x176   : > { %v1532_v3 = vsel %vm1427_vm0, %v18172_v7, %v9232_v60  ;;  %v8595_v60 = vld [vmem:[%s10827_s29 + $0x7a] sm:$0xff] }
 0x177   : > { %v1564_v10 = vsel %vm1460_vm2, %v1532_v3, %v9312_v4  ;;  %v18176_v3 = vld [vmem:[#allocation22_spill] sm:$0xff] }
 0x178   : > { %v1596_v8 = vsel %vm1493_vm1, %v1564_v10, %v9392_v23  ;;  %v9396_v48 = vpop.permute.xlu0 %9395  ;;  %v9401_v7 = vpop.permute.xlu1 %9400  ;;  %v9242_v53 = vunpack.i.l.bf16 %v18176_v3 }
 0x179   : > { %v11745_v17 = vpop.f32.mrf.mxu0  ;;  %v9397_v38 = vunpack.i.l.bf16 %v9396_v48  ;;  %v9402_v10 = vunpack.i.l.bf16 %v9401_v7 }
 0x17c   : > { %1896 = vmatmul.f32.gmra.mxu1 %v1593_v20  ;;  %8621 = vmatmul.msk.f32.vlgmr.msrb.gmra.mxu0 %vm1427_vm0, %v8589_v19  ;;  %v11783_v19 = vpop.f32.mrf.mxu1  ;;  %v18173_v20 = vld [vmem:[#allocation15_spill] sm:$0xff] }
 0x17d   : > { %v1533_v14 = vsel %vm1427_vm0, %v18173_v20, %v9233_v56  ;;  %v18177_v56 = vld [vmem:[#allocation20_spill] sm:$0xff] }
 0x17e   : > { %v1565_v62 = vsel %vm1460_vm2, %v1533_v14, %v9313_v45  ;;  %v1536_v45 = vsel %vm1427_vm0, %v18177_v56, %v9242_v53  ;;  %v8474_v53 = vld [vmem:[%s10827_s29 + $0xb1] sm:$0xff] }
 0x17f   : > { %v1597_v47 = vsel %vm1493_vm1, %v1565_v62, %v9393_v13  ;;  %v8596_v13 = vld [vmem:[%s10827_s29 + $0x82] sm:$0xff] }
 0x181   : > { %v11753_v42 = vpop.f32.mrf.mxu0 }
 0x184   : > { %1899 = vmatmul.f32.gmra.mxu1 %v1594_v12  ;;  %8622 = vmatmul.msk.f32.gmra.mxu0 %vm1427_vm0, %v8590_v0  ;;  %v1534_v0 = vsel %vm1427_vm0, %v18174_v5, %v9237_v41  ;;  %v9323_v41 = vunpack.i.h.bf16 %v11672_v2  ;;  %v8597_v5 = vld [vmem:[%s10827_s29 + $0x92] sm:$0xff] }
 0x185   : > { %v1566_v34 = vsel %vm1460_vm2, %v1534_v0, %v9317_v39  ;;  %v18178_v39 = vld [vmem:[#allocation21_spill] sm:$0xff] }
 0x186   : > { %v1598_v24 = vsel %vm1493_vm1, %v1566_v34, %v9397_v38  ;;  %v9406_v34 = vpop.permute.xlu2 %9405 }
 0x189   : > { %v11763_v27 = vpop.f32.mrf.mxu0  ;;  %v11797_v9 = vpop.f32.mrf.mxu1 }
 0x18c   : > { %1902 = vmatmul.f32.gmra.mxu1 %v1595_v29  ;;  %8623 = vmatmul.msk.f32.gmra.mxu0 %vm1427_vm0, %v8591_v25  ;;  %v9398_v25 = vunpack.i.h.bf16 %v9396_v48  ;;  %v1535_v29 = vsel %vm1427_vm0, %v18175_v43, %v9238_v51  ;;  %v9247_v51 = vunpack.i.l.bf16 %v11562_v46  ;;  %v18179_v43 = vld [vmem:[#allocation18_spill] sm:$0xff] }
 0x18d   : > { %v1567_v4 = vsel %vm1460_vm2, %v1535_v29, %v9318_v59 }
 0x18e   : > { %v1599_v11 = vsel %vm1493_vm1, %v1567_v4, %v9398_v25  ;;  %v1538_v29 = vsel %vm1427_vm0, %v18179_v43, %v9247_v51 }
 0x191   : > { %v11773_v58 = vpop.f32.mrf.mxu0  ;;  %v11813_v23 = vpop.f32.mrf.mxu1 }
 0x194   : > { %1905 = vmatmul.f32.gmra.mxu1 %v1596_v8  ;;  %8624 = vmatmul.msk.f32.gmra.mxu0 %vm1427_vm0, %v8592_v37  ;;  %v9322_v37 = vunpack.i.l.bf16 %v11672_v2  ;;  %v9327_v2 = vunpack.i.l.bf16 %v11681_v33 }
 0x196   : > { %v1568_v20 = vsel %vm1460_vm2, %v1536_v45, %v9322_v37  ;;  %v1570_v4 = vsel %vm1460_vm2, %v1538_v29, %v9327_v2  ;;  %v9408_v37 = vunpack.i.h.bf16 %v9406_v34  ;;  %v8476_v2 = vld [vmem:[%s10827_s29 + $0xc9] sm:$0xff] }
 0x197   : > { %v1600_v14 = vsel %vm1493_vm1, %v1568_v20, %v9402_v10 }
 0x199   : > { %v11785_v31 = vpop.f32.mrf.mxu0  ;;  %v11828_v62 = vpop.f32.mrf.mxu1 }
 0x19c   : > { %1908 = vmatmul.f32.gmra.mxu1 %v1597_v47  ;;  %8625 = vmatmul.msk.f32.gmra.mxu0 %vm1427_vm0, %v8593_v36  ;;  %v9243_v36 = vunpack.i.h.bf16 %v18176_v3  ;;  %v9403_v47 = vunpack.i.h.bf16 %v9401_v7  ;;  %v9248_v7 = vunpack.i.h.bf16 %v11562_v46  ;;  %v9328_v3 = vunpack.i.h.bf16 %v11681_v33  ;;  %v9411_v46 = vpop.permute.xlu0 %9410  ;;  %v8475_v33 = vld [vmem:[%s10827_s29 + $0xc1] sm:$0xff] }
 0x19d   : > { %v9413_v43 = vunpack.i.h.bf16 %v9411_v46 }
 0x19e   : > { %v1537_v38 = vsel %vm1427_vm0, %v18178_v39, %v9243_v36  ;;  %v1539_v45 = vsel %vm1427_vm0, %v8474_v53, %v9248_v7  ;;  %v9416_v7 = vpop.permute.xlu1 %9415 }
 0x19f   : > { %v1569_v0 = vsel %vm1460_vm2, %v1537_v38, %v9323_v41  ;;  %v1571_v20 = vsel %vm1460_vm2, %v1539_v45, %v9328_v3  ;;  %v9332_v41 = vunpack.i.l.bf16 %v11626_v26  ;;  %v18180_v3 = vld [vmem:[#allocation24_spill] sm:$0xff]  ;;  %v9417_v45 = vunpack.i.l.bf16 %v9416_v7 }
 0x1a0   : > { %v1603_v36 = vsel %vm1493_vm1, %v1571_v20, %v9408_v37  ;;  %v9257_v53 = vunpack.i.l.bf16 %v18180_v3  ;;  %v18181_v20 = vld [vmem:[#allocation23_spill] sm:$0xff] }
 0x1a1   : > { %v11799_v12 = vpop.f32.mrf.mxu0  ;;  %v11841_v59 = vpop.f32.mrf.mxu1 }
 0x1a4   : > { %1911 = vmatmul.f32.gmra.mxu1 %v1598_v24  ;;  %8626 = vmatmul.msk.f32.gmra.mxu0 %vm1427_vm0, %v8594_v32  ;;  %v1601_v32 = vsel %vm1493_vm1, %v1569_v0, %v9403_v47  ;;  %v9407_v24 = vunpack.i.l.bf16 %v9406_v34  ;;  %v9412_v47 = vunpack.i.l.bf16 %v9411_v46 }
 0x1a9   : > { %v11809_v57 = vpop.f32.mrf.mxu0  ;;  %v11854_v10 = vpop.f32.mrf.mxu1 }
 0x1ac   : > { %1914 = vmatmul.f32.gmra.mxu1 %v1599_v11  ;;  %8627 = vmatmul.msk.f32.gmra.mxu0 %vm1427_vm0, %v8595_v60  ;;  %v8598_v60 = vld [vmem:[%s10827_s29 + $0x9a] sm:$0xff]  ;;  %v1602_v11 = vsel %vm1493_vm1, %v1570_v4, %v9407_v24  ;;  %v9333_v24 = vunpack.i.h.bf16 %v11626_v26  ;;  %v8601_v4 = vld [vmem:[%s10827_s29 + $0xc2] sm:$0xff]  ;;  %v9337_v26 = vunpack.i.l.bf16 %v11688_v30 }
 0x1b1   : > { %v11819_v8 = vpop.f32.mrf.mxu0  ;;  %v11872_v34 = vpop.f32.mrf.mxu1 }
 0x1b4   : > { %1917 = vmatmul.f32.gmra.mxu1 %v1600_v14  ;;  %8628 = vmatmul.msk.f32.gmra.mxu0 %vm1427_vm0, %v8596_v13  ;;  %v8599_v13 = vld [vmem:[%s10827_s29 + $0xaa] sm:$0xff]  ;;  %v9252_v14 = vunpack.i.l.bf16 %v11560_v52 }
 0x1b6   : > { %v1540_v39 = vsel %vm1427_vm0, %v8475_v33, %v9252_v14  ;;  %v1542_v14 = vsel %vm1427_vm0, %v18181_v20, %v9257_v53 }
 0x1b7   : > { %v1572_v0 = vsel %vm1460_vm2, %v1540_v39, %v9332_v41  ;;  %v1574_v46 = vsel %vm1460_vm2, %v1542_v14, %v9337_v26  ;;  %v9258_v41 = vunpack.i.h.bf16 %v18180_v3  ;;  %v9338_v39 = vunpack.i.h.bf16 %v11688_v30  ;;  %v8604_v26 = vld [vmem:[%s10827_s29 + $0xe2] sm:$0xff] }
 0x1b8   : > { %v1604_v51 = vsel %vm1493_vm1, %v1572_v0, %v9412_v47  ;;  %v1606_v33 = vsel %vm1493_vm1, %v1574_v46, %v9417_v45  ;;  %v9418_v0 = vunpack.i.h.bf16 %v9416_v7  ;;  %v9342_v30 = vunpack.i.l.bf16 %v11700_v28  ;;  %v11917_v45 = vld [vmem:[%s18182_s2] ss:$0 sm:$0xff] }
 0x1b9   : > { %v11831_v48 = vpop.f32.mrf.mxu0  ;;  %v11886_v37 = vpop.f32.mrf.mxu1  ;;  %v1776_v46 = vadd.f32 %v11917_v45, %v11704_v63  ;;  %v9267_v63 = vunpack.i.l.bf16 %v11599_v49 }
 0x1bc   : > { %1920 = vmatmul.f32.gmra.mxu1 %v1601_v32  ;;  %8629 = vmatmul.msk.f32.gmra.mxu0 %vm1427_vm0, %v8597_v5  ;;  %v8600_v5 = vld [vmem:[%s10827_s29 + $0xb2] sm:$0xff]  ;;  %v9253_v32 = vunpack.i.h.bf16 %v11560_v52 }
 0x1be   : > { %v1541_v29 = vsel %vm1427_vm0, %v8476_v2, %v9253_v32  ;;  %v8603_v2 = vld [vmem:[%s10827_s29 + $0xda] sm:$0xff] }
 0x1c1   : > { %v11843_v25 = vpop.f32.mrf.mxu0 }
 0x1c4   : > { %1923 = vmatmul.f32.gmra.mxu1 %v1602_v11  ;;  %8630 = vmatmul.msk.f32.gmra.mxu0 %vm1427_vm0, %v8598_v60  ;;  %v1573_v11 = vsel %vm1460_vm2, %v1541_v29, %v9333_v24  ;;  %v9421_v29 = vpop.permute.xlu2 %9420 }
 0x1c5   : > { %v1605_v52 = vsel %vm1493_vm1, %v1573_v11, %v9413_v43  ;;  %v8479_v11 = vld [vmem:[%s10827_s29 + $0xf1] sm:$0xff] }
 0x1c9   : > { %v11856_v56 = vpop.f32.mrf.mxu0 }
 0x1cc   : > { %1926 = vmatmul.f32.gmra.mxu1 %v1603_v36  ;;  %8631 = vmatmul.msk.f32.gmra.mxu0 %vm1427_vm0, %v8599_v13  ;;  %v8602_v36 = vld [vmem:[%s10827_s29 + $0xca] sm:$0xff] }
 0x1d0   : > { %v1888_v47 = vpop.f32.mrf.mxu1 }
 0x1d1   : > { %v11867_v38 = vpop.f32.mrf.mxu0 }
 0x1d4   : > { %1929 = vmatmul.f32.gmra.mxu1 %v1604_v51  ;;  %8632 = vmatmul.msk.f32.gmra.mxu0 %vm1427_vm0, %v8600_v5  ;;  %v8478_v5 = vld [vmem:[%s10827_s29 + $0xe1] sm:$0xff] }
 0x1d5   : > { %v1543_v51 = vsel %vm1427_vm0, %v8478_v5, %v9258_v41  ;;  %v8480_v41 = vld [vmem:[%s10827_s29 + $0xf9] sm:$0xff] }
 0x1d6   : > { %v1575_v24 = vsel %vm1460_vm2, %v1543_v51, %v9338_v39  ;;  %v9423_v39 = vunpack.i.h.bf16 %v9421_v29 }
 0x1d7   : > { %v1607_v43 = vsel %vm1493_vm1, %v1575_v24, %v9418_v0  ;;  %v1889_v0 = vadd.f32 %v1888_v47, %v1776_v46 }
 0x1d8   : > { %v1891_v7 = vpop.f32.mrf.mxu1 }
 0x1d9   : > { %v11879_v60 = vpop.f32.mrf.mxu0 }
 0x1dc   : > { %1932 = vmatmul.f32.gmra.mxu1 %v1605_v52  ;;  %8633 = vmatmul.msk.f32.gmra.mxu0 %vm1427_vm0, %v8601_v4  ;;  %v9262_v4 = vunpack.i.l.bf16 %v11601_v55  ;;  %v9422_v52 = vunpack.i.l.bf16 %v9421_v29  ;;  %v9426_v29 = vpop.permute.xlu0 %9425 }
 0x1de   : > { %v1544_v53 = vsel %vm1427_vm0, %v8479_v11, %v9262_v4  ;;  %v9347_v11 = vunpack.i.l.bf16 %v11642_v21 }
 0x1df   : > { %v1576_v20 = vsel %vm1460_vm2, %v1544_v53, %v9342_v30  ;;  %v8481_v30 = vld [vmem:[%s10827_s29 + $0x109] sm:$0xff]  ;;  %v9427_v53 = vunpack.i.l.bf16 %v9426_v29 }
 0x1e0   : > { %v1608_v14 = vsel %vm1493_vm1, %v1576_v20, %v9422_v52  ;;  %v1779_v52 = vadd.f32 %v11917_v45, %v11719_v54 }
 0x1e1   : > { %v11889_v13 = vpop.f32.mrf.mxu0 }
 0x1e2   : > { %v1892_v20 = vadd.f32 %v1891_v7, %v1779_v52  ;;  %v9352_v52 = vunpack.i.l.bf16 %v11706_v22 }
 0x1e4   : > { %1935 = vmatmul.f32.gmra.mxu1 %v1606_v33  ;;  %8634 = vmatmul.msk.f32.gmra.mxu0 %vm1427_vm0, %v8602_v36  ;;  %v9263_v36 = vunpack.i.h.bf16 %v11601_v55  ;;  %v9343_v33 = vunpack.i.h.bf16 %v11700_v28 }
 0x1e6   : > { %v1545_v24 = vsel %vm1427_vm0, %v8480_v41, %v9263_v36 }
 0x1e7   : > { %v1577_v28 = vsel %vm1460_vm2, %v1545_v24, %v9343_v33  ;;  %v9268_v33 = vunpack.i.h.bf16 %v11599_v49  ;;  %v9348_v49 = vunpack.i.h.bf16 %v11642_v21  ;;  %v9428_v24 = vunpack.i.h.bf16 %v9426_v29  ;;  %v11999_v29 = vpop.permute.xlu1 %9430 }
 0x1e8   : > { %v1609_v47 = vsel %vm1493_vm1, %v1577_v28, %v9423_v39 }
 0x1e9   : > { %v11900_v32 = vpop.f32.mrf.mxu0 }
 0x1ec   : > { %1938 = vmatmul.f32.gmra.mxu1 %v1607_v43  ;;  %8635 = vmatmul.msk.f32.gmra.mxu0 %vm1427_vm0, %v8603_v2  ;;  %v10716_v2 = vmov 0.0   ;;  %v8605_v43 = vld [vmem:[%s10827_s29 + $0xf2] sm:$0xff] }
 0x1ed   : > { %2741 = vst.msk [vmem:[#allocation2 + $0x18] sm:$0xff] %vm1460_vm2, %v10716_v2 }
 0x1ee   : > { %2742 = vst.msk [vmem:[#allocation2 + $0x20] sm:$0xff] %vm1460_vm2, %v10716_v2 }
 0x1ef   : > { %2737 = vst.msk [vmem:[#allocation2] sm:$0xff] %vm1460_vm2, %v10716_v2 }
 0x1f0   : > { %2738 = vst.msk [vmem:[#allocation2 + $0x8] sm:$0xff] %vm1460_vm2, %v10716_v2 }
 0x1f1   : > { %v11910_v3 = vpop.f32.mrf.mxu0  ;;  %v11927_v5 = vpop.f32.mrf.mxu1  ;;  %2744 = vst.msk [vmem:[#allocation2 + $0x30] sm:$0xff] %vm1460_vm2, %v10716_v2 }
 0x1f2   : > { %2745 = vst.msk [vmem:[#allocation2 + $0x38] sm:$0xff] %vm1460_vm2, %v10716_v2 }
 0x1f3   : > { %2747 = vst.msk [vmem:[#allocation2 + $0x48] sm:$0xff] %vm1460_vm2, %v10716_v2 }
 0x1f4   : > { %1941 = vmatmul.f32.gmra.mxu1 %v1608_v14  ;;  %8636 = vmatmul.msk.f32.gmra.mxu0 %vm1427_vm0, %v8604_v26  ;;  %v1546_v26 = vsel %vm1427_vm0, %v8481_v30, %v9267_v63  ;;  %2748 = vst.msk [vmem:[#allocation2 + $0x50] sm:$0xff] %vm1460_vm2, %v10716_v2  ;;  %v9272_v30 = vunpack.i.l.bf16 %v11480_v6 }
 0x1f5   : > { %2750 = vst.msk [vmem:[#allocation2 + $0x60] sm:$0xff] %vm1460_vm2, %v10716_v2  ;;  %v1578_v46 = vsel %vm1460_vm2, %v1546_v26, %v9347_v11  ;;  %v8483_v26 = vld [vmem:[%s10827_s29 + $0x121] sm:$0xff] }
 0x1f6   : > { %2751 = vst.msk [vmem:[#allocation2 + $0x68] sm:$0xff] %vm1460_vm2, %v10716_v2  ;;  %v1610_v7 = vsel %vm1493_vm1, %v1578_v46, %v9427_v53 }
 0x1f7   : > { %2753 = vst.msk [vmem:[#allocation2 + $0x78] sm:$0xff] %vm1460_vm2, %v10716_v2 }
 0x1f8   : > { %2754 = vst.msk [vmem:[#allocation2 + $0x80] sm:$0xff] %vm1460_vm2, %v10716_v2 }
 0x1f9   : > { %v2001_v51 = vpop.f32.mrf.mxu0  ;;  %v11959_v14 = vpop.f32.mrf.mxu1  ;;  %2756 = vst.msk [vmem:[#allocation2 + $0x90] sm:$0xff] %vm1460_vm2, %v10716_v2 }
 0x1fa   : > { %v11933_v55 = vadd.f32 %v2001_v51, %v1889_v0  ;;  %v8482_v0 = vld [vmem:[%s10827_s29 + $0x111] sm:$0xff]  ;;  %2757 = vst.msk [vmem:[#allocation2 + $0x98] sm:$0xff] %vm1460_vm2, %v10716_v2 }
 0x1fb   : > { %2759 = vst.msk [vmem:[#allocation2 + $0xa8] sm:$0xff] %vm1460_vm2, %v10716_v2 }
 0x1fc   : > { %v8653_v4 = vmul.f32 -1.442695, %v11933_v55  ;;  %1944 = vmatmul.f32.gmra.mxu1 %v1609_v47  ;;  %8637 = vmatmul.msk.f32.gmra.mxu0 %vm1427_vm0, %v8605_v43  ;;  %v1547_v43 = vsel %vm1427_vm0, %v8482_v0, %v9268_v33  ;;  %2760 = vst.msk [vmem:[#allocation2 + $0xb0] sm:$0xff] %vm1460_vm2, %v10716_v2 }
 0x1fd   : > { %2762 = vst.msk [vmem:[#allocation2 + $0xc0] sm:$0xff] %vm1460_vm2, %v10716_v2  ;;  %v1579_v21 = vsel %vm1460_vm2, %v1547_v43, %v9348_v49  ;;  %v1782_v49 = vadd.f32 %v11917_v45, %v11732_v16  ;;  %v9353_v16 = vunpack.i.h.bf16 %v11706_v22 }
 0x1fe   : > { %10227 = vpow2.f32 %v8653_v4  ;;  %2763 = vst.msk [vmem:[#allocation2 + $0xc8] sm:$0xff] %vm1460_vm2, %v10716_v2  ;;  %v1611_v63 = vsel %vm1493_vm1, %v1579_v21, %v9428_v24  ;;  %v8610_v24 = vld [vmem:[%s10827_s29 + $0x12a] sm:$0xff]  ;;  %v9273_v21 = vunpack.i.h.bf16 %v11480_v6 }
 0x1ff   : > { %2765 = vst.msk [vmem:[#allocation2 + $0xd8] sm:$0xff] %vm1460_vm2, %v10716_v2  ;;  %8642 = vmatmul.msk.f32.vlgmr.msra.gmra.mxu2 %vm1427_vm0, %v8610_v24  ;;  %v8611_v24 = vld [vmem:[%s10827_s29 + $0x13a] sm:$0xff] }
 0x200   : > { %2766 = vst.msk [vmem:[#allocation2 + $0xe0] sm:$0xff] %vm1460_vm2, %v10716_v2 }
 0x201   : > { %v2004_v54 = vpop.f32.mrf.mxu0  ;;  %v11996_v28 = vpop.f32.mrf.mxu1  ;;  %2768 = vst.msk [vmem:[#allocation2 + $0xf0] sm:$0xff] %vm1460_vm2, %v10716_v2 }
 0x202   : > { %v11965_v36 = vadd.f32 %v2004_v54, %v1892_v20  ;;  %2769 = vst.msk [vmem:[#allocation2 + $0xf8] sm:$0xff] %vm1460_vm2, %v10716_v2  ;;  %v9432_v20 = vunpack.i.l.bf16 %v11999_v29  ;;  %v8606_v54 = vld [vmem:[%s10827_s29 + $0xfa] sm:$0xff] }
 0x203   : > { %2771 = vst.msk [vmem:[#allocation2 + $0x108] sm:$0xff] %vm1460_vm2, %v10716_v2 }
 0x204   : > { %v10228_v41 = vpop.eup %10227  ;;  %v8654_v39 = vmul.f32 -1.442695, %v11965_v36  ;;  %1947 = vmatmul.f32.gmra.mxu1 %v1610_v7  ;;  %2772 = vst.msk [vmem:[#allocation2 + $0x110] sm:$0xff] %vm1460_vm2, %v10716_v2  ;;  %8638 = vmatmul.msk.f32.gmra.mxu0 %vm1427_vm0, %v8606_v54  ;;  %v1548_v7 = vsel %vm1427_vm0, %v8483_v26, %v9272_v30  ;;  %v1895_v30 = vadd.f32 %v11927_v5, %v1782_v49 }
 0x205   : > { %v11976_v51 = vadd.f32 1.0, %v10228_v41  ;;  %2774 = vst.msk [vmem:[#allocation2 + $0x120] sm:$0xff] %vm1460_vm2, %v10716_v2  ;;  %v1580_v0 = vsel %vm1460_vm2, %v1548_v7, %v9352_v52 }
 0x206   : > { %10229 = vpow2.f32 %v8654_v39  ;;  %2775 = vst.msk [vmem:[#allocation2 + $0x128] sm:$0xff] %vm1460_vm2, %v10716_v2  ;;  %v1612_v43 = vsel %vm1493_vm1, %v1580_v0, %v9432_v20  ;;  %v9433_v20 = vunpack.i.h.bf16 %v11999_v29 }
 0x207   : > { %10231 = vrcp.f32 %v11976_v51  ;;  %v2236_v33 = vand.u32 2147483648, %v11976_v51  ;;  %v2234_v39 = vand.u32 2147483647, %v11976_v51  ;;  %2777 = vst.msk [vmem:[#allocation2 + $0x138] sm:$0xff] %vm1460_vm2, %v10716_v2  ;;  %vm2230_vm4 = vweird.f32 %v11976_v51  ;;  %8643 = vmatmul.msk.f32.gmra.mxu2 %vm1427_vm0, %v8611_v24 }
 0x208   : > { %2778 = vst.msk [vmem:[#allocation2 + $0x140] sm:$0xff] %vm1460_vm2, %v10716_v2 }
 0x209   : > { %v2237_v52 = vor.u32 1.1754944e-38, %v2236_v33  ;;  %2780 = vst.msk [vmem:[#allocation2 + $0x150] sm:$0xff] %vm1460_vm2, %v10716_v2  ;;  %v12045_v6 = vpop.f32.mrf.mxu1  ;;  %vm2235_vm6 = vcmp.eq.f32.partialorder %v2234_v39, 8.507059e+37  ;;  %v1785_v39 = vadd.f32 %v11917_v45, %v11745_v17 }
 0x20a   : > { %2781 = vst.msk [vmem:[#allocation2 + $0x158] sm:$0xff] %vm1460_vm2, %v10716_v2 }
 0x20b   : > { %2783 = vst.msk [vmem:[#allocation2 + $0x168] sm:$0xff] %vm1460_vm2, %v10716_v2  ;;  %v1898_v17 = vadd.f32 %v11959_v14, %v1785_v39  ;;  %v9278_v39 = vunpack.i.h.bf16 %v11631_v18 }
 0x20c   : > { %v10230_v47 = vpop.eup %10229  ;;  %1950 = vmatmul.f32.gmra.mxu1 %v1611_v63  ;;  %2784 = vst.msk [vmem:[#allocation2 + $0x170] sm:$0xff] %vm1460_vm2, %v10716_v2 }
 0x20d   : > { %v10232_v4 = vpop.eup %10231  ;;  %v12006_v11 = vadd.f32 1.0, %v10230_v47  ;;  %2786 = vst.msk [vmem:[#allocation2 + $0x180] sm:$0xff] %vm1460_vm2, %v10716_v2 }
 0x20e   : > { %v2226_v53 = vmul.f32 %v10232_v4, %v11976_v51  ;;  %vm2231_vm3 = vweird.f32 %v10232_v4  ;;  %v2007_v51 = vpop.f32.mrf.mxu0  ;;  %2787 = vst.msk [vmem:[#allocation2 + $0x188] sm:$0xff] %vm1460_vm2, %v10716_v2 }
 0x20f   : > { %10233 = vrcp.f32 %v12006_v11  ;;  %vm2232_vm5 = vmor %vm2230_vm4, %vm2231_vm3  ;;  %v12054_v54 = vadd.f32 %v2007_v51, %v1895_v30  ;;  %v2251_v29 = vand.u32 2147483648, %v12006_v11  ;;  %v2249_v0 = vand.u32 2147483647, %v12006_v11  ;;  %2789 = vst.msk [vmem:[#allocation2 + $0x198] sm:$0xff] %vm1460_vm2, %v10716_v2 }
 0x210   : > { %v2227_v46 = vsub.f32 1.0, %v2226_v53  ;;  %v8484_v53 = vld [vmem:[%s10827_s29 + $0x129] sm:$0xff]  ;;  %vm2245_vm8 = vweird.f32 %v12006_v11  ;;  %2790 = vst.msk [vmem:[#allocation2 + $0x1a0] sm:$0xff] %vm1460_vm2, %v10716_v2  ;;  %v9357_v51 = vunpack.i.l.bf16 %v11715_v40 }
 0x211   : > { %v1549_v7 = vsel %vm1427_vm0, %v8484_v53, %v9273_v21  ;;  %v8655_v49 = vmul.f32 -1.442695, %v12054_v54  ;;  %v12076_v21 = vpop.permute.xlu2 %9435  ;;  %v2252_v30 = vor.u32 1.1754944e-38, %v2251_v29  ;;  %v12087_v14 = vpop.f32.mrf.mxu1  ;;  %2792 = vst.msk [vmem:[#allocation3] sm:$0xff] %vm1427_vm0, %v10716_v2  ;;  %vm2250_vm10 = vcmp.eq.f32.partialorder %v2249_v0, 8.507059e+37 }
 0x212   : > { %v2228_v41 = vmul.f32 %v10232_v4, %v2227_v46  ;;  %v8607_v46 = vld [vmem:[%s10827_s29 + $0x10a] sm:$0xff]  ;;  %2793 = vst.msk [vmem:[#allocation3 + $0x8] sm:$0xff] %vm1427_vm0, %v10716_v2 }
 0x213   : > { %8639 = vmatmul.msk.f32.gmra.mxu0 %vm1427_vm0, %v8607_v46  ;;  %10235 = vpow2.f32 %v8655_v49  ;;  %2796 = vst.msk [vmem:[#allocation3 + $0x18] sm:$0xff] %vm1427_vm0, %v10716_v2  ;;  %v9358_v49 = vunpack.i.h.bf16 %v11715_v40 }
 0x214   : > { %v2229_v63 = vadd.f32 %v10232_v4, %v2228_v41  ;;  %1953 = vmatmul.f32.gmra.mxu1 %v1612_v43  ;;  %v1581_v41 = vsel %vm1460_vm2, %v1549_v7, %v9353_v16  ;;  %v9277_v16 = vunpack.i.l.bf16 %v11631_v18  ;;  %2797 = vst.msk [vmem:[#allocation3 + $0x20] sm:$0xff] %vm1427_vm0, %v10716_v2  ;;  %v8612_v7 = vld [vmem:[%s10827_s29 + $0x142] sm:$0xff] }
 0x215   : > { %v10234_v47 = vpop.eup %10233  ;;  %v1613_v43 = vsel %vm1493_vm1, %v1581_v41, %v9433_v20  ;;  %2799 = vst.msk [vmem:[#allocation3 + $0x30] sm:$0xff] %vm1427_vm0, %v10716_v2  ;;  %8644 = vmatmul.msk.f32.gmra.mxu2 %vm1427_vm0, %v8612_v7  ;;  %v8609_v18 = vld [vmem:[%s10827_s29 + $0x122] sm:$0xff] }
 0x216   : > { %v2233_v26 = vsel %vm2232_vm5, %v10232_v4, %v2229_v63  ;;  %v2241_v22 = vmul.f32 %v10234_v47, %v12006_v11  ;;  %vm2246_vm7 = vweird.f32 %v10234_v47  ;;  %2800 = vst.msk [vmem:[#allocation3 + $0x38] sm:$0xff] %vm1427_vm0, %v10716_v2 }
 0x217   : > { %v2238_v5 = vsel %vm2235_vm6, %v2237_v52, %v2233_v26  ;;  %vm2247_vm9 = vmor %vm2245_vm8, %vm2246_vm7  ;;  %v2010_v52 = vpop.f32.mrf.mxu0  ;;  %v8485_v26 = vld [vmem:[%s10827_s29 + $0x139] sm:$0xff]  ;;  %2802 = vst.msk [vmem:[#allocation3 + $0x48] sm:$0xff] %vm1427_vm0, %v10716_v2 }
 0x218   : > { %v2705_v33 = vmul.f32 %v2238_v5, %v11933_v55  ;;  %v2242_v4 = vsub.f32 1.0, %v2241_v22  ;;  %v12092_v53 = vadd.f32 %v2010_v52, %v1898_v17  ;;  %v9437_v22 = vunpack.i.l.bf16 %v12076_v21  ;;  %v8608_v5 = vld [vmem:[%s10827_s29 + $0x112] sm:$0xff]  ;;  %2803 = vst.msk [vmem:[#allocation3 + $0x50] sm:$0xff] %vm1427_vm0, %v10716_v2 }
 0x219   : > { %v10236_v41 = vpop.eup %10235  ;;  %2805 = vst.msk [vmem:[#allocation3 + $0x60] sm:$0xff] %vm1427_vm0, %v10716_v2 }
 0x21a   : > { %2848 = vst.msk [vmem:[#allocation2 + $0x19] sm:$0xff] %vm1460_vm2, %v2705_v33  ;;  %v2243_v55 = vmul.f32 %v10234_v47, %v2242_v4  ;;  %2912 = vrot.lane.b32.xlu0 %v2705_v33, %s10714_s11  ;;  %v1550_v33 = vsel %vm1427_vm0, %v8485_v26, %v9277_v16  ;;  %v1788_v4 = vadd.f32 %v11917_v45, %v11753_v42 }
 0x21b   : > { %8640 = vmatmul.msk.f32.gmra.mxu0 %vm1427_vm0, %v8608_v5  ;;  %2806 = vst.msk [vmem:[#allocation3 + $0x68] sm:$0xff] %vm1427_vm0, %v10716_v2 }
 0x21c   : > { %v2244_v63 = vadd.f32 %v10234_v47, %v2243_v55  ;;  %1956 = vmatmul.f32.gmra.mxu1 %v1613_v43  ;;  %v1901_v42 = vadd.f32 %v11996_v28, %v1788_v4  ;;  %v12127_v55 = vpop.f32.mrf.mxu1  ;;  %v8486_v28 = vld [vmem:[%s10827_s29 + $0x141] sm:$0xff]  ;;  %v9438_v43 = vunpack.i.h.bf16 %v12076_v21  ;;  %2808 = vst.msk [vmem:[#allocation3 + $0x78] sm:$0xff] %vm1427_vm0, %v10716_v2 }
 0x21d   : > { %2809 = vst.msk [vmem:[#allocation3 + $0x80] sm:$0xff] %vm1427_vm0, %v10716_v2  ;;  %v1551_v21 = vsel %vm1427_vm0, %v8486_v28, %v9278_v39  ;;  %v8488_v28 = vld [vmem:[%s10827_s29 + $0x159] sm:$0xff] }
 0x21e   : > { %v2248_v11 = vsel %vm2247_vm9, %v10234_v47, %v2244_v63  ;;  %v8656_v47 = vmul.f32 -1.442695, %v12092_v53  ;;  %v12141_v63 = vadd.f32 1.0, %v10236_v41  ;;  %2811 = vst.msk [vmem:[#allocation3 + $0x90] sm:$0xff] %vm1427_vm0, %v10716_v2  ;;  %v1583_v52 = vsel %vm1460_vm2, %v1551_v21, %v9358_v49 }
 0x21f   : > { %v2253_v20 = vsel %vm2250_vm10, %v2252_v30, %v2248_v11  ;;  %v2013_v0 = vpop.f32.mrf.mxu0  ;;  %v1791_v30 = vadd.f32 %v11917_v45, %v11763_v27  ;;  %2812 = vst.msk [vmem:[#allocation3 + $0x98] sm:$0xff] %vm1427_vm0, %v10716_v2  ;;  %v8613_v11 = vld [vmem:[%s10827_s29 + $0x152] sm:$0xff]  ;;  %v1615_v26 = vsel %vm1493_vm1, %v1583_v52, %v9438_v43 }
 0x220   : > { %v12102_v46 = vmul.f32 %v2253_v20, %v11965_v36  ;;  %10237 = vpow2.f32 %v8656_v47  ;;  %v1582_v36 = vsel %vm1460_vm2, %v1550_v33, %v9357_v51  ;;  %v12132_v24 = vadd.f32 %v2013_v0, %v1901_v42  ;;  %2814 = vst.msk [vmem:[#allocation3 + $0xa8] sm:$0xff] %vm1427_vm0, %v10716_v2  ;;  %8645 = vmatmul.msk.f32.gmra.mxu2 %vm1427_vm0, %v8613_v11  ;;  %v8487_v20 = vld [vmem:[%s10827_s29 + $0x151] sm:$0xff] }
 0x221   : > { %v1614_v29 = vsel %vm1493_vm1, %v1582_v36, %v9437_v22  ;;  %v9282_v51 = vunpack.i.l.bf16 %v11629_v15  ;;  %v12160_v22 = vpop.permute.xlu0 %9440  ;;  %v1904_v27 = vadd.f32 %v12045_v6, %v1791_v30  ;;  %2815 = vst.msk [vmem:[#allocation3 + $0xb0] sm:$0xff] %vm1427_vm0, %v10716_v2  ;;  %v9362_v33 = vunpack.i.l.bf16 %v11656_v50 }
 0x222   : > { %2914 = vrot.lane.b32.xlu1 %v12102_v46, %s10714_s11  ;;  %v8657_v40 = vmul.f32 -1.442695, %v12132_v24  ;;  %2817 = vst.msk [vmem:[#allocation3 + $0xc0] sm:$0xff] %vm1427_vm0, %v10716_v2  ;;  %v9442_v4 = vunpack.i.l.bf16 %v12160_v22  ;;  %v9283_v42 = vunpack.i.h.bf16 %v11629_v15  ;;  %v1794_v0 = vadd.f32 %v11917_v45, %v11773_v58  ;;  %v8614_v15 = vld [vmem:[%s10827_s29 + $0x15a] sm:$0xff] }
 0x223   : > { %8641 = vmatmul.msk.f32.gmra.mxu0 %vm1427_vm0, %v8609_v18  ;;  %2818 = vst.msk [vmem:[#allocation3 + $0xc8] sm:$0xff] %vm1427_vm0, %v10716_v2  ;;  %v1552_v36 = vsel %vm1427_vm0, %v8487_v20, %v9282_v51  ;;  %v9288_v51 = vunpack.i.h.bf16 %v11520_v1  ;;  %v9287_v11 = vunpack.i.l.bf16 %v11520_v1  ;;  %v9292_v20 = vunpack.i.l.bf16 %v11644_v61 }
 0x224   : > { %1959 = vmatmul.f32.gmra.mxu1 %v1614_v29  ;;  %10239 = vpow2.f32 %v8657_v40  ;;  %v12171_v5 = vpop.f32.mrf.mxu1  ;;  %2820 = vst.msk [vmem:[#allocation3 + $0xd8] sm:$0xff] %vm1427_vm0, %v10716_v2  ;;  %v1584_v49 = vsel %vm1460_vm2, %v1552_v36, %v9362_v33  ;;  %v1907_v58 = vadd.f32 %v12087_v14, %v1794_v0  ;;  %v1553_v52 = vsel %vm1427_vm0, %v8488_v28, %v9283_v42  ;;  %v9446_v33 = vpop.permute.xlu1 %9445  ;;  %v8615_v0 = vld [vmem:[%s10827_s29 + $0x16a] sm:$0xff] }
 0x225   : > { %10241 = vrcp.f32 %v12141_v63  ;;  %2821 = vst.msk [vmem:[#allocation3 + $0xe0] sm:$0xff] %vm1427_vm0, %v10716_v2  ;;  %v1616_v18 = vsel %vm1493_vm1, %v1584_v49, %v9442_v4  ;;  %v9368_v36 = vunpack.i.h.bf16 %v11717_v35  ;;  %v8489_v49 = vld [vmem:[%s10827_s29 + $0x169] sm:$0xff]  ;;  %v8490_v28 = vld [vmem:[%s10827_s29 + $0x171] sm:$0xff]  ;;  %vm2260_vm12 = vweird.f32 %v12141_v63 }
 0x226   : > { %v10238_v17 = vpop.eup %10237  ;;  %2823 = vst.msk [vmem:[#allocation3 + $0xf0] sm:$0xff] %vm1427_vm0, %v10716_v2 }
 0x227   : > { %v12147_v16 = vadd.f32 1.0, %v10238_v17  ;;  %v2016_v47 = vpop.f32.mrf.mxu0  ;;  %2824 = vst.msk [vmem:[#allocation3 + $0xf8] sm:$0xff] %vm1427_vm0, %v10716_v2  ;;  %v9363_v17 = vunpack.i.h.bf16 %v11656_v50 }
 0x228   : > { %v12176_v6 = vadd.f32 %v2016_v47, %v1904_v27  ;;  %2826 = vst.msk [vmem:[#allocation3 + $0x108] sm:$0xff] %vm1427_vm0, %v10716_v2  ;;  %8646 = vmatmul.msk.f32.gmra.mxu2 %vm1427_vm0, %v8614_v15  ;;  %v9372_v47 = vunpack.i.l.bf16 %v11735_v44  ;;  %v1797_v15 = vadd.f32 %v11917_v45, %v11785_v31 }
 0x229   : > { %10243 = vrcp.f32 %v12147_v16  ;;  %2827 = vst.msk [vmem:[#allocation3 + $0x110] sm:$0xff] %vm1427_vm0, %v10716_v2  ;;  %v1585_v1 = vsel %vm1460_vm2, %v1553_v52, %v9363_v17  ;;  %v1554_v52 = vsel %vm1427_vm0, %v8489_v49, %v9287_v11  ;;  %vm2275_vm15 = vweird.f32 %v12147_v16 }
 0x22a   : > { %v10240_v7 = vpop.eup %10239  ;;  %v8658_v29 = vmul.f32 -1.442695, %v12176_v6  ;;  %2829 = vst.msk [vmem:[#allocation3 + $0x120] sm:$0xff] %vm1427_vm0, %v10716_v2  ;;  %v1910_v31 = vadd.f32 %v12127_v55, %v1797_v15 }
 0x22b   : > { %v12188_v41 = vadd.f32 1.0, %v10240_v7  ;;  %v12190_v39 = vpop.eup %10241  ;;  %2830 = vst.msk [vmem:[#allocation3 + $0x128] sm:$0xff] %vm1427_vm0, %v10716_v2  ;;  %v9367_v7 = vunpack.i.l.bf16 %v11717_v35  ;;  %v8491_v35 = vld [vmem:[%s10827_s29 + $0x181] sm:$0xff] }
 0x22c   : > { %1962 = vmatmul.f32.gmra.mxu1 %v1615_v26  ;;  %10245 = vpow2.f32 %v8658_v29  ;;  %v2256_v40 = vmul.f32 %v12190_v39, %v12141_v63  ;;  %v12214_v21 = vpop.f32.mrf.mxu1  ;;  %v9443_v26 = vunpack.i.h.bf16 %v12160_v22  ;;  %2832 = vst.msk [vmem:[#allocation3 + $0x138] sm:$0xff] %vm1427_vm0, %v10716_v2  ;;  %v1556_v55 = vsel %vm1427_vm0, %v8491_v35, %v9292_v20 }
 0x22d   : > { %10247 = vrcp.f32 %v12188_v41  ;;  %2833 = vst.msk [vmem:[#allocation3 + $0x140] sm:$0xff] %vm1427_vm0, %v10716_v2  ;;  %v12276_v49 = vsel %vm1460_vm2, %v1556_v55, %v9372_v47  ;;  %v2264_v47 = vand.u32 2147483647, %v12141_v63  ;;  %vm2261_vm13 = vweird.f32 %v12190_v39 }
 0x22e   : > { %v2257_v29 = vsub.f32 1.0, %v2256_v40  ;;  %2835 = vst.msk [vmem:[#allocation3 + $0x150] sm:$0xff] %vm1427_vm0, %v10716_v2  ;;  %v1617_v40 = vsel %vm1493_vm1, %v1585_v1, %v9443_v26  ;;  %v1586_v1 = vsel %vm1460_vm2, %v1554_v52, %v9367_v7  ;;  %v2281_v52 = vand.u32 2147483648, %v12147_v16  ;;  %vm12320_vm3 = vmor %vm2260_vm12, %vm2261_vm13 }
 0x22f   : > { %v12198_v43 = vpop.eup %10243  ;;  %v2019_v30 = vpop.f32.mrf.mxu0  ;;  %2836 = vst.msk [vmem:[#allocation3 + $0x158] sm:$0xff] %vm1427_vm0, %v10716_v2  ;;  %vm2265_vm6 = vcmp.eq.f32.partialorder %v2264_v47, 8.507059e+37  ;;  %vm2290_vm8 = vweird.f32 %v12188_v41 }
 0x230   : > { %v2271_v50 = vmul.f32 %v12198_v43, %v12147_v16  ;;  %v12221_v14 = vadd.f32 %v2019_v30, %v1907_v58  ;;  %v9448_v58 = vunpack.i.h.bf16 %v9446_v33  ;;  %v9447_v30 = vunpack.i.l.bf16 %v9446_v33  ;;  %2838 = vst.msk [vmem:[#allocation3 + $0x168] sm:$0xff] %vm1427_vm0, %v10716_v2  ;;  %8647 = vmatmul.msk.f32.gmra.mxu2 %vm1427_vm0, %v8615_v0 }
 0x231   : > { %2839 = vst.msk [vmem:[#allocation3 + $0x170] sm:$0xff] %vm1427_vm0, %v10716_v2  ;;  %vm2276_vm14 = vweird.f32 %v12198_v43 }
 0x232   : > { %v10246_v27 = vpop.eup %10245  ;;  %v8659_v4 = vmul.f32 -1.442695, %v12221_v14  ;;  %2841 = vst.msk [vmem:[#allocation3 + $0x180] sm:$0xff] %vm1427_vm0, %v10716_v2  ;;  %v1618_v20 = vsel %vm1493_vm1, %v1586_v1, %v9447_v30  ;;  %v1803_v1 = vadd.f32 %v11917_v45, %v11809_v57  ;;  %vm12339_vm4 = vmor %vm2275_vm15, %vm2276_vm14 }
 0x233   : > { %v12234_v22 = vpop.eup %10247  ;;  %v12240_v42 = vadd.f32 1.0, %v10246_v27  ;;  %v2258_v27 = vmul.f32 %v12190_v39, %v2257_v29  ;;  %v1800_v29 = vadd.f32 %v11917_v45, %v11799_v12  ;;  %2842 = vst.msk [vmem:[#allocation3 + $0x188] sm:$0xff] %vm1427_vm0, %v10716_v2  ;;  %v2266_v12 = vand.u32 2147483648, %v12141_v63 }
 0x234   : > { %1965 = vmatmul.f32.gmra.mxu1 %v1616_v18  ;;  %v2272_v18 = vsub.f32 1.0, %v2271_v50  ;;  %v2286_v17 = vmul.f32 %v12234_v22, %v12188_v41  ;;  %10249 = vpow2.f32 %v8659_v4  ;;  %v1555_v50 = vsel %vm1427_vm0, %v8490_v28, %v9288_v51  ;;  %v12265_v4 = vpop.f32.mrf.mxu1  ;;  %2844 = vst.msk [vmem:[#allocation3 + $0x198] sm:$0xff] %vm1427_vm0, %v10716_v2 }
 0x235   : > { %10251 = vrcp.f32 %v12240_v42  ;;  %v1587_v51 = vsel %vm1460_vm2, %v1555_v50, %v9368_v36  ;;  %2845 = vst.msk [vmem:[#allocation3 + $0x1a0] sm:$0xff] %vm1427_vm0, %v10716_v2  ;;  %vm2291_vm5 = vweird.f32 %v12234_v22  ;;  %v8617_v50 = vld [vmem:[%s10827_s29 + $0x182] sm:$0xff]  ;;  %vm2305_vm13 = vweird.f32 %v12240_v42 }
 0x236   : > { %v2287_v33 = vsub.f32 1.0, %v2286_v17  ;;  %v2273_v11 = vmul.f32 %v12198_v43, %v2272_v18  ;;  %v12284_v7 = vsel %vm1493_vm1, %v1587_v51, %v9448_v58  ;;  %v2259_v18 = vadd.f32 %v12190_v39, %v2258_v27  ;;  %v8616_v58 = vld [vmem:[%s10827_s29 + $0x172] sm:$0xff]  ;;  %2743 = vst.msk [vmem:[#allocation2 + $0x28] sm:$0x3] %vm2739_vm11, %v10716_v2  ;;  %vm12362_vm9 = vmor %vm2290_vm8, %vm2291_vm5 }
 0x237   : > { %v2022_v26 = vpop.f32.mrf.mxu0  ;;  %2849 = vst.msk [vmem:[#allocation2 + $0x21] sm:$0xff] %vm1460_vm2, %v12102_v46  ;;  %v2294_v46 = vand.u32 2147483647, %v12188_v41  ;;  %v2296_v27 = vand.u32 2147483648, %v12188_v41  ;;  %v2267_v51 = vor.u32 1.1754944e-38, %v2266_v12 }
 0x238   : > { %v12272_v0 = vadd.f32 %v2022_v26, %v1910_v31  ;;  %v2288_v17 = vmul.f32 %v12234_v22, %v2287_v33  ;;  %v2274_v30 = vadd.f32 %v12198_v43, %v2273_v11  ;;  %v2279_v31 = vand.u32 2147483647, %v12147_v16  ;;  %2740 = vst.msk [vmem:[#allocation2 + $0x10] sm:$0x3] %vm2739_vm11, %v10716_v2  ;;  %8648 = vmatmul.msk.f32.gmra.mxu2 %vm1427_vm0, %v8616_v58 }
 0x239   : > { %v1913_v33 = vadd.f32 %v12171_v5, %v1800_v29  ;;  %2746 = vst.msk [vmem:[#allocation2 + $0x40] sm:$0x3] %vm2739_vm11, %v10716_v2  ;;  %v2263_v63 = vsel %vm12320_vm3, %v12190_v39, %v2259_v18  ;;  %vm12366_vm10 = vcmp.eq.f32.partialorder %v2294_v46, 8.507059e+37  ;;  %v2297_v47 = vor.u32 1.1754944e-38, %v2296_v27  ;;  %v12382_v46 = vpop.permute.xlu2 %9450 }
 0x23a   : > { %v10250_v28 = vpop.eup %10249  ;;  %v8660_v36 = vmul.f32 -1.442695, %v12272_v0  ;;  %v2289_v55 = vadd.f32 %v12234_v22, %v2288_v17  ;;  %2749 = vst.msk [vmem:[#allocation2 + $0x58] sm:$0x3] %vm2739_vm11, %v10716_v2  ;;  %v2278_v39 = vsel %vm12339_vm4, %v12198_v43, %v2274_v30  ;;  %vm2280_vm7 = vcmp.eq.f32.partialorder %v2279_v31, 8.507059e+37  ;;  %v3073_v30 = vld [vmem:[#allocation2 + $0x1] sm:$0xff] }
 0x23b   : > { %v12292_v15 = vpop.eup %10251  ;;  %v12299_v35 = vadd.f32 1.0, %v10250_v28  ;;  %2752 = vst.msk [vmem:[#allocation2 + $0x70] sm:$0x3] %vm2739_vm11, %v10716_v2  ;;  %v2268_v12 = vsel %vm2265_vm6, %v2267_v51, %v2263_v63  ;;  %v3075_v31 = vld [vmem:[#allocation2 + $0x19] sm:$0xff] }
 0x23c   : > { %1968 = vmatmul.f32.gmra.mxu1 %v1617_v40  ;;  %v2301_v40 = vmul.f32 %v12292_v15, %v12240_v42  ;;  %10253 = vpow2.f32 %v8660_v36  ;;  %v12345_v57 = vpop.f32.mrf.mxu1  ;;  %2755 = vst.msk [vmem:[#allocation2 + $0x88] sm:$0x3] %vm2739_vm11, %v10716_v2  ;;  %v2293_v58 = vsel %vm12362_vm9, %v12234_v22, %v2289_v55  ;;  %vm2306_vm12 = vweird.f32 %v12292_v15 }
 0x23d   : > { %10255 = vrcp.f32 %v12299_v35  ;;  %2758 = vst.msk [vmem:[#allocation2 + $0xa0] sm:$0x3] %vm2739_vm11, %v10716_v2  ;;  %vm12407_vm14 = vmor %vm2305_vm13, %vm2306_vm12  ;;  %v2326_v43 = vand.u32 2147483648, %v12299_v35  ;;  %vm2320_vm4 = vweird.f32 %v12299_v35 }
 0x23e   : > { %v2302_v26 = vsub.f32 1.0, %v2301_v40  ;;  %v1916_v40 = vadd.f32 %v12214_v21, %v1803_v1  ;;  %2761 = vst.msk [vmem:[#allocation2 + $0xb8] sm:$0x3] %vm2739_vm11, %v10716_v2  ;;  %v3201_v22 = vld [vmem:[#allocation2 + $0x1a] sm:$0xff]  ;;  %v2311_v21 = vand.u32 2147483648, %v12240_v42 }
 0x23f   : > { %v2025_v11 = vpop.f32.mrf.mxu0  ;;  %v3076_v63 = vld [vmem:[#allocation2 + $0x21] sm:$0xff]  ;;  %2764 = vst.msk [vmem:[#allocation2 + $0xd0] sm:$0x3] %vm2739_vm11, %v10716_v2  ;;  %v3074_v1 = vld [vmem:[#allocation2 + $0x9] sm:$0xff] }
 0x240   : > { %v2303_v16 = vmul.f32 %v12292_v15, %v2302_v26  ;;  %v12353_v29 = vadd.f32 %v2025_v11, %v1913_v33  ;;  %v3202_v26 = vld [vmem:[#allocation2 + $0x22] sm:$0xff]  ;;  %v9459_v55 = vpack.i.bf16 %v3076_v63, %v3075_v31  ;;  %2767 = vst.msk [vmem:[#allocation2 + $0xe8] sm:$0x3] %vm2739_vm11, %v10716_v2  ;;  %v2309_v11 = vand.u32 2147483647, %v12240_v42  ;;  %8649 = vmatmul.msk.f32.gmra.mxu2 %vm1427_vm0, %v8617_v50 }
 0x241   : > { %v9469_v5 = vpack.i.bf16 %v3202_v26, %v3201_v22  ;;  %v9454_v51 = vpack.i.bf16 %v3074_v1, %v3073_v30  ;;  %2770 = vst.msk [vmem:[#allocation2 + $0x100] sm:$0x3] %vm2739_vm11, %v10716_v2  ;;  %v2324_v42 = vand.u32 2147483647, %v12299_v35  ;;  %v1806_v30 = vadd.f32 %v11917_v45, %v11819_v8  ;;  %v3138_v8 = vld [vmem:[#allocation2 + $0x20] sm:$0xff]  ;;  %v8618_v26 = vld [vmem:[%s10827_s29 + $0x18a] sm:$0xff] }
 0x242   : > { %v10254_v28 = vpop.eup %10253  ;;  %v8661_v18 = vmul.f32 -1.442695, %v12353_v29  ;;  %v2304_v27 = vadd.f32 %v12292_v15, %v2303_v16  ;;  %v9452_v16 = vunpack.i.l.bf16 %v12382_v46  ;;  %9460 = vrot.lane.b32.xlu0 %v9459_v55, %s10714_s11  ;;  %2773 = vst.msk [vmem:[#allocation2 + $0x118] sm:$0x3] %vm2739_vm11, %v10716_v2  ;;  %v2707_v31 = vmul.f32 %v2268_v12, %v12054_v54 }
 0x243   : > { %v12371_v41 = vpop.eup %10255  ;;  %9470 = vrot.lane.b32.xlu1 %v9469_v5, %s10714_s11  ;;  %9455 = vrot.lane.b32.xlu2 %v9454_v51, %s10714_s11  ;;  %2776 = vst.msk [vmem:[#allocation2 + $0x130] sm:$0x3] %vm2739_vm11, %v10716_v2  ;;  %vm2310_vm3 = vcmp.eq.f32.partialorder %v2309_v11, 8.507059e+37  ;;  %v2327_v12 = vor.u32 1.1754944e-38, %v2326_v43  ;;  %vm2325_vm6 = vcmp.eq.f32.partialorder %v2324_v42, 8.507059e+37  ;;  %v9293_v55 = vunpack.i.h.bf16 %v11644_v61 }
 0x244   : > { %1971 = vmatmul.f32.gmra.mxu1 %v1618_v20  ;;  %v2282_v20 = vor.u32 1.1754944e-38, %v2281_v52  ;;  %v12379_v52 = vadd.f32 1.0, %v10254_v28  ;;  %v2316_v33 = vmul.f32 %v12371_v41, %v12299_v35  ;;  %10257 = vpow2.f32 %v8661_v18  ;;  %2779 = vst.msk [vmem:[#allocation2 + $0x148] sm:$0x3] %vm2739_vm11, %v10716_v2 }
 0x245   : > { %v2308_v36 = vsel %vm12407_vm14, %v12292_v15, %v2304_v27  ;;  %vm2321_vm15 = vweird.f32 %v12371_v41  ;;  %v2312_v15 = vor.u32 1.1754944e-38, %v2311_v21  ;;  %2782 = vst.msk [vmem:[#allocation2 + $0x160] sm:$0x3] %vm2739_vm11, %v10716_v2  ;;  %v3137_v21 = vld [vmem:[#allocation2 + $0x18] sm:$0xff]  ;;  %v1620_v5 = vsel %vm1493_vm1, %v12276_v49, %v9452_v16  ;;  %v8492_v16 = vld [vmem:[%s10827_s29 + $0x189] sm:$0xff] }
 0x246   : > { %v2283_v17 = vsel %vm2280_vm7, %v2282_v20, %v2278_v39  ;;  %10259 = vrcp.f32 %v12379_v52  ;;  %v2317_v39 = vsub.f32 1.0, %v2316_v33  ;;  %v2298_v20 = vsel %vm12366_vm10, %v2297_v47, %v2293_v58  ;;  %vm2322_vm5 = vmor %vm2320_vm4, %vm2321_vm15  ;;  %2785 = vst.msk [vmem:[#allocation2 + $0x178] sm:$0x3] %vm2739_vm11, %v10716_v2 }
 0x247   : > { %v2028_v18 = vpop.f32.mrf.mxu0  ;;  %v12433_v50 = vmul.f32 %v2283_v17, %v12092_v53  ;;  %v2709_v54 = vmul.f32 %v2298_v20, %v12132_v24  ;;  %v2313_v53 = vsel %vm2310_vm3, %v2312_v15, %v2308_v36  ;;  %2788 = vst.msk [vmem:[#allocation2 + $0x190] sm:$0x3] %vm2739_vm11, %v10716_v2  ;;  %v9464_v1 = vpack.i.bf16 %v3138_v8, %v3137_v21 }
 0x248   : > { %v2318_v47 = vmul.f32 %v12371_v41, %v2317_v39  ;;  %v12425_v58 = vadd.f32 %v2028_v18, %v1916_v40  ;;  %2791 = vst.msk [vmem:[#allocation2 + $0x1a8] sm:$0x3] %vm2739_vm11, %v10716_v2  ;;  %v1919_v11 = vadd.f32 %v12265_v4, %v1806_v30  ;;  %8650 = vmatmul.msk.f32.gmra.mxu2 %vm1427_vm0, %v8618_v26  ;;  %v9373_v39 = vunpack.i.h.bf16 %v11735_v44 }
 0x249   : > { %2850 = vst.msk [vmem:[#allocation2 + $0x31] sm:$0xff] %vm1460_vm2, %v2707_v31  ;;  %v2341_v61 = vand.u32 2147483648, %v12379_v52  ;;  %v9453_v28 = vunpack.i.h.bf16 %v12382_v46  ;;  %vm2335_vm7 = vweird.f32 %v12379_v52  ;;  %v1557_v36 = vsel %vm1427_vm0, %v8492_v16, %v9293_v55  ;;  %v12532_v16 = vld [vmem:[%s18182_s2] ss:$0 sm:$0xff] }
 0x24a   : > { %v10258_v27 = vpop.eup %10257  ;;  %v2319_v40 = vadd.f32 %v12371_v41, %v2318_v47  ;;  %v8662_v33 = vmul.f32 -1.442695, %v12425_v58  ;;  %9465 = vrot.lane.b32.xlu0 %v9464_v1, %s10714_s11  ;;  %2851 = vst.msk [vmem:[#allocation2 + $0x39] sm:$0xff] %vm1460_vm2, %v12433_v50  ;;  %v1589_v15 = vsel %vm1460_vm2, %v1557_v36, %v9373_v39 }
 0x24b   : > { %v12447_v17 = vadd.f32 1.0, %v10258_v27  ;;  %2920 = vrot.lane.b32.xlu1 %v2709_v54, %s10714_s11  ;;  %2916 = vrot.lane.b32.xlu2 %v2707_v31, %s10714_s11  ;;  %2852 = vst.msk [vmem:[#allocation2 + $0x49] sm:$0xff] %vm1460_vm2, %v2709_v54  ;;  %v2342_v46 = vor.u32 1.1754944e-38, %v2341_v61  ;;  %v8619_v31 = vld [vmem:[%s10827_s29 + $0x19a] sm:$0xff] }
 0x24c   : > { %1974 = vmatmul.f32.gmra.mxu1 %v12284_v7  ;;  %v12415_v7 = vpop.f32.mrf.mxu1  ;;  %v12440_v22 = vpop.eup %10259  ;;  %v2323_v35 = vsel %vm2322_vm5, %v12371_v41, %v2319_v40  ;;  %10261 = vpow2.f32 %v8662_v33  ;;  %v12464_v41 = vmul.f32 %v2313_v53, %v12176_v6  ;;  %v1809_v40 = vadd.f32 %v11917_v45, %v11831_v48 }
 0x24d   : > { %v2331_v63 = vmul.f32 %v12440_v22, %v12379_v52  ;;  %v2328_v24 = vsel %vm2325_vm6, %v2327_v12, %v2323_v35  ;;  %10263 = vrcp.f32 %v12447_v17  ;;  %vm2336_vm11 = vweird.f32 %v12440_v22 }
 0x24e   : > { %v12471_v49 = vmul.f32 %v2328_v24, %v12221_v14  ;;  %v2339_v14 = vand.u32 2147483647, %v12379_v52  ;;  %2853 = vst.msk [vmem:[#allocation2 + $0x51] sm:$0xff] %vm1460_vm2, %v12464_v41  ;;  %vm2337_vm8 = vmor %vm2335_vm7, %vm2336_vm11  ;;  %v1621_v33 = vsel %vm1493_vm1, %v1589_v15, %v9453_v28  ;;  %v2354_v26 = vand.u32 2147483647, %v12447_v17 }
 0x24f   : > { %v2332_v51 = vsub.f32 1.0, %v2331_v63  ;;  %v2031_v4 = vpop.f32.mrf.mxu0  ;;  %v2356_v35 = vand.u32 2147483648, %v12447_v17  ;;  %vm2350_vm12 = vweird.f32 %v12447_v17 }
 0x250   : > { %v12485_v20 = vadd.f32 %v2031_v4, %v1919_v11  ;;  %2854 = vst.msk [vmem:[#allocation2 + $0x61] sm:$0xff] %vm1460_vm2, %v12471_v49  ;;  %vm2340_vm9 = vcmp.eq.f32.partialorder %v2339_v14, 8.507059e+37  ;;  %v3077_v12 = vld [vmem:[#allocation2 + $0x31] sm:$0xff]  ;;  %8651 = vmatmul.msk.f32.gmra.mxu2 %vm1427_vm0, %v8619_v31  ;;  %v8620_v4 = vld [vmem:[%s10827_s29 + $0x1a2] sm:$0xff]  ;;  %vm2355_vm14 = vcmp.eq.f32.partialorder %v2354_v26, 8.507059e+37  ;;  %s8885_s29 = sshll.u32 %s10795_s17, 7 }
 0x251   : > { %v2333_v44 = vmul.f32 %v12440_v22, %v2332_v51  ;;  %v3203_v48 = vld [vmem:[#allocation2 + $0x32] sm:$0xff]  ;;  %v3204_v45 = vld [vmem:[#allocation2 + $0x3a] sm:$0xff]  ;;  %v2357_v51 = vor.u32 1.1754944e-38, %v2356_v35  ;;  %s8306_s20 = scalar_lea.hbm %s18105_s9, %s8885_s29 }
 0x252   : > { %v10262_v42 = vpop.eup %10261  ;;  %v8663_v18 = vmul.f32 -1.442695, %v12485_v20  ;;  %2918 = vrot.lane.b32.xlu0 %v12433_v50, %s10714_s11  ;;  %v3078_v63 = vld [vmem:[#allocation2 + $0x39] sm:$0xff]  ;;  %s8309_s25 = sshll.u32 %s8306_s20, 4  ;;  %s8310_s25 = int_to_ptr.hbm [resolvable:$true] %s8309_s25 }
 0x253   : > { %v2334_v43 = vadd.f32 %v12440_v22, %v2333_v44  ;;  %v10264_v47 = vpop.eup %10263  ;;  %v12497_v30 = vadd.f32 1.0, %v10262_v42  ;;  %v9474_v1 = vpack.i.bf16 %v3078_v63, %v3077_v12  ;;  %v3140_v42 = vld [vmem:[#allocation2 + $0x38] sm:$0xff] }
 0x254   : > { %1977 = vmatmul.f32.gmra.mxu1 %v1620_v5  ;;  %v12476_v6 = vpop.f32.mrf.mxu1  ;;  %v2346_v52 = vmul.f32 %v10264_v47, %v12447_v17  ;;  %10265 = vpow2.f32 %v8663_v18  ;;  %vm2351_vm10 = vweird.f32 %v10264_v47  ;;  %v1812_v17 = vadd.f32 %v12532_v16, %v11843_v25 }
 0x255   : > { %v2338_v27 = vsel %vm2337_vm8, %v12440_v22, %v2334_v43  ;;  %10267 = vrcp.f32 %v12497_v30  ;;  %v1922_v22 = vadd.f32 %v12345_v57, %v1809_v40  ;;  %v9484_v57 = vpack.i.bf16 %v3204_v45, %v3203_v48  ;;  %9475 = vrot.lane.b32.xlu1 %v9474_v1, %s10714_s11  ;;  %vm2352_vm13 = vmor %vm2350_vm12, %vm2351_vm10  ;;  %v3205_v40 = vld [vmem:[#allocation2 + $0x4a] sm:$0xff] }
 0x256   : > { %v2343_v8 = vsel %vm2340_vm9, %v2342_v46, %v2338_v27  ;;  %v2347_v53 = vsub.f32 1.0, %v2346_v52  ;;  %v1925_v18 = vadd.f32 %v12415_v7, %v1812_v17  ;;  %v2369_v46 = vand.u32 2147483647, %v12497_v30 }
 0x257   : > { %v12508_v54 = vmul.f32 %v2343_v8, %v12272_v0  ;;  %v2034_v0 = vpop.f32.mrf.mxu0  ;;  %9485 = vrot.lane.b32.xlu2 %v9484_v57, %s10714_s11  ;;  %v2371_v25 = vand.u32 2147483648, %v12497_v30  ;;  %vm2365_vm3 = vweird.f32 %v12497_v30 }
 0x258   : > { %v2348_v24 = vmul.f32 %v10264_v47, %v2347_v53  ;;  %v12520_v5 = vadd.f32 %v2034_v0, %v1922_v22  ;;  %8652 = vmatmul.msk.f32.gmra.mxu2 %vm1427_vm0, %v8620_v4  ;;  %v1815_v53 = vadd.f32 %v12532_v16, %v11856_v56  ;;  %vm2370_vm5 = vcmp.eq.f32.partialorder %v2369_v46, 8.507059e+37  ;;  %v3080_v46 = vld [vmem:[#allocation2 + $0x51] sm:$0xff] }
 0x259   : > { %2855 = vst.msk [vmem:[#allocation2 + $0x69] sm:$0xff] %vm1460_vm2, %v12508_v54  ;;  %v2372_v12 = vor.u32 1.1754944e-38, %v2371_v25 }
 0x25a   : > { %v10266_v55 = vpop.eup %10265  ;;  %v2349_v11 = vadd.f32 %v10264_v47, %v2348_v24  ;;  %v8664_v61 = vmul.f32 -1.442695, %v12520_v5  ;;  %2924 = vrot.lane.b32.xlu0 %v12471_v49, %s10714_s11  ;;  %v3206_v49 = vld [vmem:[#allocation2 + $0x52] sm:$0xff]  ;;  %v1928_v0 = vadd.f32 %v12476_v6, %v1815_v53 }
 0x25b   : > { %v10268_v50 = vpop.eup %10267  ;;  %v12525_v39 = vadd.f32 1.0, %v10266_v55  ;;  %v9504_v45 = vpack.i.bf16 %v3206_v49, %v3205_v40 }
 0x25c   : > { %1980 = vmatmul.f32.gmra.mxu1 %v1621_v33  ;;  %v12516_v21 = vpop.f32.mrf.mxu1  ;;  %v2353_v44 = vsel %vm2352_vm13, %v10264_v47, %v2349_v11  ;;  %v2361_v14 = vmul.f32 %v10268_v50, %v12497_v30  ;;  %v3139_v47 = vld [vmem:[#allocation2 + $0x30] sm:$0xff]  ;;  %vm2366_vm15 = vweird.f32 %v10268_v50 }
 0x25d   : > { %v2358_v28 = vsel %vm2355_vm14, %v2357_v51, %v2353_v44  ;;  %10269 = vrcp.f32 %v12525_v39  ;;  %v9479_v7 = vpack.i.bf16 %v3140_v42, %v3139_v47  ;;  %vm2367_vm4 = vmor %vm2365_vm3, %vm2366_vm15  ;;  %v2386_v56 = vand.u32 2147483648, %v12525_v39 }
 0x25e   : > { %v12539_v43 = vmul.f32 %v2358_v28, %v12353_v29  ;;  %v2362_v36 = vsub.f32 1.0, %v2361_v14  ;;  %10271 = vpow2.f32 %v8664_v61  ;;  %vm2380_vm11 = vweird.f32 %v12525_v39  ;;  %v3081_v61 = vld [vmem:[#allocation2 + $0x61] sm:$0xff] }
 0x25f   : > { %v2037_v15 = vpop.f32.mrf.mxu0  ;;  %9490 = vrot.lane.b32.xlu2 %v9474_v1, %s10714_s11  ;;  %9480 = vrot.lane.b32.xlu1 %v9479_v7, %s10714_s11  ;;  %v2387_v17 = vor.u32 1.1754944e-38, %v2386_v56 }
 0x260   : > { %2856 = vst.msk [vmem:[#allocation2 + $0x79] sm:$0xff] %vm1460_vm2, %v12539_v43  ;;  %v2363_v29 = vmul.f32 %v10268_v50, %v2362_v36  ;;  %v12551_v27 = vadd.f32 %v2037_v15, %v1925_v18  ;;  %v3082_v11 = vld [vmem:[#allocation2 + $0x69] sm:$0xff]  ;;  %v1818_v18 = vadd.f32 %v12532_v16, %v11867_v38 }
 0x261   : > { %v3207_v14 = vld [vmem:[#allocation2 + $0x62] sm:$0xff]  ;;  %v3208_v28 = vld [vmem:[#allocation2 + $0x6a] sm:$0xff]  ;;  %v9509_v42 = vpack.i.bf16 %v3082_v11, %v3081_v61 }
 0x262   : > { %v2364_v52 = vadd.f32 %v10268_v50, %v2363_v29  ;;  %v8665_v8 = vmul.f32 -1.442695, %v12551_v27  ;;  %9505 = vrot.lane.b32.xlu0 %v9504_v45, %s10714_s11  ;;  %v1931_v25 = vadd.f32 %v12516_v21, %v1818_v18  ;;  %v9519_v15 = vpack.i.bf16 %v3208_v28, %v3207_v14  ;;  %v3079_v29 = vld [vmem:[#allocation2 + $0x49] sm:$0xff] }
 0x263   : > { %v10270_v33 = vpop.eup %10269  ;;  %v9494_v40 = vpack.i.bf16 %v3080_v46, %v3079_v29  ;;  %v3144_v53 = vld [vmem:[#allocation2 + $0x68] sm:$0xff]  ;;  %v3984_v18 = vld [vmem:[%s18193_s3 + $0x70] sm:$0xff] }
 0x264   : > { %v12547_v31 = vpop.f32.mrf.mxu1  ;;  %v10272_v22 = vpop.eup %10271  ;;  %v2368_v26 = vsel %vm2367_vm4, %v10268_v50, %v2364_v52  ;;  %v2376_v35 = vmul.f32 %v10270_v33, %v12525_v39  ;;  %10273 = vpow2.f32 %v8665_v8  ;;  %vm2381_vm6 = vweird.f32 %v10270_v33  ;;  %v3141_v11 = vld [vmem:[#allocation2 + $0x48] sm:$0xff] }
 0x265   : > { %v2373_v30 = vsel %vm2370_vm5, %v2372_v12, %v2368_v26  ;;  %v12560_v48 = vadd.f32 1.0, %v10272_v22  ;;  %vm2382_vm7 = vmor %vm2380_vm11, %vm2381_vm6  ;;  %v1821_v26 = vadd.f32 %v12532_v16, %v11879_v60 }
 0x266   : > { %v12563_v63 = vmul.f32 %v2373_v30, %v12425_v58  ;;  %v2377_v24 = vsub.f32 1.0, %v2376_v35  ;;  %v2384_v58 = vand.u32 2147483647, %v12525_v39 }
 0x267   : > { %10275 = vrcp.f32 %v12560_v48  ;;  %v2040_v1 = vpop.f32.mrf.mxu0  ;;  %2922 = vrot.lane.b32.xlu2 %v12464_v41, %s10714_s11  ;;  %2926 = vrot.lane.b32.xlu1 %v12508_v54, %s10714_s11  ;;  %v2401_v8 = vand.u32 2147483648, %v12560_v48  ;;  %v2399_v21 = vand.u32 2147483647, %v12560_v48  ;;  %vm2395_vm10 = vweird.f32 %v12560_v48 }
 0x268   : > { %2857 = vst.msk [vmem:[#allocation2 + $0x81] sm:$0xff] %vm1460_vm2, %v12563_v63  ;;  %v2378_v55 = vmul.f32 %v10270_v33, %v2377_v24  ;;  %v12574_v50 = vadd.f32 %v2040_v1, %v1928_v0  ;;  %vm2385_vm8 = vcmp.eq.f32.partialorder %v2384_v58, 8.507059e+37  ;;  %v3142_v0 = vld [vmem:[#allocation2 + $0x50] sm:$0xff]  ;;  %v3143_v24 = vld [vmem:[#allocation2 + $0x60] sm:$0xff]  ;;  %v1934_v60 = vadd.f32 %v12547_v31, %v1821_v26  ;;  %v3985_v31 = vld [vmem:[%s18193_s3 + $0x78] sm:$0xff] }
 0x269   : > { %v2402_v56 = vor.u32 1.1754944e-38, %v2401_v8  ;;  %v9514_v1 = vpack.i.bf16 %v3144_v53, %v3143_v24  ;;  %vm2400_vm13 = vcmp.eq.f32.partialorder %v2399_v21, 8.507059e+37  ;;  %v9499_v61 = vpack.i.bf16 %v3142_v0, %v3141_v11  ;;  %4142 = vmatpush.msrb.mxu3 %v3985_v31  ;;  %v3083_v8 = vld [vmem:[#allocation2 + $0x79] sm:$0xff]  ;;  %v3980_v24 = vld [vmem:[%s18193_s3 + $0x50] sm:$0xff] }
 0x26a   : > { %v10274_v6 = vpop.eup %10273  ;;  %v2379_v51 = vadd.f32 %v10270_v33, %v2378_v55  ;;  %v8666_v4 = vmul.f32 -1.442695, %v12574_v50  ;;  %9510 = vrot.lane.b32.xlu0 %v9509_v42, %s10714_s11  ;;  %v3981_v26 = vld [vmem:[%s18193_s3 + $0x58] sm:$0xff] }
 0x26b   : > { %v12582_v44 = vadd.f32 1.0, %v10274_v6  ;;  %4143 = vmatpush.msrb.mxu3 %v3984_v18  ;;  %v3145_v18 = vld [vmem:[#allocation2 + $0x78] sm:$0xff] }
 0x26c   : > { %v12569_v57 = vpop.f32.mrf.mxu1  ;;  %v2383_v39 = vsel %vm2382_vm7, %v10270_v33, %v2379_v51  ;;  %10277 = vpow2.f32 %v8666_v4 }
 0x26d   : > { %v10276_v41 = vpop.eup %10275  ;;  %v2388_v36 = vsel %vm2385_vm8, %v2387_v17, %v2383_v39  ;;  %10279 = vrcp.f32 %v12582_v44  ;;  %v2416_v51 = vand.u32 2147483648, %v12582_v44  ;;  %vm2410_vm15 = vweird.f32 %v12582_v44 }
 0x26e   : > { %v2715_v54 = vmul.f32 %v2388_v36, %v12485_v20  ;;  %v2391_v47 = vmul.f32 %v10276_v41, %v12560_v48  ;;  %vm2396_vm9 = vweird.f32 %v10276_v41  ;;  %v2414_v48 = vand.u32 2147483647, %v12582_v44  ;;  %v3983_v36 = vld [vmem:[%s18193_s3 + $0x68] sm:$0xff] }
 0x26f   : > { %v2043_v38 = vpop.f32.mrf.mxu0  ;;  %9495 = vrot.lane.b32.xlu2 %v9494_v40, %s10714_s11  ;;  %9520 = vrot.lane.b32.xlu1 %v9519_v15, %s10714_s11  ;;  %vm2397_vm12 = vmor %vm2395_vm10, %vm2396_vm9  ;;  %v3084_v29 = vld [vmem:[#allocation2 + $0x81] sm:$0xff] }
 0x270   : > { %2858 = vst.msk [vmem:[#allocation2 + $0x91] sm:$0xff] %vm1460_vm2, %v2715_v54  ;;  %v2392_v52 = vsub.f32 1.0, %v2391_v47  ;;  %v12594_v49 = vadd.f32 %v2043_v38, %v1931_v25  ;;  %v1824_v25 = vadd.f32 %v12532_v16, %v11889_v13  ;;  %v2417_v47 = vor.u32 1.1754944e-38, %v2416_v51  ;;  %4144 = vmatpush.msrb.mxu3 %v3983_v36 }
 0x271   : > { %vm2415_vm4 = vcmp.eq.f32.partialorder %v2414_v48, 8.507059e+37  ;;  %v9524_v21 = vpack.i.bf16 %v3084_v29, %v3083_v8  ;;  %v1830_v8 = vadd.f32 %v12532_v16, %v11910_v3  ;;  %v4028_v29 = vld [vmem:[%s18193_s3 + $0x1d0] sm:$0xff] }
 0x272   : > { %v10278_v20 = vpop.eup %10277  ;;  %v2393_v33 = vmul.f32 %v10276_v41, %v2392_v52  ;;  %v8667_v12 = vmul.f32 -1.442695, %v12594_v49  ;;  %9515 = vrot.lane.b32.xlu0 %v9514_v1, %s10714_s11  ;;  %v1937_v13 = vadd.f32 %v12569_v57, %v1824_v25  ;;  %v1827_v1 = vadd.f32 %v12532_v16, %v11900_v32  ;;  %v3146_v32 = vld [vmem:[#allocation2 + $0x80] sm:$0xff]  ;;  %v4017_v25 = vld [vmem:[%s18193_s3 + $0x178] sm:$0xff] }
 0x273   : > { %v10280_v22 = vpop.eup %10279  ;;  %v12603_v35 = vadd.f32 1.0, %v10278_v20  ;;  %v3982_v20 = vld [vmem:[%s18193_s3 + $0x60] sm:$0xff]  ;;  %4368 = vmatpush.msra.mxu0 %v4017_v25  ;;  %v3995_v25 = vld [vmem:[%s18193_s3 + $0xc8] sm:$0xff] }
 0x274   : > { %v12591_v7 = vpop.f32.mrf.mxu1  ;;  %v2394_v30 = vadd.f32 %v10276_v41, %v2393_v33  ;;  %v2406_v45 = vmul.f32 %v10280_v22, %v12582_v44  ;;  %10281 = vpow2.f32 %v8667_v12  ;;  %vm2411_vm14 = vweird.f32 %v10280_v22  ;;  %4145 = vmatpush.msrb.mxu3 %v3982_v20 }
 0x275   : > { %10283 = vrcp.f32 %v12603_v35  ;;  %vm2412_vm3 = vmor %vm2410_vm15, %vm2411_vm14  ;;  %v2431_v33 = vand.u32 2147483648, %v12603_v35  ;;  %v2429_v57 = vand.u32 2147483647, %v12603_v35  ;;  %vm2425_vm6 = vweird.f32 %v12603_v35 }
 0x276   : > { %v2398_v55 = vsel %vm2397_vm12, %v10276_v41, %v2394_v30  ;;  %v2407_v58 = vsub.f32 1.0, %v2406_v45  ;;  %4146 = vmatpush.msrb.mxu3 %v3981_v26  ;;  %v3209_v45 = vld [vmem:[#allocation2 + $0x7a] sm:$0xff]  ;;  %v1940_v51 = vadd.f32 %v12591_v7, %v1827_v1  ;;  %v4031_v26 = vld [vmem:[%s18193_s3 + $0x1e8] sm:$0xff] }
 0x277   : > { %v2403_v6 = vsel %vm2400_vm13, %v2402_v56, %v2398_v55  ;;  %v2046_v17 = vpop.f32.mrf.mxu0  ;;  %9500 = vrot.lane.b32.xlu2 %v9499_v61, %s10714_s11  ;;  %2932 = vrot.lane.b32.xlu1 %v2715_v54, %s10714_s11  ;;  %v3210_v55 = vld [vmem:[#allocation2 + $0x82] sm:$0xff]  ;;  %vm2430_vm7 = vcmp.eq.f32.partialorder %v2429_v57, 8.507059e+37 }
 0x278   : > { %v12616_v14 = vmul.f32 %v2403_v6, %v12520_v5  ;;  %v2408_v28 = vmul.f32 %v10280_v22, %v2407_v58  ;;  %v12618_v42 = vadd.f32 %v2046_v17, %v1934_v60  ;;  %4147 = vmatpush.msrb.mxu3 %v3980_v24  ;;  %v9534_v17 = vpack.i.bf16 %v3210_v55, %v3209_v45  ;;  %v4014_v1 = vld [vmem:[%s18193_s3 + $0x160] sm:$0xff] }
 0x27a   : > { %v10282_v39 = vpop.eup %10281  ;;  %2859 = vst.msk [vmem:[#allocation2 + $0x99] sm:$0xff] %vm1460_vm2, %v12616_v14  ;;  %v2409_v41 = vadd.f32 %v10280_v22, %v2408_v28  ;;  %v8668_v5 = vmul.f32 -1.442695, %v12618_v42  ;;  %2930 = vrot.lane.b32.xlu0 %v12563_v63, %s10714_s11  ;;  %v3978_v28 = vld [vmem:[%s18193_s3 + $0x40] sm:$0xff] }
 0x27b   : > { %v10284_v46 = vpop.eup %10283  ;;  %v12638_v15 = vadd.f32 1.0, %v10282_v39 }
 0x27c   : > { %v12613_v4 = vpop.f32.mrf.mxu1  ;;  %v2413_v44 = vsel %vm2412_vm3, %v10280_v22, %v2409_v41  ;;  %v2421_v54 = vmul.f32 %v10284_v46, %v12603_v35  ;;  %10285 = vpow2.f32 %v8668_v5  ;;  %vm2426_vm5 = vweird.f32 %v10284_v46 }
 0x27d   : > { %v2418_v38 = vsel %vm2415_vm4, %v2417_v47, %v2413_v44  ;;  %10287 = vrcp.f32 %v12638_v15  ;;  %vm2427_vm11 = vmor %vm2425_vm6, %vm2426_vm5  ;;  %v2432_v35 = vor.u32 1.1754944e-38, %v2431_v33  ;;  %v2446_v31 = vand.u32 2147483648, %v12638_v15  ;;  %v4033_v47 = vld [vmem:[%s18193_s3 + $0x1f8] sm:$0xff] }
 0x27e   : > { %v12643_v52 = vmul.f32 %v2418_v38, %v12551_v27  ;;  %v2422_v40 = vsub.f32 1.0, %v2421_v54  ;;  %v2444_v7 = vand.u32 2147483647, %v12638_v15  ;;  %v9529_v5 = vpack.i.bf16 %v3146_v32, %v3145_v18  ;;  %4481 = vmatpush.msra.mxu1 %v4033_v47  ;;  %v4001_v32 = vld [vmem:[%s18193_s3 + $0xf8] sm:$0xff] }
 0x27f   : > { %v2049_v12 = vpop.f32.mrf.mxu0  ;;  %2928 = vrot.lane.b32.xlu2 %v12539_v43, %s10714_s11  ;;  %9525 = vrot.lane.b32.xlu1 %v9524_v21, %s10714_s11  ;;  %v3979_v43 = vld [vmem:[%s18193_s3 + $0x48] sm:$0xff]  ;;  %vm2440_vm9 = vweird.f32 %v12638_v15  ;;  %v2447_v20 = vor.u32 1.1754944e-38, %v2446_v31  ;;  %v4032_v21 = vld [vmem:[%s18193_s3 + $0x1f0] sm:$0xff]  ;;  %vm2794_vm5 = vcmask 254976  }
 0x280   : > { %2860 = vst.msk [vmem:[#allocation2 + $0xa9] sm:$0xff] %vm1460_vm2, %v12643_v52  ;;  %v2423_v27 = vmul.f32 %v10284_v46, %v2422_v40  ;;  %v12657_v22 = vadd.f32 %v2049_v12, %v1937_v13  ;;  %4148 = vmatpush.msrb.mxu3 %v3979_v43  ;;  %v4016_v13 = vld [vmem:[%s18193_s3 + $0x170] sm:$0xff]  ;;  %v3975_v12 = vld [vmem:[%s18193_s3 + $0x28] sm:$0xff]  ;;  %vm2445_vm12 = vcmp.eq.f32.partialorder %v2444_v7, 8.507059e+37  ;;  %4482 = vmatpush.msra.mxu1 %v4032_v21 }
 0x281   : > { %4369 = vmatpush.msra.mxu0 %v4016_v13  ;;  %4255 = vmatpush.msrb.mxu2 %v4001_v32  ;;  %v3972_v7 = vld [vmem:[%s18193_s3 + $0x10] sm:$0xff]  ;;  %v3999_v13 = vld [vmem:[%s18193_s3 + $0xe8] sm:$0xff]  ;;  %2798 = vst.msk [vmem:[#allocation3 + $0x28] sm:$0x3] %vm2794_vm5, %v10716_v2 }
 0x282   : > { %v10286_v63 = vpop.eup %10285  ;;  %v2424_v30 = vadd.f32 %v10284_v46, %v2423_v27  ;;  %v8669_v0 = vmul.f32 -1.442695, %v12657_v22  ;;  %4149 = vmatpush.msrb.mxu3 %v3978_v28  ;;  %v4015_v27 = vld [vmem:[%s18193_s3 + $0x168] sm:$0xff]  ;;  %4483 = vmatpush.msra.mxu1 %v4031_v26  ;;  %2795 = vst.msk [vmem:[#allocation3 + $0x10] sm:$0x3] %vm2794_vm5, %v10716_v2 }
 0x283   : > { %v12670_v56 = vpop.eup %10287  ;;  %v12675_v60 = vadd.f32 1.0, %v10286_v63  ;;  %4370 = vmatpush.msra.mxu0 %v4015_v27  ;;  %v4027_v27 = vld [vmem:[%s18193_s3 + $0x1c8] sm:$0xff]  ;;  %2801 = vst.msk [vmem:[#allocation3 + $0x40] sm:$0x3] %vm2794_vm5, %v10716_v2 }
 0x284   : > { %v12652_v53 = vpop.f32.mrf.mxu1  ;;  %v2428_v58 = vsel %vm2427_vm11, %v10284_v46, %v2424_v30  ;;  %v2436_v11 = vmul.f32 %v12670_v56, %v12638_v15  ;;  %10289 = vpow2.f32 %v8669_v0  ;;  %vm2441_vm8 = vweird.f32 %v12670_v56  ;;  %v3977_v46 = vld [vmem:[%s18193_s3 + $0x38] sm:$0xff]  ;;  %v3976_v15 = vld [vmem:[%s18193_s3 + $0x30] sm:$0xff]  ;;  %2804 = vst.msk [vmem:[#allocation3 + $0x58] sm:$0x3] %vm2794_vm5, %v10716_v2 }
 0x285   : > { %v2433_v6 = vsel %vm2430_vm7, %v2432_v35, %v2428_v58  ;;  %10291 = vrcp.f32 %v12675_v60  ;;  %4150 = vmatpush.msrb.mxu3 %v3977_v46  ;;  %vm12713_vm10 = vmor %vm2440_vm9, %vm2441_vm8  ;;  %v1839_v30 = vadd.f32 %v12532_v16, %v11813_v23  ;;  %v1943_v0 = vadd.f32 %v12613_v4, %v1830_v8  ;;  %v4030_v35 = vld [vmem:[%s18193_s3 + $0x1e0] sm:$0xff]  ;;  %4371 = vmatpush.msra.mxu0 %v4014_v1  ;;  %v4011_v8 = vld [vmem:[%s18193_s3 + $0x148] sm:$0xff] }
 0x286   : > { %v12684_v48 = vmul.f32 %v2433_v6, %v12574_v50  ;;  %v2437_v61 = vsub.f32 1.0, %v2436_v11  ;;  %v2459_v23 = vand.u32 2147483647, %v12675_v60  ;;  %v3973_v6 = vld [vmem:[%s18193_s3 + $0x18] sm:$0xff]  ;;  %4484 = vmatpush.msra.mxu1 %v4030_v35  ;;  %vm2455_vm14 = vweird.f32 %v12675_v60  ;;  %v4010_v1 = vld [vmem:[%s18193_s3 + $0x140] sm:$0xff] }
 0x287   : > { %v2052_v41 = vpop.f32.mrf.mxu0  ;;  %9535 = vrot.lane.b32.xlu2 %v9534_v17, %s10714_s11  ;;  %9530 = vrot.lane.b32.xlu1 %v9529_v5, %s10714_s11  ;;  %v4029_v17 = vld [vmem:[%s18193_s3 + $0x1d8] sm:$0xff]  ;;  %v4000_v5 = vld [vmem:[%s18193_s3 + $0xf0] sm:$0xff]  ;;  %2807 = vst.msk [vmem:[#allocation3 + $0x70] sm:$0x3] %vm2794_vm5, %v10716_v2 }
 0x288   : > { %2861 = vst.msk [vmem:[#allocation2 + $0xb1] sm:$0xff] %vm1460_vm2, %v12684_v48  ;;  %v2438_v50 = vmul.f32 %v12670_v56, %v2437_v61  ;;  %v12698_v36 = vadd.f32 %v2052_v41, %v1940_v51  ;;  %4151 = vmatpush.msrb.mxu3 %v3976_v15  ;;  %v4013_v51 = vld [vmem:[%s18193_s3 + $0x158] sm:$0xff]  ;;  %v2064_v61 = vpop.f32.mrf.mxu2  ;;  %4485 = vmatpush.msra.mxu1 %v4029_v17  ;;  %vm2460_vm3 = vcmp.eq.f32.partialorder %v2459_v23, 8.507059e+37  ;;  %v3971_v15 = vld [vmem:[%s18193_s3 + $0x8] sm:$0xff]  ;;  %v4026_v35 = vld [vmem:[%s18193_s3 + $0x1c0] sm:$0xff] }
 0x289   : > { %4372 = vmatpush.msra.mxu0 %v4013_v51  ;;  %4256 = vmatpush.msrb.mxu2 %v4000_v5  ;;  %2810 = vst.msk [vmem:[#allocation3 + $0x88] sm:$0x3] %vm2794_vm5, %v10716_v2 }
 0x28a   : > { %v10290_v44 = vpop.eup %10289  ;;  %v2439_v54 = vadd.f32 %v12670_v56, %v2438_v50  ;;  %v8670_v38 = vmul.f32 -1.442695, %v12698_v36  ;;  %4152 = vmatpush.msrb.mxu3 %v3975_v12  ;;  %v3085_v12 = vld [vmem:[#allocation2 + $0x91] sm:$0xff]  ;;  %4486 = vmatpush.msra.mxu1 %v4028_v29  ;;  %2813 = vst.msk [vmem:[#allocation3 + $0xa0] sm:$0x3] %vm2794_vm5, %v10716_v2 }
 0x28b   : > { %v12726_v40 = vpop.eup %10291  ;;  %v12730_v33 = vadd.f32 1.0, %v10290_v44  ;;  %v3086_v44 = vld [vmem:[#allocation2 + $0x99] sm:$0xff]  ;;  %4257 = vmatpush.msrb.mxu2 %v3999_v13  ;;  %2816 = vst.msk [vmem:[#allocation3 + $0xb8] sm:$0x3] %vm2794_vm5, %v10716_v2 }
 0x28c   : > { %v12692_v39 = vpop.f32.mrf.mxu1  ;;  %v2443_v3 = vsel %vm12713_vm10, %v12670_v56, %v2439_v54  ;;  %v2451_v57 = vmul.f32 %v12726_v40, %v12675_v60  ;;  %10293 = vpow2.f32 %v8670_v38  ;;  %v3974_v56 = vld [vmem:[%s18193_s3 + $0x20] sm:$0xff]  ;;  %vm2456_vm13 = vweird.f32 %v12726_v40  ;;  %v2913_v50 = vpop.permute.xlu0 %2912  ;;  %4487 = vmatpush.msra.mxu1 %v4027_v27  ;;  %2819 = vst.msk [vmem:[#allocation3 + $0xd0] sm:$0x3] %vm2794_vm5, %v10716_v2 }
 0x28d   : > { %v2448_v63 = vsel %vm2445_vm12, %v2447_v20, %v2443_v3  ;;  %10295 = vrcp.f32 %v12730_v33  ;;  %4153 = vmatpush.msrb.mxu3 %v3974_v56  ;;  %vm12807_vm15 = vmor %vm2455_vm14, %vm2456_vm13  ;;  %3009 = vst.msk [vmem:[#allocation3 + $0x19] sm:$0xff] %vm1427_vm0, %v2913_v50  ;;  %v2474_v21 = vand.u32 2147483647, %v12730_v33  ;;  %v9539_v26 = vpack.i.bf16 %v3086_v44, %v3085_v12  ;;  %v3994_v12 = vld [vmem:[%s18193_s3 + $0xc0] sm:$0xff] }
 0x28e   : > { %v12753_v45 = vmul.f32 %v2448_v63, %v12594_v49  ;;  %v2452_v24 = vsub.f32 1.0, %v2451_v57  ;;  %v2461_v49 = vand.u32 2147483648, %v12675_v60  ;;  %v4012_v60 = vld [vmem:[%s18193_s3 + $0x150] sm:$0xff]  ;;  %4488 = vmatpush.msra.mxu1 %v4026_v35  ;;  %vm2470_vm6 = vweird.f32 %v12730_v33  ;;  %v4006_v27 = vld [vmem:[%s18193_s3 + $0x120] sm:$0xff]  ;;  %2822 = vst.msk [vmem:[#allocation3 + $0xe8] sm:$0x3] %vm2794_vm5, %v10716_v2 }
 0x28f   : > { %4154 = vmatpush.msrb.mxu3 %v3973_v6  ;;  %2934 = vrot.lane.b32.xlu2 %v12616_v14, %s10714_s11  ;;  %v1833_v14 = vadd.f32 %v12532_v16, %v11783_v19  ;;  %vm12873_vm11 = vcmp.eq.f32.partialorder %v2474_v21, 8.507059e+37  ;;  %v3041_v35 = vld [vmem:[#allocation2] sm:$0xff]  ;;  %2825 = vst.msk [vmem:[#allocation3 + $0x100] sm:$0x3] %vm2794_vm5, %v10716_v2 }
 0x290   : > { %v2055_v55 = vpop.f32.mrf.mxu0  ;;  %2862 = vst.msk [vmem:[#allocation2 + $0xc1] sm:$0xff] %vm1460_vm2, %v12753_v45  ;;  %v2453_v43 = vmul.f32 %v12726_v40, %v2452_v24  ;;  %v2462_v47 = vor.u32 1.1754944e-38, %v2461_v49  ;;  %4373 = vmatpush.msra.mxu0 %v4012_v60  ;;  %v2476_v24 = vand.u32 2147483648, %v12730_v33  ;;  %v3997_v49 = vld [vmem:[%s18193_s3 + $0xd8] sm:$0xff] }
 0x291   : > { %v12771_v11 = vadd.f32 %v2055_v55, %v1943_v0  ;;  %4155 = vmatpush.msrb.mxu3 %v3972_v7  ;;  %v1946_v0 = vadd.f32 %v12652_v53, %v1833_v14  ;;  %v4025_v55 = vld [vmem:[%s18193_s3 + $0x1b8] sm:$0xff]  ;;  %2828 = vst.msk [vmem:[#allocation3 + $0x118] sm:$0x3] %vm2794_vm5, %v10716_v2 }
 0x292   : > { %v10294_v28 = vpop.eup %10293  ;;  %v2454_v31 = vadd.f32 %v12726_v40, %v2453_v43  ;;  %4374 = vmatpush.msra.mxu0 %v4011_v8  ;;  %v2477_v5 = vor.u32 1.1754944e-38, %v2476_v24  ;;  %4489 = vmatpush.msra.mxu1 %v4025_v55  ;;  %2831 = vst.msk [vmem:[#allocation3 + $0x130] sm:$0x3] %vm2794_vm5, %v10716_v2 }
 0x293   : > { %v8671_v18 = vmul.f32 -1.442695, %v12771_v11  ;;  %v12801_v46 = vpop.eup %10295  ;;  %v12811_v54 = vadd.f32 1.0, %v10294_v28  ;;  %4156 = vmatpush.msrb.mxu3 %v3971_v15  ;;  %2834 = vst.msk [vmem:[#allocation3 + $0x148] sm:$0x3] %vm2794_vm5, %v10716_v2 }
 0x294   : > { %v1951_v4 = vpop.f32.mrf.mxu1  ;;  %v2458_v19 = vsel %vm12807_vm15, %v12726_v40, %v2454_v31  ;;  %v2466_v38 = vmul.f32 %v12801_v46, %v12730_v33  ;;  %v1842_v40 = vadd.f32 %v12532_v16, %v11828_v62  ;;  %v3970_v62 = vld [vmem:[%s18193_s3] sm:$0xff]  ;;  %vm2471_vm4 = vweird.f32 %v12801_v46  ;;  %4375 = vmatpush.msra.mxu0 %v4010_v1  ;;  %v2915_v28 = vpop.permute.xlu1 %2914  ;;  %v3996_v31 = vld [vmem:[%s18193_s3 + $0xd0] sm:$0xff]  ;;  %v4021_v1 = vld [vmem:[%s18193_s3 + $0x198] sm:$0xff]  ;;  %2837 = vst.msk [vmem:[#allocation3 + $0x160] sm:$0x3] %vm2794_vm5, %v10716_v2 }
 0x295   : > { %v1952_v58 = vadd.f32 %v1951_v4, %v1839_v30  ;;  %10297 = vpow2.f32 %v8671_v18  ;;  %v2463_v20 = vsel %vm2460_vm3, %v2462_v47, %v2458_v19  ;;  %v3998_v30 = vld [vmem:[%s18193_s3 + $0xe0] sm:$0xff]  ;;  %4157 = vmatpush.msrb.mxu3 %v3970_v62  ;;  %v4009_v4 = vld [vmem:[%s18193_s3 + $0x138] sm:$0xff]  ;;  %v4008_v33 = vld [vmem:[%s18193_s3 + $0x130] sm:$0xff]  ;;  %3010 = vst.msk [vmem:[#allocation3 + $0x21] sm:$0xff] %vm1427_vm0, %v2915_v28  ;;  %v1836_v47 = vadd.f32 %v12532_v16, %v11797_v9 }
 0x296   : > { %10299 = vrcp.f32 %v12811_v54  ;;  %v12839_v3 = vmul.f32 %v2463_v20, %v12618_v42  ;;  %v2467_v57 = vsub.f32 1.0, %v2466_v38  ;;  %4258 = vmatpush.msrb.mxu2 %v3998_v30  ;;  %v4024_v18 = vld [vmem:[%s18193_s3 + $0x1b0] sm:$0xff]  ;;  %vm12897_vm7 = vmor %vm2470_vm6, %vm2471_vm4  ;;  %4376 = vmatpush.msra.mxu0 %v4009_v4  ;;  %v4007_v38 = vld [vmem:[%s18193_s3 + $0x128] sm:$0xff]  ;;  %v2489_v13 = vand.u32 2147483647, %v12811_v54 }
 0x297   : > { %v12790_v41 = vadd.f32 %v2064_v61, %v1952_v58  ;;  %v2067_v58 = vpop.f32.mrf.mxu2  ;;  %9540 = vrot.lane.b32.xlu2 %v9539_v26, %s10714_s11  ;;  %v12878_v61 = vld [vmem:[#allocation2 + $0x98] sm:$0xff]  ;;  %v4023_v9 = vld [vmem:[%s18193_s3 + $0x1a8] sm:$0xff]  ;;  %4490 = vmatpush.msra.mxu1 %v4024_v18  ;;  %v1949_v20 = vadd.f32 %v12692_v39, %v1836_v47  ;;  %v4022_v62 = vld [vmem:[%s18193_s3 + $0x1a0] sm:$0xff]  ;;  %vm2485_vm9 = vweird.f32 %v12811_v54  ;;  %2840 = vst.msk [vmem:[#allocation3 + $0x178] sm:$0x3] %vm2794_vm5, %v10716_v2 }
 0x298   : > { %v2058_v56 = vpop.f32.mrf.mxu0  ;;  %2863 = vst.msk [vmem:[#allocation2 + $0xc9] sm:$0xff] %vm1460_vm2, %v12839_v3  ;;  %v2468_v23 = vmul.f32 %v12801_v46, %v2467_v57  ;;  %4259 = vmatpush.msrb.mxu2 %v3997_v49  ;;  %4377 = vmatpush.msra.mxu0 %v4008_v33  ;;  %vm13000_vm12 = vcmp.eq.f32.partialorder %v2489_v13, 8.507059e+37 }
 0x299   : > { %v8674_v63 = vmul.f32 -1.442695, %v12790_v41  ;;  %v12869_v43 = vadd.f32 %v2058_v56, %v1946_v0  ;;  %4491 = vmatpush.msra.mxu1 %v4023_v9  ;;  %v4005_v56 = vld [vmem:[%s18193_s3 + $0x118] sm:$0xff]  ;;  %2843 = vst.msk [vmem:[#allocation3 + $0x190] sm:$0x3] %vm2794_vm5, %v10716_v2 }
 0x29a   : > { %v2469_v32 = vadd.f32 %v12801_v46, %v2468_v23  ;;  %4260 = vmatpush.msrb.mxu2 %v3996_v31  ;;  %4378 = vmatpush.msra.mxu0 %v4007_v38  ;;  %v4019_v38 = vld [vmem:[%s18193_s3 + $0x188] sm:$0xff]  ;;  %2846 = vst.msk [vmem:[#allocation3 + $0x1a8] sm:$0x3] %vm2794_vm5, %v10716_v2 }
 0x29b   : > { %10301 = vpow2.f32 %v8674_v63  ;;  %v10298_v6 = vpop.eup %10297  ;;  %v8672_v14 = vmul.f32 -1.442695, %v12869_v43  ;;  %4492 = vmatpush.msra.mxu1 %v4022_v62 }
 0x29c   : > { %v1954_v42 = vpop.f32.mrf.mxu1  ;;  %v12893_v50 = vpop.eup %10299  ;;  %v12901_v60 = vadd.f32 1.0, %v10298_v6  ;;  %v2473_v44 = vsel %vm12897_vm7, %v12801_v46, %v2469_v32  ;;  %v1845_v46 = vadd.f32 %v12532_v16, %v11841_v59  ;;  %v3147_v59 = vld [vmem:[#allocation2 + $0x90] sm:$0xff]  ;;  %4261 = vmatpush.msrb.mxu2 %v3995_v25  ;;  %4379 = vmatpush.msra.mxu0 %v4006_v27  ;;  %v4003_v25 = vld [vmem:[%s18193_s3 + $0x108] sm:$0xff]  ;;  %v4002_v27 = vld [vmem:[%s18193_s3 + $0x100] sm:$0xff] }
 0x29d   : > { %v1955_v53 = vadd.f32 %v1954_v42, %v1842_v40  ;;  %v2481_v29 = vmul.f32 %v12893_v50, %v12811_v54  ;;  %v2478_v15 = vsel %vm12873_vm11, %v2477_v5, %v2473_v44  ;;  %v9544_v57 = vpack.i.bf16 %v12878_v61, %v3147_v59  ;;  %v3993_v42 = vld [vmem:[%s18193_s3 + $0xb8] sm:$0xff]  ;;  %v4004_v6 = vld [vmem:[%s18193_s3 + $0x110] sm:$0xff]  ;;  %4493 = vmatpush.msra.mxu1 %v4021_v1  ;;  %v3042_v59 = vld [vmem:[#allocation2 + $0x8] sm:$0xff] }
 0x29e   : > { %10303 = vrcp.f32 %v12901_v60  ;;  %v12933_v40 = vmul.f32 %v2478_v15, %v12657_v22  ;;  %v2491_v22 = vand.u32 2147483648, %v12811_v54  ;;  %vm2486_vm8 = vweird.f32 %v12893_v50  ;;  %4262 = vmatpush.msrb.mxu2 %v3994_v12  ;;  %4380 = vmatpush.msra.mxu0 %v4005_v56 }
 0x29f   : > { %v12880_v17 = vadd.f32 %v2067_v58, %v1955_v53  ;;  %v2482_v21 = vsub.f32 1.0, %v2481_v29  ;;  %10305 = vpow2.f32 %v8672_v14  ;;  %v2070_v23 = vpop.f32.mrf.mxu2  ;;  %v12971_v53 = vpop.permute.xlu2 %9455  ;;  %9545 = vrot.lane.b32.xlu2 %v9544_v57, %s10714_s11  ;;  %v3992_v58 = vld [vmem:[%s18193_s3 + $0xb0] sm:$0xff]  ;;  %v12991_v54 = vadd.f32 %v12532_v16, %v11854_v10  ;;  %vm12996_vm10 = vmor %vm2485_vm9, %vm2486_vm8  ;;  %v3991_v14 = vld [vmem:[%s18193_s3 + $0xa8] sm:$0xff] }
 0x2a0   : > { %v2061_v63 = vpop.f32.mrf.mxu0  ;;  %2864 = vst.msk [vmem:[#allocation2 + $0xd9] sm:$0xff] %vm1460_vm2, %v12933_v40  ;;  %4263 = vmatpush.msrb.mxu2 %v3993_v42  ;;  %v9457_v51 = vunpack.i.l.bf16 %v12971_v53  ;;  %v2492_v31 = vor.u32 1.1754944e-38, %v2491_v22  ;;  %v4020_v10 = vld [vmem:[%s18193_s3 + $0x190] sm:$0xff]  ;;  %v2504_v5 = vand.u32 2147483647, %v12901_v60  ;;  %v2506_v44 = vand.u32 2147483648, %v12901_v60  ;;  %4381 = vmatpush.msra.mxu0 %v4004_v6 }
 0x2a1   : > { %v8675_v19 = vmul.f32 -1.442695, %v12880_v17  ;;  %v10302_v8 = vpop.eup %10301  ;;  %v2483_v30 = vmul.f32 %v12893_v50, %v2482_v21  ;;  %v12957_v24 = vadd.f32 %v2061_v63, %v1949_v20  ;;  %4494 = vmatpush.msra.mxu1 %v4020_v10  ;;  %v13046_v20 = vadd.f32 %v12532_v16, %v11872_v34  ;;  %v3990_v34 = vld [vmem:[%s18193_s3 + $0xa0] sm:$0xff]  ;;  %v3989_v57 = vld [vmem:[%s18193_s3 + $0x98] sm:$0xff] }
 0x2a2   : > { %v12946_v39 = vadd.f32 1.0, %v10302_v8  ;;  %4264 = vmatpush.msrb.mxu2 %v3992_v58  ;;  %v9458_v21 = vunpack.i.h.bf16 %v12971_v53  ;;  %4382 = vmatpush.msra.mxu0 %v4003_v25  ;;  %v4018_v22 = vld [vmem:[%s18193_s3 + $0x180] sm:$0xff]  ;;  %vm2500_vm14 = vweird.f32 %v12901_v60  ;;  %vm13076_vm15 = vcmp.eq.f32.partialorder %v2504_v5, 8.507059e+37 }
 0x2a3   : > { %10307 = vpow2.f32 %v8675_v19  ;;  %v2484_v49 = vadd.f32 %v12893_v50, %v2483_v30  ;;  %v8673_v4 = vmul.f32 -1.442695, %v12957_v24  ;;  %v3842_v19 = vsel %vm1460_vm2, %v3041_v35, %v9457_v51  ;;  %4495 = vmatpush.msra.mxu1 %v4019_v38  ;;  %v3987_v51 = vld [vmem:[%s18193_s3 + $0x88] sm:$0xff] }
 0x2a4   : > { %v1957_v26 = vpop.f32.mrf.mxu1  ;;  %10309 = vrcp.f32 %v12946_v39  ;;  %v12987_v32 = vpop.eup %10303  ;;  %4158 = vmatmul.f32.vlgmr.msrb.gmra.mxu3 %v3842_v19  ;;  %4265 = vmatpush.msrb.mxu2 %v3991_v14  ;;  %v2549_v63 = vand.u32 2147483647, %v12946_v39  ;;  %v2551_v62 = vand.u32 2147483648, %v12946_v39  ;;  %v2507_v1 = vor.u32 1.1754944e-38, %v2506_v44 }
 0x2a5   : > { %v1958_v0 = vadd.f32 %v1957_v26, %v1845_v46  ;;  %v10306_v33 = vpop.eup %10305  ;;  %v2488_v18 = vsel %vm12996_vm10, %v12893_v50, %v2484_v49  ;;  %v2496_v7 = vmul.f32 %v12987_v32, %v12901_v60  ;;  %10311 = vpow2.f32 %v8673_v4  ;;  %4383 = vmatpush.msra.mxu0 %v4002_v27  ;;  %4496 = vmatpush.msra.mxu1 %v4018_v22 }
 0x2a6   : > { %v2493_v50 = vsel %vm13000_vm12, %v2492_v31, %v2488_v18  ;;  %v13026_v29 = vadd.f32 1.0, %v10306_v33  ;;  %vm2501_vm13 = vweird.f32 %v12987_v32  ;;  %4266 = vmatpush.msrb.mxu2 %v3990_v34  ;;  %vm2545_vm4 = vweird.f32 %v12946_v39 }
 0x2a7   : > { %v12979_v55 = vadd.f32 %v2070_v23, %v1958_v0  ;;  %v13035_v9 = vmul.f32 %v2493_v50, %v12698_v36  ;;  %v2497_v46 = vsub.f32 1.0, %v2496_v7  ;;  %v13050_v36 = vadd.f32 %v12532_v16, %v11886_v37  ;;  %v2073_v30 = vpop.f32.mrf.mxu2  ;;  %v2917_v42 = vpop.permute.xlu2 %2916  ;;  %v3988_v23 = vld [vmem:[%s18193_s3 + $0x90] sm:$0xff]  ;;  %vm2502_vm3 = vmor %vm2500_vm14, %vm2501_vm13  ;;  %v3986_v7 = vld [vmem:[%s18193_s3 + $0x80] sm:$0xff] }
 0x2a8   : > { %10313 = vrcp.f32 %v13026_v29  ;;  %3011 = vst.msk [vmem:[#allocation3 + $0x31] sm:$0xff] %vm1427_vm0, %v2917_v42  ;;  %v2519_v53 = vand.u32 2147483647, %v13026_v29  ;;  %v3843_v4 = vsel %vm1460_vm2, %v3042_v59, %v9458_v21  ;;  %4267 = vmatpush.msrb.mxu2 %v3989_v57  ;;  %vm13113_vm11 = vcmp.eq.f32.partialorder %v2549_v63, 8.507059e+37 }
 0x2a9   : > { %v10308_v47 = vpop.eup %10307  ;;  %v8676_v13 = vmul.f32 -1.442695, %v12979_v55  ;;  %2865 = vst.msk [vmem:[#allocation2 + $0xe1] sm:$0xff] %vm1460_vm2, %v13035_v9  ;;  %v2498_v37 = vmul.f32 %v12987_v32, %v2497_v46  ;;  %v2552_v31 = vor.u32 1.1754944e-38, %v2551_v62  ;;  %vm2515_vm7 = vweird.f32 %v13026_v29 }
 0x2aa   : > { %v13037_v15 = vadd.f32 1.0, %v10308_v47  ;;  %v13042_v8 = vpop.eup %10309  ;;  %4268 = vmatpush.msrb.mxu2 %v3988_v23  ;;  %vm13138_vm9 = vcmp.eq.f32.partialorder %v2519_v53, 8.507059e+37  ;;  %v2521_v5 = vand.u32 2147483648, %v13026_v29 }
 0x2ab   : > { %v2541_v16 = vmul.f32 %v13042_v8, %v12946_v39  ;;  %v10312_v0 = vpop.eup %10311  ;;  %v2499_v56 = vadd.f32 %v12987_v32, %v2498_v37  ;;  %vm2546_vm6 = vweird.f32 %v13042_v8 }
 0x2ac   : > { %v1960_v12 = vpop.f32.mrf.mxu1  ;;  %10315 = vrcp.f32 %v13037_v15  ;;  %v13097_v49 = vadd.f32 1.0, %v10312_v0  ;;  %4161 = vmatmul.f32.gmra.mxu3 %v3843_v4  ;;  %vm2547_vm8 = vmor %vm2545_vm4, %vm2546_vm6  ;;  %v2564_v25 = vand.u32 2147483647, %v13037_v15  ;;  %4269 = vmatpush.msrb.mxu2 %v3987_v51  ;;  %v2566_v21 = vand.u32 2147483648, %v13037_v15 }
 0x2ad   : > { %v2542_v35 = vsub.f32 1.0, %v2541_v16  ;;  %10317 = vpow2.f32 %v8676_v13  ;;  %v2503_v58 = vsel %vm2502_vm3, %v12987_v32, %v2499_v56  ;;  %v1961_v60 = vadd.f32 %v1960_v12, %v12991_v54 }
 0x2ae   : > { %v13109_v61 = vpop.eup %10313  ;;  %v2508_v28 = vsel %vm13076_vm15, %v2507_v1, %v2503_v58  ;;  %10319 = vrcp.f32 %v13097_v49  ;;  %4270 = vmatpush.msrb.mxu2 %v3986_v7  ;;  %v2522_v22 = vor.u32 1.1754944e-38, %v2521_v5  ;;  %vm2560_vm12 = vweird.f32 %v13037_v15 }
 0x2af   : > { %v2543_v6 = vmul.f32 %v13042_v8, %v2542_v35  ;;  %v13123_v10 = vmul.f32 %v2508_v28, %v12771_v11  ;;  %v2511_v18 = vmul.f32 %v13109_v61, %v13026_v29  ;;  %v13151_v19 = vadd.f32 %v2073_v30, %v1961_v60  ;;  %v2076_v59 = vpop.f32.mrf.mxu2  ;;  %v3214_v28 = vld [vmem:[#allocation2 + $0xb2] sm:$0xff] }
 0x2b0   : > { %vm2516_vm5 = vweird.f32 %v13109_v61  ;;  %vm2565_vm14 = vcmp.eq.f32.partialorder %v2564_v25, 8.507059e+37  ;;  %v2567_v62 = vor.u32 1.1754944e-38, %v2566_v21  ;;  %v2534_v30 = vand.u32 2147483647, %v13097_v49  ;;  %v3169_v21 = vld [vmem:[#allocation2 + $0x19] sm:$0xff] }
 0x2b1   : > { %v2544_v33 = vadd.f32 %v13042_v8, %v2543_v6  ;;  %2866 = vst.msk [vmem:[#allocation2 + $0xf1] sm:$0xff] %vm1460_vm2, %v13123_v10  ;;  %v2512_v44 = vsub.f32 1.0, %v2511_v18  ;;  %v13175_v57 = vpop.permute.xlu2 %9485  ;;  %vm2517_vm13 = vmor %vm2515_vm7, %vm2516_vm5  ;;  %v2536_v42 = vand.u32 2147483648, %v13097_v49  ;;  %vm2530_vm4 = vweird.f32 %v13097_v49 }
 0x2b2   : > { %v13120_v54 = vpop.eup %10315  ;;  %vm13211_vm6 = vcmp.eq.f32.partialorder %v2534_v30, 8.507059e+37 }
 0x2b3   : > { %v2556_v14 = vmul.f32 %v13120_v54, %v13037_v15  ;;  %v10318_v50 = vpop.eup %10317  ;;  %v2548_v39 = vsel %vm2547_vm8, %v13042_v8, %v2544_v33  ;;  %v2513_v34 = vmul.f32 %v13109_v61, %v2512_v44  ;;  %v8677_v8 = vmul.f32 -1.442695, %v13151_v19  ;;  %v3043_v33 = vld [vmem:[#allocation2 + $0x18] sm:$0xff] }
 0x2b4   : > { %v1963_v47 = vpop.f32.mrf.mxu1  ;;  %v2553_v46 = vsel %vm13113_vm11, %v2552_v31, %v2548_v39  ;;  %v13157_v2 = vadd.f32 1.0, %v10318_v50  ;;  %v13163_v37 = vpop.eup %10319  ;;  %vm2561_vm10 = vweird.f32 %v13120_v54  ;;  %v2537_v31 = vor.u32 1.1754944e-38, %v2536_v42  ;;  %v3211_v50 = vld [vmem:[#allocation2 + $0x92] sm:$0xff]  ;;  %v3212_v39 = vld [vmem:[#allocation2 + $0x9a] sm:$0xff] }
 0x2b5   : > { %v1964_v38 = vadd.f32 %v1963_v47, %v13046_v20  ;;  %v2557_v13 = vsub.f32 1.0, %v2556_v14  ;;  %v2726_v12 = vmul.f32 %v2553_v46, %v12790_v41  ;;  %v13165_v20 = vpop.f32.mrf.mxu3  ;;  %v2514_v41 = vadd.f32 %v13109_v61, %v2513_v34  ;;  %vm2562_vm15 = vmor %vm2560_vm12, %vm2561_vm10  ;;  %v13203_v51 = vpop.permute.xlu1 %9470  ;;  %v13248_v34 = vld [vmem:[#allocation2 + $0x30] sm:$0xff] }
 0x2b6   : > { %10321 = vrcp.f32 %v13157_v2  ;;  %v2526_v26 = vmul.f32 %v13163_v37, %v13097_v49  ;;  %vm2531_vm3 = vweird.f32 %v13163_v37  ;;  %v2579_v14 = vand.u32 2147483647, %v13157_v2 }
 0x2b7   : > { %v2558_v16 = vmul.f32 %v13120_v54, %v2557_v13  ;;  %v13170_v27 = vadd.f32 %v2076_v59, %v1964_v38  ;;  %2869 = vst.msk [vmem:[#allocation2 + $0x111] sm:$0xff] %vm1460_vm2, %v2726_v12  ;;  %2954 = vrot.lane.b32.xlu0 %v2726_v12, %s10714_s11  ;;  %v2518_v15 = vsel %vm2517_vm13, %v13109_v61, %v2514_v41  ;;  %10323 = vpow2.f32 %v8677_v8  ;;  %v13205_v61 = vpop.permute.xlu0 %9460  ;;  %vm13220_vm11 = vmor %vm2530_vm4, %vm2531_vm3 }
 0x2b8   : > { %v2527_v0 = vsub.f32 1.0, %v2526_v26  ;;  %v2523_v56 = vsel %vm13138_vm9, %v2522_v22, %v2518_v15  ;;  %v9462_v49 = vunpack.i.l.bf16 %v13205_v61  ;;  %v2581_v25 = vand.u32 2147483648, %v13157_v2 }
 0x2b9   : > { %v2559_v63 = vadd.f32 %v13120_v54, %v2558_v16  ;;  %v8678_v1 = vmul.f32 -1.442695, %v13170_v27  ;;  %v13196_v23 = vmul.f32 %v2523_v56, %v12869_v43  ;;  %v13234_v47 = vpop.permute.xlu2 %9490  ;;  %v13255_v16 = vld [vmem:[%s18182_s2] ss:$0 sm:$0xff]  ;;  %vm2575_vm8 = vweird.f32 %v13157_v2 }
 0x2ba   : > { %v2528_v4 = vmul.f32 %v13163_v37, %v2527_v0  ;;  %v9492_v46 = vunpack.i.l.bf16 %v13234_v47  ;;  %v3844_v13 = vsel %vm1460_vm2, %v3043_v33, %v9462_v49  ;;  %v1857_v41 = vadd.f32 %v13255_v16, %v13165_v20  ;;  %v3105_v0 = vld [vmem:[#allocation2 + $0x2] sm:$0xff] }
 0x2bb   : > { %v2563_v29 = vsel %vm2562_vm15, %v13120_v54, %v2559_v63  ;;  %10325 = vpow2.f32 %v8678_v1  ;;  %2867 = vst.msk [vmem:[#allocation2 + $0xf9] sm:$0xff] %vm1460_vm2, %v13196_v23  ;;  %v9472_v54 = vunpack.i.l.bf16 %v13203_v51  ;;  %4164 = vmatmul.f32.gmra.mxu3 %v3844_v13  ;;  %v9549_v63 = vpack.i.bf16 %v3212_v39, %v3211_v50 }
 0x2bc   : > { %v1966_v35 = vpop.f32.mrf.mxu1  ;;  %v2568_v53 = vsel %vm2565_vm14, %v2567_v62, %v2563_v29  ;;  %v13200_v6 = vpop.eup %10321  ;;  %v2529_v43 = vadd.f32 %v13163_v37, %v2528_v4  ;;  %v2582_v30 = vor.u32 1.1754944e-38, %v2581_v25  ;;  %v9463_v20 = vunpack.i.h.bf16 %v13205_v61 }
 0x2bd   : > { %v1967_v58 = vadd.f32 %v1966_v35, %v13050_v36  ;;  %v2727_v60 = vmul.f32 %v2568_v53, %v12880_v17  ;;  %v2571_v36 = vmul.f32 %v13200_v6, %v13157_v2  ;;  %v2079_v17 = vpop.f32.mrf.mxu2  ;;  %v10324_v7 = vpop.eup %10323  ;;  %vm2576_vm7 = vweird.f32 %v13200_v6 }
 0x2be   : > { %v2533_v11 = vsel %vm13220_vm11, %v13163_v37, %v2529_v43  ;;  %v1859_v44 = vpop.f32.mrf.mxu3  ;;  %v13250_v8 = vadd.f32 1.0, %v10324_v7  ;;  %vm2577_vm9 = vmor %vm2575_vm8, %vm2576_vm7  ;;  %v2921_v56 = vpop.permute.xlu1 %2920  ;;  %vm2580_vm5 = vcmp.eq.f32.partialorder %v2579_v14, 8.507059e+37  ;;  %v9473_v2 = vunpack.i.h.bf16 %v13203_v51  ;;  %v3213_v51 = vld [vmem:[#allocation2 + $0xaa] sm:$0xff] }
 0x2bf   : > { %2870 = vst.msk [vmem:[#allocation2 + $0x121] sm:$0xff] %vm1460_vm2, %v2727_v60  ;;  %v13226_v18 = vadd.f32 %v2079_v17, %v1967_v58  ;;  %2956 = vrot.lane.b32.xlu1 %v2727_v60, %s10714_s11  ;;  %v2572_v5 = vsub.f32 1.0, %v2571_v36  ;;  %2936 = vrot.lane.b32.xlu0 %v12643_v52, %s10714_s11  ;;  %v2538_v38 = vsel %vm13211_vm6, %v2537_v31, %v2533_v11  ;;  %v13270_v15 = vpop.permute.xlu0 %9465  ;;  %v9493_v58 = vunpack.i.h.bf16 %v13234_v47  ;;  %v3170_v17 = vld [vmem:[#allocation2 + $0x21] sm:$0xff] }
 0x2c0   : > { %v13244_v59 = vmul.f32 %v2538_v38, %v12957_v24  ;;  %v3906_v52 = vsel %vm1460_vm2, %v3169_v21, %v9472_v54  ;;  %v3938_v24 = vsel %vm1460_vm2, %v13248_v34, %v9492_v46  ;;  %10327 = vrcp.f32 %v13250_v8  ;;  %3013 = vst.msk [vmem:[#allocation3 + $0x49] sm:$0xff] %vm1427_vm0, %v2921_v56  ;;  %v13294_v54 = vld [vmem:[#allocation2 + $0x38] sm:$0xff] }
 0x2c1   : > { %v2573_v12 = vmul.f32 %v13200_v6, %v2572_v5  ;;  %v10326_v37 = vpop.eup %10325  ;;  %4384 = vmatmul.f32.vlgmr.msra.gmra.mxu0 %v3906_v52  ;;  %v8679_v22 = vmul.f32 -1.442695, %v13226_v18  ;;  %4497 = vmatmul.f32.vlgmr.msra.gmra.mxu1 %v3938_v24  ;;  %v9467_v35 = vunpack.i.l.bf16 %v13270_v15  ;;  %v2923_v61 = vpop.permute.xlu2 %2922  ;;  %v3939_v11 = vsel %vm1460_vm2, %v13294_v54, %v9493_v58  ;;  %v3106_v52 = vld [vmem:[#allocation2 + $0xa] sm:$0xff] }
 0x2c2   : > { %2868 = vst.msk [vmem:[#allocation2 + $0x109] sm:$0xff] %vm1460_vm2, %v13244_v59  ;;  %v13272_v42 = vadd.f32 1.0, %v10326_v37  ;;  %v9579_v25 = vpack.i.bf16 %v3214_v28, %v3213_v51  ;;  %v9487_v47 = vunpack.i.l.bf16 %v13175_v57  ;;  %v9468_v50 = vunpack.i.h.bf16 %v13270_v15 }
 0x2c3   : > { %v2574_v62 = vadd.f32 %v13200_v6, %v2573_v12  ;;  %10329 = vpow2.f32 %v8679_v22  ;;  %v3874_v43 = vsel %vm1460_vm2, %v3105_v0, %v9467_v35  ;;  %3014 = vst.msk [vmem:[#allocation3 + $0x51] sm:$0xff] %vm1427_vm0, %v2923_v61  ;;  %v2594_v13 = vand.u32 2147483647, %v13250_v8 }
 0x2c4   : > { %v1969_v26 = vpop.f32.mrf.mxu1  ;;  %10331 = vrcp.f32 %v13272_v42  ;;  %4271 = vmatmul.f32.vlgmr.msrb.gmra.mxu2 %v3874_v43  ;;  %v2596_v21 = vand.u32 2147483648, %v13250_v8  ;;  %vm2590_vm12 = vweird.f32 %v13250_v8  ;;  %vm2605_vm3 = vweird.f32 %v13272_v42 }
 0x2c5   : > { %v1970_v29 = vadd.f32 %v1969_v26, %v1857_v41  ;;  %v2578_v1 = vsel %vm2577_vm9, %v13200_v6, %v2574_v62  ;;  %v2082_v53 = vpop.f32.mrf.mxu2  ;;  %v3044_v6 = vld [vmem:[#allocation2 + $0x20] sm:$0xff]  ;;  %v3171_v26 = vld [vmem:[#allocation2 + $0x31] sm:$0xff]  ;;  %vm13328_vm13 = vcmp.eq.f32.partialorder %v2594_v13, 8.507059e+37 }
 0x2c6   : > { %v2583_v4 = vsel %vm2580_vm5, %v2582_v30, %v2578_v1  ;;  %v3845_v36 = vsel %vm1460_vm2, %v3044_v6, %v9463_v20  ;;  %v13289_v31 = vpop.eup %10327  ;;  %v1862_v33 = vpop.f32.mrf.mxu3  ;;  %v3875_v20 = vsel %vm1460_vm2, %v3106_v52, %v9468_v50  ;;  %v3908_v15 = vsel %vm1460_vm2, %v3171_v26, %v9487_v47  ;;  %v3097_v58 = vld [vmem:[#allocation2 + $0x121] sm:$0xff] }
 0x2c7   : > { %2938 = vrot.lane.b32.xlu1 %v12684_v48, %s10714_s11  ;;  %v2728_v60 = vmul.f32 %v2583_v4, %v12979_v55  ;;  %9550 = vrot.lane.b32.xlu0 %v9549_v63, %s10714_s11  ;;  %v13287_v32 = vadd.f32 %v2082_v53, %v1970_v29  ;;  %v1860_v48 = vadd.f32 %v13255_v16, %v1859_v44  ;;  %v2919_v12 = vpop.permute.xlu0 %2918  ;;  %vm2591_vm10 = vweird.f32 %v13289_v31  ;;  %v13325_v0 = vpop.permute.xlu1 %9475 }
 0x2c8   : > { %4167 = vmatmul.f32.gmra.mxu3 %v3845_v36  ;;  %v3907_v55 = vsel %vm1460_vm2, %v3170_v17, %v9473_v2  ;;  %v2586_v7 = vmul.f32 %v13289_v31, %v13250_v8  ;;  %3012 = vst.msk [vmem:[#allocation3 + $0x39] sm:$0xff] %vm1427_vm0, %v2919_v12  ;;  %v1863_v24 = vadd.f32 %v13255_v16, %v1862_v33  ;;  %v2597_v1 = vor.u32 1.1754944e-38, %v2596_v21  ;;  %vm2592_vm14 = vmor %vm2590_vm12, %vm2591_vm10  ;;  %v3172_v21 = vld [vmem:[#allocation2 + $0x39] sm:$0xff] }
 0x2c9   : > { %2871 = vst.msk [vmem:[#allocation2 + $0x129] sm:$0xff] %vm1460_vm2, %v2728_v60  ;;  %2958 = vrot.lane.b32.xlu2 %v2728_v60, %s10714_s11  ;;  %v10330_v49 = vpop.eup %10329  ;;  %4387 = vmatmul.f32.gmra.mxu0 %v3907_v55  ;;  %v8680_v5 = vmul.f32 -1.442695, %v13287_v32  ;;  %v13321_v30 = vpop.permute.xlu2 %9495  ;;  %v2611_v2 = vand.u32 2147483648, %v13272_v42  ;;  %v2609_v53 = vand.u32 2147483647, %v13272_v42  ;;  %v9477_v4 = vunpack.i.l.bf16 %v13325_v0 }
 0x2ca   : > { %4500 = vmatmul.f32.gmra.mxu1 %v3939_v11  ;;  %v13304_v39 = vadd.f32 1.0, %v10330_v49  ;;  %v13306_v38 = vpop.eup %10331  ;;  %v2587_v46 = vsub.f32 1.0, %v2586_v7 }
 0x2cb   : > { %10333 = vpow2.f32 %v8680_v5  ;;  %v2601_v37 = vmul.f32 %v13306_v38, %v13272_v42  ;;  %vm2606_vm15 = vweird.f32 %v13306_v38  ;;  %v9488_v42 = vunpack.i.h.bf16 %v13175_v57 }
 0x2cc   : > { %v1972_v14 = vpop.f32.mrf.mxu1  ;;  %10335 = vrcp.f32 %v13304_v39  ;;  %v2588_v22 = vmul.f32 %v13289_v31, %v2587_v46  ;;  %4274 = vmatmul.f32.gmra.mxu2 %v3875_v20  ;;  %vm2607_vm4 = vmor %vm2605_vm3, %vm2606_vm15  ;;  %v2612_v33 = vor.u32 1.1754944e-38, %v2611_v2  ;;  %vm2610_vm6 = vcmp.eq.f32.partialorder %v2609_v53, 8.507059e+37 }
 0x2cd   : > { %v1973_v44 = vadd.f32 %v1972_v14, %v1860_v48  ;;  %v2085_v41 = vpop.f32.mrf.mxu2  ;;  %v2602_v62 = vsub.f32 1.0, %v2601_v37  ;;  %v3846_v48 = vsel %vm1460_vm2, %v13248_v34, %v9477_v4  ;;  %v2626_v5 = vand.u32 2147483648, %v13304_v39 }
 0x2ce   : > { %v2589_v56 = vadd.f32 %v13289_v31, %v2588_v22  ;;  %v2624_v13 = vand.u32 2147483647, %v13304_v39  ;;  %v3909_v37 = vsel %vm1460_vm2, %v3172_v21, %v9488_v42  ;;  %vm2620_vm7 = vweird.f32 %v13304_v39 }
 0x2cf   : > { %v13317_v63 = vadd.f32 %v2085_v41, %v1973_v44  ;;  %9580 = vrot.lane.b32.xlu1 %v9579_v25, %s10714_s11  ;;  %v2603_v35 = vmul.f32 %v13306_v38, %v2602_v62  ;;  %v2925_v11 = vpop.permute.xlu0 %2924  ;;  %v9478_v25 = vunpack.i.h.bf16 %v13325_v0  ;;  %v2627_v62 = vor.u32 1.1754944e-38, %v2626_v5  ;;  %v3159_v0 = vld [vmem:[#allocation2 + $0x120] sm:$0xff] }
 0x2d0   : > { %v3098_v8 = vld [vmem:[#allocation2 + $0x129] sm:$0xff]  ;;  %v2593_v61 = vsel %vm2592_vm14, %v13289_v31, %v2589_v56  ;;  %v1865_v31 = vpop.f32.mrf.mxu3  ;;  %4170 = vmatmul.f32.gmra.mxu3 %v3846_v48  ;;  %3015 = vst.msk [vmem:[#allocation3 + $0x61] sm:$0xff] %vm1427_vm0, %v2925_v11  ;;  %vm2625_vm9 = vcmp.eq.f32.partialorder %v2624_v13, 8.507059e+37 }
 0x2d1   : > { %v10334_v60 = vpop.eup %10333  ;;  %4390 = vmatmul.f32.gmra.mxu0 %v3908_v15  ;;  %v8681_v6 = vmul.f32 -1.442695, %v13317_v63  ;;  %v13342_v43 = vpack.i.bf16 %v3098_v8, %v3097_v58  ;;  %v2598_v36 = vsel %vm13328_vm13, %v2597_v1, %v2593_v61  ;;  %v2604_v17 = vadd.f32 %v13306_v38, %v2603_v35  ;;  %v13369_v50 = vpop.permute.xlu2 %9500  ;;  %v3160_v12 = vld [vmem:[#allocation2 + $0x128] sm:$0xff]  ;;  %v3107_v15 = vld [vmem:[#allocation2 + $0x1a] sm:$0xff] }
 0x2d2   : > { %v13344_v28 = vpop.eup %10335  ;;  %v13351_v55 = vadd.f32 1.0, %v10334_v60  ;;  %v2729_v49 = vmul.f32 %v2598_v36, %v13151_v19  ;;  %v13371_v44 = vpop.permute.xlu1 %9480  ;;  %v1866_v52 = vadd.f32 %v13255_v16, %v1865_v31  ;;  %v3224_v22 = vld [vmem:[#allocation2 + $0x12a] sm:$0xff]  ;;  %v3847_v20 = vsel %vm1460_vm2, %v13294_v54, %v9478_v25  ;;  %v3108_v13 = vld [vmem:[#allocation2 + $0x22] sm:$0xff] }
 0x2d3   : > { %v2616_v7 = vmul.f32 %v13344_v28, %v13304_v39  ;;  %9555 = vrot.lane.b32.xlu2 %v13342_v43, %s10714_s11  ;;  %v2608_v34 = vsel %vm2607_vm4, %v13306_v38, %v2604_v17  ;;  %vm2621_vm11 = vweird.f32 %v13344_v28  ;;  %v9559_v8 = vpack.i.bf16 %v3160_v12, %v3159_v0 }
 0x2d4   : > { %v1975_v51 = vpop.f32.mrf.mxu1  ;;  %10337 = vrcp.f32 %v13351_v55  ;;  %2872 = vst.msk [vmem:[#allocation2 + $0x139] sm:$0xff] %vm1460_vm2, %v2729_v49  ;;  %v2613_v57 = vsel %vm2610_vm6, %v2612_v33, %v2608_v34  ;;  %2960 = vrot.lane.b32.xlu0 %v2729_v49, %s10714_s11  ;;  %vm2622_vm8 = vmor %vm2620_vm7, %vm2621_vm11  ;;  %v9497_v60 = vunpack.i.l.bf16 %v13321_v30  ;;  %v2639_v42 = vand.u32 2147483647, %v13351_v55  ;;  %v13413_v34 = vld [vmem:[#allocation2 + $0x49] sm:$0xff] }
 0x2d5   : > { %v2088_v19 = vpop.f32.mrf.mxu2  ;;  %v2617_v14 = vsub.f32 1.0, %v2616_v7  ;;  %10339 = vpow2.f32 %v8681_v6  ;;  %v2730_v47 = vmul.f32 %v2613_v57, %v13170_v27  ;;  %v1976_v38 = vadd.f32 %v1975_v51, %v1863_v24  ;;  %v3223_v24 = vld [vmem:[#allocation2 + $0x122] sm:$0xff] }
 0x2d6   : > { %v9482_v27 = vunpack.i.l.bf16 %v13371_v44  ;;  %v9564_v58 = vpack.i.bf16 %v3224_v22, %v3223_v24  ;;  %v2641_v49 = vand.u32 2147483648, %v13351_v55  ;;  %v9483_v33 = vunpack.i.h.bf16 %v13371_v44 }
 0x2d7   : > { %v2618_v46 = vmul.f32 %v13344_v28, %v2617_v14  ;;  %2873 = vst.msk [vmem:[#allocation2 + $0x141] sm:$0xff] %vm1460_vm2, %v2730_v47  ;;  %v13380_v41 = vadd.f32 %v2088_v19, %v1976_v38  ;;  %2962 = vrot.lane.b32.xlu1 %v2730_v47, %s10714_s11  ;;  %v13396_v4 = vpop.permute.xlu0 %9505  ;;  %v13424_v47 = vld [vmem:[#allocation2 + $0xb1] sm:$0xff]  ;;  %vm2635_vm10 = vweird.f32 %v13351_v55  ;;  %vm2640_vm13 = vcmp.eq.f32.partialorder %v2639_v42, 8.507059e+37 }
 0x2d8   : > { %v3876_v1 = vsel %vm1460_vm2, %v3107_v15, %v9482_v27  ;;  %4173 = vmatmul.f32.gmra.mxu3 %v3847_v20  ;;  %v9507_v51 = vunpack.i.l.bf16 %v13396_v4  ;;  %v2642_v12 = vor.u32 1.1754944e-38, %v2641_v49  ;;  %v13437_v27 = vld [vmem:[#allocation2 + $0xa9] sm:$0xff]  ;;  %v9508_v0 = vunpack.i.h.bf16 %v13396_v4  ;;  %v13471_v4 = vld [vmem:[#allocation2 + $0x51] sm:$0xff] }
 0x2d9   : > { %v2619_v26 = vadd.f32 %v13344_v28, %v2618_v46  ;;  %4393 = vmatmul.f32.gmra.mxu0 %v3909_v37  ;;  %v8682_v2 = vmul.f32 -1.442695, %v13380_v41  ;;  %4277 = vmatmul.f32.gmra.mxu2 %v3876_v1  ;;  %v2929_v7 = vpop.permute.xlu2 %2928  ;;  %v3047_v46 = vld [vmem:[#allocation2 + $0x48] sm:$0xff]  ;;  %v3877_v37 = vsel %vm1460_vm2, %v3108_v13, %v9483_v33 }
 0x2da   : > { %v13387_v29 = vpop.eup %10337  ;;  %v2927_v11 = vpop.permute.xlu1 %2926  ;;  %v3910_v5 = vsel %vm1460_vm2, %v13413_v34, %v9507_v51  ;;  %3017 = vst.msk [vmem:[#allocation3 + $0x79] sm:$0xff] %vm1427_vm0, %v2929_v7  ;;  %v13485_v7 = vld [vmem:[#allocation2 + $0xa8] sm:$0xff] }
 0x2db   : > { %v10340_v39 = vpop.eup %10339  ;;  %v2623_v53 = vsel %vm2622_vm8, %v13344_v28, %v2619_v26  ;;  %v2631_v54 = vmul.f32 %v13387_v29, %v13351_v55  ;;  %9560 = vrot.lane.b32.xlu2 %v9559_v8, %s10714_s11  ;;  %v1868_v28 = vpop.f32.mrf.mxu3  ;;  %10341 = vpow2.f32 %v8682_v2  ;;  %vm2636_vm5 = vweird.f32 %v13387_v29  ;;  %3016 = vst.msk [vmem:[#allocation3 + $0x69] sm:$0xff] %vm1427_vm0, %v2927_v11 }
 0x2dc   : > { %v1978_v56 = vpop.f32.mrf.mxu1  ;;  %v2628_v61 = vsel %vm2625_vm9, %v2627_v62, %v2623_v53  ;;  %v13399_v6 = vadd.f32 1.0, %v10340_v39  ;;  %9565 = vrot.lane.b32.xlu0 %v9564_v58, %s10714_s11  ;;  %v1869_v25 = vadd.f32 %v13255_v16, %v1868_v28  ;;  %vm13431_vm12 = vmor %vm2635_vm10, %vm2636_vm5  ;;  %v13447_v62 = vpack.i.bf16 %v13424_v47, %v13437_v27  ;;  %v3048_v28 = vld [vmem:[#allocation2 + $0x50] sm:$0xff] }
 0x2dd   : > { %v1979_v35 = vadd.f32 %v1978_v56, %v1866_v52  ;;  %v2091_v36 = vpop.f32.mrf.mxu2  ;;  %v13404_v17 = vmul.f32 %v2628_v61, %v13226_v18  ;;  %v2632_v48 = vsub.f32 1.0, %v2631_v54  ;;  %v3848_v52 = vsel %vm1460_vm2, %v3047_v46, %v9497_v60  ;;  %v13478_v61 = vld [vmem:[#allocation2 + $0xb0] sm:$0xff] }
 0x2de   : > { %10343 = vrcp.f32 %v13399_v6  ;;  %v3225_v57 = vld [vmem:[#allocation2 + $0x13a] sm:$0xff]  ;;  %v3226_v14 = vld [vmem:[#allocation2 + $0x142] sm:$0xff]  ;;  %v9502_v39 = vunpack.i.l.bf16 %v13369_v50  ;;  %v2656_v58 = vand.u32 2147483648, %v13399_v6  ;;  %vm2650_vm15 = vweird.f32 %v13399_v6 }
 0x2df   : > { %v13407_v31 = vadd.f32 %v2091_v36, %v1979_v35  ;;  %2874 = vst.msk [vmem:[#allocation2 + $0x151] sm:$0xff] %vm1460_vm2, %v13404_v17  ;;  %v2633_v18 = vmul.f32 %v13387_v29, %v2632_v48  ;;  %v9594_v44 = vpack.i.bf16 %v3226_v14, %v3225_v57  ;;  %v13443_v26 = vpop.permute.xlu0 %9510  ;;  %v9498_v35 = vunpack.i.h.bf16 %v13321_v30  ;;  %v3109_v48 = vld [vmem:[#allocation2 + $0x32] sm:$0xff] }
 0x2e0   : > { %4176 = vmatmul.f32.gmra.mxu3 %v3848_v52  ;;  %v3911_v30 = vsel %vm1460_vm2, %v13471_v4, %v9508_v0  ;;  %v2654_v36 = vand.u32 2147483647, %v13399_v6  ;;  %v3878_v33 = vsel %vm1460_vm2, %v3109_v48, %v9502_v39  ;;  %v2657_v57 = vor.u32 1.1754944e-38, %v2656_v58  ;;  %v13513_v52 = vld [vmem:[#allocation2 + $0xc2] sm:$0xff] }
 0x2e1   : > { %v8683_v19 = vmul.f32 -1.442695, %v13407_v31  ;;  %v2634_v38 = vadd.f32 %v13387_v29, %v2633_v18  ;;  %4396 = vmatmul.f32.gmra.mxu0 %v3910_v5  ;;  %9595 = vrot.lane.b32.xlu1 %v9594_v44, %s10714_s11  ;;  %v10342_v24 = vpop.eup %10341  ;;  %v13464_v53 = vpop.permute.xlu2 %9535  ;;  %v3849_v49 = vsel %vm1460_vm2, %v3048_v28, %v9498_v35  ;;  %v9574_v5 = vpack.i.bf16 %v13478_v61, %v13485_v7  ;;  %v3110_v35 = vld [vmem:[#allocation2 + $0x3a] sm:$0xff] }
 0x2e2   : > { %4280 = vmatmul.f32.gmra.mxu2 %v3877_v37  ;;  %v13450_v56 = vadd.f32 1.0, %v10342_v24  ;;  %vm2655_vm4 = vcmp.eq.f32.partialorder %v2654_v36, 8.507059e+37  ;;  %v9503_v44 = vunpack.i.h.bf16 %v13369_v50  ;;  %v9512_v13 = vunpack.i.l.bf16 %v13443_v26  ;;  %v13515_v37 = vld [vmem:[#allocation2 + $0xca] sm:$0xff] }
 0x2e3   : > { %10345 = vpow2.f32 %v8683_v19  ;;  %v2638_v22 = vsel %vm13431_vm12, %v13387_v29, %v2634_v38  ;;  %2940 = vrot.lane.b32.xlu2 %v12753_v45, %s10714_s11  ;;  %v13467_v45 = vpop.permute.xlu1 %9520  ;;  %v9609_v58 = vpack.i.bf16 %v13515_v37, %v13513_v52 }
 0x2e4   : > { %v1981_v21 = vpop.f32.mrf.mxu1  ;;  %v10344_v20 = vpop.eup %10343  ;;  %v2643_v15 = vsel %vm2640_vm13, %v2642_v12, %v2638_v22  ;;  %9570 = vrot.lane.b32.xlu0 %v13447_v62, %s10714_s11  ;;  %10347 = vrcp.f32 %v13450_v56  ;;  %v9522_v14 = vunpack.i.l.bf16 %v13467_v45  ;;  %v2669_v24 = vand.u32 2147483647, %v13450_v56 }
 0x2e5   : > { %v1982_v55 = vadd.f32 %v1981_v21, %v1869_v25  ;;  %v2094_v1 = vpop.f32.mrf.mxu2  ;;  %v13455_v29 = vmul.f32 %v2643_v15, %v13287_v32  ;;  %v2646_v2 = vmul.f32 %v10344_v20, %v13399_v6  ;;  %vm2651_vm14 = vweird.f32 %v10344_v20  ;;  %v13503_v25 = vld [vmem:[#allocation2 + $0xc9] sm:$0xff]  ;;  %v13507_v21 = vld [vmem:[#allocation2 + $0x61] sm:$0xff] }
 0x2e6   : > { %vm2652_vm3 = vmor %vm2650_vm15, %vm2651_vm14  ;;  %v2671_v22 = vand.u32 2147483648, %v13450_v56  ;;  %vm2665_vm11 = vweird.f32 %v13450_v56  ;;  %vm2670_vm8 = vcmp.eq.f32.partialorder %v2669_v24, 8.507059e+37 }
 0x2e7   : > { %v13460_v8 = vadd.f32 %v2094_v1, %v1982_v55  ;;  %2875 = vst.msk [vmem:[#allocation2 + $0x159] sm:$0xff] %vm1460_vm2, %v13455_v29  ;;  %v2647_v32 = vsub.f32 1.0, %v2646_v2  ;;  %v13490_v18 = vpop.permute.xlu0 %9515  ;;  %v13517_v55 = vld [vmem:[#allocation2 + $0xc1] sm:$0xff] }
 0x2e8   : > { %4179 = vmatmul.f32.gmra.mxu3 %v3849_v49  ;;  %v3049_v2 = vld [vmem:[#allocation2 + $0x60] sm:$0xff]  ;;  %v2672_v48 = vor.u32 1.1754944e-38, %v2671_v22 }
 0x2e9   : > { %v10346_v54 = vpop.eup %10345  ;;  %v2648_v51 = vmul.f32 %v10344_v20, %v2647_v32  ;;  %4399 = vmatmul.f32.gmra.mxu0 %v3911_v30  ;;  %v8684_v42 = vmul.f32 -1.442695, %v13460_v8  ;;  %2944 = vrot.lane.b32.xlu1 %v12933_v40, %s10714_s11  ;;  %v2935_v46 = vpop.permute.xlu2 %2934  ;;  %v3850_v39 = vsel %vm1460_vm2, %v3049_v2, %v9512_v13  ;;  %v3111_v13 = vld [vmem:[#allocation2 + $0x4a] sm:$0xff] }
 0x2ea   : > { %v13476_v60 = vadd.f32 1.0, %v10346_v54  ;;  %4283 = vmatmul.f32.gmra.mxu2 %v3878_v33  ;;  %v13494_v19 = vpop.eup %10347  ;;  %3020 = vst.msk [vmem:[#allocation3 + $0x99] sm:$0xff] %vm1427_vm0, %v2935_v46  ;;  %v3879_v54 = vsel %vm1460_vm2, %v3110_v35, %v9503_v44  ;;  %v13554_v33 = vld [vmem:[#allocation2 + $0xc8] sm:$0xff]  ;;  %v13566_v44 = vld [vmem:[#allocation2 + $0xc0] sm:$0xff] }
 0x2eb   : > { %v2649_v11 = vadd.f32 %v10344_v20, %v2648_v51  ;;  %2964 = vrot.lane.b32.xlu2 %v13404_v17, %s10714_s11  ;;  %v2661_v6 = vmul.f32 %v13494_v19, %v13450_v56  ;;  %v2933_v16 = vpop.permute.xlu1 %2932  ;;  %vm2666_vm6 = vweird.f32 %v13494_v19  ;;  %v9523_v51 = vunpack.i.h.bf16 %v13467_v45 }
 0x2ec   : > { %10349 = vrcp.f32 %v13476_v60  ;;  %9575 = vrot.lane.b32.xlu0 %v9574_v5, %s10714_s11  ;;  %3019 = vst.msk [vmem:[#allocation3 + $0x91] sm:$0xff] %vm1427_vm0, %v2933_v16  ;;  %vm2667_vm7 = vmor %vm2665_vm11, %vm2666_vm6  ;;  %v2684_v49 = vand.u32 2147483647, %v13476_v60  ;;  %v9513_v5 = vunpack.i.h.bf16 %v13443_v26  ;;  %vm2680_vm5 = vweird.f32 %v13476_v60  ;;  %v3100_v26 = vld [vmem:[#allocation2 + $0x141] sm:$0xff] }
 0x2ed   : > { %10351 = vpow2.f32 %v8684_v42  ;;  %v2653_v40 = vsel %vm2652_vm3, %v10344_v20, %v2649_v11  ;;  %v2662_v12 = vsub.f32 1.0, %v2661_v6  ;;  %v3912_v20 = vsel %vm1460_vm2, %v13507_v21, %v9522_v14 }
 0x2ee   : > { %v2658_v38 = vsel %vm2655_vm4, %v2657_v57, %v2653_v40  ;;  %v2686_v42 = vand.u32 2147483648, %v13476_v60  ;;  %v9517_v57 = vunpack.i.l.bf16 %v13490_v18  ;;  %v9604_v46 = vpack.i.bf16 %v13554_v33, %v13566_v44 }
 0x2ef   : > { %v13510_v17 = vmul.f32 %v2658_v38, %v13317_v63  ;;  %v13526_v63 = vpack.i.bf16 %v13503_v25, %v13517_v55  ;;  %v2663_v0 = vmul.f32 %v13494_v19, %v2662_v12  ;;  %v2931_v28 = vpop.permute.xlu0 %2930  ;;  %vm2685_vm12 = vcmp.eq.f32.partialorder %v2684_v49, 8.507059e+37 }
 0x2f0   : > { %4182 = vmatmul.f32.gmra.mxu3 %v3850_v39  ;;  %3018 = vst.msk [vmem:[#allocation3 + $0x81] sm:$0xff] %vm1427_vm0, %v2931_v28  ;;  %v3880_v22 = vsel %vm1460_vm2, %v3111_v13, %v9517_v57  ;;  %v3113_v13 = vld [vmem:[#allocation2 + $0x62] sm:$0xff] }
 0x2f1   : > { %2876 = vst.msk [vmem:[#allocation2 + $0x169] sm:$0xff] %vm1460_vm2, %v13510_v17  ;;  %4402 = vmatmul.f32.gmra.mxu0 %v3912_v20  ;;  %9600 = vrot.lane.b32.xlu1 %v13526_v63, %s10714_s11  ;;  %v2664_v30 = vadd.f32 %v13494_v19, %v2663_v0  ;;  %v3099_v20 = vld [vmem:[#allocation2 + $0x139] sm:$0xff] }
 0x2f2   : > { %v10350_v50 = vpop.eup %10349  ;;  %4286 = vmatmul.f32.gmra.mxu2 %v3879_v54  ;;  %v3051_v54 = vld [vmem:[#allocation2 + $0x78] sm:$0xff] }
 0x2f3   : > { %v10352_v15 = vpop.eup %10351  ;;  %v2676_v1 = vmul.f32 %v10350_v50, %v13476_v60  ;;  %9610 = vrot.lane.b32.xlu2 %v9609_v58, %s10714_s11  ;;  %v2668_v56 = vsel %vm2667_vm7, %v13494_v19, %v2664_v30  ;;  %vm2681_vm9 = vweird.f32 %v10350_v50  ;;  %v13562_v19 = vld [vmem:[#allocation2 + $0x69] sm:$0xff]  ;;  %v13564_v6 = vpop.permute.xlu1 %9525 }
 0x2f4   : > { %v13535_v32 = vadd.f32 1.0, %v10352_v15  ;;  %2942 = vrot.lane.b32.xlu0 %v12839_v3, %s10714_s11  ;;  %v2673_v11 = vsel %vm2670_vm8, %v2672_v48, %v2668_v56  ;;  %vm2682_vm10 = vmor %vm2680_vm5, %vm2681_vm9  ;;  %v2687_v3 = vor.u32 1.1754944e-38, %v2686_v42  ;;  %v3913_v38 = vsel %vm1460_vm2, %v13562_v19, %v9523_v51  ;;  %v3050_v60 = vld [vmem:[#allocation2 + $0x68] sm:$0xff]  ;;  %v13594_v51 = vld [vmem:[#allocation2 + $0x79] sm:$0xff] }
 0x2f5   : > { %v2677_v36 = vsub.f32 1.0, %v2676_v1  ;;  %v13559_v14 = vmul.f32 %v2673_v11, %v13380_v41  ;;  %v3851_v24 = vsel %vm1460_vm2, %v3050_v60, %v9513_v5  ;;  %v9537_v1 = vunpack.i.l.bf16 %v13464_v53  ;;  %v3162_v42 = vld [vmem:[#allocation2 + $0x140] sm:$0xff]  ;;  %v3161_v5 = vld [vmem:[#allocation2 + $0x138] sm:$0xff] }
 0x2f6   : > { %10353 = vrcp.f32 %v13535_v32  ;;  %v9527_v2 = vunpack.i.l.bf16 %v13564_v6  ;;  %v2701_v39 = vand.u32 2147483648, %v13535_v32  ;;  %v2699_v30 = vand.u32 2147483647, %v13535_v32 }
 0x2f7   : > { %v2678_v45 = vmul.f32 %v10350_v50, %v2677_v36  ;;  %2877 = vst.msk [vmem:[#allocation2 + $0x171] sm:$0xff] %vm1460_vm2, %v13559_v14  ;;  %v3227_v36 = vld [vmem:[#allocation2 + $0x152] sm:$0xff]  ;;  %v3914_v48 = vsel %vm1460_vm2, %v13594_v51, %v9537_v1  ;;  %vm2695_vm14 = vweird.f32 %v13535_v32  ;;  %v9528_v60 = vunpack.i.h.bf16 %v13564_v6 }
 0x2f8   : > { %4185 = vmatmul.f32.gmra.mxu3 %v3851_v24  ;;  %v3852_v28 = vsel %vm1460_vm2, %v3051_v54, %v9527_v2  ;;  %v2702_v49 = vor.u32 1.1754944e-38, %v2701_v39  ;;  %vm2700_vm3 = vcmp.eq.f32.partialorder %v2699_v30, 8.507059e+37  ;;  %v13624_v6 = vld [vmem:[#allocation2 + $0xd9] sm:$0xff] }
 0x2f9   : > { %v2679_v40 = vadd.f32 %v10350_v50, %v2678_v45  ;;  %4405 = vmatmul.f32.gmra.mxu0 %v3913_v38  ;;  %9605 = vrot.lane.b32.xlu1 %v9604_v46, %s10714_s11  ;;  %v9538_v38 = vunpack.i.h.bf16 %v13464_v53  ;;  %v13617_v53 = vld [vmem:[#allocation2 + $0xe1] sm:$0xff] }
 0x2fa   : > { %4289 = vmatmul.f32.gmra.mxu2 %v3880_v22  ;;  %v13629_v2 = vpack.i.bf16 %v13617_v53, %v13624_v6  ;;  %v13637_v54 = vld [vmem:[#allocation2 + $0xe0] sm:$0xff] }
 0x2fb   : > { %v2683_v41 = vsel %vm2682_vm10, %v10350_v50, %v2679_v40  ;;  %v13581_v50 = vpack.i.bf16 %v3100_v26, %v3099_v20  ;;  %2946 = vrot.lane.b32.xlu2 %v13035_v9, %s10714_s11  ;;  %v3228_v9 = vld [vmem:[#allocation2 + $0x15a] sm:$0xff]  ;;  %v9531_v45 = vpop.permute.xlu1 %9530  ;;  %v9541_v20 = vpop.permute.xlu2 %9540 }
 0x2fc   : > { %v10354_v16 = vpop.eup %10353  ;;  %v2688_v12 = vsel %vm2685_vm12, %v2687_v3, %v2683_v41  ;;  %v9624_v57 = vpack.i.bf16 %v3228_v9, %v3227_v36  ;;  %v9589_v3 = vpack.i.bf16 %v3162_v42, %v3161_v5  ;;  %v9532_v46 = vunpack.i.l.bf16 %v9531_v45  ;;  %v3053_v36 = vld [vmem:[#allocation2 + $0x90] sm:$0xff]  ;;  %v3054_v5 = vld [vmem:[#allocation2 + $0x98] sm:$0xff] }
 0x2fd   : > { %v13578_v15 = vmul.f32 %v2688_v12, %v13407_v31  ;;  %v2691_v0 = vmul.f32 %v10354_v16, %v13535_v32  ;;  %9585 = vrot.lane.b32.xlu0 %v13581_v50, %s10714_s11  ;;  %v9518_v31 = vunpack.i.h.bf16 %v13490_v18  ;;  %vm2696_vm13 = vweird.f32 %v10354_v16  ;;  %v3112_v18 = vld [vmem:[#allocation2 + $0x52] sm:$0xff]  ;;  %v3114_v9 = vld [vmem:[#allocation2 + $0x6a] sm:$0xff] }
 0x2fe   : > { %vm2697_vm15 = vmor %vm2695_vm14, %vm2696_vm13  ;;  %v4041_v32 = vld [vmem:[%s18193_s3 + $0x238] sm:$0xff]  ;;  %v3882_v24 = vsel %vm1460_vm2, %v3113_v13, %v9532_v46  ;;  %v9533_v39 = vunpack.i.h.bf16 %v9531_v45  ;;  %v3103_v13 = vld [vmem:[#allocation2 + $0x169] sm:$0xff] }
 0x2ff   : > { %2878 = vst.msk [vmem:[#allocation2 + $0x181] sm:$0xff] %vm1460_vm2, %v13578_v15  ;;  %v2692_v35 = vsub.f32 1.0, %v2691_v0  ;;  %v3881_v11 = vsel %vm1460_vm2, %v3112_v18, %v9518_v31  ;;  %4602 = vmatpush.msra.mxu3 %v4041_v32  ;;  %v3101_v12 = vld [vmem:[#allocation2 + $0x151] sm:$0xff]  ;;  %v3052_v0 = vld [vmem:[#allocation2 + $0x80] sm:$0xff]  ;;  %v9542_v31 = vunpack.i.l.bf16 %v9541_v20  ;;  %v9543_v18 = vunpack.i.h.bf16 %v9541_v20 }
 0x300   : > { %4188 = vmatmul.f32.gmra.mxu3 %v3852_v28  ;;  %v3853_v1 = vsel %vm1460_vm2, %v3052_v0, %v9528_v60  ;;  %v13639_v28 = vld [vmem:[#allocation2 + $0xd8] sm:$0xff]  ;;  %v3883_v42 = vsel %vm1460_vm2, %v3114_v9, %v9533_v39  ;;  %v3116_v60 = vld [vmem:[#allocation2 + $0x82] sm:$0xff]  ;;  %v3229_v20 = vld [vmem:[#allocation2 + $0x16a] sm:$0xff] }
 0x301   : > { %v2693_v58 = vmul.f32 %v10354_v16, %v2692_v35  ;;  %4408 = vmatmul.f32.gmra.mxu0 %v3914_v48  ;;  %2968 = vrot.lane.b32.xlu1 %v13510_v17, %s10714_s11  ;;  %v3102_v17 = vld [vmem:[#allocation2 + $0x159] sm:$0xff]  ;;  %v3854_v48 = vsel %vm1460_vm2, %v3053_v36, %v9542_v31  ;;  %v3104_v46 = vld [vmem:[#allocation2 + $0x171] sm:$0xff] }
 0x302   : > { %4292 = vmatmul.f32.gmra.mxu2 %v3881_v11  ;;  %v13622_v22 = vpack.i.bf16 %v3102_v17, %v3101_v12  ;;  %v3164_v35 = vld [vmem:[#allocation2 + $0x158] sm:$0xff]  ;;  %v3218_v11 = vld [vmem:[#allocation2 + $0xe2] sm:$0xff] }
 0x303   : > { %v2694_v56 = vadd.f32 %v10354_v16, %v2693_v58  ;;  %9625 = vrot.lane.b32.xlu2 %v9624_v57, %s10714_s11  ;;  %v3163_v58 = vld [vmem:[#allocation2 + $0x150] sm:$0xff]  ;;  %v3115_v57 = vld [vmem:[#allocation2 + $0x7a] sm:$0xff] }
 0x304   : > { %v9619_v30 = vpack.i.bf16 %v3164_v35, %v3163_v58  ;;  %v3230_v0 = vld [vmem:[#allocation2 + $0x172] sm:$0xff]  ;;  %v3165_v35 = vld [vmem:[#allocation2 + $0x168] sm:$0xff] }
 0x305   : > { %v2698_v40 = vsel %vm2697_vm15, %v10354_v16, %v2694_v56  ;;  %9590 = vrot.lane.b32.xlu0 %v9589_v3, %s10714_s11  ;;  %v13615_v16 = vld [vmem:[#allocation2 + $0x81] sm:$0xff]  ;;  %v9634_v56 = vpack.i.bf16 %v13637_v54, %v13639_v28  ;;  %v9654_v39 = vpack.i.bf16 %v3230_v0, %v3229_v20  ;;  %v13678_v58 = vld [vmem:[#allocation2 + $0x109] sm:$0xff]  ;;  %v13680_v9 = vld [vmem:[#allocation2 + $0xf9] sm:$0xff] }
 0x306   : > { %v2703_v26 = vsel %vm2700_vm3, %v2702_v49, %v2698_v40  ;;  %v13649_v49 = vld [vmem:[#allocation2 + $0xda] sm:$0xff]  ;;  %v3855_v40 = vsel %vm1460_vm2, %v3054_v5, %v9543_v18  ;;  %v13698_v18 = vld [vmem:[#allocation2 + $0x110] sm:$0xff] }
 0x307   : > { %v13609_v41 = vmul.f32 %v2703_v26, %v13460_v8  ;;  %v3915_v8 = vsel %vm1460_vm2, %v13615_v16, %v9538_v38  ;;  %v9639_v32 = vpack.i.bf16 %v3218_v11, %v13649_v49  ;;  %v3220_v38 = vld [vmem:[#allocation2 + $0xfa] sm:$0xff] }
 0x308   : > { %4191 = vmatmul.f32.gmra.mxu3 %v3853_v1  ;;  %v6611_v11 = vld [vmem:[%s18101_s5 + $0x78] sm:$0xff] }
 0x309   : > { %2879 = vst.msk [vmem:[#allocation2 + $0x189] sm:$0xff] %vm1460_vm2, %v13609_v41  ;;  %4411 = vmatmul.f32.gmra.mxu0 %v3915_v8  ;;  %9615 = vrot.lane.b32.xlu1 %v13622_v22, %s10714_s11  ;;  %v4040_v8 = vld [vmem:[%s18193_s3 + $0x230] sm:$0xff] }
 0x30a   : > { %4295 = vmatmul.f32.gmra.mxu2 %v3882_v24  ;;  %v13660_v24 = vpack.i.bf16 %v3104_v46, %v3103_v13  ;;  %4603 = vmatpush.msra.mxu3 %v4040_v8 }
 0x30b   : > { %9630 = vrot.lane.b32.xlu2 %v13629_v2, %s10714_s11  ;;  %6732 = vmatpush.msra.mxu2 %v6611_v11 }
 0x30d   : > { %2966 = vrot.lane.b32.xlu0 %v13455_v29, %s10714_s11  ;;  %v9546_v29 = vpop.permute.xlu2 %9545 }
 0x30e   : > { %v9547_v45 = vunpack.i.l.bf16 %v9546_v29  ;;  %v9548_v26 = vunpack.i.h.bf16 %v9546_v29  ;;  %v13696_v29 = vld [vmem:[#allocation2 + $0x108] sm:$0xff] }
 0x310   : > { %4194 = vmatmul.f32.gmra.mxu3 %v3854_v48  ;;  %v3884_v3 = vsel %vm1460_vm2, %v3115_v57, %v9547_v45  ;;  %v3885_v12 = vsel %vm1460_vm2, %v3116_v60, %v9548_v26  ;;  %v13705_v57 = vld [vmem:[#allocation2 + $0xf8] sm:$0xff] }
 0x311   : > { %9620 = vrot.lane.b32.xlu1 %v9619_v30, %s10714_s11  ;;  %v3096_v30 = vld [vmem:[#allocation2 + $0x111] sm:$0xff] }
 0x312   : > { %4298 = vmatmul.f32.gmra.mxu2 %v3883_v42  ;;  %v13683_v48 = vpack.i.bf16 %v3096_v30, %v13678_v58 }
 0x313   : > { %9635 = vrot.lane.b32.xlu2 %v9634_v56, %s10714_s11 }
 0x315   : > { %2948 = vrot.lane.b32.xlu0 %v13123_v10, %s10714_s11  ;;  %v3219_v10 = vld [vmem:[#allocation2 + $0xf2] sm:$0xff] }
 0x316   : > { %v9674_v17 = vpack.i.bf16 %v3220_v38, %v3219_v10  ;;  %v9694_v10 = vpack.i.bf16 %v13615_v16, %v13594_v51  ;;  %v3179_v38 = vld [vmem:[#allocation2 + $0x91] sm:$0xff]  ;;  %v4039_v51 = vld [vmem:[%s18193_s3 + $0x228] sm:$0xff]  ;;  %v9689_v16 = vpack.i.bf16 %v13562_v19, %v13507_v21 }
 0x317   : > { %4604 = vmatpush.msra.mxu3 %v4039_v51  ;;  %v5381_v51 = vld [vmem:[#allocation3 + $0x19] sm:$0xff] }
 0x318   : > { %4197 = vmatmul.f32.gmra.mxu3 %v3855_v40  ;;  %v9684_v40 = vpack.i.bf16 %v13698_v18, %v13696_v29 }
 0x319   : > { %2950 = vrot.lane.b32.xlu1 %v13196_v23, %s10714_s11 }
 0x31a   : > { %4301 = vmatmul.f32.gmra.mxu2 %v3884_v3 }
 0x31b   : > { %2970 = vrot.lane.b32.xlu2 %v13559_v14, %s10714_s11  ;;  %v3166_v14 = vld [vmem:[#allocation2 + $0x170] sm:$0xff] }
 0x31c   : > { %v9649_v31 = vpack.i.bf16 %v3166_v14, %v3165_v35  ;;  %v9669_v14 = vpack.i.bf16 %v13471_v4, %v13413_v34 }
 0x31d   : > { %9640 = vrot.lane.b32.xlu0 %v9639_v32, %s10714_s11  ;;  %v13710_v32 = vld [vmem:[#allocation2 + $0xf0] sm:$0xff] }
 0x31e   : > { %v9664_v26 = vpack.i.bf16 %v13705_v57, %v13710_v32 }
 0x321   : > { %9675 = vrot.lane.b32.xlu1 %v9674_v17, %s10714_s11 }
 0x322   : > { %4304 = vmatmul.f32.gmra.mxu2 %v3885_v12  ;;  %v6610_v12 = vld [vmem:[%s18101_s5 + $0x70] sm:$0xff] }
 0x323   : > { %v2959_v23 = vpop.permute.xlu2 %2958  ;;  %9645 = vrot.lane.b32.xlu2 %v13660_v24, %s10714_s11  ;;  %6733 = vmatpush.msra.mxu2 %v6610_v12 }
 0x324   : > { %3032 = vst.msk [vmem:[#allocation3 + $0x129] sm:$0xff] %vm1427_vm0, %v2959_v23  ;;  %v3180_v23 = vld [vmem:[#allocation2 + $0x99] sm:$0xff] }
 0x325   : > { %2972 = vrot.lane.b32.xlu0 %v13578_v15, %s10714_s11  ;;  %v9699_v34 = vpack.i.bf16 %v3180_v23, %v3179_v38 }
 0x329   : > { %v2955_v1 = vpop.permute.xlu0 %2954  ;;  %2974 = vrot.lane.b32.xlu1 %v13609_v41, %s10714_s11  ;;  %v13687_v41 = vld [vmem:[#allocation2 + $0xf1] sm:$0xff] }
 0x32a   : > { %3030 = vst.msk [vmem:[#allocation3 + $0x111] sm:$0xff] %vm1427_vm0, %v2955_v1  ;;  %v9659_v56 = vpack.i.bf16 %v13680_v9, %v13687_v41  ;;  %v3297_v1 = vld [vmem:[#allocation2 + $0x1a1] sm:$0xff] }
 0x32b   : > { %9650 = vrot.lane.b32.xlu2 %v9649_v31, %s10714_s11 }
 0x32d   : > { %9655 = vrot.lane.b32.xlu0 %v9654_v39, %s10714_s11  ;;  %v13676_v15 = vpop.permute.xlu2 %9555 }
 0x331   : > { %v2957_v36 = vpop.permute.xlu1 %2956  ;;  %v2937_v42 = vpop.permute.xlu0 %2936  ;;  %9680 = vrot.lane.b32.xlu1 %v13683_v48, %s10714_s11 }
 0x332   : > { %3031 = vst.msk [vmem:[#allocation3 + $0x121] sm:$0xff] %vm1427_vm0, %v2957_v36 }
 0x333   : > { %3021 = vst.msk [vmem:[#allocation3 + $0xa9] sm:$0xff] %vm1427_vm0, %v2937_v42  ;;  %2952 = vrot.lane.b32.xlu2 %v13244_v59, %s10714_s11 }
 0x335   : > { %9660 = vrot.lane.b32.xlu0 %v9659_v56, %s10714_s11  ;;  %v13700_v45 = vpop.permute.xlu2 %9560 }
 0x339   : > { %v2939_v5 = vpop.permute.xlu1 %2938  ;;  %v9551_v59 = vpop.permute.xlu0 %9550  ;;  %9685 = vrot.lane.b32.xlu1 %v9684_v40, %s10714_s11 }
 0x33a   : > { %3022 = vst.msk [vmem:[#allocation3 + $0xb1] sm:$0xff] %vm1427_vm0, %v2939_v5  ;;  %v9552_v3 = vunpack.i.l.bf16 %v9551_v59  ;;  %v9553_v60 = vunpack.i.h.bf16 %v9551_v59 }
 0x33b   : > { %9695 = vrot.lane.b32.xlu2 %v9694_v10, %s10714_s11 }
 0x33c   : > { %v3916_v46 = vsel %vm1460_vm2, %v3179_v38, %v9552_v3  ;;  %v3917_v8 = vsel %vm1460_vm2, %v3180_v23, %v9553_v60  ;;  %v13765_v3 = vld [vmem:[#allocation2 + $0x10a] sm:$0xff]  ;;  %v10613_v23 = vld [vmem:[#allocation2 + $0x92] sm:$0xff] }
 0x33d   : > { %4414 = vmatmul.f32.gmra.mxu0 %v3916_v46  ;;  %9665 = vrot.lane.b32.xlu0 %v9664_v26, %s10714_s11  ;;  %v2941_v17 = vpop.permute.xlu2 %2940 }
 0x33e   : > { %3023 = vst.msk [vmem:[#allocation3 + $0xc1] sm:$0xff] %vm1427_vm0, %v2941_v17 }
 0x341   : > { %v9581_v13 = vpop.permute.xlu1 %9580  ;;  %9690 = vrot.lane.b32.xlu1 %v9689_v16, %s10714_s11  ;;  %v13751_v36 = vld [vmem:[#allocation3 + $0xaa] sm:$0xff] }
 0x342   : > { %v9582_v19 = vunpack.i.l.bf16 %v9581_v13  ;;  %v9583_v31 = vunpack.i.h.bf16 %v9581_v13  ;;  %18220 = vst [vmem:[#allocation10_spill] sm:$0xff] %v13751_v36 }
 0x343   : > { %9710 = vrot.lane.b32.xlu2 %v13526_v63, %s10714_s11  ;;  %v3296_v63 = vld [vmem:[#allocation2 + $0x199] sm:$0xff] }
 0x344   : > { %v3918_v4 = vsel %vm1460_vm2, %v13437_v27, %v9582_v19  ;;  %v9744_v30 = vpack.i.bf16 %v3297_v1, %v3296_v63  ;;  %v13753_v27 = vld [vmem:[#allocation3 + $0xb2] sm:$0xff] }
 0x345   : > { %4417 = vmatmul.f32.gmra.mxu0 %v3917_v8  ;;  %9670 = vrot.lane.b32.xlu0 %v9669_v14, %s10714_s11  ;;  %v2965_v21 = vpop.permute.xlu2 %2964  ;;  %v13800_v1 = vld [vmem:[#allocation3 + $0x39] sm:$0xff] }
 0x346   : > { %v2961_v20 = vpop.permute.xlu0 %2960  ;;  %3035 = vst.msk [vmem:[#allocation3 + $0x151] sm:$0xff] %vm1427_vm0, %v2965_v21 }
 0x347   : > { %3033 = vst.msk [vmem:[#allocation3 + $0x139] sm:$0xff] %vm1427_vm0, %v2961_v20  ;;  %v5414_v20 = vld [vmem:[#allocation3 + $0x22] sm:$0xff] }
 0x349   : > { %9705 = vrot.lane.b32.xlu1 %v13447_v62, %s10714_s11  ;;  %v2963_v0 = vpop.permute.xlu1 %2962  ;;  %v6609_v62 = vld [vmem:[%s18101_s5 + $0x68] sm:$0xff] }
 0x34a   : > { %3034 = vst.msk [vmem:[#allocation3 + $0x141] sm:$0xff] %vm1427_vm0, %v2963_v0  ;;  %6734 = vmatpush.msra.mxu2 %v6609_v62  ;;  %v13809_v62 = vld [vmem:[#allocation3 + $0x31] sm:$0xff] }
 0x34b   : > { %9735 = vrot.lane.b32.xlu2 %v13622_v22, %s10714_s11  ;;  %v3919_v22 = vsel %vm1460_vm2, %v13424_v47, %v9583_v31  ;;  %v13768_v47 = vld [vmem:[#allocation2 + $0x112] sm:$0xff]  ;;  %v3118_v31 = vld [vmem:[#allocation2 + $0x9a] sm:$0xff] }
 0x34c   : > { %v9759_v38 = vpack.i.bf16 %v13768_v47, %v13765_v3 }
 0x34d   : > { %4420 = vmatmul.f32.gmra.mxu0 %v3918_v4  ;;  %9700 = vrot.lane.b32.xlu0 %v9699_v34, %s10714_s11  ;;  %v9611_v35 = vpop.permute.xlu2 %9610  ;;  %v5379_v34 = vld [vmem:[#allocation3 + $0x1] sm:$0xff]  ;;  %v5380_v4 = vld [vmem:[#allocation3 + $0x9] sm:$0xff] }
 0x34e   : > { %v13746_v39 = vpop.permute.xlu0 %9565  ;;  %v9612_v5 = vunpack.i.l.bf16 %v9611_v35  ;;  %v9613_v17 = vunpack.i.h.bf16 %v9611_v35 }
 0x350   : > { %v3921_v8 = vsel %vm1460_vm2, %v13503_v25, %v9613_v17 }
 0x351   : > { %9720 = vrot.lane.b32.xlu1 %v9659_v56, %s10714_s11 }
 0x353   : > { %9745 = vrot.lane.b32.xlu2 %v9744_v30, %s10714_s11  ;;  %v13761_v11 = vpop.permute.xlu1 %9595 }
 0x355   : > { %4423 = vmatmul.f32.gmra.mxu0 %v3919_v22  ;;  %9715 = vrot.lane.b32.xlu0 %v13629_v2, %s10714_s11  ;;  %v2947_v59 = vpop.permute.xlu2 %2946  ;;  %v3920_v2 = vsel %vm1460_vm2, %v13517_v55, %v9612_v5  ;;  %v9769_v22 = vpack.i.bf16 %v13800_v1, %v13809_v62 }
 0x356   : > { %v9571_v40 = vpop.permute.xlu0 %9570  ;;  %3026 = vst.msk [vmem:[#allocation3 + $0xe1] sm:$0xff] %vm1427_vm0, %v2947_v59  ;;  %v5416_v59 = vld [vmem:[#allocation3 + $0x3a] sm:$0xff] }
 0x357   : > { %v9572_v56 = vunpack.i.l.bf16 %v9571_v40  ;;  %v9573_v46 = vunpack.i.h.bf16 %v9571_v40 }
 0x359   : > { %v3856_v10 = vsel %vm1460_vm2, %v13485_v7, %v9572_v56  ;;  %9730 = vrot.lane.b32.xlu1 %v13581_v50, %s10714_s11  ;;  %v5382_v7 = vld [vmem:[#allocation3 + $0x21] sm:$0xff]  ;;  %v4038_v50 = vld [vmem:[%s18193_s3 + $0x220] sm:$0xff]  ;;  %v3857_v12 = vsel %vm1460_vm2, %v13478_v61, %v9573_v46 }
 0x35a   : > { %4200 = vmatmul.f32.gmra.mxu3 %v3856_v10  ;;  %v9754_v13 = vpack.i.bf16 %v5382_v7, %v5381_v51  ;;  %v5413_v61 = vld [vmem:[#allocation3 + $0x1a] sm:$0xff]  ;;  %v5411_v56 = vld [vmem:[#allocation3 + $0x2] sm:$0xff]  ;;  %v5412_v10 = vld [vmem:[#allocation3 + $0xa] sm:$0xff] }
 0x35b   : > { %9760 = vrot.lane.b32.xlu2 %v9759_v38, %s10714_s11  ;;  %v2945_v26 = vpop.permute.xlu1 %2944  ;;  %4605 = vmatpush.msra.mxu3 %v4038_v50  ;;  %v13807_v35 = vpack.i.bf16 %v5414_v20, %v5413_v61  ;;  %v13818_v38 = vpop.f32.mrf.mxu3  ;;  %v3119_v7 = vld [vmem:[#allocation2 + $0xaa] sm:$0xff]  ;;  %v6607_v46 = vld [vmem:[%s18101_s5 + $0x58] sm:$0xff] }
 0x35c   : > { %3025 = vst.msk [vmem:[#allocation3 + $0xd9] sm:$0xff] %vm1427_vm0, %v2945_v26  ;;  %v13840_v61 = vld [vmem:[#allocation3 + $0x38] sm:$0xff] }
 0x35d   : > { %4426 = vmatmul.f32.gmra.mxu0 %v3920_v2  ;;  %9725 = vrot.lane.b32.xlu0 %v13342_v43, %s10714_s11  ;;  %v13785_v55 = vpop.permute.xlu2 %9625  ;;  %v6608_v43 = vld [vmem:[%s18101_s5 + $0x60] sm:$0xff]  ;;  %18221 = vst [vmem:[#allocation11_spill] sm:$0xff] %v13818_v38 }
 0x35e   : > { %v9576_v60 = vpop.permute.xlu0 %9575  ;;  %6735 = vmatpush.msra.mxu2 %v6608_v43  ;;  %v3124_v38 = vld [vmem:[#allocation2 + $0xe2] sm:$0xff] }
 0x35f   : > { %v9577_v16 = vunpack.i.l.bf16 %v9576_v60  ;;  %v9578_v0 = vunpack.i.h.bf16 %v9576_v60  ;;  %v3168_v60 = vld [vmem:[#allocation2 + $0x188] sm:$0xff] }
 0x360   : > { %6736 = vmatpush.msra.mxu2 %v6607_v46  ;;  %v13874_v46 = vld [vmem:[#allocation3 + $0x48] sm:$0xff] }
 0x361   : > { %v3886_v14 = vsel %vm1460_vm2, %v10613_v23, %v9577_v16  ;;  %9755 = vrot.lane.b32.xlu1 %v9754_v13, %s10713_s30  ;;  %v3887_v30 = vsel %vm1460_vm2, %v3118_v31, %v9578_v0  ;;  %v9784_v16 = vpack.i.bf16 %v5412_v10, %v5411_v56  ;;  %v3167_v13 = vld [vmem:[#allocation2 + $0x180] sm:$0xff]  ;;  %v3232_v10 = vld [vmem:[#allocation2 + $0x18a] sm:$0xff] }
 0x362   : > { %4203 = vmatmul.f32.gmra.mxu3 %v3857_v12  ;;  %4307 = vmatmul.f32.gmra.mxu2 %v3886_v14  ;;  %v9774_v12 = vpack.i.bf16 %v3168_v60, %v3167_v13  ;;  %v5417_v14 = vld [vmem:[#allocation3 + $0x4a] sm:$0xff]  ;;  %v3231_v56 = vld [vmem:[#allocation2 + $0x182] sm:$0xff]  ;;  %v6606_v13 = vld [vmem:[%s18101_s5 + $0x50] sm:$0xff] }
 0x363   : > { %9765 = vrot.lane.b32.xlu2 %v13683_v48, %s10714_s11  ;;  %v9601_v21 = vpop.permute.xlu1 %9600  ;;  %v13842_v20 = vpop.f32.mrf.mxu3  ;;  %6737 = vmatpush.msra.mxu2 %v6606_v13 }
 0x364   : > { %v9602_v19 = vunpack.i.l.bf16 %v9601_v21  ;;  %v9603_v2 = vunpack.i.h.bf16 %v9601_v21  ;;  %18222 = vst [vmem:[#allocation19_spill] sm:$0xff] %v13842_v20 }
 0x365   : > { %4429 = vmatmul.f32.gmra.mxu0 %v3921_v8  ;;  %9740 = vrot.lane.b32.xlu0 %v13660_v24, %s10714_s11  ;;  %v13803_v25 = vpop.permute.xlu2 %9630  ;;  %v9749_v24 = vpack.i.bf16 %v5380_v4, %v5379_v34  ;;  %v13844_v34 = vld [vmem:[#allocation3 + $0x49] sm:$0xff] }
 0x366   : > { %v2943_v63 = vpop.permute.xlu0 %2942  ;;  %v3858_v48 = vsel %vm1460_vm2, %v13566_v44, %v9602_v19  ;;  %v5415_v44 = vld [vmem:[#allocation3 + $0x32] sm:$0xff]  ;;  %v3859_v43 = vsel %vm1460_vm2, %v13554_v33, %v9603_v2  ;;  %v9632_v8 = vunpack.i.l.bf16 %v13803_v25  ;;  %v9633_v2 = vunpack.i.h.bf16 %v13803_v25  ;;  %v5444_v25 = vld [vmem:[#allocation3 + $0x20] sm:$0xff] }
 0x367   : > { %3024 = vst.msk [vmem:[#allocation3 + $0xc9] sm:$0xff] %vm1427_vm0, %v2943_v63  ;;  %v13828_v50 = vpack.i.bf16 %v5416_v59, %v5415_v44  ;;  %v5418_v33 = vld [vmem:[#allocation3 + $0x52] sm:$0xff]  ;;  %v3120_v63 = vld [vmem:[#allocation2 + $0xb2] sm:$0xff] }
 0x368   : > { %v13846_v4 = vpack.i.bf16 %v5418_v33, %v5417_v14  ;;  %v5443_v14 = vld [vmem:[#allocation3 + $0x18] sm:$0xff]  ;;  %v6626_v59 = vld [vmem:[%s18101_s5 + $0xf0] sm:$0xff] }
 0x369   : > { %9795 = vrot.lane.b32.xlu1 %v13807_v35, %s10714_s11 }
 0x36a   : > { %4310 = vmatmul.f32.gmra.mxu2 %v3887_v30  ;;  %4206 = vmatmul.f32.gmra.mxu3 %v3858_v48  ;;  %v13849_v48 = vld [vmem:[#allocation3 + $0x30] sm:$0xff]  ;;  %v3860_v30 = vsel %vm1460_vm2, %v13639_v28, %v9632_v8  ;;  %v3861_v8 = vsel %vm1460_vm2, %v13637_v54, %v9633_v2 }
 0x36b   : > { %9770 = vrot.lane.b32.xlu2 %v9769_v22, %s10713_s30  ;;  %v9606_v5 = vpop.permute.xlu1 %9605 }
 0x36c   : > { %v9607_v40 = vunpack.i.l.bf16 %v9606_v5  ;;  %v9608_v21 = vunpack.i.h.bf16 %v9606_v5  ;;  %v9799_v5 = vpack.i.bf16 %v13840_v61, %v13849_v48 }
 0x36d   : > { %9750 = vrot.lane.b32.xlu0 %v9749_v24, %s10713_s30  ;;  %v13825_v17 = vpop.permute.xlu2 %9635  ;;  %v13853_v24 = vld [vmem:[#allocation3 + $0x51] sm:$0xff] }
 0x36e   : > { %v3888_v51 = vsel %vm1460_vm2, %v3119_v7, %v9607_v40  ;;  %v13851_v31 = vld [vmem:[#allocation3 + $0xc2] sm:$0xff]  ;;  %v3889_v22 = vsel %vm1460_vm2, %v3120_v63, %v9608_v21  ;;  %v13862_v44 = vld [vmem:[#allocation3 + $0xca] sm:$0xff]  ;;  %v9779_v40 = vpack.i.bf16 %v13853_v24, %v13844_v34  ;;  %v9637_v7 = vunpack.i.l.bf16 %v13825_v17 }
 0x36f   : > { %v13820_v26 = vpop.permute.xlu0 %9585  ;;  %v9638_v54 = vunpack.i.h.bf16 %v13825_v17  ;;  %v13912_v17 = vpop.f32.mrf.mxu2 }
 0x370   : > { %v3890_v21 = vsel %vm1460_vm2, %v13513_v52, %v9637_v7  ;;  %v3294_v52 = vld [vmem:[#allocation2 + $0x181] sm:$0xff]  ;;  %18224 = vst [vmem:[#allocation17_spill] sm:$0xff] %v13912_v17 }
 0x371   : > { %9805 = vrot.lane.b32.xlu1 %v13828_v50, %s10714_s11  ;;  %v6605_v7 = vld [vmem:[%s18101_s5 + $0x48] sm:$0xff]  ;;  %v3891_v13 = vsel %vm1460_vm2, %v13515_v37, %v9638_v54  ;;  %v13932_v37 = vld [vmem:[#allocation3 + $0x69] sm:$0xff] }
 0x372   : > { %4209 = vmatmul.f32.gmra.mxu3 %v3859_v43  ;;  %4313 = vmatmul.f32.gmra.mxu2 %v3888_v51  ;;  %v13876_v51 = vld [vmem:[#allocation3 + $0x50] sm:$0xff] }
 0x373   : > { %9785 = vrot.lane.b32.xlu2 %v9784_v16, %s10714_s11  ;;  %v2969_v23 = vpop.permute.xlu1 %2968  ;;  %v4037_v16 = vld [vmem:[%s18193_s3 + $0x218] sm:$0xff]  ;;  %v9809_v33 = vpack.i.bf16 %v13876_v51, %v13874_v46  ;;  %6738 = vmatpush.msra.mxu2 %v6605_v7 }
 0x374   : > { %3037 = vst.msk [vmem:[#allocation3 + $0x169] sm:$0xff] %vm1427_vm0, %v2969_v23  ;;  %4606 = vmatpush.msra.mxu3 %v4037_v16  ;;  %v13887_v23 = vpop.f32.mrf.mxu3  ;;  %v13914_v16 = vld [vmem:[#allocation3 + $0x60] sm:$0xff] }
 0x375   : > { %9775 = vrot.lane.b32.xlu0 %v9774_v12, %s10714_s11  ;;  %v2971_v0 = vpop.permute.xlu2 %2970  ;;  %v9819_v12 = vpack.i.bf16 %v3232_v10, %v3231_v56  ;;  %18223 = vst [vmem:[#allocation16_spill] sm:$0xff] %v13887_v23  ;;  %v5420_v10 = vld [vmem:[#allocation3 + $0x6a] sm:$0xff] }
 0x376   : > { %3038 = vst.msk [vmem:[#allocation3 + $0x171] sm:$0xff] %vm1427_vm0, %v2971_v0  ;;  %v9789_v0 = vpack.i.bf16 %v5444_v25, %v5443_v14  ;;  %v6631_v14 = vld [vmem:[%s18101_s5 + $0x118] sm:$0xff] }
 0x377   : > { %v13838_v19 = vpop.permute.xlu0 %9590  ;;  %6970 = vmatpush.msrb.mxu1 %v6631_v14  ;;  %v13948_v7 = vpop.f32.mrf.mxu2 }
 0x378   : > { %18226 = vst [vmem:[#allocation15_spill] sm:$0xff] %v13948_v7 }
 0x379   : > { %9815 = vrot.lane.b32.xlu1 %v13846_v4, %s10714_s11 }
 0x37a   : > { %4212 = vmatmul.f32.gmra.mxu3 %v3860_v30  ;;  %4316 = vmatmul.f32.gmra.mxu2 %v3889_v22  ;;  %v3295_v30 = vld [vmem:[#allocation2 + $0x189] sm:$0xff] }
 0x37b   : > { %9800 = vrot.lane.b32.xlu2 %v9799_v5, %s10715_s12  ;;  %v13869_v28 = vpop.permute.xlu1 %9615  ;;  %v5419_v5 = vld [vmem:[#allocation3 + $0x62] sm:$0xff]  ;;  %v9824_v2 = vpack.i.bf16 %v3295_v30, %v3294_v52  ;;  %v13941_v52 = vld [vmem:[#allocation3 + $0x79] sm:$0xff] }
 0x37c   : > { %v13936_v30 = vld [vmem:[#allocation3 + $0x81] sm:$0xff] }
 0x37d   : > { %9780 = vrot.lane.b32.xlu0 %v9779_v40, %s10713_s30  ;;  %v13885_v43 = vpop.permute.xlu2 %9645  ;;  %v13901_v40 = vld [vmem:[#allocation3 + $0x68] sm:$0xff] }
 0x37e   : > { %v9834_v25 = vpack.i.bf16 %v13901_v40, %v13914_v16 }
 0x37f   : > { %v2967_v60 = vpop.permute.xlu0 %2966  ;;  %v13984_v23 = vpop.f32.mrf.mxu2 }
 0x380   : > { %3036 = vst.msk [vmem:[#allocation3 + $0x159] sm:$0xff] %vm1427_vm0, %v2967_v60  ;;  %v6627_v60 = vld [vmem:[%s18101_s5 + $0xf8] sm:$0xff] }
 0x381   : > { %9820 = vrot.lane.b32.xlu1 %v9819_v12, %s10714_s11  ;;  %6845 = vmatpush.msrb.mxu0 %v6627_v60  ;;  %v13921_v12 = vpack.i.bf16 %v5420_v10, %v5419_v5  ;;  %18229 = vst [vmem:[#allocation22_spill] sm:$0xff] %v13984_v23 }
 0x382   : > { %4215 = vmatmul.f32.gmra.mxu3 %v3861_v8  ;;  %4319 = vmatmul.f32.gmra.mxu2 %v3890_v21  ;;  %v13926_v8 = vpop.f32.mrf.mxu3 }
 0x383   : > { %9810 = vrot.lane.b32.xlu2 %v9809_v33, %s10715_s12  ;;  %v13897_v63 = vpop.permute.xlu1 %9620  ;;  %18225 = vst [vmem:[#allocation14_spill] sm:$0xff] %v13926_v8  ;;  %6846 = vmatpush.msrb.mxu0 %v6626_v59 }
 0x385   : > { %9790 = vrot.lane.b32.xlu0 %v9789_v0, %s10715_s12  ;;  %v13904_v56 = vpop.permute.xlu2 %9650  ;;  %v13934_v0 = vld [vmem:[#allocation3 + $0x61] sm:$0xff] }
 0x386   : > { %v9829_v5 = vpack.i.bf16 %v13932_v37, %v13934_v0 }
 0x387   : > { %v2949_v22 = vpop.permute.xlu0 %2948  ;;  %v14015_v23 = vpop.f32.mrf.mxu2 }
 0x388   : > { %3027 = vst.msk [vmem:[#allocation3 + $0xf1] sm:$0xff] %vm1427_vm0, %v2949_v22 }
 0x389   : > { %9825 = vrot.lane.b32.xlu1 %v9824_v2, %s10714_s11  ;;  %v9844_v2 = vpack.i.bf16 %v13936_v30, %v13941_v52  ;;  %18232 = vst [vmem:[#allocation18_spill] sm:$0xff] %v14015_v23  ;;  %v5404_v23 = vld [vmem:[#allocation3 + $0x129] sm:$0xff] }
 0x38a   : > { %4322 = vmatmul.f32.gmra.mxu2 %v3891_v13  ;;  %v13950_v60 = vpop.f32.mrf.mxu3 }
 0x38b   : > { %9835 = vrot.lane.b32.xlu2 %v9834_v25, %s10715_s12  ;;  %v2951_v21 = vpop.permute.xlu1 %2950  ;;  %18227 = vst [vmem:[#allocation12_spill] sm:$0xff] %v13950_v60  ;;  %v13955_v25 = vld [vmem:[#allocation3 + $0x80] sm:$0xff] }
 0x38c   : > { %3028 = vst.msk [vmem:[#allocation3 + $0xf9] sm:$0xff] %vm1427_vm0, %v2951_v21  ;;  %v13979_v60 = vld [vmem:[#allocation3 + $0x99] sm:$0xff] }
 0x38d   : > { %9840 = vrot.lane.b32.xlu0 %v13921_v12, %s10714_s11  ;;  %v2953_v22 = vpop.permute.xlu2 %2952 }
 0x38e   : > { %3029 = vst.msk [vmem:[#allocation3 + $0x109] sm:$0xff] %vm1427_vm0, %v2953_v22  ;;  %v5421_v22 = vld [vmem:[#allocation3 + $0x7a] sm:$0xff] }
 0x38f   : > { %v9641_v33 = vpop.permute.xlu0 %9640 }
 0x390   : > { %v9642_v54 = vunpack.i.l.bf16 %v9641_v33  ;;  %v9643_v14 = vunpack.i.h.bf16 %v9641_v33  ;;  %v6604_v33 = vld [vmem:[%s18101_s5 + $0x40] sm:$0xff] }
 0x391   : > { %9830 = vrot.lane.b32.xlu1 %v9829_v5, %s10713_s30  ;;  %v5422_v5 = vld [vmem:[#allocation3 + $0x82] sm:$0xff]  ;;  %6739 = vmatpush.msra.mxu2 %v6604_v33 }
 0x392   : > { %v3922_v10 = vsel %vm1460_vm2, %v13624_v6, %v9642_v54  ;;  %v13957_v6 = vld [vmem:[#allocation3 + $0x78] sm:$0xff]  ;;  %v3923_v42 = vsel %vm1460_vm2, %v13617_v53, %v9643_v14  ;;  %v13982_v8 = vpack.i.bf16 %v5422_v5, %v5421_v22  ;;  %v13992_v53 = vpop.f32.mrf.mxu3  ;;  %v13998_v5 = vld [vmem:[#allocation3 + $0x90] sm:$0xff] }
 0x393   : > { %4432 = vmatmul.f32.gmra.mxu0 %v3922_v10  ;;  %9845 = vrot.lane.b32.xlu2 %v9844_v2, %s10713_s30  ;;  %v9676_v13 = vpop.permute.xlu1 %9675  ;;  %v13959_v54 = vld [vmem:[#allocation3 + $0x91] sm:$0xff]  ;;  %v9849_v2 = vpack.i.bf16 %v13955_v25, %v13957_v6  ;;  %18230 = vst [vmem:[#allocation20_spill] sm:$0xff] %v13992_v53 }
 0x394   : > { %v9879_v7 = vpack.i.bf16 %v13979_v60, %v13959_v54  ;;  %v9677_v14 = vunpack.i.l.bf16 %v9676_v13 }
 0x395   : > { %9860 = vrot.lane.b32.xlu0 %v13807_v35, %s10713_s30  ;;  %v13962_v10 = vpop.permute.xlu2 %9695  ;;  %v4036_v35 = vld [vmem:[%s18193_s3 + $0x210] sm:$0xff] }
 0x396   : > { %4607 = vmatpush.msra.mxu3 %v4036_v35 }
 0x397   : > { %v2973_v21 = vpop.permute.xlu0 %2972 }
 0x398   : > { %3039 = vst.msk [vmem:[#allocation3 + $0x181] sm:$0xff] %vm1427_vm0, %v2973_v21  ;;  %v13975_v21 = vpop.f32.mrf.mxu0 }
 0x399   : > { %18228 = vst [vmem:[#allocation13_spill] sm:$0xff] %v13975_v21  ;;  %9850 = vrot.lane.b32.xlu1 %v9849_v2, %s10715_s12  ;;  %v3924_v2 = vsel %vm1460_vm2, %v13687_v41, %v9677_v14  ;;  %v5423_v41 = vld [vmem:[#allocation3 + $0x92] sm:$0xff]  ;;  %v9678_v14 = vunpack.i.h.bf16 %v9676_v13  ;;  %v5424_v21 = vld [vmem:[#allocation3 + $0x9a] sm:$0xff] }
 0x39a   : > { %v14018_v20 = vpop.f32.mrf.mxu3  ;;  %v14022_v17 = vpack.i.bf16 %v5424_v21, %v5423_v41 }
 0x39b   : > { %4435 = vmatmul.f32.gmra.mxu0 %v3923_v42  ;;  %9855 = vrot.lane.b32.xlu2 %v13982_v8, %s10714_s11  ;;  %v2975_v35 = vpop.permute.xlu1 %2974  ;;  %v14000_v42 = vld [vmem:[#allocation3 + $0x98] sm:$0xff]  ;;  %18233 = vst [vmem:[#allocation24_spill] sm:$0xff] %v14018_v20  ;;  %v3925_v20 = vsel %vm1460_vm2, %v13680_v9, %v9678_v14  ;;  %v14045_v9 = vpop.f32.mrf.mxu2 }
 0x39c   : > { %3040 = vst.msk [vmem:[#allocation3 + $0x189] sm:$0xff] %vm1427_vm0, %v2975_v35  ;;  %v9884_v33 = vpack.i.bf16 %v14000_v42, %v13998_v5 }
 0x39d   : > { %9880 = vrot.lane.b32.xlu0 %v9879_v7, %s10713_s30  ;;  %v13996_v59 = vpop.permute.xlu2 %9710  ;;  %v9864_v7 = vpack.i.bf16 %v13874_v46, %v13840_v61  ;;  %18236 = vst [vmem:[#allocation26_spill] sm:$0xff] %v14045_v9 }
 0x39f   : > { %v13994_v22 = vpop.permute.xlu0 %9655 }
 0x3a0   : > { %v14010_v35 = vpop.f32.mrf.mxu0 }
 0x3a1   : > { %9870 = vrot.lane.b32.xlu1 %v13828_v50, %s10713_s30  ;;  %18231 = vst [vmem:[#allocation21_spill] sm:$0xff] %v14010_v35 }
 0x3a3   : > { %4438 = vmatmul.f32.gmra.mxu0 %v3924_v2  ;;  %9865 = vrot.lane.b32.xlu2 %v9864_v7, %s10714_s11  ;;  %v14013_v53 = vpop.permute.xlu1 %9680  ;;  %v5403_v2 = vld [vmem:[#allocation3 + $0x121] sm:$0xff] }
 0x3a4   : > { %v6603_v7 = vld [vmem:[%s18101_s5 + $0x38] sm:$0xff]  ;;  %v9899_v21 = vpack.i.bf16 %v5404_v23, %v5403_v2  ;;  %v14053_v23 = vpop.f32.mrf.mxu3 }
 0x3a5   : > { %9885 = vrot.lane.b32.xlu0 %v9884_v33, %s10715_s12  ;;  %v14020_v46 = vpop.permute.xlu2 %9735  ;;  %v6625_v33 = vld [vmem:[%s18101_s5 + $0xe8] sm:$0xff]  ;;  %6740 = vmatpush.msra.mxu2 %v6603_v7  ;;  %v14041_v7 = vld [vmem:[#allocation3 + $0xa8] sm:$0xff]  ;;  %18238 = vst [vmem:[#allocation28_spill] sm:$0xff] %v14053_v23  ;;  %v14088_v23 = vpop.f32.mrf.mxu2 }
 0x3a6   : > { %18234 = vst [vmem:[#allocation23_spill] sm:$0xff] %v14020_v46  ;;  %6847 = vmatpush.msrb.mxu0 %v6625_v33 }
 0x3a7   : > { %v9661_v50 = vpop.permute.xlu0 %9660  ;;  %18241 = vst [vmem:[#allocation31_spill] sm:$0xff] %v14088_v23 }
 0x3a8   : > { %v9662_v61 = vunpack.i.l.bf16 %v9661_v50 }
 0x3a9   : > { %9890 = vrot.lane.b32.xlu1 %v14022_v17, %s10714_s11 }
 0x3aa   : > { %v3862_v13 = vsel %vm1460_vm2, %v13710_v32, %v9662_v61  ;;  %v14043_v32 = vpop.f32.mrf.mxu0  ;;  %v9663_v61 = vunpack.i.h.bf16 %v9661_v50  ;;  %v9909_v50 = vpack.i.bf16 %v13849_v48, %v13751_v36  ;;  %v14073_v48 = vld [vmem:[#allocation3 + $0xa9] sm:$0xff] }
 0x3ab   : > { %4218 = vmatmul.f32.gmra.mxu3 %v3862_v13  ;;  %4441 = vmatmul.f32.gmra.mxu0 %v3925_v20  ;;  %v14038_v41 = vpop.permute.xlu1 %9685  ;;  %18235 = vst [vmem:[#allocation25_spill] sm:$0xff] %v14043_v32  ;;  %v14049_v20 = vld [vmem:[#allocation3 + $0xb0] sm:$0xff] }
 0x3ac   : > { %9875 = vrot.lane.b32.xlu2 %v13846_v4, %s10713_s30  ;;  %v9894_v4 = vpack.i.bf16 %v13809_v62, %v14041_v7  ;;  %v3863_v2 = vsel %vm1460_vm2, %v13705_v57, %v9663_v61  ;;  %v14068_v57 = vld [vmem:[#allocation3 + $0xb1] sm:$0xff] }
 0x3ad   : > { %9900 = vrot.lane.b32.xlu0 %v9899_v21, %s10713_s30  ;;  %v14047_v35 = vpop.permute.xlu2 %9745  ;;  %v9914_v21 = vpack.i.bf16 %v13800_v1, %v14049_v20  ;;  %18239 = vst [vmem:[#allocation29_spill] sm:$0xff] %v14068_v57  ;;  %v9904_v1 = vpack.i.bf16 %v14068_v57, %v14073_v48 }
 0x3ae   : > { %18237 = vst [vmem:[#allocation27_spill] sm:$0xff] %v14047_v35  ;;  %v3236_v35 = vld [vmem:[#allocation2 + $0x48] sm:$0xff] }
 0x3af   : > { %v9666_v14 = vpop.permute.xlu0 %9665 }
 0x3b0   : > { %v9667_v33 = vunpack.i.l.bf16 %v9666_v14  ;;  %v9668_v61 = vunpack.i.h.bf16 %v9666_v14  ;;  %v6624_v14 = vld [vmem:[%s18101_s5 + $0xe0] sm:$0xff] }
 0x3b1   : > { %9895 = vrot.lane.b32.xlu1 %v9894_v4, %s10715_s12  ;;  %v14071_v4 = vld [vmem:[#allocation3 + $0xc0] sm:$0xff]  ;;  %6848 = vmatpush.msrb.mxu0 %v6624_v14  ;;  %v14125_v14 = vpop.f32.mrf.mxu2 }
 0x3b2   : > { %v3892_v13 = vsel %vm1460_vm2, %v13649_v49, %v9667_v33  ;;  %v9682_v49 = vunpack.i.l.bf16 %v14013_v53  ;;  %v14086_v9 = vpop.f32.mrf.mxu0  ;;  %v3893_v36 = vsel %vm1460_vm2, %v3124_v38, %v9668_v61  ;;  %v9683_v38 = vunpack.i.h.bf16 %v14013_v53  ;;  %18245 = vst [vmem:[#allocation35_spill] sm:$0xff] %v14125_v14  ;;  %v3238_v14 = vld [vmem:[#allocation2 + $0x60] sm:$0xff] }
 0x3b3   : > { %4221 = vmatmul.f32.gmra.mxu3 %v3863_v2  ;;  %4325 = vmatmul.f32.gmra.mxu2 %v3892_v13  ;;  %v14065_v62 = vpop.permute.xlu1 %9690  ;;  %18240 = vst [vmem:[#allocation30_spill] sm:$0xff] %v14086_v9  ;;  %v9919_v9 = vpack.i.bf16 %v13876_v51, %v13753_v27  ;;  %v9687_v51 = vunpack.i.l.bf16 %v14038_v41 }
 0x3b4   : > { %9910 = vrot.lane.b32.xlu2 %v9909_v50, %s10714_s11  ;;  %v4035_v50 = vld [vmem:[%s18193_s3 + $0x208] sm:$0xff]  ;;  %v3864_v46 = vsel %vm1460_vm2, %v13696_v29, %v9682_v49  ;;  %v3865_v61 = vsel %vm1460_vm2, %v13698_v18, %v9683_v38 }
 0x3b5   : > { %9915 = vrot.lane.b32.xlu0 %v9914_v21, %s10715_s12  ;;  %v9761_v13 = vpop.permute.xlu2 %9760  ;;  %v6602_v21 = vld [vmem:[%s18101_s5 + $0x30] sm:$0xff]  ;;  %4608 = vmatpush.msra.mxu3 %v4035_v50  ;;  %v9924_v50 = vpack.i.bf16 %v13844_v34, %v14071_v4 }
 0x3b6   : > { %v9762_v32 = vunpack.i.l.bf16 %v9761_v13  ;;  %6741 = vmatpush.msra.mxu2 %v6602_v21  ;;  %v14101_v21 = vpop.f32.mrf.mxu3  ;;  %v5405_v34 = vld [vmem:[#allocation3 + $0x139] sm:$0xff] }
 0x3b7   : > { %v9671_v33 = vpop.permute.xlu0 %9670  ;;  %18242 = vst [vmem:[#allocation32_spill] sm:$0xff] %v14101_v21 }
 0x3b8   : > { %v9672_v2 = vunpack.i.l.bf16 %v9671_v33  ;;  %v3926_v23 = vsel %vm1460_vm2, %v13678_v58, %v9762_v32  ;;  %v9763_v58 = vunpack.i.h.bf16 %v9761_v13  ;;  %v3190_v13 = vld [vmem:[#allocation2 + $0x111] sm:$0xff] }
 0x3b9   : > { %9905 = vrot.lane.b32.xlu1 %v9904_v1, %s10713_s30  ;;  %4444 = vmatmul.f32.gmra.mxu0 %v3926_v23  ;;  %v14113_v23 = vld [vmem:[#allocation3 + $0xc9] sm:$0xff]  ;;  %v14123_v1 = vld [vmem:[#allocation3 + $0xc1] sm:$0xff] }
 0x3ba   : > { %v3940_v57 = vsel %vm1460_vm2, %v3236_v35, %v9672_v2  ;;  %v9673_v35 = vunpack.i.h.bf16 %v9671_v33  ;;  %v14115_v49 = vpop.f32.mrf.mxu0  ;;  %v3237_v2 = vld [vmem:[#allocation2 + $0x50] sm:$0xff]  ;;  %v9944_v33 = vpack.i.bf16 %v13914_v16, %v13851_v31  ;;  %v9934_v18 = vpack.i.bf16 %v14113_v23, %v14123_v1  ;;  %v14135_v16 = vld [vmem:[#allocation3 + $0xc8] sm:$0xff] }
 0x3bb   : > { %4224 = vmatmul.f32.gmra.mxu3 %v3864_v46  ;;  %4328 = vmatmul.f32.gmra.mxu2 %v3893_v36  ;;  %v14103_v29 = vpop.permute.xlu1 %9705  ;;  %v5406_v36 = vld [vmem:[#allocation3 + $0x141] sm:$0xff]  ;;  %18244 = vst [vmem:[#allocation34_spill] sm:$0xff] %v14115_v49 }
 0x3bc   : > { %4503 = vmatmul.f32.gmra.mxu1 %v3940_v57  ;;  %9925 = vrot.lane.b32.xlu2 %v9924_v50, %s10715_s12  ;;  %v9929_v57 = vpack.i.bf16 %v5406_v36, %v5405_v34  ;;  %v3941_v50 = vsel %vm1460_vm2, %v3237_v2, %v9673_v35  ;;  %v3927_v36 = vsel %vm1460_vm2, %v3190_v13, %v9763_v58  ;;  %v9567_v34 = vunpack.i.l.bf16 %v13746_v39  ;;  %v6623_v13 = vld [vmem:[%s18101_s5 + $0xd8] sm:$0xff] }
 0x3bd   : > { %9920 = vrot.lane.b32.xlu0 %v9919_v9, %s10714_s11  ;;  %v14111_v32 = vpop.permute.xlu2 %9765  ;;  %v3125_v9 = vld [vmem:[#allocation2 + $0xf2] sm:$0xff]  ;;  %v9688_v58 = vunpack.i.h.bf16 %v14038_v41  ;;  %v9939_v2 = vpack.i.bf16 %v13853_v24, %v14135_v16  ;;  %v3126_v41 = vld [vmem:[#allocation2 + $0xfa] sm:$0xff]  ;;  %6849 = vmatpush.msrb.mxu0 %v6623_v13 }
 0x3be   : > { %18243 = vst [vmem:[#allocation33_spill] sm:$0xff] %v14111_v32  ;;  %v3894_v53 = vsel %vm1460_vm2, %v3125_v9, %v9687_v51  ;;  %v9557_v51 = vunpack.i.l.bf16 %v13676_v15  ;;  %v14139_v35 = vpop.f32.mrf.mxu3 }
 0x3bf   : > { %v14109_v46 = vpop.permute.xlu0 %9700  ;;  %18247 = vst [vmem:[#allocation37_spill] sm:$0xff] %v14139_v35  ;;  %v3895_v49 = vsel %vm1460_vm2, %v3126_v41, %v9688_v58  ;;  %v5407_v35 = vld [vmem:[#allocation3 + $0x151] sm:$0xff]  ;;  %v14169_v58 = vpop.f32.mrf.mxu2  ;;  %v3192_v41 = vld [vmem:[#allocation2 + $0x129] sm:$0xff] }
 0x3c0   : > { %18250 = vst [vmem:[#allocation40_spill] sm:$0xff] %v14169_v58 }
 0x3c1   : > { %9930 = vrot.lane.b32.xlu1 %v9929_v57, %s10713_s30  ;;  %4447 = vmatmul.f32.gmra.mxu0 %v3927_v36  ;;  %v9692_v57 = vunpack.i.l.bf16 %v14065_v62  ;;  %v3191_v36 = vld [vmem:[#allocation2 + $0x121] sm:$0xff] }
 0x3c2   : > { %v3928_v24 = vsel %vm1460_vm2, %v3191_v36, %v9567_v34  ;;  %v14159_v21 = vpop.f32.mrf.mxu0  ;;  %v6630_v34 = vld [vmem:[%s18101_s5 + $0x110] sm:$0xff]  ;;  %v3239_v36 = vld [vmem:[#allocation2 + $0x68] sm:$0xff] }
 0x3c3   : > { %4227 = vmatmul.f32.gmra.mxu3 %v3865_v61  ;;  %4331 = vmatmul.f32.gmra.mxu2 %v3894_v53  ;;  %v14131_v38 = vpop.permute.xlu1 %9720  ;;  %v5408_v53 = vld [vmem:[#allocation3 + $0x159] sm:$0xff]  ;;  %18248 = vst [vmem:[#allocation38_spill] sm:$0xff] %v14159_v21  ;;  %v3942_v32 = vsel %vm1460_vm2, %v3238_v14, %v9692_v57  ;;  %v9558_v14 = vunpack.i.h.bf16 %v13676_v15 }
 0x3c4   : > { %4506 = vmatmul.f32.gmra.mxu1 %v3941_v50  ;;  %18246 = vst [vmem:[#allocation36_spill] sm:$0xff] %v14131_v38  ;;  %9935 = vrot.lane.b32.xlu2 %v9934_v18, %s10713_s30  ;;  %v3065_v50 = vld [vmem:[#allocation2 + $0x120] sm:$0xff]  ;;  %v9964_v38 = vpack.i.bf16 %v5408_v53, %v5407_v35  ;;  %v9693_v35 = vunpack.i.h.bf16 %v14065_v62  ;;  %v3066_v15 = vld [vmem:[#allocation2 + $0x128] sm:$0xff] }
 0x3c5   : > { %9945 = vrot.lane.b32.xlu0 %v9944_v33, %s10714_s11  ;;  %v14145_v61 = vpop.permute.xlu2 %9770  ;;  %v6601_v33 = vld [vmem:[%s18101_s5 + $0x28] sm:$0xff]  ;;  %v3866_v18 = vsel %vm1460_vm2, %v3065_v50, %v9557_v51  ;;  %6971 = vmatpush.msrb.mxu1 %v6630_v34 }
 0x3c6   : > { %6742 = vmatpush.msra.mxu2 %v6601_v33  ;;  %v9949_v33 = vpack.i.bf16 %v13901_v40, %v13862_v44  ;;  %v9562_v40 = vunpack.i.l.bf16 %v13700_v45  ;;  %v14181_v53 = vpop.f32.mrf.mxu3  ;;  %v14189_v50 = vld [vmem:[#allocation3 + $0xda] sm:$0xff] }
 0x3c7   : > { %v14143_v9 = vpop.permute.xlu0 %9715  ;;  %18252 = vst [vmem:[#allocation42_spill] sm:$0xff] %v14181_v53  ;;  %v9979_v34 = vpack.i.bf16 %v13957_v6, %v14189_v50  ;;  %v9697_v6 = vunpack.i.l.bf16 %v13962_v10  ;;  %v3240_v53 = vld [vmem:[#allocation2 + $0x78] sm:$0xff] }
 0x3c8   : > { %v3896_v62 = vsel %vm1460_vm2, %v13765_v3, %v9562_v40  ;;  %v9563_v40 = vunpack.i.h.bf16 %v13700_v45  ;;  %v4034_v45 = vld [vmem:[%s18193_s3 + $0x200] sm:$0xff]  ;;  %s10637_s3 = scalar_lea.hbm %s18105_s9, 256 }
 0x3c9   : > { %9940 = vrot.lane.b32.xlu1 %v9939_v2, %s10715_s12  ;;  %4450 = vmatmul.f32.gmra.mxu0 %v3928_v24  ;;  %v3944_v58 = vsel %vm1460_vm2, %v3240_v53, %v9697_v6  ;;  %v9588_v53 = vunpack.i.h.bf16 %v13820_v26  ;;  %v14265_v6 = vld [vmem:[#allocation3 + $0x109] sm:$0xff] }
 0x3ca   : > { %4609 = vmatpush.msra.mxu3 %v4034_v45  ;;  %v3897_v21 = vsel %vm1460_vm2, %v13768_v47, %v9563_v40  ;;  %18258 = vst [vmem:[#allocation48_spill] sm:$0xff] %v14265_v6 }
 0x3cb   : > { %4230 = vmatmul.f32.gmra.mxu3 %v3866_v18  ;;  %4334 = vmatmul.f32.gmra.mxu2 %v3895_v49  ;;  %v14164_v51 = vpop.permute.xlu1 %9730  ;;  %v14173_v49 = vld [vmem:[#allocation3 + $0xd8] sm:$0xff]  ;;  %v14194_v18 = vld [vmem:[#allocation3 + $0xe1] sm:$0xff] }
 0x3cc   : > { %4509 = vmatmul.f32.gmra.mxu1 %v3942_v32  ;;  %18249 = vst [vmem:[#allocation39_spill] sm:$0xff] %v14164_v51  ;;  %9950 = vrot.lane.b32.xlu2 %v9949_v33, %s10714_s11  ;;  %v9568_v32 = vunpack.i.h.bf16 %v13746_v39  ;;  %v9954_v13 = vpack.i.bf16 %v13934_v0, %v14173_v49  ;;  %v3867_v39 = vsel %vm1460_vm2, %v3066_v15, %v9558_v14  ;;  %v14205_v14 = vpop.f32.mrf.mxu0 }
 0x3cd   : > { %9965 = vrot.lane.b32.xlu0 %v9964_v38, %s10713_s30  ;;  %v14183_v2 = vpop.permute.xlu2 %9785  ;;  %v14185_v38 = vld [vmem:[#allocation3 + $0xd9] sm:$0xff]  ;;  %v3943_v0 = vsel %vm1460_vm2, %v3239_v36, %v9693_v35  ;;  %18253 = vst [vmem:[#allocation43_spill] sm:$0xff] %v14205_v14  ;;  %v9587_v35 = vunpack.i.l.bf16 %v13820_v26  ;;  %v6600_v36 = vld [vmem:[%s18101_s5 + $0x20] sm:$0xff] }
 0x3ce   : > { %v3929_v24 = vsel %vm1460_vm2, %v3192_v41, %v9568_v32  ;;  %v9969_v33 = vpack.i.bf16 %v14194_v18, %v14185_v38  ;;  %v9597_v32 = vunpack.i.l.bf16 %v13761_v11  ;;  %v14217_v41 = vld [vmem:[#allocation3 + $0xe0] sm:$0xff]  ;;  %6743 = vmatpush.msra.mxu2 %v6600_v36  ;;  %v3068_v26 = vld [vmem:[#allocation2 + $0x140] sm:$0xff] }
 0x3cf   : > { %v14179_v57 = vpop.permute.xlu0 %9725  ;;  %v9974_v45 = vpack.i.bf16 %v13932_v37, %v14217_v41  ;;  %v3129_v36 = vld [vmem:[#allocation2 + $0x122] sm:$0xff] }
 0x3d0   : > { %18251 = vst [vmem:[#allocation41_spill] sm:$0xff] %v14179_v57  ;;  %v3242_v57 = vld [vmem:[#allocation2 + $0x90] sm:$0xff] }
 0x3d1   : > { %9955 = vrot.lane.b32.xlu1 %v9954_v13, %s10715_s12  ;;  %4453 = vmatmul.f32.gmra.mxu0 %v3929_v24  ;;  %v14212_v13 = vpop.f32.mrf.mxu2  ;;  %v6622_v24 = vld [vmem:[%s18101_s5 + $0xd0] sm:$0xff] }
 0x3d2   : > { %18254 = vst [vmem:[#allocation44_spill] sm:$0xff] %v14212_v13  ;;  %6850 = vmatpush.msrb.mxu0 %v6622_v24  ;;  %v3194_v24 = vld [vmem:[#allocation2 + $0x141] sm:$0xff] }
 0x3d3   : > { %4233 = vmatmul.f32.gmra.mxu3 %v3867_v39  ;;  %4337 = vmatmul.f32.gmra.mxu2 %v3896_v62  ;;  %v14203_v3 = vpop.permute.xlu1 %9755  ;;  %v14219_v39 = vld [vmem:[#allocation3 + $0xf8] sm:$0xff] }
 0x3d4   : > { %4512 = vmatmul.f32.gmra.mxu1 %v3943_v0  ;;  %9980 = vrot.lane.b32.xlu2 %v9979_v34, %s10714_s11  ;;  %v3067_v0 = vld [vmem:[#allocation2 + $0x138] sm:$0xff]  ;;  %v14232_v34 = vpop.f32.mrf.mxu3  ;;  %v14254_v37 = vpop.f32.mrf.mxu0 }
 0x3d5   : > { %9970 = vrot.lane.b32.xlu0 %v9969_v33, %s10713_s30  ;;  %v14221_v62 = vpop.permute.xlu2 %9800  ;;  %v3193_v33 = vld [vmem:[#allocation2 + $0x139] sm:$0xff]  ;;  %18256 = vst [vmem:[#allocation46_spill] sm:$0xff] %v14232_v34  ;;  %v3868_v14 = vsel %vm1460_vm2, %v3067_v0, %v9587_v35  ;;  %v10009_v35 = vpack.i.bf16 %v13936_v30, %v14219_v39  ;;  %v9698_v30 = vunpack.i.h.bf16 %v13962_v10  ;;  %v3869_v0 = vsel %vm1460_vm2, %v3068_v26, %v9588_v53 }
 0x3d6   : > { %v3930_v13 = vsel %vm1460_vm2, %v3193_v33, %v9597_v32  ;;  %18257 = vst [vmem:[#allocation47_spill] sm:$0xff] %v14254_v37  ;;  %v14261_v32 = vld [vmem:[#allocation3 + $0xf0] sm:$0xff]  ;;  %v9702_v26 = vunpack.i.l.bf16 %v14109_v46 }
 0x3d7   : > { %v14215_v15 = vpop.permute.xlu0 %9740  ;;  %v3241_v33 = vld [vmem:[#allocation2 + $0x80] sm:$0xff]  ;;  %v9989_v37 = vpack.i.bf16 %v13941_v52, %v14261_v32  ;;  %v9627_v52 = vunpack.i.l.bf16 %v13785_v55 }
 0x3d8   : > { %18255 = vst [vmem:[#allocation45_spill] sm:$0xff] %v14215_v15 }
 0x3d9   : > { %9960 = vrot.lane.b32.xlu1 %v13921_v12, %s10713_s30  ;;  %4456 = vmatmul.f32.gmra.mxu0 %v3930_v13  ;;  %v14249_v12 = vld [vmem:[#allocation3 + $0xe2] sm:$0xff] }
 0x3da   : > { %v9984_v13 = vpack.i.bf16 %v13955_v25, %v14249_v12  ;;  %v3945_v25 = vsel %vm1460_vm2, %v3241_v33, %v9698_v30  ;;  %v9593_v30 = vunpack.i.h.bf16 %v13838_v19  ;;  %v9757_v33 = vunpack.i.l.bf16 %v14203_v3 }
 0x3db   : > { %4236 = vmatmul.f32.gmra.mxu3 %v3868_v14  ;;  %4340 = vmatmul.f32.gmra.mxu2 %v3897_v21  ;;  %v14245_v47 = vpop.permute.xlu1 %9795  ;;  %v9598_v21 = vunpack.i.h.bf16 %v13761_v11  ;;  %v9592_v14 = vunpack.i.l.bf16 %v13838_v19  ;;  %v14267_v11 = vpop.f32.mrf.mxu2  ;;  %v9758_v19 = vunpack.i.h.bf16 %v14203_v3  ;;  %v3946_v3 = vsel %vm1460_vm2, %v3242_v57, %v9702_v26 }
 0x3dc   : > { %4515 = vmatmul.f32.gmra.mxu1 %v3944_v58  ;;  %10010 = vrot.lane.b32.xlu2 %v10009_v35, %s10715_s12  ;;  %18259 = vst [vmem:[#allocation49_spill] sm:$0xff] %v14267_v11  ;;  %v14273_v35 = vld [vmem:[#allocation3 + $0x111] sm:$0xff]  ;;  %v14280_v53 = vpop.f32.mrf.mxu3  ;;  %v9797_v11 = vunpack.i.l.bf16 %v14245_v47  ;;  %v9803_v57 = vunpack.i.h.bf16 %v14221_v62 }
 0x3dd   : > { %9975 = vrot.lane.b32.xlu0 %v9974_v45, %s10715_s12  ;;  %v14259_v40 = vpop.permute.xlu2 %9810  ;;  %v3898_v10 = vsel %vm1460_vm2, %v3129_v36, %v9592_v14  ;;  %v3931_v45 = vsel %vm1460_vm2, %v3194_v24, %v9598_v21  ;;  %18260 = vst [vmem:[#allocation50_spill] sm:$0xff] %v14273_v35  ;;  %v10019_v34 = vpack.i.bf16 %v14273_v35, %v14265_v6  ;;  %v14286_v21 = vld [vmem:[#allocation3 + $0xf9] sm:$0xff]  ;;  %v14294_v24 = vld [vmem:[#allocation3 + $0xf1] sm:$0xff]  ;;  %v3195_v6 = vld [vmem:[#allocation2 + $0x151] sm:$0xff] }
 0x3de   : > { %18261 = vst [vmem:[#allocation51_spill] sm:$0xff] %v14280_v53  ;;  %v9798_v53 = vunpack.i.h.bf16 %v14245_v47  ;;  %v6599_v47 = vld [vmem:[%s18101_s5 + $0x18] sm:$0xff] }
 0x3df   : > { %v14257_v58 = vpop.permute.xlu0 %9750  ;;  %18262 = vst [vmem:[#allocation52_spill] sm:$0xff] %v14286_v21  ;;  %6744 = vmatpush.msra.mxu2 %v6599_v47  ;;  %v5409_v47 = vld [vmem:[#allocation3 + $0x169] sm:$0xff] }
 0x3e1   : > { %9985 = vrot.lane.b32.xlu1 %v9984_v13, %s10714_s11  ;;  %4459 = vmatmul.f32.gmra.mxu0 %v3931_v45  ;;  %v9617_v13 = vunpack.i.l.bf16 %v13869_v28  ;;  %v3069_v45 = vld [vmem:[#allocation2 + $0x150] sm:$0xff] }
 0x3e3   : > { %4239 = vmatmul.f32.gmra.mxu3 %v3869_v0  ;;  %4343 = vmatmul.f32.gmra.mxu2 %v3898_v10  ;;  %v14282_v14 = vpop.permute.xlu1 %9805  ;;  %v14298_v10 = vld [vmem:[#allocation3 + $0x108] sm:$0xff]  ;;  %v3870_v15 = vsel %vm1460_vm2, %v3069_v45, %v9617_v13  ;;  %v14311_v35 = vpop.f32.mrf.mxu2 }
 0x3e4   : > { %4518 = vmatmul.f32.gmra.mxu1 %v3945_v25  ;;  %10020 = vrot.lane.b32.xlu2 %v10019_v34, %s10713_s30  ;;  %v10004_v34 = vpack.i.bf16 %v14286_v21, %v14294_v24  ;;  %v3130_v25 = vld [vmem:[#allocation2 + $0x12a] sm:$0xff]  ;;  %18264 = vst [vmem:[#allocation54_spill] sm:$0xff] %v14311_v35  ;;  %v10024_v21 = vpack.i.bf16 %v13959_v54, %v14298_v10  ;;  %v14330_v54 = vld [vmem:[#allocation3 + $0xf2] sm:$0xff]  ;;  %v14336_v45 = vpop.f32.mrf.mxu3 }
 0x3e5   : > { %9990 = vrot.lane.b32.xlu0 %v9989_v37, %s10715_s12  ;;  %v14296_v0 = vpop.permute.xlu2 %9835  ;;  %v14302_v37 = vpop.f32.mrf.mxu0  ;;  %v3899_v51 = vsel %vm1460_vm2, %v3130_v25, %v9593_v30  ;;  %v6621_v30 = vld [vmem:[%s18101_s5 + $0xc8] sm:$0xff]  ;;  %18265 = vst [vmem:[#allocation55_spill] sm:$0xff] %v14336_v45  ;;  %v9703_v25 = vunpack.i.h.bf16 %v14109_v46  ;;  %v3070_v46 = vld [vmem:[#allocation2 + $0x158] sm:$0xff] }
 0x3e6   : > { %18263 = vst [vmem:[#allocation53_spill] sm:$0xff] %v14302_v37  ;;  %v3932_v37 = vsel %vm1460_vm2, %v3195_v6, %v9627_v52  ;;  %v9802_v6 = vunpack.i.l.bf16 %v14221_v62  ;;  %6851 = vmatpush.msrb.mxu0 %v6621_v30  ;;  %v5410_v30 = vld [vmem:[#allocation3 + $0x171] sm:$0xff] }
 0x3e7   : > { %v14292_v36 = vpop.permute.xlu0 %9775 }
 0x3e9   : > { %10005 = vrot.lane.b32.xlu1 %v10004_v34, %s10713_s30  ;;  %4462 = vmatmul.f32.gmra.mxu0 %v3932_v37  ;;  %v9618_v34 = vunpack.i.h.bf16 %v13869_v28  ;;  %v9622_v37 = vunpack.i.l.bf16 %v13897_v63 }
 0x3eb   : > { %4242 = vmatmul.f32.gmra.mxu3 %v3870_v15  ;;  %4346 = vmatmul.f32.gmra.mxu2 %v3899_v51  ;;  %v14323_v13 = vpop.permute.xlu1 %9815  ;;  %v5349_v51 = vld [vmem:[#allocation3 + $0x18] sm:$0xff]  ;;  %v5350_v15 = vld [vmem:[#allocation3 + $0x20] sm:$0xff] }
 0x3ec   : > { %4521 = vmatmul.f32.gmra.mxu1 %v3946_v3  ;;  %10025 = vrot.lane.b32.xlu2 %v10024_v21, %s10715_s12  ;;  %v6406_v52 = vsel %vm1427_vm0, %v5349_v51, %v9757_v33  ;;  %v6407_v26 = vsel %vm1427_vm0, %v5350_v15, %v9758_v19  ;;  %v9628_v21 = vunpack.i.h.bf16 %v13785_v55  ;;  %v9772_v55 = vunpack.i.l.bf16 %v14145_v61  ;;  %v3131_v51 = vld [vmem:[#allocation2 + $0x13a] sm:$0xff] }
 0x3ed   : > { %9995 = vrot.lane.b32.xlu0 %v13982_v8, %s10713_s30  ;;  %v6438_v62 = vsel %vm1460_vm2, %v6406_v52, %v9797_v11  ;;  %v6439_v8 = vsel %vm1460_vm2, %v6407_v26, %v9798_v53  ;;  %v14350_v33 = vpop.permute.xlu2 %9845  ;;  %v10014_v11 = vpack.i.bf16 %v13998_v5, %v14330_v54  ;;  %v9773_v53 = vunpack.i.h.bf16 %v14145_v61  ;;  %v3243_v26 = vld [vmem:[#allocation2 + $0x98] sm:$0xff] }
 0x3ee   : > { %v14345_v19 = vsel %vm1493_vm1, %v6438_v62, %v9802_v6  ;;  %v14348_v28 = vsel %vm1493_vm1, %v6439_v8, %v9803_v57  ;;  %v9808_v15 = vunpack.i.h.bf16 %v14282_v14  ;;  %v9807_v6 = vunpack.i.l.bf16 %v14282_v14  ;;  %v3196_v62 = vld [vmem:[#allocation2 + $0x159] sm:$0xff]  ;;  %v14361_v8 = vpop.f32.mrf.mxu0 }
 0x3ef   : > { %v14342_v3 = vpop.permute.xlu0 %9780  ;;  %v3871_v57 = vsel %vm1460_vm2, %v3070_v46, %v9618_v34  ;;  %v3900_v52 = vsel %vm1460_vm2, %v3131_v51, %v9622_v37  ;;  %18266 = vst [vmem:[#allocation56_spill] sm:$0xff] %v14361_v8  ;;  %v3947_v5 = vsel %vm1460_vm2, %v3243_v26, %v9703_v25  ;;  %v9999_v61 = vpack.i.bf16 %v5410_v30, %v5409_v47  ;;  %v14367_v34 = vld [vmem:[#allocation3 + $0x110] sm:$0xff]  ;;  %v5352_v46 = vld [vmem:[#allocation3 + $0x38] sm:$0xff]  ;;  %v14371_v8 = vpop.f32.mrf.mxu2 }
 0x3f0   : > { %v3933_v45 = vsel %vm1460_vm2, %v3196_v62, %v9628_v21  ;;  %v5351_v37 = vld [vmem:[#allocation3 + $0x30] sm:$0xff]  ;;  %v9647_v51 = vunpack.i.l.bf16 %v13885_v43  ;;  %18267 = vst [vmem:[#allocation57_spill] sm:$0xff] %v14371_v8  ;;  %v14378_v25 = vpop.f32.mrf.mxu3  ;;  %v9813_v47 = vunpack.i.h.bf16 %v14259_v40  ;;  %v9812_v30 = vunpack.i.l.bf16 %v14259_v40  ;;  %v14394_v40 = vld [vmem:[#allocation3 + $0xfa] sm:$0xff] }
 0x3f1   : > { %10015 = vrot.lane.b32.xlu1 %v10014_v11, %s10714_s11  ;;  %4465 = vmatmul.f32.gmra.mxu0 %v3933_v45  ;;  %v9623_v11 = vunpack.i.h.bf16 %v13897_v63  ;;  %v6408_v21 = vsel %vm1427_vm0, %v5351_v37, %v9772_v55  ;;  %v6409_v45 = vsel %vm1427_vm0, %v5352_v46, %v9773_v53  ;;  %18268 = vst [vmem:[#allocation58_spill] sm:$0xff] %v14378_v25  ;;  %v9707_v26 = vunpack.i.l.bf16 %v14103_v29  ;;  %v3071_v37 = vld [vmem:[#allocation2 + $0x168] sm:$0xff] }
 0x3f2   : > { %v6441_v63 = vsel %vm1460_vm2, %v6409_v45, %v9808_v15  ;;  %v9783_v53 = vunpack.i.h.bf16 %v14342_v3  ;;  %v9782_v55 = vunpack.i.l.bf16 %v14342_v3  ;;  %v3132_v46 = vld [vmem:[#allocation2 + $0x142] sm:$0xff]  ;;  %v6598_v3 = vld [vmem:[%s18101_s5 + $0x10] sm:$0xff]  ;;  %v9817_v45 = vunpack.i.l.bf16 %v14323_v13 }
 0x3f3   : > { %4245 = vmatmul.f32.gmra.mxu3 %v3871_v57  ;;  %4349 = vmatmul.f32.gmra.mxu2 %v3900_v52  ;;  %v14365_v14 = vpop.permute.xlu1 %9820  ;;  %v6440_v57 = vsel %vm1460_vm2, %v6408_v21, %v9807_v6  ;;  %v9657_v52 = vunpack.i.l.bf16 %v13994_v22  ;;  %v14396_v6 = vld [vmem:[#allocation3 + $0x112] sm:$0xff]  ;;  %v9818_v21 = vunpack.i.h.bf16 %v14323_v13  ;;  %v3872_v25 = vsel %vm1460_vm2, %v3071_v37, %v9647_v51 }
 0x3f4   : > { %4524 = vmatmul.f32.gmra.mxu1 %v3947_v5  ;;  %10035 = vrot.lane.b32.xlu2 %v14022_v17, %s10713_s30  ;;  %v10039_v17 = vpack.i.bf16 %v13979_v60, %v14367_v34  ;;  %v14399_v15 = vsel %vm1493_vm1, %v6440_v57, %v9812_v30  ;;  %v10054_v60 = vpack.i.bf16 %v14049_v20, %v14396_v6  ;;  %v3244_v57 = vld [vmem:[#allocation2 + $0xa8] sm:$0xff]  ;;  %v6620_v51 = vld [vmem:[%s18101_s5 + $0xc0] sm:$0xff] }
 0x3f5   : > { %10000 = vrot.lane.b32.xlu0 %v9999_v61, %s10713_s30  ;;  %v14392_v5 = vpop.permute.xlu2 %9855  ;;  %v14402_v61 = vsel %vm1493_vm1, %v6441_v63, %v9813_v47  ;;  %v3901_v30 = vsel %vm1460_vm2, %v3132_v46, %v9623_v11  ;;  %v3197_v47 = vld [vmem:[#allocation2 + $0x169] sm:$0xff]  ;;  %6745 = vmatpush.msra.mxu2 %v6598_v3  ;;  %v5353_v63 = vld [vmem:[#allocation3 + $0x48] sm:$0xff]  ;;  %v3948_v20 = vsel %vm1460_vm2, %v3244_v57, %v9707_v26  ;;  %v9838_v3 = vunpack.i.h.bf16 %v14296_v0 }
 0x3f6   : > { %v14414_v8 = vpop.f32.mrf.mxu0  ;;  %v10029_v35 = vpack.i.bf16 %v14000_v42, %v14394_v40  ;;  %v3934_v13 = vsel %vm1460_vm2, %v3197_v47, %v9657_v52  ;;  %v7718_v11 = vld [vmem:[%s18103_s7 + $0x38] sm:$0xff]  ;;  %v6410_v26 = vsel %vm1427_vm0, %v5353_v63, %v9782_v55  ;;  %v9648_v42 = vunpack.i.h.bf16 %v13885_v43  ;;  %v14438_v57 = vld [vmem:[#allocation3 + $0x120] sm:$0xff]  ;;  %6852 = vmatpush.msrb.mxu0 %v6620_v51 }
 0x3f7   : > { %v14386_v62 = vpop.permute.xlu0 %9790  ;;  %18269 = vst [vmem:[#allocation59_spill] sm:$0xff] %v14414_v8  ;;  %v9652_v52 = vunpack.i.l.bf16 %v13904_v56  ;;  %v14432_v46 = vpop.f32.mrf.mxu2  ;;  %v9658_v43 = vunpack.i.h.bf16 %v13994_v22  ;;  %v9753_v55 = vunpack.i.h.bf16 %v14257_v58  ;;  %7823 = vmatpush.msrb.mxu3 %v7718_v11  ;;  %v6442_v47 = vsel %vm1460_vm2, %v6410_v26, %v9817_v45 }
 0x3f8   : > { %18271 = vst [vmem:[#allocation61_spill] sm:$0xff] %v14432_v46  ;;  %v14461_v45 = vpop.f32.mrf.mxu3  ;;  %v10049_v26 = vpack.i.bf16 %v14073_v48, %v14438_v57  ;;  %v5348_v46 = vld [vmem:[#allocation3 + $0x8] sm:$0xff]  ;;  %v9858_v48 = vunpack.i.h.bf16 %v14392_v5 }
 0x3f9   : > { %10040 = vrot.lane.b32.xlu1 %v10039_v17, %s10715_s12  ;;  %v5354_v17 = vld [vmem:[#allocation3 + $0x50] sm:$0xff]  ;;  %4468 = vmatmul.f32.gmra.mxu0 %v3934_v13  ;;  %18272 = vst [vmem:[#allocation62_spill] sm:$0xff] %v14461_v45  ;;  %v3245_v45 = vld [vmem:[#allocation2 + $0xb0] sm:$0xff] }
 0x3fa   : > { %v6411_v37 = vsel %vm1427_vm0, %v5354_v17, %v9783_v53  ;;  %v6619_v53 = vld [vmem:[%s18101_s5 + $0xb8] sm:$0xff] }
 0x3fb   : > { %4248 = vmatmul.f32.gmra.mxu3 %v3872_v25  ;;  %4352 = vmatmul.f32.gmra.mxu2 %v3901_v30  ;;  %v14426_v25 = vpop.permute.xlu1 %9825  ;;  %v9837_v30 = vunpack.i.l.bf16 %v14296_v0  ;;  %v6443_v0 = vsel %vm1460_vm2, %v6411_v37, %v9818_v21  ;;  %v14451_v13 = vld [vmem:[#allocation3 + $0x10a] sm:$0xff]  ;;  %v14453_v17 = vld [vmem:[#allocation3 + $0x122] sm:$0xff]  ;;  %v6597_v37 = vld [vmem:[%s18101_s5 + $0x8] sm:$0xff] }
 0x3fc   : > { %4527 = vmatmul.f32.gmra.mxu1 %v3948_v20  ;;  %18270 = vst [vmem:[#allocation60_spill] sm:$0xff] %v14426_v25  ;;  %10055 = vrot.lane.b32.xlu2 %v10054_v60, %s10714_s11  ;;  %v9788_v60 = vunpack.i.h.bf16 %v14183_v2  ;;  %v3133_v20 = vld [vmem:[#allocation2 + $0x152] sm:$0xff]  ;;  %v14459_v51 = vsel %vm1493_vm1, %v6443_v0, %v9838_v3  ;;  %v10069_v11 = vpack.i.bf16 %v14071_v4, %v14453_v17 }
 0x3fd   : > { %10030 = vrot.lane.b32.xlu0 %v10029_v35, %s10714_s11  ;;  %v9708_v35 = vunpack.i.h.bf16 %v14103_v29  ;;  %v14456_v22 = vsel %vm1493_vm1, %v6442_v47, %v9837_v30  ;;  %v14463_v21 = vpop.permute.xlu2 %9865  ;;  %v3072_v29 = vld [vmem:[#allocation2 + $0x170] sm:$0xff]  ;;  %6853 = vmatpush.msrb.mxu0 %v6619_v53  ;;  %v9848_v30 = vunpack.i.h.bf16 %v14350_v33  ;;  %v9847_v47 = vunpack.i.l.bf16 %v14350_v33 }
 0x3fe   : > { %v6618_v3 = vld [vmem:[%s18101_s5 + $0xb0] sm:$0xff]  ;;  %v3873_v0 = vsel %vm1460_vm2, %v3072_v29, %v9648_v42  ;;  %v3902_v4 = vsel %vm1460_vm2, %v3133_v20, %v9652_v52  ;;  %6746 = vmatpush.msra.mxu2 %v6597_v37  ;;  %v9857_v53 = vunpack.i.l.bf16 %v14392_v5  ;;  %v10044_v8 = vpack.i.bf16 %v14041_v7, %v14451_v13  ;;  %v6596_v5 = vld [vmem:[%s18101_s5] sm:$0xff]  ;;  %v6617_v7 = vld [vmem:[%s18101_s5 + $0xa8] sm:$0xff] }
 0x3ff   : > { %v14449_v63 = vpop.permute.xlu0 %9840  ;;  %v3198_v25 = vld [vmem:[#allocation2 + $0x171] sm:$0xff]  ;;  %6854 = vmatpush.msrb.mxu0 %v6618_v3  ;;  %v6405_v33 = vsel %vm1427_vm0, %v5348_v46, %v9753_v55  ;;  %v3949_v42 = vsel %vm1460_vm2, %v3245_v45, %v9708_v35  ;;  %v5357_v55 = vld [vmem:[#allocation3 + $0x78] sm:$0xff]  ;;  %v14498_v35 = vpop.f32.mrf.mxu0  ;;  %v9653_v45 = vunpack.i.h.bf16 %v13904_v56  ;;  %v9822_v3 = vunpack.i.l.bf16 %v14365_v14 }
 0x400   : > { %v3935_v52 = vsel %vm1460_vm2, %v3198_v25, %v9658_v43  ;;  %v14494_v20 = vsel %vm1460_vm2, %v6405_v33, %v9788_v60  ;;  %v5358_v29 = vld [vmem:[#allocation3 + $0x80] sm:$0xff]  ;;  %18273 = vst [vmem:[#allocation63_spill] sm:$0xff] %v14498_v35  ;;  %v6616_v25 = vld [vmem:[%s18101_s5 + $0xa0] sm:$0xff]  ;;  %v6414_v43 = vsel %vm1427_vm0, %v5357_v55, %v9847_v47  ;;  %6747 = vmatpush.msra.mxu2 %v6596_v5  ;;  %v6615_v56 = vld [vmem:[%s18101_s5 + $0x98] sm:$0xff] }
 0x401   : > { %10050 = vrot.lane.b32.xlu1 %v10049_v26, %s10715_s12  ;;  %4471 = vmatmul.f32.gmra.mxu0 %v3935_v52  ;;  %v6415_v60 = vsel %vm1427_vm0, %v5358_v29, %v9848_v30  ;;  %v14509_v26 = vsel %vm1460_vm2, %v6414_v43, %v9857_v53  ;;  %v14523_v30 = vpop.f32.mrf.mxu3  ;;  %v14527_v53 = vld [vmem:[#allocation3 + $0x128] sm:$0xff]  ;;  %v14532_v55 = vld [vmem:[#allocation3 + $0x140] sm:$0xff]  ;;  %v18277_v29 = vld [vmem:[#allocation10_spill] sm:$0xff] }
 0x402   : > { %6855 = vmatpush.msrb.mxu0 %v6617_v7  ;;  %v14512_v37 = vsel %vm1460_vm2, %v6415_v60, %v9858_v48  ;;  %18275 = vst [vmem:[#allocation65_spill] sm:$0xff] %v14523_v30  ;;  %v3298_v48 = vld [vmem:[#allocation2 + $0x32] sm:$0xff]  ;;  %v3199_v7 = vld [vmem:[#allocation2 + $0x181] sm:$0xff]  ;;  %v18278_v43 = vpack.i.bf16 %v13753_v27, %v18277_v29  ;;  %v3200_v30 = vld [vmem:[#allocation2 + $0x189] sm:$0xff] }
 0x403   : > { %4251 = vmatmul.f32.gmra.mxu3 %v3873_v0  ;;  %4355 = vmatmul.f32.gmra.mxu2 %v3902_v4  ;;  %v14496_v46 = vpop.permute.xlu1 %9830  ;;  %v3134_v4 = vld [vmem:[#allocation2 + $0x15a] sm:$0xff]  ;;  %v3936_v60 = vsel %vm1460_vm2, %v3199_v7, %v9822_v3  ;;  %v6629_v27 = vld [vmem:[%s18101_s5 + $0x108] sm:$0xff]  ;;  %v9713_v3 = vunpack.i.h.bf16 %v13996_v59 }
 0x404   : > { %4530 = vmatmul.f32.gmra.mxu1 %v3949_v42  ;;  %10070 = vrot.lane.b32.xlu2 %v10069_v11, %s10714_s11  ;;  %v14515_v11 = vpop.f32.mrf.mxu2  ;;  %v3903_v33 = vsel %vm1460_vm2, %v3134_v4, %v9653_v45  ;;  %v3246_v42 = vld [vmem:[#allocation2 + $0xc0] sm:$0xff]  ;;  %v18276_v52 = vld [vmem:[#allocation29_spill] sm:$0xff]  ;;  %v10084_v45 = vpack.i.bf16 %v14113_v23, %v14532_v55  ;;  %v6614_v4 = vld [vmem:[%s18101_s5 + $0x90] sm:$0xff] }
 0x405   : > { %10045 = vrot.lane.b32.xlu0 %v10044_v8, %s10714_s11  ;;  %v9712_v8 = vunpack.i.l.bf16 %v13996_v59  ;;  %18274 = vst [vmem:[#allocation64_spill] sm:$0xff] %v14515_v11  ;;  %6856 = vmatpush.msrb.mxu0 %v6616_v25  ;;  %v10059_v5 = vpack.i.bf16 %v18276_v52, %v14527_v53  ;;  %v6613_v23 = vld [vmem:[%s18101_s5 + $0x88] sm:$0xff]  ;;  %v6612_v7 = vld [vmem:[%s18101_s5 + $0x80] sm:$0xff] }
 0x406   : > { %v14525_v47 = vpop.permute.xlu2 %9875  ;;  %6972 = vmatpush.msrb.mxu1 %v6629_v27  ;;  %v14583_v11 = vld [vmem:[#allocation3 + $0x150] sm:$0xff] }
 0x407   : > { %v14518_v0 = vpop.permute.xlu0 %9860  ;;  %6857 = vmatpush.msrb.mxu0 %v6615_v56  ;;  %v3950_v25 = vsel %vm1460_vm2, %v3246_v42, %v9712_v8  ;;  %v9777_v8 = vunpack.i.l.bf16 %v14292_v36  ;;  %v14558_v56 = vpop.f32.mrf.mxu0  ;;  %v14563_v42 = vld [vmem:[#allocation3 + $0x138] sm:$0xff] }
 0x408   : > { %18279 = vst [vmem:[#allocation29_spill] sm:$0xff] %v14558_v56  ;;  %v3247_v56 = vld [vmem:[#allocation2 + $0xc8] sm:$0xff] }
 0x409   : > { %10065 = vrot.lane.b32.xlu1 %v18278_v43, %s10713_s30  ;;  %4474 = vmatmul.f32.gmra.mxu0 %v3936_v60  ;;  %v14576_v60 = vpop.f32.mrf.mxu3 }
 0x40a   : > { %6858 = vmatpush.msrb.mxu0 %v6614_v4  ;;  %18281 = vst [vmem:[#allocation66_spill] sm:$0xff] %v14576_v60  ;;  %v9832_v4 = vunpack.i.l.bf16 %v14496_v46 }
 0x40b   : > { %4358 = vmatmul.f32.gmra.mxu2 %v3903_v33  ;;  %8685 = vmatmul.msk.f32.vlgmr.msra.gmra.mxu3 %vm1460_vm2, %v3298_v48  ;;  %v14546_v52 = vpop.permute.xlu1 %9850  ;;  %v9823_v48 = vunpack.i.h.bf16 %v14365_v14  ;;  %v3299_v14 = vld [vmem:[#allocation2 + $0x3a] sm:$0xff] }
 0x40c   : > { %4533 = vmatmul.f32.gmra.mxu1 %v3950_v25  ;;  %10085 = vrot.lane.b32.xlu2 %v10084_v45, %s10715_s12  ;;  %v14570_v29 = vpop.f32.mrf.mxu2  ;;  %v3135_v25 = vld [vmem:[#allocation2 + $0x16a] sm:$0xff]  ;;  %v9833_v45 = vunpack.i.h.bf16 %v14496_v46  ;;  %v10099_v46 = vpack.i.bf16 %v14185_v38, %v14583_v11 }
 0x40d   : > { %10060 = vrot.lane.b32.xlu0 %v10059_v5, %s10715_s12  ;;  %v14565_v5 = vld [vmem:[#allocation3 + $0x12a] sm:$0xff]  ;;  %18280 = vst [vmem:[#allocation10_spill] sm:$0xff] %v14570_v29  ;;  %6859 = vmatpush.msrb.mxu0 %v6613_v23  ;;  %v3904_v27 = vsel %vm1460_vm2, %v3135_v25, %v9777_v8  ;;  %v10074_v29 = vpack.i.bf16 %v14123_v1, %v14563_v42  ;;  %v9843_v1 = vunpack.i.h.bf16 %v14449_v63  ;;  %v9842_v25 = vunpack.i.l.bf16 %v14449_v63 }
 0x40e   : > { %v14572_v43 = vpop.permute.xlu2 %9910  ;;  %v10079_v59 = vpack.i.bf16 %v14135_v16, %v14565_v5  ;;  %v3951_v16 = vsel %vm1460_vm2, %v3247_v56, %v9713_v3  ;;  %v3937_v23 = vsel %vm1460_vm2, %v3200_v30, %v9823_v48  ;;  %v5355_v3 = vld [vmem:[#allocation3 + $0x60] sm:$0xff]  ;;  %v5356_v56 = vld [vmem:[#allocation3 + $0x68] sm:$0xff]  ;;  %v9717_v48 = vunpack.i.l.bf16 %v14143_v9 }
 0x40f   : > { %v14561_v33 = vpop.permute.xlu0 %9880  ;;  %6860 = vmatpush.msrb.mxu0 %v6612_v7  ;;  %v9778_v7 = vunpack.i.h.bf16 %v14292_v36  ;;  %v6412_v30 = vsel %vm1427_vm0, %v5355_v3, %v9832_v4  ;;  %v6413_v38 = vsel %vm1427_vm0, %v5356_v56, %v9833_v45  ;;  %v5347_v4 = vld [vmem:[#allocation3] sm:$0xff]  ;;  %v9853_v3 = vunpack.i.h.bf16 %v14546_v52 }
 0x410   : > { %v6445_v63 = vsel %vm1460_vm2, %v6413_v38, %v9843_v1  ;;  %v3136_v45 = vld [vmem:[#allocation2 + $0x172] sm:$0xff]  ;;  %v9852_v56 = vunpack.i.l.bf16 %v14546_v52  ;;  %v10114_v52 = vpack.i.bf16 %v14249_v12, %v14189_v50 }
 0x411   : > { %10080 = vrot.lane.b32.xlu1 %v10079_v59, %s10714_s11  ;;  %4477 = vmatmul.f32.gmra.mxu0 %v3937_v23  ;;  %v14610_v23 = vpop.f32.mrf.mxu0  ;;  %v3248_v1 = vld [vmem:[#allocation2 + $0xd8] sm:$0xff]  ;;  %v14643_v12 = vsel %vm1493_vm1, %v6445_v63, %v9853_v3  ;;  %v3249_v63 = vld [vmem:[#allocation2 + $0xe0] sm:$0xff] }
 0x412   : > { %18282 = vst [vmem:[#allocation67_spill] sm:$0xff] %v14610_v23  ;;  %v3952_v38 = vsel %vm1460_vm2, %v3248_v1, %v9717_v48  ;;  %v14636_v48 = vld [vmem:[#allocation3 + $0x158] sm:$0xff] }
 0x413   : > { %4361 = vmatmul.f32.gmra.mxu2 %v3904_v27  ;;  %8686 = vmatmul.msk.f32.gmra.mxu3 %vm1460_vm2, %v3299_v14  ;;  %v14591_v8 = vpop.permute.xlu1 %9870  ;;  %v14601_v14 = vld [vmem:[#allocation3 + $0x13a] sm:$0xff]  ;;  %v6444_v27 = vsel %vm1460_vm2, %v6412_v30, %v9842_v25  ;;  %v3905_v25 = vsel %vm1460_vm2, %v3136_v45, %v9778_v7  ;;  %v14627_v45 = vpop.f32.mrf.mxu3 }
 0x414   : > { %4536 = vmatmul.f32.gmra.mxu1 %v3951_v16  ;;  %10100 = vrot.lane.b32.xlu2 %v10099_v46, %s10715_s12  ;;  %v10094_v36 = vpack.i.bf16 %v14173_v49, %v14601_v14  ;;  %v14612_v46 = vpop.f32.mrf.mxu2  ;;  %v3300_v30 = vld [vmem:[#allocation2 + $0x4a] sm:$0xff]  ;;  %18284 = vst [vmem:[#allocation69_spill] sm:$0xff] %v14627_v45  ;;  %v14640_v50 = vsel %vm1493_vm1, %v6444_v27, %v9852_v56  ;;  %v3301_v27 = vld [vmem:[#allocation2 + $0x52] sm:$0xff]  ;;  %v9913_v56 = vunpack.i.h.bf16 %v14572_v43 }
 0x415   : > { %10075 = vrot.lane.b32.xlu0 %v10074_v29, %s10715_s12  ;;  %v9752_v29 = vunpack.i.l.bf16 %v14257_v58  ;;  %18283 = vst [vmem:[#allocation68_spill] sm:$0xff] %v14612_v46  ;;  %v7717_v49 = vld [vmem:[%s18103_s7 + $0x30] sm:$0xff]  ;;  %v9787_v58 = vunpack.i.l.bf16 %v14183_v2  ;;  %v18285_v2 = vpack.i.bf16 %v13862_v44, %v13851_v31  ;;  %v5360_v45 = vld [vmem:[#allocation3 + $0x98] sm:$0xff] }
 0x416   : > { %v14606_v16 = vpop.permute.xlu2 %9925  ;;  %7824 = vmatpush.msrb.mxu3 %v7717_v49  ;;  %v10109_v49 = vpack.i.bf16 %v14194_v18, %v14636_v48 }
 0x417   : > { %v9886_v59 = vpop.permute.xlu0 %9885  ;;  %v6404_v7 = vsel %vm1427_vm0, %v5347_v4, %v9752_v29  ;;  %v9718_v29 = vunpack.i.h.bf16 %v14143_v9  ;;  %v14656_v9 = vld [vmem:[#allocation3 + $0x142] sm:$0xff] }
 0x418   : > { %v6436_v1 = vsel %vm1460_vm2, %v6404_v7, %v9787_v58  ;;  %v9888_v31 = vunpack.i.h.bf16 %v9886_v59  ;;  %v9887_v44 = vunpack.i.l.bf16 %v9886_v59  ;;  %v10104_v18 = vpack.i.bf16 %v14217_v41, %v14656_v9 }
 0x419   : > { %10095 = vrot.lane.b32.xlu1 %v10094_v36, %s10714_s11  ;;  %v14661_v59 = vpop.f32.mrf.mxu0  ;;  %v3953_v58 = vsel %vm1460_vm2, %v3249_v63, %v9718_v29 }
 0x41a   : > { %18286 = vst [vmem:[#allocation70_spill] sm:$0xff] %v14661_v59  ;;  %v14679_v29 = vsel %vm1493_vm1, %v14512_v37, %v9888_v31  ;;  %v9863_v37 = vunpack.i.h.bf16 %v14518_v0  ;;  %v14704_v59 = vld [vmem:[#allocation3 + $0x152] sm:$0xff] }
 0x41b   : > { %4364 = vmatmul.f32.gmra.mxu2 %v3905_v25  ;;  %8687 = vmatmul.msk.f32.gmra.mxu3 %vm1460_vm2, %v3300_v30  ;;  %v14629_v36 = vpop.permute.xlu1 %9890  ;;  %v9792_v25 = vunpack.i.l.bf16 %v14386_v62  ;;  %v14686_v63 = vpop.f32.mrf.mxu3 }
 0x41c   : > { %4539 = vmatmul.f32.gmra.mxu1 %v3952_v38  ;;  %10115 = vrot.lane.b32.xlu2 %v10114_v52, %s10713_s30  ;;  %v9862_v38 = vunpack.i.l.bf16 %v14518_v0  ;;  %v14658_v52 = vld [vmem:[#allocation3 + $0x15a] sm:$0xff]  ;;  %18288 = vst [vmem:[#allocation72_spill] sm:$0xff] %v14686_v63  ;;  %v9893_v23 = vunpack.i.h.bf16 %v14629_v36 }
 0x41d   : > { %10090 = vrot.lane.b32.xlu0 %v18285_v2, %s10713_s30  ;;  %v6468_v3 = vsel %vm1493_vm1, %v6436_v1, %v9792_v25  ;;  %v10129_v7 = vpack.i.bf16 %v14219_v39, %v14658_v52  ;;  %v5475_v2 = vld [vmem:[#allocation3 + $0x19] sm:$0xff]  ;;  %v14669_v25 = vpop.f32.mrf.mxu2  ;;  %v9793_v39 = vunpack.i.h.bf16 %v14386_v62  ;;  %v5476_v0 = vld [vmem:[#allocation3 + $0x21] sm:$0xff] }
 0x41e   : > { %v14649_v30 = vpop.permute.xlu2 %9935  ;;  %18287 = vst [vmem:[#allocation71_spill] sm:$0xff] %v14669_v25 }
 0x41f   : > { %v14646_v4 = vpop.permute.xlu0 %9900  ;;  %v6469_v25 = vsel %vm1493_vm1, %v14494_v20, %v9793_v39 }
 0x421   : > { %10110 = vrot.lane.b32.xlu1 %v10109_v49, %s10715_s12  ;;  %v14675_v49 = vsel %vm1493_vm1, %v14509_v26, %v9887_v44  ;;  %v14689_v26 = vpop.f32.mrf.mxu1  ;;  %v18290_v44 = vld [vmem:[#allocation36_spill] sm:$0xff]  ;;  %v14727_v60 = vpop.f32.mrf.mxu0 }
 0x422   : > { %18289 = vst [vmem:[#allocation73_spill] sm:$0xff] %v14689_v26  ;;  %v9927_v26 = vunpack.i.l.bf16 %v14606_v16 }
 0x423   : > { %8688 = vmatmul.msk.f32.gmra.mxu3 %vm1460_vm2, %v3301_v27  ;;  %6748 = vmatmul.f32.vlgmr.msra.gmra.mxu2 %v6468_v3  ;;  %v14671_v1 = vpop.permute.xlu1 %9895  ;;  %v6500_v27 = vsel %vm1427_vm0, %v5475_v2, %v9862_v38  ;;  %v9882_v2 = vunpack.i.l.bf16 %v14561_v33  ;;  %18291 = vst [vmem:[#allocation36_spill] sm:$0xff] %v14727_v60 }
 0x424   : > { %4542 = vmatmul.f32.gmra.mxu1 %v3953_v58  ;;  %10130 = vrot.lane.b32.xlu2 %v10129_v7, %s10714_s11  ;;  %v9898_v41 = vunpack.i.h.bf16 %v14671_v1  ;;  %v6532_v3 = vsel %vm1460_vm2, %v6500_v27, %v9913_v56  ;;  %v9722_v58 = vunpack.i.l.bf16 %v18290_v44  ;;  %v9883_v56 = vunpack.i.h.bf16 %v14561_v33  ;;  %v3302_v27 = vld [vmem:[#allocation2 + $0x62] sm:$0xff]  ;;  %v7931_v33 = vld [vmem:[%s18104_s8 + $0x18] sm:$0xff] }
 0x425   : > { %10105 = vrot.lane.b32.xlu0 %v10104_v18, %s10714_s11  ;;  %v14696_v18 = vld [vmem:[#allocation3 + $0x168] sm:$0xff]  ;;  %8040 = vmatpush.msrb.mxu2 %v7931_v33  ;;  %v9723_v33 = vunpack.i.h.bf16 %v18290_v44 }
 0x426   : > { %v6564_v38 = vsel %vm1493_vm1, %v6532_v3, %v9898_v41  ;;  %v14698_v7 = vpop.permute.xlu2 %9950  ;;  %v10124_v62 = vpack.i.bf16 %v14294_v24, %v14696_v18  ;;  %v9892_v41 = vunpack.i.l.bf16 %v14629_v36  ;;  %v3250_v3 = vld [vmem:[#allocation2 + $0xf0] sm:$0xff]  ;;  %v14712_v24 = vld [vmem:[#allocation3 + $0x16a] sm:$0xff]  ;;  %v9867_v36 = vunpack.i.l.bf16 %v14463_v21 }
 0x427   : > { %v14693_v31 = vpop.permute.xlu0 %9915  ;;  %6861 = vmatmul.f32.vlgmr.msrb.gmra.mxu0 %v6564_v38  ;;  %v10119_v38 = vpack.i.bf16 %v14261_v32, %v14704_v59  ;;  %v3954_v63 = vsel %vm1460_vm2, %v3250_v3, %v9722_v58  ;;  %v10144_v20 = vpack.i.bf16 %v14298_v10, %v14712_v24  ;;  %v6501_v32 = vsel %vm1427_vm0, %v5476_v0, %v9863_v37  ;;  %v14734_v37 = vpop.f32.mrf.mxu2 }
 0x428   : > { %v9918_v46 = vunpack.i.h.bf16 %v14693_v31  ;;  %v9872_v58 = vunpack.i.l.bf16 %v14591_v8  ;;  %18292 = vst [vmem:[#allocation74_spill] sm:$0xff] %v14734_v37  ;;  %v3252_v37 = vld [vmem:[#allocation2 + $0x108] sm:$0xff] }
 0x429   : > { %10125 = vrot.lane.b32.xlu1 %v10124_v62, %s10715_s12  ;;  %v5359_v62 = vld [vmem:[#allocation3 + $0x90] sm:$0xff] }
 0x42a   : > { %v6416_v10 = vsel %vm1427_vm0, %v5359_v62, %v9882_v2  ;;  %v9917_v2 = vunpack.i.l.bf16 %v14693_v31  ;;  %v9952_v31 = vunpack.i.l.bf16 %v14698_v7  ;;  %v3251_v62 = vld [vmem:[#allocation2 + $0xf8] sm:$0xff] }
 0x42b   : > { %8689 = vmatmul.msk.f32.gmra.mxu3 %vm1460_vm2, %v3302_v27  ;;  %6751 = vmatmul.f32.gmra.mxu2 %v6469_v25  ;;  %v14725_v39 = vpop.permute.xlu1 %9905  ;;  %v6417_v25 = vsel %vm1427_vm0, %v5360_v45, %v9883_v56  ;;  %v6533_v27 = vsel %vm1460_vm2, %v6501_v32, %v9867_v36  ;;  %v6448_v0 = vsel %vm1460_vm2, %v6416_v10, %v9892_v41  ;;  %v14750_v56 = vld [vmem:[#allocation3 + $0x188] sm:$0xff]  ;;  %v5477_v32 = vld [vmem:[#allocation3 + $0x31] sm:$0xff]  ;;  %v14752_v41 = vpop.f32.mrf.mxu1  ;;  %v9868_v36 = vunpack.i.h.bf16 %v14463_v21  ;;  %v3303_v10 = vld [vmem:[#allocation2 + $0x6a] sm:$0xff] }
 0x42c   : > { %4545 = vmatmul.f32.gmra.mxu1 %v3954_v63  ;;  %10145 = vrot.lane.b32.xlu2 %v10144_v20, %s10714_s11  ;;  %v6449_v3 = vsel %vm1460_vm2, %v6417_v25, %v9893_v23  ;;  %v10139_v45 = vpack.i.bf16 %v14394_v40, %v14330_v54  ;;  %18293 = vst [vmem:[#allocation75_spill] sm:$0xff] %v14752_v41  ;;  %v9938_v23 = vunpack.i.h.bf16 %v14649_v30  ;;  %v14759_v25 = vld [vmem:[#allocation3 + $0x170] sm:$0xff]  ;;  %v18294_v40 = vld [vmem:[#allocation52_spill] sm:$0xff] }
 0x42d   : > { %10120 = vrot.lane.b32.xlu0 %v10119_v38, %s10714_s11  ;;  %v6565_v38 = vsel %vm1493_vm1, %v6533_v27, %v9918_v46  ;;  %v6502_v44 = vsel %vm1427_vm0, %v5477_v32, %v9872_v58  ;;  %v9897_v46 = vunpack.i.l.bf16 %v14671_v1  ;;  %v3955_v54 = vsel %vm1460_vm2, %v3251_v62, %v9723_v33  ;;  %v18295_v21 = vld [vmem:[#allocation50_spill] sm:$0xff]  ;;  %v14775_v33 = vpop.f32.mrf.mxu0  ;;  %v5478_v41 = vld [vmem:[#allocation3 + $0x39] sm:$0xff] }
 0x42e   : > { %v14736_v63 = vpop.f32.mrf.mxu3  ;;  %v14746_v20 = vpop.permute.xlu2 %9980  ;;  %v10134_v58 = vpack.i.bf16 %v18294_v40, %v14759_v25  ;;  %v10169_v1 = vpack.i.bf16 %v18295_v21, %v14750_v56  ;;  %v14773_v32 = vsel %vm1493_vm1, %v6449_v3, %v9917_v2  ;;  %18297 = vst [vmem:[#allocation50_spill] sm:$0xff] %v14775_v33  ;;  %v9928_v62 = vunpack.i.h.bf16 %v14606_v16  ;;  %v18299_v2 = vld [vmem:[#allocation33_spill] sm:$0xff]  ;;  %v14795_v21 = vld [vmem:[#allocation3 + $0x172] sm:$0xff] }
 0x42f   : > { %v14742_v60 = vpop.permute.xlu0 %9920  ;;  %6864 = vmatmul.f32.gmra.mxu0 %v6565_v38  ;;  %v6534_v38 = vsel %vm1460_vm2, %v6502_v44, %v9868_v36  ;;  %v14786_v44 = vsel %vm1493_vm1, %v6448_v0, %v9897_v46  ;;  %v9767_v36 = vunpack.i.l.bf16 %v18299_v2  ;;  %v10154_v0 = vpack.i.bf16 %v14367_v34, %v14795_v21  ;;  %v5592_v46 = vld [vmem:[#allocation3 + $0x121] sm:$0xff]  ;;  %v7716_v34 = vld [vmem:[%s18103_s7 + $0x28] sm:$0xff] }
 0x430   : > { %v9923_v33 = vunpack.i.h.bf16 %v14742_v60  ;;  %7825 = vmatpush.msrb.mxu3 %v7716_v34 }
 0x431   : > { %10140 = vrot.lane.b32.xlu1 %v10139_v45, %s10713_s30  ;;  %v5364_v45 = vld [vmem:[#allocation3 + $0xc8] sm:$0xff] }
 0x433   : > { %8690 = vmatmul.msk.f32.gmra.mxu3 %vm1460_vm2, %v3303_v10  ;;  %6754 = vmatmul.f32.gmra.mxu2 %v14345_v19  ;;  %v14769_v27 = vpop.permute.xlu1 %9930  ;;  %v6421_v19 = vsel %vm1427_vm0, %v5364_v45, %v9938_v23  ;;  %v14799_v23 = vld [vmem:[#allocation3 + $0x180] sm:$0xff] }
 0x434   : > { %4548 = vmatmul.f32.gmra.mxu1 %v3955_v54  ;;  %18296 = vst [vmem:[#allocation52_spill] sm:$0xff] %v14769_v27  ;;  %10170 = vrot.lane.b32.xlu2 %v10169_v1, %s10715_s12  ;;  %v14789_v3 = vsel %vm1460_vm2, %v6421_v19, %v9952_v31  ;;  %v9873_v31 = vunpack.i.h.bf16 %v14591_v8  ;;  %v3304_v19 = vld [vmem:[#allocation2 + $0x7a] sm:$0xff]  ;;  %v18301_v8 = vld [vmem:[#allocation48_spill] sm:$0xff] }
 0x435   : > { %10135 = vrot.lane.b32.xlu0 %v10134_v58, %s10715_s12  ;;  %v6566_v58 = vsel %vm1493_vm1, %v6534_v38, %v9928_v62  ;;  %v9908_v38 = vunpack.i.h.bf16 %v14725_v39  ;;  %v9907_v62 = vunpack.i.l.bf16 %v14725_v39  ;;  %v10149_v35 = vpack.i.bf16 %v18301_v8, %v14799_v23  ;;  %v14835_v34 = vpop.f32.mrf.mxu0  ;;  %v5595_v8 = vld [vmem:[#allocation3 + $0x141] sm:$0xff] }
 0x436   : > { %v14781_v10 = vpop.f32.mrf.mxu3  ;;  %v14783_v54 = vpop.f32.mrf.mxu2 }
 0x437   : > { %18298 = vst [vmem:[#allocation76_spill] sm:$0xff] %v14783_v54  ;;  %v14792_v40 = vpop.permute.xlu0 %9945  ;;  %v14797_v1 = vpop.permute.xlu2 %10010  ;;  %6867 = vmatmul.f32.gmra.mxu0 %v6566_v58  ;;  %v5593_v54 = vld [vmem:[#allocation3 + $0x129] sm:$0xff]  ;;  %v3956_v58 = vsel %vm1460_vm2, %v3252_v37, %v9767_v36 }
 0x438   : > { %v5361_v36 = vld [vmem:[#allocation3 + $0xa8] sm:$0xff] }
 0x439   : > { %v14804_v45 = vpop.f32.mrf.mxu1  ;;  %10155 = vrot.lane.b32.xlu1 %v10154_v0, %s10714_s11  ;;  %v9912_v0 = vunpack.i.l.bf16 %v14572_v43  ;;  %v6418_v16 = vsel %vm1427_vm0, %v5361_v36, %v9907_v62  ;;  %v9877_v62 = vunpack.i.l.bf16 %v14525_v47  ;;  %v3253_v36 = vld [vmem:[#allocation2 + $0x110] sm:$0xff] }
 0x43a   : > { %18300 = vst [vmem:[#allocation33_spill] sm:$0xff] %v14804_v45  ;;  %v10174_v45 = vpack.i.bf16 %v5593_v54, %v5592_v46  ;;  %v9922_v54 = vunpack.i.l.bf16 %v14742_v60 }
 0x43b   : > { %8691 = vmatmul.msk.f32.gmra.mxu3 %vm1460_vm2, %v3304_v19  ;;  %6757 = vmatmul.f32.gmra.mxu2 %v14348_v28  ;;  %v14818_v39 = vpop.permute.xlu1 %9940  ;;  %v6503_v28 = vsel %vm1427_vm0, %v5478_v41, %v9873_v31  ;;  %v5362_v19 = vld [vmem:[#allocation3 + $0xb0] sm:$0xff]  ;;  %v9937_v41 = vunpack.i.l.bf16 %v14649_v30  ;;  %v6450_v27 = vsel %vm1460_vm2, %v6418_v16, %v9912_v0  ;;  %v9948_v0 = vunpack.i.h.bf16 %v14792_v40  ;;  %v5363_v16 = vld [vmem:[#allocation3 + $0xc0] sm:$0xff] }
 0x43c   : > { %4551 = vmatmul.f32.gmra.mxu1 %v3956_v58  ;;  %10175 = vrot.lane.b32.xlu2 %v10174_v45, %s10715_s12  ;;  %v9943_v37 = vunpack.i.h.bf16 %v14818_v39  ;;  %v6535_v43 = vsel %vm1460_vm2, %v6503_v28, %v9923_v33  ;;  %v9768_v45 = vunpack.i.h.bf16 %v18299_v2  ;;  %v14848_v2 = vsel %vm1493_vm1, %v6450_v27, %v9927_v26 }
 0x43d   : > { %10150 = vrot.lane.b32.xlu0 %v10149_v35, %s10715_s12  ;;  %v6419_v35 = vsel %vm1427_vm0, %v5362_v19, %v9908_v38  ;;  %v10164_v38 = vpack.i.bf16 %v14527_v53, %v14438_v57  ;;  %v3305_v19 = vld [vmem:[#allocation2 + $0x82] sm:$0xff]  ;;  %v14859_v57 = vld [vmem:[%s18303_s4] ss:$0 sm:$0xff]  ;;  %v10159_v26 = vpack.i.bf16 %v14396_v6, %v14451_v13  ;;  %v6420_v27 = vsel %vm1427_vm0, %v5363_v16, %v9937_v41 }
 0x43e   : > { %v14827_v46 = vpop.f32.mrf.mxu3  ;;  %v14829_v58 = vpop.f32.mrf.mxu2  ;;  %v6567_v60 = vsel %vm1493_vm1, %v6535_v43, %v9943_v37  ;;  %v6451_v30 = vsel %vm1460_vm2, %v6419_v35, %v9922_v54  ;;  %v5594_v37 = vld [vmem:[#allocation3 + $0x139] sm:$0xff]  ;;  %v3957_v53 = vsel %vm1460_vm2, %v3253_v36, %v9768_v45  ;;  %v5479_v54 = vld [vmem:[#allocation3 + $0x49] sm:$0xff] }
 0x43f   : > { %18302 = vst [vmem:[#allocation48_spill] sm:$0xff] %v14829_v58  ;;  %v14838_v31 = vpop.permute.xlu0 %9965  ;;  %v9947_v58 = vunpack.i.l.bf16 %v14792_v40  ;;  %v14843_v33 = vpop.permute.xlu2 %10020  ;;  %6870 = vmatmul.f32.gmra.mxu0 %v6567_v60  ;;  %v10189_v43 = vpack.i.bf16 %v5595_v8, %v5594_v37  ;;  %v4220_v60 = vadd.f32 %v14859_v57, %v14736_v63  ;;  %v6504_v6 = vsel %vm1427_vm0, %v5479_v54, %v9877_v62  ;;  %v18304_v8 = vld [vmem:[#allocation41_spill] sm:$0xff]  ;;  %v5597_v62 = vld [vmem:[#allocation3 + $0x159] sm:$0xff] }
 0x440   : > { %v6536_v41 = vsel %vm1460_vm2, %v6504_v6, %v9948_v0  ;;  %v9942_v0 = vunpack.i.l.bf16 %v14818_v39  ;;  %v6628_v39 = vld [vmem:[%s18101_s5 + $0x100] sm:$0xff]  ;;  %v4223_v6 = vadd.f32 %v14859_v57, %v14781_v10 }
 0x441   : > { %v14852_v28 = vpop.f32.mrf.mxu1  ;;  %10165 = vrot.lane.b32.xlu1 %v10164_v38, %s10714_s11  ;;  %v14870_v35 = vsel %vm1460_vm2, %v6420_v27, %v9947_v58  ;;  %v9727_v38 = vunpack.i.l.bf16 %v18304_v8  ;;  %v5596_v27 = vld [vmem:[#allocation3 + $0x151] sm:$0xff]  ;;  %6973 = vmatpush.msrb.mxu1 %v6628_v39 }
 0x442   : > { %v5365_v39 = vld [vmem:[#allocation3 + $0xd8] sm:$0xff] }
 0x443   : > { %8692 = vmatmul.msk.f32.gmra.mxu3 %vm1460_vm2, %v3305_v19  ;;  %6760 = vmatmul.f32.gmra.mxu2 %v14399_v15  ;;  %v14867_v40 = vpop.permute.xlu1 %9955  ;;  %v10184_v19 = vpack.i.bf16 %v14532_v55, %v14563_v42  ;;  %v10179_v55 = vpack.i.bf16 %v14565_v5, %v14453_v17  ;;  %v10204_v42 = vpack.i.bf16 %v5597_v62, %v5596_v27 }
 0x444   : > { %4554 = vmatmul.f32.gmra.mxu1 %v3957_v53  ;;  %10190 = vrot.lane.b32.xlu2 %v10189_v43, %s10715_s12  ;;  %v9958_v15 = vunpack.i.h.bf16 %v14867_v40  ;;  %v14891_v43 = vpop.f32.mrf.mxu0  ;;  %v3254_v53 = vld [vmem:[#allocation2 + $0x120] sm:$0xff]  ;;  %v10199_v62 = vpack.i.bf16 %v14636_v48, %v14583_v11  ;;  %v10194_v27 = vpack.i.bf16 %v14656_v9, %v14601_v14 }
 0x445   : > { %10160 = vrot.lane.b32.xlu0 %v10159_v26, %s10713_s30  ;;  %v3306_v26 = vld [vmem:[#allocation2 + $0x92] sm:$0xff]  ;;  %v3958_v54 = vsel %vm1460_vm2, %v3254_v53, %v9727_v38 }
 0x446   : > { %v14878_v13 = vpop.f32.mrf.mxu3  ;;  %v4332_v45 = vpop.f32.mrf.mxu2  ;;  %v6568_v63 = vsel %vm1493_vm1, %v6536_v41, %v9958_v15  ;;  %v9878_v15 = vunpack.i.h.bf16 %v14525_v47  ;;  %v9728_v41 = vunpack.i.h.bf16 %v18304_v8  ;;  %v9957_v8 = vunpack.i.l.bf16 %v14867_v40  ;;  %v5598_v14 = vld [vmem:[#allocation3 + $0x169] sm:$0xff] }
 0x447   : > { %v14882_v58 = vadd.f32 %v4332_v45, %v4220_v60  ;;  %v14884_v37 = vpop.permute.xlu0 %9970  ;;  %v14887_v36 = vpop.permute.xlu2 %10025  ;;  %6873 = vmatmul.f32.gmra.mxu0 %v6568_v63  ;;  %v14916_v45 = vsel %vm1493_vm1, %v6451_v30, %v9942_v0  ;;  %v3255_v0 = vld [vmem:[#allocation2 + $0x128] sm:$0xff] }
 0x448   : > { %v9972_v10 = vunpack.i.l.bf16 %v14884_v37  ;;  %v3959_v48 = vsel %vm1460_vm2, %v3255_v0, %v9728_v41  ;;  %v5481_v41 = vld [vmem:[#allocation3 + $0x61] sm:$0xff]  ;;  %v9983_v0 = vunpack.i.h.bf16 %v14746_v20 }
 0x449   : > { %v14893_v16 = vpop.f32.mrf.mxu1  ;;  %10185 = vrot.lane.b32.xlu1 %v10184_v19, %s10714_s11 }
 0x44b   : > { %8693 = vmatmul.msk.f32.gmra.mxu3 %vm1460_vm2, %v3306_v26  ;;  %6763 = vmatmul.f32.gmra.mxu2 %v14402_v61  ;;  %v14902_v60 = vpop.permute.xlu1 %9960  ;;  %v9953_v61 = vunpack.i.h.bf16 %v14698_v7  ;;  %v5480_v7 = vld [vmem:[#allocation3 + $0x51] sm:$0xff] }
 0x44c   : > { %4557 = vmatmul.f32.gmra.mxu1 %v3958_v54  ;;  %10205 = vrot.lane.b32.xlu2 %v10204_v42, %s10715_s12  ;;  %v6505_v30 = vsel %vm1427_vm0, %v5480_v7, %v9878_v15  ;;  %v3307_v26 = vld [vmem:[#allocation2 + $0x9a] sm:$0xff]  ;;  %v9982_v42 = vunpack.i.l.bf16 %v14746_v20  ;;  %v9962_v11 = vunpack.i.l.bf16 %v14902_v60  ;;  %v6422_v15 = vsel %vm1427_vm0, %v5365_v39, %v9972_v10  ;;  %v18305_v7 = vld [vmem:[#allocation39_spill] sm:$0xff] }
 0x44d   : > { %10180 = vrot.lane.b32.xlu0 %v10179_v55, %s10713_s30  ;;  %v6537_v54 = vsel %vm1460_vm2, %v6505_v30, %v9953_v61  ;;  %v14937_v55 = vpop.f32.mrf.mxu0  ;;  %v9732_v10 = vunpack.i.l.bf16 %v18305_v7  ;;  %v9963_v20 = vunpack.i.h.bf16 %v14902_v60  ;;  %v7715_v39 = vld [vmem:[%s18103_s7 + $0x20] sm:$0xff] }
 0x44e   : > { %v14913_v17 = vpop.f32.mrf.mxu3  ;;  %v4335_v5 = vpop.f32.mrf.mxu2  ;;  %v14953_v61 = vsel %vm1460_vm2, %v6422_v15, %v9982_v42  ;;  %v6506_v30 = vsel %vm1427_vm0, %v5481_v41, %v9962_v11  ;;  %v3256_v42 = vld [vmem:[#allocation2 + $0x138] sm:$0xff]  ;;  %7826 = vmatpush.msrb.mxu3 %v7715_v39 }
 0x44f   : > { %v14919_v38 = vadd.f32 %v4335_v5, %v4223_v6  ;;  %v14921_v47 = vpop.permute.xlu0 %9975  ;;  %v14925_v19 = vpop.permute.xlu2 %10035  ;;  %v4226_v6 = vadd.f32 %v14859_v57, %v14827_v46 }
 0x450   : > { %v9978_v63 = vunpack.i.h.bf16 %v14921_v47 }
 0x451   : > { %v14929_v53 = vpop.f32.mrf.mxu1  ;;  %10200 = vrot.lane.b32.xlu1 %v10199_v62, %s10714_s11 }
 0x452   : > { %v6569_v40 = vsel %vm1493_vm1, %v6537_v54, %v9978_v63  ;;  %v14959_v63 = vsel %vm1493_vm1, %v14870_v35, %v9957_v8  ;;  %v10214_v35 = vpack.i.bf16 %v14759_v25, %v14696_v18  ;;  %v10209_v18 = vpack.i.bf16 %v14658_v52, %v14704_v59 }
 0x453   : > { %8694 = vmatmul.msk.f32.gmra.mxu3 %vm1460_vm2, %v3307_v26  ;;  %6766 = vmatmul.f32.gmra.mxu2 %v14456_v22  ;;  %v14945_v9 = vpop.permute.xlu1 %9985  ;;  %v9977_v26 = vunpack.i.l.bf16 %v14921_v47  ;;  %v3960_v47 = vsel %vm1460_vm2, %v3256_v42, %v9732_v10 }
 0x454   : > { %4560 = vmatmul.f32.gmra.mxu1 %v3959_v48  ;;  %6876 = vmatmul.f32.gmra.mxu0 %v6569_v40  ;;  %v3308_v48 = vld [vmem:[#allocation2 + $0xaa] sm:$0xff]  ;;  %v6538_v40 = vsel %vm1460_vm2, %v6506_v30, %v9983_v0  ;;  %v9987_v42 = vunpack.i.l.bf16 %v14945_v9 }
 0x455   : > { %10195 = vrot.lane.b32.xlu0 %v10194_v27, %s10713_s30  ;;  %6360 = vrot.lane.b32.xlu2 %v5598_v14, %s10715_s12  ;;  %v14978_v11 = vpop.f32.mrf.mxu0  ;;  %v9988_v14 = vunpack.i.h.bf16 %v14945_v9  ;;  %v14995_v15 = vsel %vm1493_vm1, %v14789_v3, %v9977_v26  ;;  %v10013_v26 = vunpack.i.h.bf16 %v14797_v1  ;;  %v5599_v9 = vld [vmem:[#allocation3 + $0x171] sm:$0xff] }
 0x456   : > { %v14955_v22 = vpop.f32.mrf.mxu3  ;;  %v4338_v5 = vpop.f32.mrf.mxu2 }
 0x457   : > { %v14962_v62 = vadd.f32 %v4338_v5, %v4226_v6  ;;  %v14964_v46 = vpop.permute.xlu0 %9990  ;;  %v14970_v54 = vpop.permute.xlu2 %10055  ;;  %v5482_v6 = vld [vmem:[#allocation3 + $0x69] sm:$0xff]  ;;  %v9733_v5 = vunpack.i.h.bf16 %v18305_v7  ;;  %v9973_v7 = vunpack.i.h.bf16 %v14884_v37  ;;  %v5366_v37 = vld [vmem:[#allocation3 + $0xe0] sm:$0xff] }
 0x458   : > { %v9993_v27 = vunpack.i.h.bf16 %v14964_v46  ;;  %v6507_v3 = vsel %vm1427_vm0, %v5482_v6, %v9963_v20  ;;  %v3309_v20 = vld [vmem:[#allocation2 + $0xb2] sm:$0xff] }
 0x459   : > { %v14974_v8 = vpop.f32.mrf.mxu1  ;;  %10215 = vrot.lane.b32.xlu1 %v10214_v35, %s10714_s11  ;;  %v6539_v0 = vsel %vm1460_vm2, %v6507_v3, %v9988_v14  ;;  %v5370_v14 = vld [vmem:[#allocation3 + $0x110] sm:$0xff]  ;;  %v6423_v6 = vsel %vm1427_vm0, %v5366_v37, %v9973_v7  ;;  %v18307_v3 = vld [vmem:[#allocation23_spill] sm:$0xff] }
 0x45a   : > { %v6570_v25 = vsel %vm1493_vm1, %v6538_v40, %v9993_v27  ;;  %v10023_v27 = vunpack.i.h.bf16 %v14843_v33  ;;  %v3257_v40 = vld [vmem:[#allocation2 + $0x140] sm:$0xff] }
 0x45b   : > { %8695 = vmatmul.msk.f32.gmra.mxu3 %vm1460_vm2, %v3308_v48  ;;  %6769 = vmatmul.f32.gmra.mxu2 %v14459_v51  ;;  %v14991_v60 = vpop.permute.xlu1 %10005  ;;  %v4229_v51 = vadd.f32 %v14859_v57, %v14878_v13  ;;  %v9992_v13 = vunpack.i.l.bf16 %v14964_v46  ;;  %v10057_v48 = vunpack.i.l.bf16 %v14970_v54 }
 0x45c   : > { %4563 = vmatmul.f32.gmra.mxu1 %v3960_v47  ;;  %6879 = vmatmul.f32.gmra.mxu0 %v6570_v25  ;;  %v10012_v47 = vunpack.i.l.bf16 %v14797_v1 }
 0x45d   : > { %10210 = vrot.lane.b32.xlu0 %v10209_v18, %s10713_s30  ;;  %6236 = vrot.lane.b32.xlu2 %v14799_v23, %s10714_s11  ;;  %v10219_v23 = vpack.i.bf16 %v14795_v21, %v14712_v24  ;;  %v3961_v24 = vsel %vm1460_vm2, %v3257_v40, %v9733_v5  ;;  %v6571_v21 = vsel %vm1493_vm1, %v6539_v0, %v10013_v26  ;;  %v5601_v18 = vld [vmem:[#allocation3 + $0x189] sm:$0xff]  ;;  %v10028_v40 = vunpack.i.h.bf16 %v14887_v36 }
 0x45e   : > { %v15002_v52 = vpop.f32.mrf.mxu3  ;;  %v4341_v59 = vpop.f32.mrf.mxu2  ;;  %v15034_v39 = vsel %vm1493_vm1, %v14953_v61, %v9992_v13  ;;  %v6427_v5 = vsel %vm1427_vm0, %v5370_v14, %v10023_v27  ;;  %v9737_v61 = vunpack.i.l.bf16 %v18307_v3 }
 0x45f   : > { %v15005_v41 = vadd.f32 %v4341_v59, %v4229_v51  ;;  %v15007_v10 = vpop.permute.xlu0 %9995  ;;  %v15011_v30 = vpop.permute.xlu2 %10070  ;;  %v5483_v59 = vld [vmem:[#allocation3 + $0x79] sm:$0xff]  ;;  %v15051_v26 = vsel %vm1460_vm2, %v6427_v5, %v10057_v48 }
 0x460   : > { %v9997_v46 = vunpack.i.l.bf16 %v15007_v10  ;;  %v15036_v51 = vpop.f32.mrf.mxu0  ;;  %v10072_v48 = vunpack.i.l.bf16 %v15011_v30 }
 0x461   : > { %18306 = vst [vmem:[#allocation41_spill] sm:$0xff] %v15005_v41  ;;  %v15019_v35 = vpop.f32.mrf.mxu1  ;;  %10220 = vrot.lane.b32.xlu1 %v10219_v23, %s10713_s30 }
 0x462   : > { %v6508_v23 = vsel %vm1427_vm0, %v5483_v59, %v9997_v46  ;;  %v9902_v46 = vunpack.i.l.bf16 %v14646_v4  ;;  %v5371_v59 = vld [vmem:[#allocation3 + $0x120] sm:$0xff] }
 0x463   : > { %8696 = vmatmul.msk.f32.gmra.mxu3 %vm1460_vm2, %v3309_v20  ;;  %6772 = vmatmul.f32.gmra.mxu2 %v14640_v50  ;;  %v15030_v25 = vpop.permute.xlu1 %10015  ;;  %v4232_v50 = vadd.f32 %v14859_v57, %v14913_v17  ;;  %v6455_v17 = vsel %vm1460_vm2, %v6423_v6, %v9987_v42  ;;  %v4235_v6 = vadd.f32 %v14859_v57, %v14955_v22 }
 0x464   : > { %4566 = vmatmul.f32.gmra.mxu1 %v3961_v24  ;;  %6882 = vmatmul.f32.gmra.mxu0 %v6571_v21  ;;  %v10018_v1 = vunpack.i.h.bf16 %v15030_v25  ;;  %v15060_v7 = vsel %vm1493_vm1, %v6455_v17, %v10012_v47  ;;  %v7930_v47 = vld [vmem:[%s18104_s8 + $0x10] sm:$0xff]  ;;  %v6428_v5 = vsel %vm1427_vm0, %v5371_v59, %v9902_v46  ;;  %v10007_v46 = vunpack.i.l.bf16 %v14991_v60 }
 0x465   : > { %6362 = vrot.lane.b32.xlu0 %v5599_v9, %s10715_s12  ;;  %6366 = vrot.lane.b32.xlu2 %v5601_v18, %s10715_s12  ;;  %v3258_v9 = vld [vmem:[#allocation2 + $0x150] sm:$0xff]  ;;  %v3310_v18 = vld [vmem:[#allocation2 + $0xc2] sm:$0xff] }
 0x466   : > { %v15046_v13 = vpop.f32.mrf.mxu3  ;;  %v4344_v0 = vpop.f32.mrf.mxu2  ;;  %v6540_v27 = vsel %vm1460_vm2, %v6508_v23, %v10018_v1  ;;  %v3962_v14 = vsel %vm1460_vm2, %v3258_v9, %v9737_v61  ;;  %8041 = vmatpush.msrb.mxu2 %v7930_v47  ;;  %v9738_v23 = vunpack.i.h.bf16 %v18307_v3  ;;  %v5484_v9 = vld [vmem:[#allocation3 + $0x81] sm:$0xff]  ;;  %v10017_v3 = vunpack.i.l.bf16 %v15030_v25  ;;  %v5367_v25 = vld [vmem:[#allocation3 + $0xf0] sm:$0xff] }
 0x467   : > { %v15054_v20 = vadd.f32 %v4344_v0, %v4232_v50  ;;  %v15056_v24 = vpop.permute.xlu0 %10000  ;;  %v15062_v21 = vpop.permute.xlu2 %10085  ;;  %v6572_v42 = vsel %vm1493_vm1, %v6540_v27, %v10028_v40  ;;  %v5600_v50 = vld [vmem:[#allocation3 + $0x181] sm:$0xff]  ;;  %v5570_v27 = vld [vmem:[#allocation3 + $0x198] sm:$0xff] }
 0x468   : > { %v15090_v17 = vpop.f32.mrf.mxu0 }
 0x469   : > { %18308 = vst [vmem:[#allocation39_spill] sm:$0xff] %v15054_v20  ;;  %v15065_v37 = vpop.f32.mrf.mxu1  ;;  %6238 = vrot.lane.b32.xlu1 %v14750_v56, %s10714_s11  ;;  %v9998_v56 = vunpack.i.h.bf16 %v15007_v10 }
 0x46b   : > { %8697 = vmatmul.msk.f32.gmra.mxu3 %vm1460_vm2, %v3310_v18  ;;  %6775 = vmatmul.f32.gmra.mxu2 %v14643_v12  ;;  %v15077_v1 = vpop.permute.xlu1 %10040  ;;  %v15087_v12 = vsel %vm1460_vm2, %v6428_v5, %v10072_v48  ;;  %v6509_v48 = vsel %vm1427_vm0, %v5484_v9, %v9998_v56  ;;  %v10027_v9 = vunpack.i.l.bf16 %v14887_v36 }
 0x46c   : > { %4569 = vmatmul.f32.gmra.mxu1 %v3962_v14  ;;  %6885 = vmatmul.f32.gmra.mxu0 %v6572_v42  ;;  %v10043_v10 = vunpack.i.h.bf16 %v15077_v1  ;;  %v3259_v14 = vld [vmem:[#allocation2 + $0x158] sm:$0xff] }
 0x46d   : > { %6364 = vrot.lane.b32.xlu0 %v5600_v50, %s10715_s12  ;;  %v3311_v50 = vld [vmem:[#allocation2 + $0xca] sm:$0xff] }
 0x46e   : > { %v15084_v61 = vpop.f32.mrf.mxu3  ;;  %v4347_v0 = vpop.f32.mrf.mxu2 }
 0x46f   : > { %v15092_v40 = vadd.f32 %v4347_v0, %v4235_v6  ;;  %v10031_v22 = vpop.permute.xlu0 %10030  ;;  %v15098_v47 = vpop.permute.xlu2 %10100  ;;  %v3963_v6 = vsel %vm1460_vm2, %v3259_v14, %v9738_v23  ;;  %v5537_v0 = vld [vmem:[#allocation3 + $0x182] sm:$0xff]  ;;  %v6424_v23 = vsel %vm1427_vm0, %v5367_v25, %v10007_v46  ;;  %v5485_v25 = vld [vmem:[#allocation3 + $0x91] sm:$0xff] }
 0x470   : > { %v10033_v42 = vunpack.i.h.bf16 %v10031_v22  ;;  %v15127_v20 = vpop.f32.mrf.mxu0 }
 0x471   : > { %18309 = vst [vmem:[#allocation23_spill] sm:$0xff] %v15092_v40  ;;  %v15096_v18 = vpop.f32.mrf.mxu1  ;;  %6240 = vrot.lane.b32.xlu1 %v5570_v27, %s10714_s11  ;;  %v4238_v27 = vadd.f32 %v14859_v57, %v15002_v52  ;;  %v5571_v40 = vld [vmem:[#allocation3 + $0x1a0] sm:$0xff] }
 0x472   : > { %v6541_v59 = vsel %vm1460_vm2, %v6509_v48, %v10033_v42  ;;  %v10037_v42 = vunpack.i.l.bf16 %v14925_v19 }
 0x473   : > { %8698 = vmatmul.msk.f32.gmra.mxu3 %vm1460_vm2, %v3311_v50  ;;  %6778 = vmatmul.f32.gmra.mxu2 %v14675_v49  ;;  %v6573_v5 = vsel %vm1493_vm1, %v6541_v59, %v10043_v10  ;;  %v15108_v56 = vpop.permute.xlu1 %10050  ;;  %v18310_v49 = vld [vmem:[#allocation45_spill] sm:$0xff]  ;;  %v6456_v50 = vsel %vm1460_vm2, %v6424_v23, %v10017_v3  ;;  %v10008_v59 = vunpack.i.h.bf16 %v14991_v60  ;;  %v10042_v60 = vunpack.i.l.bf16 %v15077_v1 }
 0x474   : > { %4572 = vmatmul.f32.gmra.mxu1 %v3963_v6  ;;  %6888 = vmatmul.f32.gmra.mxu0 %v6573_v5  ;;  %v9742_v48 = vunpack.i.l.bf16 %v18310_v49  ;;  %v10053_v5 = vunpack.i.h.bf16 %v15108_v56  ;;  %v15125_v52 = vsel %vm1493_vm1, %v6456_v50, %v10027_v9  ;;  %v6510_v3 = vsel %vm1427_vm0, %v5485_v25, %v10037_v42  ;;  %v3312_v23 = vld [vmem:[#allocation2 + $0xda] sm:$0xff] }
 0x475   : > { %6112 = vrot.lane.b32.xlu0 %v5537_v0, %s10713_s30  ;;  %v10032_v0 = vunpack.i.l.bf16 %v10031_v22  ;;  %v5538_v1 = vld [vmem:[#allocation3 + $0x18a] sm:$0xff]  ;;  %v4241_v25 = vadd.f32 %v14859_v57, %v15046_v13 }
 0x476   : > { %v15117_v10 = vpop.f32.mrf.mxu3  ;;  %v4350_v14 = vpop.f32.mrf.mxu2 }
 0x477   : > { %v15121_v6 = vadd.f32 %v4350_v14, %v4238_v27  ;;  %v10046_v36 = vpop.permute.xlu0 %10045  ;;  %v3260_v27 = vld [vmem:[#allocation2 + $0x168] sm:$0xff]  ;;  %v15135_v9 = vpop.permute.xlu2 %10115 }
 0x478   : > { %v10048_v46 = vunpack.i.h.bf16 %v10046_v36  ;;  %v3964_v22 = vsel %vm1460_vm2, %v3260_v27, %v9742_v48  ;;  %v10047_v13 = vunpack.i.l.bf16 %v10046_v36 }
 0x479   : > { %18311 = vst [vmem:[#allocation45_spill] sm:$0xff] %v15121_v6  ;;  %v15129_v41 = vpop.f32.mrf.mxu1  ;;  %6242 = vrot.lane.b32.xlu1 %v5571_v40, %s10714_s11  ;;  %v5368_v6 = vld [vmem:[#allocation3 + $0xf8] sm:$0xff]  ;;  %v10038_v40 = vunpack.i.h.bf16 %v14925_v19  ;;  %s8427_s11 = sshll.u32 %s18013_s26, 5 }
 0x47a   : > { %v6542_v14 = vsel %vm1460_vm2, %v6510_v3, %v10048_v46  ;;  %v6425_v42 = vsel %vm1427_vm0, %v5368_v6, %v10008_v59  ;;  %v9743_v6 = vunpack.i.h.bf16 %v18310_v49  ;;  %v15164_v49 = vpop.f32.mrf.mxu0 }
 0x47b   : > { %8699 = vmatmul.msk.f32.gmra.mxu3 %vm1460_vm2, %v3312_v23  ;;  %6781 = vmatmul.f32.gmra.mxu2 %v14679_v29  ;;  %v6574_v50 = vsel %vm1493_vm1, %v6542_v14, %v10053_v5  ;;  %v6457_v46 = vsel %vm1460_vm2, %v6425_v42, %v10032_v0  ;;  %v15147_v48 = vpop.permute.xlu1 %10065  ;;  %v10058_v29 = vunpack.i.h.bf16 %v14970_v54  ;;  %v10022_v0 = vunpack.i.l.bf16 %v14843_v33  ;;  %v5486_v14 = vld [vmem:[#allocation3 + $0x99] sm:$0xff] }
 0x47c   : > { %4575 = vmatmul.f32.gmra.mxu1 %v3964_v22  ;;  %6891 = vmatmul.f32.gmra.mxu0 %v6574_v50  ;;  %v15153_v59 = vsel %vm1493_vm1, %v6457_v46, %v10042_v60  ;;  %v6511_v54 = vsel %vm1427_vm0, %v5486_v14, %v10038_v40  ;;  %v10052_v50 = vunpack.i.l.bf16 %v15108_v56  ;;  %v3261_v42 = vld [vmem:[#allocation2 + $0x170] sm:$0xff]  ;;  %v5369_v46 = vld [vmem:[#allocation3 + $0x108] sm:$0xff]  ;;  %v4244_v40 = vadd.f32 %v14859_v57, %v15084_v61  ;;  %v3262_v61 = vld [vmem:[#allocation2 + $0x180] sm:$0xff] }
 0x47d   : > { %6114 = vrot.lane.b32.xlu0 %v5538_v1, %s10713_s30  ;;  %v3313_v1 = vld [vmem:[#allocation2 + $0xe2] sm:$0xff]  ;;  %v6543_v60 = vsel %vm1460_vm2, %v6511_v54, %v10058_v29  ;;  %v3965_v33 = vsel %vm1460_vm2, %v3261_v42, %v9743_v6  ;;  %s18016_s30 = scalar_lea.vmem [#allocation4], %s8426_s27  ;;  %s8290_s27 = scalar_lea.sflag [#allocation5], %s18013_s26 }
 0x47e   : > { %v15150_v3 = vpop.f32.mrf.mxu3  ;;  %v4353_v5 = vpop.f32.mrf.mxu2  ;;  %s8307_s21 = sshll.u32 %s18016_s30, 4  ;;  %s8308_s21 = int_to_ptr.vmem [resolvable:$true] %s8307_s21 }
 0x47f   : > { %v15157_v19 = vadd.f32 %v4353_v5, %v4241_v25  ;;  %v10061_v27 = vpop.permute.xlu0 %10060  ;;  %v6426_v25 = vsel %vm1427_vm0, %v5369_v46, %v10022_v0  ;;  %v15174_v29 = vpop.permute.xlu2 %10130  ;;  %v3314_v46 = vld [vmem:[#allocation2 + $0xf2] sm:$0xff] }
 0x480   : > { %v10063_v23 = vunpack.i.h.bf16 %v10061_v27  ;;  %v6458_v56 = vsel %vm1460_vm2, %v6426_v25, %v10047_v13  ;;  %v10067_v13 = vunpack.i.l.bf16 %v15147_v48  ;;  %v10073_v25 = vunpack.i.h.bf16 %v15011_v30 }
 0x481   : > { %18312 = vst [vmem:[#allocation77_spill] sm:$0xff] %v15157_v19  ;;  %v15159_v22 = vpop.f32.mrf.mxu1  ;;  %v15179_v14 = vsel %vm1493_vm1, %v6458_v56, %v10052_v50  ;;  %v10132_v56 = vunpack.i.l.bf16 %v15174_v29 }
 0x482   : > { %18313 = vst [vmem:[#allocation78_spill] sm:$0xff] %v15159_v22  ;;  %v6575_v36 = vsel %vm1493_vm1, %v6543_v60, %v10063_v23 }
 0x483   : > { %8700 = vmatmul.msk.f32.gmra.mxu3 %vm1460_vm2, %v3313_v1  ;;  %6784 = vmatmul.f32.gmra.mxu2 %v14786_v44  ;;  %v18314_v44 = vld [vmem:[#allocation60_spill] sm:$0xff]  ;;  %v15184_v42 = vpop.permute.xlu1 %10080  ;;  %v10062_v1 = vunpack.i.l.bf16 %v10061_v27  ;;  %v5487_v27 = vld [vmem:[#allocation3 + $0xa9] sm:$0xff] }
 0x484   : > { %4578 = vmatmul.f32.gmra.mxu1 %v3965_v33  ;;  %6894 = vmatmul.f32.gmra.mxu0 %v6575_v36  ;;  %v9827_v54 = vunpack.i.l.bf16 %v18314_v44  ;;  %v9968_v33 = vunpack.i.h.bf16 %v14838_v31  ;;  %v9828_v19 = vunpack.i.h.bf16 %v18314_v44  ;;  %v10083_v44 = vunpack.i.h.bf16 %v15184_v42 }
 0x486   : > { %v15176_v5 = vpop.f32.mrf.mxu3  ;;  %v4356_v6 = vpop.f32.mrf.mxu2  ;;  %v3966_v50 = vsel %vm1460_vm2, %v3262_v61, %v9827_v54  ;;  %v6512_v54 = vsel %vm1427_vm0, %v5487_v27, %v10067_v13  ;;  %v5602_v61 = vld [vmem:[#allocation3 + $0x199] sm:$0xff]  ;;  %v9903_v13 = vunpack.i.h.bf16 %v14646_v4  ;;  %v10068_v27 = vunpack.i.h.bf16 %v15147_v48 }
 0x487   : > { %v15182_v23 = vadd.f32 %v4356_v6, %v4244_v40  ;;  %v10076_v0 = vpop.permute.xlu0 %10075  ;;  %v15197_v40 = vsel %vm1493_vm1, %v15051_v26, %v10062_v1  ;;  %v15199_v6 = vpop.f32.mrf.mxu0  ;;  %v6544_v30 = vsel %vm1460_vm2, %v6512_v54, %v10073_v25  ;;  %6368 = vrot.lane.b32.xlu2 %v5602_v61, %s10715_s12  ;;  %v10002_v54 = vunpack.i.l.bf16 %v15056_v24  ;;  %v3263_v4 = vld [vmem:[#allocation2 + $0x188] sm:$0xff]  ;;  %v3315_v61 = vld [vmem:[#allocation2 + $0xfa] sm:$0xff] }
 0x488   : > { %v10078_v36 = vunpack.i.h.bf16 %v10076_v0  ;;  %18317 = vst [vmem:[#allocation80_spill] sm:$0xff] %v15199_v6  ;;  %v10077_v22 = vunpack.i.l.bf16 %v10076_v0  ;;  %v15217_v6 = vpop.permute.xlu2 %10145  ;;  %v3967_v0 = vsel %vm1460_vm2, %v3263_v4, %v9828_v19  ;;  %v4250_v19 = vadd.f32 %v14859_v57, %v15150_v3  ;;  %v5603_v4 = vld [vmem:[#allocation3 + $0x1a1] sm:$0xff] }
 0x489   : > { %18315 = vst [vmem:[#allocation60_spill] sm:$0xff] %v15182_v23  ;;  %v15187_v60 = vpop.f32.mrf.mxu1  ;;  %v4247_v23 = vadd.f32 %v14859_v57, %v15117_v10  ;;  %v10147_v48 = vunpack.i.l.bf16 %v15217_v6 }
 0x48a   : > { %18316 = vst [vmem:[#allocation79_spill] sm:$0xff] %v15187_v60  ;;  %v6576_v1 = vsel %vm1493_vm1, %v6544_v30, %v10078_v36 }
 0x48b   : > { %8701 = vmatmul.msk.f32.gmra.mxu3 %vm1460_vm2, %v3314_v46  ;;  %6787 = vmatmul.f32.gmra.mxu2 %v14773_v32  ;;  %v15225_v36 = vpop.permute.xlu1 %10095 }
 0x48c   : > { %4581 = vmatmul.f32.gmra.mxu1 %v3966_v50  ;;  %v5376_v50 = vld [vmem:[#allocation3 + $0x158] sm:$0xff]  ;;  %6897 = vmatmul.f32.gmra.mxu0 %v6576_v1  ;;  %v10088_v1 = vunpack.i.h.bf16 %v15062_v21 }
 0x48d   : > { %v6433_v10 = vsel %vm1427_vm0, %v5376_v50, %v9968_v33  ;;  %v10082_v33 = vunpack.i.l.bf16 %v15184_v42  ;;  %v15236_v50 = vsel %vm1493_vm1, %v15087_v12, %v10077_v22 }
 0x48e   : > { %v4359_v46 = vpop.f32.mrf.mxu2  ;;  %v15204_v32 = vpop.f32.mrf.mxu3  ;;  %v15220_v25 = vsel %vm1460_vm2, %v6433_v10, %v10132_v56  ;;  %v5488_v56 = vld [vmem:[#allocation3 + $0xb1] sm:$0xff]  ;;  %v10087_v10 = vunpack.i.l.bf16 %v15062_v21 }
 0x48f   : > { %v15209_v26 = vadd.f32 %v4359_v46, %v4247_v23  ;;  %v15212_v60 = vpop.permute.xlu0 %10090  ;;  %v5372_v46 = vld [vmem:[#allocation3 + $0x128] sm:$0xff]  ;;  %v6513_v30 = vsel %vm1427_vm0, %v5488_v56, %v10068_v27  ;;  %6370 = vrot.lane.b32.xlu2 %v5603_v4, %s10715_s12  ;;  %s18026_s12 = scalar_lea.vmem [#allocation6], %s8427_s11  ;;  %s10631_s11 = sshra.s32 %s8310_s25, 4  ;;  %s10632_s11 = int_to_ptr.hbm [resolvable:$true] %s10631_s11 }
 0x490   : > { %v6429_v42 = vsel %vm1427_vm0, %v5372_v46, %v9903_v13  ;;  %v7714_v27 = vld [vmem:[%s18103_s7 + $0x18] sm:$0xff]  ;;  %v15253_v13 = vpop.f32.mrf.mxu0  ;;  %v10092_v4 = vunpack.i.l.bf16 %v15212_v60  ;;  %s10633_s0 = scalar_lea.hbm %s10632_s11, 128  ;;  %p10638_p0 = scmp.lt.s32.totalorder %s10632_s11, %s18105_s9 }
 0x491   : > { %18318 = vst [vmem:[#allocation81_spill] sm:$0xff] %v15209_v26  ;;  %v15223_v23 = vpop.f32.mrf.mxu1  ;;  %7827 = vmatpush.msrb.mxu3 %v7714_v27  ;;  %v6461_v21 = vsel %vm1460_vm2, %v6429_v42, %v10082_v33  ;;  %v3316_v42 = vld [vmem:[#allocation2 + $0x10a] sm:$0xff]  ;;  %p10634_p11 = scmp.ne.s32.totalorder %s10632_s11, %s10633_s0  ;;  %p10639_p1 = scmp.lt.s32.totalorder %s10637_s3, %s10633_s0 }
 0x492   : > { %18319 = vst [vmem:[#allocation82_spill] sm:$0xff] %v15223_v23  ;;  %v3264_v23 = vld [vmem:[#allocation2 + $0x198] sm:$0xff] }
 0x493   : > { %8702 = vmatmul.msk.f32.gmra.mxu3 %vm1460_vm2, %v3315_v61  ;;  %6790 = vmatmul.f32.gmra.mxu2 %v14848_v2  ;;  %v6545_v2 = vsel %vm1460_vm2, %v6513_v30, %v10083_v44  ;;  %v5377_v61 = vld [vmem:[#allocation3 + $0x168] sm:$0xff]  ;;  %v15259_v30 = vsel %vm1493_vm1, %v6461_v21, %v10087_v10  ;;  %v4253_v21 = vadd.f32 %v14859_v57, %v15176_v5  ;;  %v10093_v5 = vunpack.i.h.bf16 %v15212_v60  ;;  %p10635_p12 = pnand %p10634_p11, %p10812_p5  ;;  %p10640_p2 = por %p10639_p1, %p10638_p0 }
 0x494   : > { %4584 = vmatmul.f32.gmra.mxu1 %v3967_v0  ;;  %v18320_v0 = vld [vmem:[#allocation27_spill] sm:$0xff]  ;;  %v6434_v3 = vsel %vm1427_vm0, %v5377_v61, %v10002_v54  ;;  %v6577_v46 = vsel %vm1493_vm1, %v6545_v2, %v10088_v1  ;;  %v10098_v54 = vunpack.i.h.bf16 %v15225_v36  ;;  %v5489_v10 = vld [vmem:[#allocation3 + $0xc1] sm:$0xff]  ;;  %v10103_v2 = vunpack.i.h.bf16 %v15098_v47  ;;  %v5490_v60 = vld [vmem:[#allocation3 + $0xc9] sm:$0xff] }
 0x495   : > { %v9747_v12 = vunpack.i.l.bf16 %v18320_v0  ;;  %18321 = vst [vmem:[#allocation27_spill] sm:$0xff] %v15253_v13  ;;  %v15262_v26 = vsel %vm1460_vm2, %v6434_v3, %v10147_v48  ;;  %6900 = vmatmul.f32.gmra.mxu0 %v6577_v46  ;;  %v10097_v48 = vunpack.i.l.bf16 %v15225_v36  ;;  %v6514_v3 = vsel %vm1427_vm0, %v5489_v10, %v10092_v4  ;;  %p10636_p13 = pneg %p10635_p12 }
 0x496   : > { %v4362_v22 = vpop.f32.mrf.mxu2  ;;  %v15248_v56 = vpop.f32.mrf.mxu3  ;;  %v9748_v46 = vunpack.i.h.bf16 %v18320_v0  ;;  %v3265_v0 = vld [vmem:[#allocation2 + $0x1a0] sm:$0xff] }
 0x497   : > { %v15255_v44 = vadd.f32 %v4362_v22, %v4250_v19  ;;  %v10106_v27 = vpop.permute.xlu0 %10105  ;;  %v18324_v19 = vld [vmem:[#allocation52_spill] sm:$0xff]  ;;  %v10111_v22 = vpop.permute.xlu1 %10110  ;;  %v3968_v1 = vsel %vm1460_vm2, %v3264_v23, %v9747_v12  ;;  %v6546_v23 = vsel %vm1460_vm2, %v6514_v3, %v10098_v54  ;;  %v5373_v12 = vld [vmem:[#allocation3 + $0x138] sm:$0xff]  ;;  %p10641_p3 = pnand %p10640_p2, %p10636_p13 }
 0x498   : > { %v9932_v61 = vunpack.i.l.bf16 %v18324_v19  ;;  %v9933_v57 = vunpack.i.h.bf16 %v18324_v19  ;;  %v15289_v10 = vpop.f32.mrf.mxu0  ;;  %v10108_v54 = vunpack.i.h.bf16 %v10106_v27  ;;  %v10107_v3 = vunpack.i.l.bf16 %v10106_v27 }
 0x499   : > { %18322 = vst [vmem:[#allocation83_spill] sm:$0xff] %v15255_v44  ;;  %v15265_v33 = vpop.f32.mrf.mxu1  ;;  %v3969_v19 = vsel %vm1460_vm2, %v3265_v0, %v9748_v46  ;;  %v6515_v27 = vsel %vm1427_vm0, %v5490_v60, %v10093_v5 }
 0x49a   : > { %18323 = vst [vmem:[#allocation84_spill] sm:$0xff] %v15265_v33 }
 0x49b   : > { %8703 = vmatmul.msk.f32.gmra.mxu3 %vm1460_vm2, %v3316_v42  ;;  %6793 = vmatmul.f32.gmra.mxu2 %v14916_v45  ;;  %v10102_v45 = vunpack.i.l.bf16 %v15098_v47  ;;  %v6578_v42 = vsel %vm1493_vm1, %v6546_v23, %v10103_v2  ;;  %v10113_v2 = vunpack.i.h.bf16 %v10111_v22 }
 0x49c   : > { %4587 = vmatmul.f32.gmra.mxu1 %v3968_v1  ;;  %v6430_v1 = vsel %vm1427_vm0, %v5373_v12, %v9932_v61 }
 0x49d   : > { %6903 = vmatmul.f32.gmra.mxu0 %v6578_v42  ;;  %v6462_v4 = vsel %vm1460_vm2, %v6430_v1, %v10097_v48  ;;  %v5374_v48 = vld [vmem:[#allocation3 + $0x140] sm:$0xff] }
 0x49e   : > { %v4365_v44 = vpop.f32.mrf.mxu2  ;;  %v15278_v33 = vpop.f32.mrf.mxu3  ;;  %v15294_v47 = vsel %vm1493_vm1, %v6462_v4, %v10102_v45  ;;  %v6431_v23 = vsel %vm1427_vm0, %v5374_v48, %v9933_v57  ;;  %v6547_v45 = vsel %vm1460_vm2, %v6515_v27, %v10108_v54  ;;  %v3318_v57 = vld [vmem:[#allocation2 + $0x122] sm:$0xff]  ;;  %v9967_v54 = vunpack.i.l.bf16 %v14838_v31 }
 0x49f   : > { %v15282_v36 = vadd.f32 %v4365_v44, %v4253_v21  ;;  %v3317_v44 = vld [vmem:[#allocation2 + $0x112] sm:$0xff]  ;;  %v10121_v61 = vpop.permute.xlu0 %10120  ;;  %v10112_v21 = vunpack.i.l.bf16 %v10111_v22  ;;  %v10126_v12 = vpop.permute.xlu1 %10125  ;;  %v6463_v42 = vsel %vm1460_vm2, %v6431_v23, %v10107_v3  ;;  %v6579_v0 = vsel %vm1493_vm1, %v6547_v45, %v10113_v2  ;;  %v5604_v2 = vld [vmem:[#allocation3 + $0x32] sm:$0xff] }
 0x4a0   : > { %v10123_v5 = vunpack.i.h.bf16 %v10121_v61  ;;  %v10128_v3 = vunpack.i.h.bf16 %v10126_v12  ;;  %v10122_v60 = vunpack.i.l.bf16 %v10121_v61 }
 0x4a1   : > { %18325 = vst [vmem:[#allocation52_spill] sm:$0xff] %v15282_v36  ;;  %v15291_v13 = vpop.f32.mrf.mxu1  ;;  %v15310_v22 = vsel %vm1493_vm1, %v6463_v42, %v10112_v21  ;;  %v10127_v21 = vunpack.i.l.bf16 %v10126_v12  ;;  %v5375_v42 = vld [vmem:[#allocation3 + $0x150] sm:$0xff] }
 0x4a2   : > { %18326 = vst [vmem:[#allocation85_spill] sm:$0xff] %v15291_v13  ;;  %v18421_v13 = vld [vmem:[#allocation74_spill] sm:$0xff] }
 0x4a3   : > { %8704 = vmatmul.msk.f32.gmra.mxu3 %vm1460_vm2, %v3317_v44  ;;  %6796 = vmatmul.f32.gmra.mxu2 %v14959_v63  ;;  %v10117_v63 = vunpack.i.l.bf16 %v15135_v9  ;;  %v15315_v44 = vpop.f32.mrf.mxu0 }
 0x4a4   : > { %4590 = vmatmul.f32.gmra.mxu1 %v3969_v19  ;;  %v5491_v19 = vld [vmem:[#allocation3 + $0xd9] sm:$0xff] }
 0x4a5   : > { %6906 = vmatmul.f32.gmra.mxu0 %v6579_v0  ;;  %v6516_v48 = vsel %vm1427_vm0, %v5491_v19, %v10117_v63  ;;  %v10118_v63 = vunpack.i.h.bf16 %v15135_v9  ;;  %v3319_v19 = vld [vmem:[#allocation2 + $0x12a] sm:$0xff] }
 0x4a6   : > { %v15303_v1 = vpop.f32.mrf.mxu3  ;;  %v15305_v46 = vpop.f32.mrf.mxu2  ;;  %v6548_v23 = vsel %vm1460_vm2, %v6516_v48, %v10123_v5 }
 0x4a7   : > { %18327 = vst [vmem:[#allocation86_spill] sm:$0xff] %v15305_v46  ;;  %v10136_v27 = vpop.permute.xlu0 %10135  ;;  %v6580_v0 = vsel %vm1493_vm1, %v6548_v23, %v10128_v3  ;;  %v5492_v3 = vld [vmem:[#allocation3 + $0xe1] sm:$0xff] }
 0x4a8   : > { %v10138_v48 = vunpack.i.h.bf16 %v10136_v27  ;;  %v10137_v9 = vunpack.i.l.bf16 %v10136_v27  ;;  %v6517_v23 = vsel %vm1427_vm0, %v5492_v3, %v10118_v63  ;;  %v5493_v3 = vld [vmem:[#allocation3 + $0xf1] sm:$0xff] }
 0x4a9   : > { %v15312_v4 = vpop.f32.mrf.mxu1 }
 0x4aa   : > { %18328 = vst [vmem:[#allocation87_spill] sm:$0xff] %v15312_v4  ;;  %v15358_v63 = vsel %vm1493_vm1, %v15220_v25, %v10137_v9  ;;  %v10171_v25 = vpop.permute.xlu2 %10170 }
 0x4ab   : > { %8705 = vmatmul.msk.f32.gmra.mxu3 %vm1460_vm2, %v3318_v57  ;;  %6799 = vmatmul.f32.gmra.mxu2 %v14995_v15  ;;  %v6432_v15 = vsel %vm1427_vm0, %v5375_v42, %v9967_v54  ;;  %v15328_v57 = vpop.permute.xlu1 %10140  ;;  %v5605_v54 = vld [vmem:[#allocation3 + $0x3a] sm:$0xff]  ;;  %18335 = vst [vmem:[#allocation94_spill] sm:$0xff] %v15358_v63 }
 0x4ac   : > { %8749 = vmatmul.msk.f32.vlgmr.msrb.gmra.mxu1 %vm1427_vm0, %v5604_v2  ;;  %v6464_v61 = vsel %vm1460_vm2, %v6432_v15, %v10122_v60  ;;  %v10133_v2 = vunpack.i.h.bf16 %v15174_v29  ;;  %v15341_v60 = vpop.f32.mrf.mxu0  ;;  %v5494_v63 = vld [vmem:[#allocation3 + $0xf9] sm:$0xff] }
 0x4ad   : > { %6909 = vmatmul.f32.gmra.mxu0 %v6580_v0  ;;  %v15335_v5 = vsel %vm1493_vm1, %v6464_v61, %v10127_v21  ;;  %18332 = vst [vmem:[#allocation91_spill] sm:$0xff] %v15341_v60  ;;  %v7713_v21 = vld [vmem:[%s18103_s7 + $0x10] sm:$0xff] }
 0x4ae   : > { %v15322_v45 = vpop.f32.mrf.mxu3  ;;  %v15324_v31 = vpop.f32.mrf.mxu2  ;;  %18331 = vst [vmem:[#allocation90_spill] sm:$0xff] %v15335_v5  ;;  %v6549_v0 = vsel %vm1460_vm2, %v6517_v23, %v10133_v2  ;;  %7828 = vmatpush.msrb.mxu3 %v7713_v21  ;;  %v5606_v2 = vld [vmem:[#allocation3 + $0x4a] sm:$0xff]  ;;  %v10148_v21 = vunpack.i.h.bf16 %v15217_v6 }
 0x4af   : > { %18329 = vst [vmem:[#allocation88_spill] sm:$0xff] %v15324_v31  ;;  %v6581_v15 = vsel %vm1493_vm1, %v6549_v0, %v10138_v48  ;;  %v10151_v61 = vpop.permute.xlu0 %10150  ;;  %v10003_v48 = vunpack.i.h.bf16 %v15056_v24  ;;  %v5378_v24 = vld [vmem:[#allocation3 + $0x170] sm:$0xff] }
 0x4b0   : > { %v10152_v0 = vunpack.i.l.bf16 %v10151_v61 }
 0x4b1   : > { %v15332_v12 = vpop.f32.mrf.mxu1 }
 0x4b2   : > { %18330 = vst [vmem:[#allocation89_spill] sm:$0xff] %v15332_v12  ;;  %v10153_v12 = vunpack.i.h.bf16 %v10151_v61  ;;  %v15377_v61 = vsel %vm1493_vm1, %v15262_v26, %v10152_v0  ;;  %v18341_v0 = vld [vmem:[#allocation11_spill] sm:$0xff] }
 0x4b3   : > { %8706 = vmatmul.msk.f32.gmra.mxu3 %vm1460_vm2, %v3319_v19  ;;  %6802 = vmatmul.f32.gmra.mxu2 %v15034_v39  ;;  %v10142_v39 = vunpack.i.l.bf16 %v15328_v57  ;;  %v10156_v19 = vpop.permute.xlu1 %10155  ;;  %18338 = vst [vmem:[#allocation97_spill] sm:$0xff] %v15377_v61 }
 0x4b4   : > { %8750 = vmatmul.msk.f32.gmra.mxu1 %vm1427_vm0, %v5605_v54  ;;  %v3320_v54 = vld [vmem:[#allocation2 + $0x13a] sm:$0xff]  ;;  %v10157_v9 = vunpack.i.l.bf16 %v10156_v19  ;;  %v10158_v6 = vunpack.i.h.bf16 %v10156_v19 }
 0x4b5   : > { %6912 = vmatmul.f32.gmra.mxu0 %v6581_v15  ;;  %v6518_v23 = vsel %vm1427_vm0, %v5493_v3, %v10142_v39  ;;  %v10172_v3 = vunpack.i.l.bf16 %v10171_v25 }
 0x4b6   : > { %v15347_v29 = vpop.f32.mrf.mxu3  ;;  %v15349_v42 = vpop.f32.mrf.mxu2 }
 0x4b7   : > { %18333 = vst [vmem:[#allocation92_spill] sm:$0xff] %v15349_v42  ;;  %v15371_v42 = vpop.f32.mrf.mxu0 }
 0x4b8   : > { %18337 = vst [vmem:[#allocation96_spill] sm:$0xff] %v15371_v42  ;;  %v18418_v42 = vld [vmem:[#allocation48_spill] sm:$0xff] }
 0x4b9   : > { %v15354_v27 = vpop.f32.mrf.mxu1 }
 0x4ba   : > { %18334 = vst [vmem:[#allocation93_spill] sm:$0xff] %v15354_v27 }
 0x4bb   : > { %8707 = vmatmul.msk.f32.gmra.mxu3 %vm1460_vm2, %v3320_v54  ;;  %6805 = vmatmul.f32.gmra.mxu2 %v15060_v7  ;;  %v6550_v54 = vsel %vm1460_vm2, %v6518_v23, %v10148_v21  ;;  %v10143_v7 = vunpack.i.h.bf16 %v15328_v57  ;;  %v10161_v21 = vpop.permute.xlu0 %10160 }
 0x4bc   : > { %8751 = vmatmul.msk.f32.gmra.mxu1 %vm1427_vm0, %v5606_v2  ;;  %v6582_v39 = vsel %vm1493_vm1, %v6550_v54, %v10153_v12  ;;  %v6435_v2 = vsel %vm1427_vm0, %v5378_v24, %v10003_v48  ;;  %v5607_v12 = vld [vmem:[#allocation3 + $0x52] sm:$0xff]  ;;  %v15394_v48 = vld [vmem:[%s18303_s4] ss:$0 sm:$0xff]  ;;  %v10173_v54 = vunpack.i.h.bf16 %v10171_v25 }
 0x4bd   : > { %6915 = vmatmul.f32.gmra.mxu0 %v6582_v39  ;;  %v6467_v23 = vsel %vm1460_vm2, %v6435_v2, %v10157_v9  ;;  %v6519_v26 = vsel %vm1427_vm0, %v5494_v63, %v10143_v7  ;;  %v4160_v9 = vadd.f32 %v15394_v48, %v18341_v0  ;;  %v10162_v39 = vunpack.i.l.bf16 %v10161_v21  ;;  %v18344_v2 = vld [vmem:[#allocation17_spill] sm:$0xff]  ;;  %v10176_v0 = vpop.permute.xlu2 %10175 }
 0x4be   : > { %v15366_v15 = vpop.f32.mrf.mxu3  ;;  %v15368_v27 = vpop.f32.mrf.mxu2  ;;  %v15384_v57 = vsel %vm1493_vm1, %v6467_v23, %v10172_v3  ;;  %v6551_v19 = vsel %vm1460_vm2, %v6519_v26, %v10158_v6  ;;  %v5495_v6 = vld [vmem:[#allocation3 + $0x109] sm:$0xff] }
 0x4bf   : > { %18336 = vst [vmem:[#allocation95_spill] sm:$0xff] %v15368_v27  ;;  %v3321_v27 = vld [vmem:[#allocation2 + $0x142] sm:$0xff]  ;;  %v6583_v24 = vsel %vm1493_vm1, %v6551_v19, %v10173_v54  ;;  %v4273_v23 = vadd.f32 %v18344_v2, %v4160_v9  ;;  %v6520_v26 = vsel %vm1427_vm0, %v5495_v6, %v10162_v39  ;;  %v18348_v54 = vld [vmem:[#allocation13_spill] sm:$0xff]  ;;  %v10177_v2 = vunpack.i.l.bf16 %v10176_v0 }
 0x4c0   : > { %18340 = vst [vmem:[#allocation99_spill] sm:$0xff] %v15384_v57  ;;  %v3322_v57 = vld [vmem:[#allocation2 + $0x152] sm:$0xff]  ;;  %v18351_v6 = vld [vmem:[#allocation15_spill] sm:$0xff] }
 0x4c1   : > { %v15380_v36 = vpop.f32.mrf.mxu1 }
 0x4c2   : > { %18339 = vst [vmem:[#allocation98_spill] sm:$0xff] %v15380_v36 }
 0x4c3   : > { %8708 = vmatmul.msk.f32.gmra.mxu3 %vm1460_vm2, %v3321_v27  ;;  %6808 = vmatmul.f32.gmra.mxu2 %v15125_v52  ;;  %v10166_v27 = vpop.permute.xlu1 %10165  ;;  %v7929_v52 = vld [vmem:[%s18104_s8 + $0x8] sm:$0xff] }
 0x4c4   : > { %8752 = vmatmul.msk.f32.gmra.mxu1 %vm1427_vm0, %v5607_v12  ;;  %8042 = vmatpush.msrb.mxu2 %v7929_v52  ;;  %v10167_v3 = vunpack.i.l.bf16 %v10166_v27  ;;  %v15407_v12 = vpop.f32.mrf.mxu0  ;;  %v5608_v52 = vld [vmem:[#allocation3 + $0x62] sm:$0xff]  ;;  %v10168_v61 = vunpack.i.h.bf16 %v10166_v27  ;;  %v5609_v27 = vld [vmem:[#allocation3 + $0x6a] sm:$0xff] }
 0x4c5   : > { %6918 = vmatmul.f32.gmra.mxu0 %v6583_v24  ;;  %18345 = vst [vmem:[#allocation17_spill] sm:$0xff] %v15407_v12  ;;  %v4386_v24 = vadd.f32 %v18348_v54, %v4273_v23  ;;  %v5496_v12 = vld [vmem:[#allocation3 + $0x111] sm:$0xff] }
 0x4c6   : > { %v15401_v63 = vpop.f32.mrf.mxu3  ;;  %v15403_v7 = vpop.f32.mrf.mxu2  ;;  %v6552_v9 = vsel %vm1460_vm2, %v6520_v26, %v10167_v3  ;;  %v3323_v26 = vld [vmem:[#allocation2 + $0x15a] sm:$0xff] }
 0x4c7   : > { %18342 = vst [vmem:[#allocation11_spill] sm:$0xff] %v15401_v63 }
 0x4c8   : > { %18343 = vst [vmem:[#allocation100_spill] sm:$0xff] %v15403_v7  ;;  %v18347_v7 = vld [vmem:[#allocation19_spill] sm:$0xff] }
 0x4c9   : > { %v15409_v25 = vpop.f32.mrf.mxu1  ;;  %v4163_v19 = vadd.f32 %v15394_v48, %v18347_v7  ;;  %v18352_v7 = vld [vmem:[#allocation73_spill] sm:$0xff] }
 0x4ca   : > { %18346 = vst [vmem:[#allocation101_spill] sm:$0xff] %v15409_v25  ;;  %v10163_v25 = vunpack.i.h.bf16 %v10161_v21  ;;  %v4499_v31 = vadd.f32 %v18352_v7, %v4386_v24  ;;  %v10181_v21 = vpop.permute.xlu0 %10180 }
 0x4cb   : > { %8709 = vmatmul.msk.f32.gmra.mxu3 %vm1460_vm2, %v3322_v57  ;;  %6811 = vmatmul.f32.gmra.mxu2 %v15153_v59  ;;  %v6584_v57 = vsel %vm1493_vm1, %v6552_v9, %v10177_v2  ;;  %v4276_v59 = vadd.f32 %v18351_v6, %v4163_v19  ;;  %v18356_v19 = vld [vmem:[#allocation21_spill] sm:$0xff]  ;;  %v10178_v2 = vunpack.i.h.bf16 %v10176_v0  ;;  %v15439_v6 = vpop.permute.xlu1 %10185  ;;  %v18360_v0 = vld [vmem:[#allocation75_spill] sm:$0xff] }
 0x4cc   : > { %8753 = vmatmul.msk.f32.gmra.mxu1 %vm1427_vm0, %v5608_v52  ;;  %v15426_v52 = vpop.f32.mrf.mxu0  ;;  %v6521_v23 = vsel %vm1427_vm0, %v5496_v12, %v10163_v25  ;;  %v15432_v54 = vadd.f32 %v15204_v32, %v4499_v31  ;;  %v7712_v32 = vld [vmem:[%s18103_s7 + $0x8] sm:$0xff] }
 0x4cd   : > { %6921 = vmatmul.f32.gmra.mxu0 %v6584_v57  ;;  %18353 = vst [vmem:[#allocation15_spill] sm:$0xff] %v15426_v52  ;;  %v4389_v9 = vadd.f32 %v18356_v19, %v4276_v59  ;;  %v6553_v24 = vsel %vm1460_vm2, %v6521_v23, %v10168_v61  ;;  %v10182_v57 = vunpack.i.l.bf16 %v10181_v21  ;;  %7829 = vmatpush.msrb.mxu3 %v7712_v32  ;;  %v10187_v23 = vunpack.i.l.bf16 %v15439_v6  ;;  %v18375_v52 = vld [vmem:[#allocation26_spill] sm:$0xff] }
 0x4ce   : > { %v15419_v36 = vpop.f32.mrf.mxu3  ;;  %v15421_v39 = vpop.f32.mrf.mxu2  ;;  %18355 = vst [vmem:[#allocation102_spill] sm:$0xff] %v15432_v54  ;;  %v8717_v59 = vmul.f32 -1.442695, %v15432_v54  ;;  %v6585_v61 = vsel %vm1493_vm1, %v6553_v24, %v10178_v2  ;;  %v18365_v2 = vld [vmem:[#allocation14_spill] sm:$0xff]  ;;  %v18381_v54 = vld [vmem:[#allocation37_spill] sm:$0xff] }
 0x4cf   : > { %18349 = vst [vmem:[#allocation19_spill] sm:$0xff] %v15419_v36  ;;  %v4502_v7 = vadd.f32 %v18360_v0, %v4389_v9  ;;  %v5610_v9 = vld [vmem:[#allocation3 + $0x7a] sm:$0xff]  ;;  %v18409_v36 = vld [vmem:[#allocation65_spill] sm:$0xff] }
 0x4d0   : > { %18350 = vst [vmem:[#allocation13_spill] sm:$0xff] %v15421_v39  ;;  %v3324_v39 = vld [vmem:[#allocation2 + $0x16a] sm:$0xff]  ;;  %10355 = vpow2.f32 %v8717_v59  ;;  %v18367_v59 = vld [vmem:[#allocation18_spill] sm:$0xff] }
 0x4d1   : > { %v15428_v3 = vpop.f32.mrf.mxu1  ;;  %v15459_v32 = vadd.f32 %v15248_v56, %v4502_v7  ;;  %v18366_v56 = vld [vmem:[#allocation25_spill] sm:$0xff]  ;;  %v10183_v7 = vunpack.i.h.bf16 %v10181_v21 }
 0x4d2   : > { %18354 = vst [vmem:[#allocation73_spill] sm:$0xff] %v15428_v3 }
 0x4d3   : > { %8710 = vmatmul.msk.f32.gmra.mxu3 %vm1460_vm2, %v3323_v26  ;;  %6814 = vmatmul.f32.gmra.mxu2 %v15179_v14  ;;  %v18359_v14 = vld [vmem:[#allocation16_spill] sm:$0xff]  ;;  %18363 = vst [vmem:[#allocation75_spill] sm:$0xff] %v15459_v32 }
 0x4d4   : > { %8754 = vmatmul.msk.f32.gmra.mxu1 %vm1427_vm0, %v5609_v27  ;;  %v4166_v25 = vadd.f32 %v15394_v48, %v18359_v14  ;;  %v5497_v26 = vld [vmem:[#allocation3 + $0x121] sm:$0xff]  ;;  %v18361_v27 = vld [vmem:[#allocation22_spill] sm:$0xff]  ;;  %v15461_v14 = vpop.permute.xlu2 %10190  ;;  %v15463_v24 = vpop.f32.mrf.mxu0 }
 0x4d5   : > { %6924 = vmatmul.f32.gmra.mxu0 %v6585_v61  ;;  %18364 = vst [vmem:[#allocation22_spill] sm:$0xff] %v15463_v24  ;;  %v10192_v0 = vunpack.i.l.bf16 %v15461_v14  ;;  %v18371_v24 = vld [vmem:[#allocation33_spill] sm:$0xff] }
 0x4d6   : > { %v15444_v31 = vpop.f32.mrf.mxu3  ;;  %v15446_v12 = vpop.f32.mrf.mxu2  ;;  %v4279_v19 = vadd.f32 %v18361_v27, %v4166_v25  ;;  %v4169_v25 = vadd.f32 %v15394_v48, %v18365_v2  ;;  %v8718_v27 = vmul.f32 -1.442695, %v15459_v32 }
 0x4d7   : > { %18357 = vst [vmem:[#allocation21_spill] sm:$0xff] %v15444_v31  ;;  %v10356_v32 = vpop.eup %10355  ;;  %v15501_v31 = vpop.permute.xlu0 %10195 }
 0x4d8   : > { %18358 = vst [vmem:[#allocation103_spill] sm:$0xff] %v15446_v12  ;;  %v6522_v12 = vsel %vm1427_vm0, %v5497_v26, %v10182_v57  ;;  %v4392_v61 = vadd.f32 %v18366_v56, %v4279_v19  ;;  %v4282_v26 = vadd.f32 %v18367_v59, %v4169_v25  ;;  %v18373_v56 = vld [vmem:[#allocation24_spill] sm:$0xff]  ;;  %v10188_v25 = vunpack.i.h.bf16 %v15439_v6  ;;  %v5498_v59 = vld [vmem:[#allocation3 + $0x129] sm:$0xff] }
 0x4d9   : > { %v15455_v3 = vpop.f32.mrf.mxu1  ;;  %v6554_v57 = vsel %vm1460_vm2, %v6522_v12, %v10187_v23  ;;  %v18372_v23 = vld [vmem:[#allocation20_spill] sm:$0xff]  ;;  %v4178_v21 = vadd.f32 %v15394_v48, %v18373_v56  ;;  %v18379_v56 = vld [vmem:[#allocation31_spill] sm:$0xff]  ;;  %10357 = vpow2.f32 %v8718_v27  ;;  %v15511_v27 = vadd.f32 1.0, %v10356_v32 }
 0x4da   : > { %18362 = vst [vmem:[#allocation16_spill] sm:$0xff] %v15455_v3  ;;  %v18370_v3 = vld [vmem:[#allocation12_spill] sm:$0xff]  ;;  %v6586_v12 = vsel %vm1493_vm1, %v6554_v57, %v10192_v0  ;;  %v4175_v19 = vadd.f32 %v15394_v48, %v18372_v23 }
 0x4db   : > { %8711 = vmatmul.msk.f32.gmra.mxu3 %vm1460_vm2, %v3324_v39  ;;  %6817 = vmatmul.f32.gmra.mxu2 %v15197_v40  ;;  %v4172_v2 = vadd.f32 %v15394_v48, %v18370_v3  ;;  %v18378_v0 = vld [vmem:[#allocation32_spill] sm:$0xff]  ;;  %10359 = vrcp.f32 %v15511_v27  ;;  %vm4840_vm6 = vweird.f32 %v15511_v27 }
 0x4dc   : > { %8755 = vmatmul.msk.f32.gmra.mxu1 %vm1427_vm0, %v5610_v9  ;;  %v4505_v9 = vadd.f32 %v18371_v24, %v4392_v61  ;;  %v6523_v61 = vsel %vm1427_vm0, %v5498_v59, %v10183_v7  ;;  %v4184_v23 = vadd.f32 %v15394_v48, %v18378_v0  ;;  %v4288_v6 = vadd.f32 %v18379_v56, %v4175_v19  ;;  %v5611_v7 = vld [vmem:[#allocation3 + $0x82] sm:$0xff]  ;;  %v15566_v46 = vpop.permute.xlu2 %10205 }
 0x4dd   : > { %6927 = vmatmul.f32.gmra.mxu0 %v6586_v12  ;;  %v4285_v3 = vadd.f32 %v18375_v52, %v4172_v2  ;;  %v18380_v12 = vld [vmem:[#allocation30_spill] sm:$0xff]  ;;  %v4187_v52 = vadd.f32 %v15394_v48, %v18381_v54  ;;  %v18384_v59 = vld [vmem:[#allocation44_spill] sm:$0xff]  ;;  %v6555_v0 = vsel %vm1460_vm2, %v6523_v61, %v10188_v25 }
 0x4de   : > { %v15475_v39 = vpop.f32.mrf.mxu3  ;;  %v15477_v40 = vpop.f32.mrf.mxu2  ;;  %v15492_v24 = vadd.f32 %v15278_v33, %v4505_v9  ;;  %v4395_v4 = vadd.f32 %v18380_v12, %v4282_v26  ;;  %v18382_v33 = vld [vmem:[#allocation35_spill] sm:$0xff]  ;;  %v18383_v9 = vld [vmem:[#allocation40_spill] sm:$0xff]  ;;  %v4297_v19 = vadd.f32 %v18384_v59, %v4184_v23  ;;  %v18385_v54 = vld [vmem:[#allocation34_spill] sm:$0xff] }
 0x4df   : > { %18368 = vst [vmem:[#allocation14_spill] sm:$0xff] %v15475_v39  ;;  %v18374_v39 = vld [vmem:[#allocation28_spill] sm:$0xff]  ;;  %v4291_v2 = vadd.f32 %v18382_v33, %v4178_v21  ;;  %v4398_v56 = vadd.f32 %v18385_v54, %v4285_v3  ;;  %v15518_v12 = vpop.f32.mrf.mxu0  ;;  %v18387_v23 = vld [vmem:[#allocation42_spill] sm:$0xff]  ;;  %v18394_v59 = vld [vmem:[#allocation43_spill] sm:$0xff] }
 0x4e0   : > { %18369 = vst [vmem:[#allocation25_spill] sm:$0xff] %v15477_v40  ;;  %v4181_v40 = vadd.f32 %v15394_v48, %v18374_v39  ;;  %v3325_v39 = vld [vmem:[#allocation2 + $0x172] sm:$0xff]  ;;  %v4508_v26 = vadd.f32 %v14852_v28, %v4395_v4  ;;  %v8719_v21 = vmul.f32 -1.442695, %v15492_v24  ;;  %v4190_v28 = vadd.f32 %v15394_v48, %v18387_v23  ;;  %v18389_v33 = vld [vmem:[#allocation38_spill] sm:$0xff] }
 0x4e1   : > { %18376 = vst [vmem:[#allocation18_spill] sm:$0xff] %v15492_v24  ;;  %v15494_v57 = vpop.f32.mrf.mxu1  ;;  %v18388_v4 = vld [vmem:[#allocation49_spill] sm:$0xff]  ;;  %v18393_v61 = vld [vmem:[#allocation46_spill] sm:$0xff]  ;;  %v15539_v54 = vadd.f32 %v18394_v59, %v4291_v2  ;;  %v18395_v24 = vld [vmem:[#allocation47_spill] sm:$0xff] }
 0x4e2   : > { %18377 = vst [vmem:[#allocation12_spill] sm:$0xff] %v15494_v57  ;;  %v4294_v57 = vadd.f32 %v18383_v9, %v4181_v40  ;;  %v10193_v40 = vunpack.i.h.bf16 %v15461_v14  ;;  %v4300_v32 = vadd.f32 %v18388_v4, %v4187_v52  ;;  %v15527_v9 = vadd.f32 %v18389_v33, %v4288_v6  ;;  %v10358_v6 = vpop.eup %10357  ;;  %v18396_v4 = vld [vmem:[#allocation54_spill] sm:$0xff]  ;;  %v18399_v59 = vld [vmem:[#allocation57_spill] sm:$0xff] }
 0x4e3   : > { %8712 = vmatmul.msk.f32.gmra.mxu3 %vm1460_vm2, %v3325_v39  ;;  %6820 = vmatmul.f32.gmra.mxu2 %v15236_v50  ;;  %18386 = vst [vmem:[#allocation33_spill] sm:$0xff] %v15518_v12  ;;  %v10197_v50 = vunpack.i.l.bf16 %v15501_v31  ;;  %v15521_v39 = vpop.permute.xlu1 %10200  ;;  %v15530_v25 = vadd.f32 %v15303_v1, %v4508_v26  ;;  %v4303_v33 = vadd.f32 %v18396_v4, %v4190_v28  ;;  %v18397_v1 = vld [vmem:[#allocation53_spill] sm:$0xff]  ;;  %10361 = vpow2.f32 %v8719_v21  ;;  %v18402_v28 = vld [vmem:[#allocation59_spill] sm:$0xff]  ;;  %v15590_v5 = vpop.eup %10359 }
 0x4e4   : > { %8756 = vmatmul.msk.f32.gmra.mxu1 %vm1427_vm0, %v5611_v7  ;;  %v4193_v7 = vadd.f32 %v15394_v48, %v18393_v61  ;;  %v15542_v23 = vadd.f32 %v18395_v24, %v4294_v57  ;;  %v6587_v52 = vsel %vm1493_vm1, %v6555_v0, %v10193_v40  ;;  %v15547_v26 = vadd.f32 %v18397_v1, %v4297_v19  ;;  %v5499_v61 = vld [vmem:[#allocation3 + $0x139] sm:$0xff] }
 0x4e5   : > { %18390 = vst [vmem:[#allocation20_spill] sm:$0xff] %v15530_v25  ;;  %6930 = vmatmul.f32.gmra.mxu0 %v6587_v52  ;;  %v6524_v0 = vsel %vm1427_vm0, %v5499_v61, %v10197_v50  ;;  %v18401_v40 = vld [vmem:[#allocation55_spill] sm:$0xff]  ;;  %v15560_v4 = vadd.f32 %v18402_v28, %v4303_v33  ;;  %v18403_v1 = vld [vmem:[#allocation56_spill] sm:$0xff]  ;;  %v8720_v52 = vmul.f32 -1.442695, %v15530_v25  ;;  %v18406_v61 = vld [vmem:[#allocation62_spill] sm:$0xff]  ;;  %vm4841_vm4 = vweird.f32 %v15590_v5 }
 0x4e6   : > { %v15532_v3 = vpop.f32.mrf.mxu3  ;;  %v15534_v14 = vpop.f32.mrf.mxu2  ;;  %v4306_v24 = vadd.f32 %v18399_v59, %v4193_v7  ;;  %v4199_v19 = vadd.f32 %v15394_v48, %v18401_v40  ;;  %v15563_v12 = vadd.f32 %v18403_v1, %v4300_v32  ;;  %v18404_v7 = vld [vmem:[#allocation63_spill] sm:$0xff]  ;;  %v18405_v59 = vld [vmem:[#allocation58_spill] sm:$0xff]  ;;  %v4205_v40 = vadd.f32 %v15394_v48, %v18406_v61  ;;  %v18407_v33 = vld [vmem:[#allocation61_spill] sm:$0xff] }
 0x4e7   : > { %18391 = vst [vmem:[#allocation24_spill] sm:$0xff] %v15532_v3  ;;  %v18398_v3 = vld [vmem:[#allocation51_spill] sm:$0xff]  ;;  %v4202_v50 = vadd.f32 %v15394_v48, %v18405_v59  ;;  %v18408_v1 = vld [vmem:[#allocation64_spill] sm:$0xff]  ;;  %v18410_v59 = vld [vmem:[#allocation66_spill] sm:$0xff]  ;;  %v4511_v61 = vadd.f32 %v14893_v16, %v4398_v56  ;;  %10363 = vpow2.f32 %v8720_v52 }
 0x4e8   : > { %18392 = vst [vmem:[#allocation28_spill] sm:$0xff] %v15534_v14  ;;  %v10202_v14 = vunpack.i.l.bf16 %v15521_v39  ;;  %v4196_v2 = vadd.f32 %v15394_v48, %v18398_v3  ;;  %v3326_v3 = vld [vmem:[#allocation2 + $0x182] sm:$0xff]  ;;  %v15569_v21 = vadd.f32 %v18404_v7, %v4306_v24  ;;  %v4312_v25 = vadd.f32 %v18408_v1, %v4199_v19  ;;  %v18413_v1 = vld [vmem:[#allocation72_spill] sm:$0xff]  ;;  %vm15784_vm11 = vmor %vm4840_vm6, %vm4841_vm4 }
 0x4e9   : > { %v15554_v57 = vpop.f32.mrf.mxu1  ;;  %v5612_v32 = vld [vmem:[#allocation3 + $0x92] sm:$0xff]  ;;  %v4208_v24 = vadd.f32 %v15394_v48, %v18409_v36  ;;  %v10362_v16 = vpop.eup %10361  ;;  %v18416_v56 = vld [vmem:[#allocation68_spill] sm:$0xff] }
 0x4ea   : > { %18400 = vst [vmem:[#allocation26_spill] sm:$0xff] %v15554_v57  ;;  %v15575_v57 = vadd.f32 1.0, %v10358_v6  ;;  %v4309_v28 = vadd.f32 %v18407_v33, %v4196_v2  ;;  %v6556_v7 = vsel %vm1460_vm2, %v6524_v0, %v10202_v14  ;;  %v4211_v6 = vadd.f32 %v15394_v48, %v18410_v59  ;;  %v18411_v2 = vld [vmem:[#allocation10_spill] sm:$0xff]  ;;  %v18412_v33 = vld [vmem:[#allocation69_spill] sm:$0xff] }
 0x4eb   : > { %8713 = vmatmul.msk.f32.gmra.mxu3 %vm1460_vm2, %v3326_v3  ;;  %6823 = vmatmul.f32.gmra.mxu2 %v15259_v30  ;;  %v10207_v3 = vunpack.i.l.bf16 %v15566_v46  ;;  %v10198_v30 = vunpack.i.h.bf16 %v15501_v31  ;;  %v4315_v19 = vadd.f32 %v18411_v2, %v4202_v50  ;;  %v4214_v36 = vadd.f32 %v15394_v48, %v18412_v33  ;;  %v18417_v2 = vld [vmem:[#allocation76_spill] sm:$0xff] }
 0x4ec   : > { %8757 = vmatmul.msk.f32.gmra.mxu1 %vm1427_vm0, %v5612_v32  ;;  %v4217_v32 = vadd.f32 %v15394_v48, %v18413_v1  ;;  %v4318_v59 = vadd.f32 %v18416_v56, %v4205_v40  ;;  %10365 = vrcp.f32 %v15575_v57  ;;  %v15604_v31 = vadd.f32 %v15322_v45, %v4511_v61  ;;  %v18419_v48 = vld [vmem:[#allocation29_spill] sm:$0xff]  ;;  %v15612_v1 = vpop.f32.mrf.mxu0  ;;  %v18420_v56 = vld [vmem:[#allocation71_spill] sm:$0xff] }
 0x4ed   : > { %v6588_v50 = vsel %vm1493_vm1, %v6556_v7, %v10207_v3  ;;  %v4327_v33 = vadd.f32 %v18417_v2, %v4214_v36  ;;  %v15610_v52 = vadd.f32 %v18419_v48, %v4309_v28  ;;  %v5500_v40 = vld [vmem:[#allocation3 + $0x141] sm:$0xff]  ;;  %v4324_v45 = vadd.f32 %v18421_v13, %v4211_v6  ;;  %v18422_v61 = vld [vmem:[#allocation67_spill] sm:$0xff] }
 0x4ee   : > { %v15597_v14 = vpop.f32.mrf.mxu3  ;;  %v15599_v0 = vpop.f32.mrf.mxu2  ;;  %v4330_v60 = vadd.f32 %v18418_v42, %v4217_v32  ;;  %6933 = vmatmul.f32.gmra.mxu0 %v6588_v50  ;;  %v15618_v63 = vadd.f32 %v18422_v61, %v4312_v25  ;;  %v6525_v42 = vsel %vm1427_vm0, %v5500_v40, %v10198_v30  ;;  %v4514_v28 = vadd.f32 %v14929_v53, %v15527_v9  ;;  %v3327_v13 = vld [vmem:[#allocation2 + $0x18a] sm:$0xff]  ;;  %v18424_v25 = vld [vmem:[#allocation50_spill] sm:$0xff] }
 0x4ef   : > { %18414 = vst [vmem:[#allocation32_spill] sm:$0xff] %v15597_v14  ;;  %v4321_v14 = vadd.f32 %v18420_v56, %v4208_v24  ;;  %v4836_v3 = vmul.f32 %v15590_v5, %v15511_v27  ;;  %v15630_v32 = vadd.f32 1.0, %v10362_v16  ;;  %v15632_v24 = vpop.permute.xlu0 %10210  ;;  %v15638_v50 = vadd.f32 %v14835_v34, %v4324_v45  ;;  %v18425_v30 = vld [vmem:[#allocation36_spill] sm:$0xff]  ;;  %v3328_v45 = vld [vmem:[#allocation2 + $0x19a] sm:$0xff] }
 0x4f0   : > { %18415 = vst [vmem:[#allocation31_spill] sm:$0xff] %v15599_v0  ;;  %v10203_v0 = vunpack.i.h.bf16 %v15521_v39  ;;  %v18423_v39 = vld [vmem:[#allocation70_spill] sm:$0xff]  ;;  %v15641_v2 = vadd.f32 %v18425_v30, %v4318_v59  ;;  %v8721_v53 = vmul.f32 -1.442695, %v15604_v31  ;;  %v5613_v9 = vld [vmem:[#allocation3 + $0x9a] sm:$0xff]  ;;  %v15647_v16 = vadd.f32 %v15347_v29, %v4514_v28 }
 0x4f1   : > { %v15620_v7 = vpop.f32.mrf.mxu1  ;;  %v15628_v36 = vadd.f32 %v18423_v39, %v4315_v19  ;;  %v15635_v6 = vadd.f32 %v18424_v25, %v4321_v14  ;;  %v10364_v19 = vpop.eup %10363  ;;  %v15650_v14 = vadd.f32 %v14891_v43, %v4327_v33  ;;  %v15653_v34 = vadd.f32 %v14937_v55, %v4330_v60  ;;  %v7711_v55 = vld [vmem:[%s18103_s7] sm:$0xff]  ;;  %v18431_v25 = vld [vmem:[#allocation80_spill] sm:$0xff] }
 0x4f2   : > { %v6557_v59 = vsel %vm1460_vm2, %v6525_v42, %v10203_v0  ;;  %v15657_v48 = vpop.eup %10365  ;;  %v10208_v40 = vunpack.i.h.bf16 %v15566_v46  ;;  %v15664_v29 = vadd.f32 %v14978_v11, %v14882_v58  ;;  %v10212_v43 = vunpack.i.l.bf16 %v15632_v24  ;;  %v15667_v33 = vpop.permute.xlu1 %10215  ;;  %7830 = vmatpush.msrb.mxu3 %v7711_v55  ;;  %v5501_v61 = vld [vmem:[#allocation3 + $0x151] sm:$0xff]  ;;  %v18427_v42 = vld [vmem:[#allocation41_spill] sm:$0xff] }
 0x4f3   : > { %8714 = vmatmul.msk.f32.gmra.mxu3 %vm1460_vm2, %v3327_v13  ;;  %6826 = vmatmul.f32.gmra.mxu2 %v15294_v47  ;;  %v4517_v47 = vadd.f32 %v14974_v8, %v15539_v54  ;;  %v4520_v60 = vadd.f32 %v15019_v35, %v15542_v23  ;;  %v4837_v0 = vsub.f32 1.0, %v4836_v3  ;;  %10367 = vrcp.f32 %v15630_v32  ;;  %v18432_v30 = vld [vmem:[#allocation78_spill] sm:$0xff] }
 0x4f4   : > { %8758 = vmatmul.msk.f32.gmra.mxu1 %vm1427_vm0, %v5613_v9  ;;  %v15677_v8 = vadd.f32 %v15036_v51, %v14919_v38  ;;  %v15681_v11 = vadd.f32 1.0, %v10364_v19  ;;  %10369 = vpow2.f32 %v8721_v53  ;;  %v15685_v46 = vadd.f32 %v15090_v17, %v14962_v62  ;;  %v18433_v9 = vld [vmem:[#allocation79_spill] sm:$0xff] }
 0x4f5   : > { %v6589_v35 = vsel %vm1493_vm1, %v6557_v59, %v10208_v40  ;;  %v4851_v23 = vmul.f32 %v15657_v48, %v15575_v57  ;;  %v8722_v38 = vmul.f32 -1.442695, %v15647_v16  ;;  %v15694_v51 = vadd.f32 %v15366_v15, %v4517_v47  ;;  %v18435_v19 = vld [vmem:[#allocation27_spill] sm:$0xff] }
 0x4f6   : > { %v15679_v58 = vpop.f32.mrf.mxu3  ;;  %v15687_v54 = vpop.f32.mrf.mxu2  ;;  %v10217_v56 = vunpack.i.l.bf16 %v15667_v33  ;;  %6936 = vmatmul.f32.gmra.mxu0 %v6589_v35  ;;  %v15699_v62 = vadd.f32 %v15065_v37, %v15547_v26  ;;  %v15703_v17 = vadd.f32 %v15096_v18, %v15563_v12  ;;  %v15707_v28 = vadd.f32 %v15127_v20, %v18427_v42  ;;  %v18429_v26 = vld [vmem:[#allocation39_spill] sm:$0xff]  ;;  %v18437_v35 = vld [vmem:[#allocation82_spill] sm:$0xff] }
 0x4f7   : > { %18426 = vst [vmem:[#allocation30_spill] sm:$0xff] %v15687_v54  ;;  %v6526_v15 = vsel %vm1427_vm0, %v5501_v61, %v10212_v43  ;;  %v15714_v39 = vadd.f32 %v15129_v41, %v15560_v4  ;;  %v4838_v13 = vmul.f32 %v15590_v5, %v4837_v0  ;;  %v15717_v37 = vpop.f32.mrf.mxu0  ;;  %v15721_v18 = vadd.f32 %v15164_v49, %v18429_v26  ;;  %v18430_v12 = vld [vmem:[#allocation23_spill] sm:$0xff]  ;;  %v18434_v4 = vld [vmem:[#allocation45_spill] sm:$0xff]  ;;  %v6361_v42 = vpop.permute.xlu2 %6360  ;;  %v18441_v26 = vld [vmem:[#allocation60_spill] sm:$0xff] }
 0x4f8   : > { %v15725_v20 = vadd.f32 %v18431_v25, %v18430_v12  ;;  %v15729_v53 = vadd.f32 %v18432_v30, %v15569_v21  ;;  %v15733_v41 = vadd.f32 %v18433_v9, %v15610_v52  ;;  %10371 = vrcp.f32 %v15681_v11  ;;  %v5614_v49 = vld [vmem:[#allocation3 + $0xaa] sm:$0xff]  ;;  %v5616_v54 = vld [vmem:[#allocation3 + $0xc2] sm:$0xff] }
 0x4f9   : > { %v15709_v3 = vpop.f32.mrf.mxu1  ;;  %v15738_v59 = vadd.f32 %v18435_v19, %v18434_v4  ;;  %v15742_v47 = vpop.eup %10367  ;;  %v4852_v40 = vsub.f32 1.0, %v4851_v23  ;;  %10373 = vpow2.f32 %v8722_v38  ;;  %v8723_v21 = vmul.f32 -1.442695, %v15694_v51  ;;  %v18440_v38 = vld [vmem:[#allocation84_spill] sm:$0xff] }
 0x4fa   : > { %18428 = vst [vmem:[#allocation37_spill] sm:$0xff] %v15709_v3  ;;  %v6558_v52 = vsel %vm1460_vm2, %v6526_v15, %v10217_v56  ;;  %v10370_v43 = vpop.eup %10369  ;;  %v4844_v55 = vand.u32 2147483647, %v15511_v27  ;;  %v4846_v0 = vand.u32 2147483648, %v15511_v27  ;;  %v4839_v23 = vadd.f32 %v15590_v5, %v4838_v13  ;;  %v6363_v4 = vpop.permute.xlu0 %6362  ;;  %v18457_v27 = vld [vmem:[#allocation90_spill] sm:$0xff]  ;;  %v18465_v3 = vld [vmem:[#allocation21_spill] sm:$0xff] }
 0x4fb   : > { %18436 = vst [vmem:[#allocation35_spill] sm:$0xff] %v15738_v59  ;;  %8715 = vmatmul.msk.f32.gmra.mxu3 %vm1460_vm2, %v3328_v45  ;;  %6829 = vmatmul.f32.gmra.mxu2 %v15310_v22  ;;  %v15751_v45 = vadd.f32 %v18437_v35, %v15618_v63  ;;  %v18438_v22 = vld [vmem:[#allocation77_spill] sm:$0xff]  ;;  %v15761_v56 = vadd.f32 %v18440_v38, %v15628_v36  ;;  %v18443_v63 = vld [vmem:[#allocation11_spill] sm:$0xff]  ;;  %v10213_v13 = vunpack.i.h.bf16 %v15632_v24  ;;  %v15778_v9 = vadd.f32 1.0, %v10370_v43  ;;  %v18461_v24 = vld [vmem:[#allocation86_spill] sm:$0xff] }
 0x4fc   : > { %8759 = vmatmul.msk.f32.gmra.mxu1 %vm1427_vm0, %v5614_v49  ;;  %v15755_v61 = vadd.f32 %v15289_v10, %v18438_v22  ;;  %v15767_v12 = vadd.f32 %v15315_v44, %v18441_v26  ;;  %v15771_v10 = vadd.f32 %v18443_v63, %v4520_v60  ;;  %v6590_v25 = vsel %vm1493_vm1, %v6558_v52, %v6361_v42  ;;  %v3329_v44 = vld [vmem:[#allocation2 + $0x1a2] sm:$0xff]  ;;  %v18448_v49 = vld [vmem:[#allocation85_spill] sm:$0xff] }
 0x4fd   : > { %v4853_v30 = vmul.f32 %v15657_v48, %v4852_v40  ;;  %v4866_v36 = vmul.f32 %v15742_v47, %v15630_v32  ;;  %10375 = vpow2.f32 %v8723_v21  ;;  %vm15788_vm7 = vcmp.eq.f32.partialorder %v4844_v55, 8.507059e+37  ;;  %v18451_v43 = vld [vmem:[#allocation81_spill] sm:$0xff]  ;;  %v18452_v35 = vld [vmem:[#allocation91_spill] sm:$0xff]  ;;  %v18475_v59 = vld [vmem:[#allocation94_spill] sm:$0xff] }
 0x4fe   : > { %18439 = vst [vmem:[#allocation40_spill] sm:$0xff] %v15755_v61  ;;  %v15763_v15 = vpop.f32.mrf.mxu3  ;;  %6939 = vmatmul.f32.gmra.mxu0 %v6590_v25  ;;  %v15780_v19 = vpop.eup %10371  ;;  %v4847_v60 = vor.u32 1.1754944e-38, %v4846_v0  ;;  %v15794_v40 = vadd.f32 %v18448_v49, %v15641_v2  ;;  %v15802_v22 = vadd.f32 %v18452_v35, %v18451_v43  ;;  %v4843_v55 = vsel %vm15784_vm11, %v15590_v5, %v4839_v23  ;;  %v15811_v2 = vld [vmem:[%s18102_s6] ss:$0 sm:$0xff]  ;;  %v5502_v26 = vld [vmem:[#allocation3 + $0x159] sm:$0xff] }
 0x4ff   : > { %18442 = vst [vmem:[#allocation44_spill] sm:$0xff] %v15767_v12  ;;  %v15796_v21 = vpop.f32.mrf.mxu2  ;;  %v10374_v38 = vpop.eup %10373  ;;  %v4859_v42 = vand.u32 2147483647, %v15575_v57  ;;  %v10218_v0 = vunpack.i.h.bf16 %v15667_v33  ;;  %v18454_v63 = vld [vmem:[#allocation83_spill] sm:$0xff]  ;;  %v18455_v25 = vld [vmem:[#allocation96_spill] sm:$0xff]  ;;  %vm4855_vm8 = vweird.f32 %v15575_v57  ;;  %vm4856_vm9 = vweird.f32 %v15657_v48 }
 0x500   : > { %18449 = vst [vmem:[#allocation34_spill] sm:$0xff] %v15796_v21  ;;  %v15816_v49 = vadd.f32 %v18455_v25, %v18454_v63  ;;  %v8724_v5 = vmul.f32 -1.442695, %v15771_v10  ;;  %v15821_v23 = vpop.permute.xlu1 %10220  ;;  %v5615_v43 = vld [vmem:[#allocation3 + $0xb2] sm:$0xff]  ;;  %v6527_v33 = vsel %vm1427_vm0, %v5502_v26, %v10213_v13  ;;  %v4854_v35 = vadd.f32 %v15657_v48, %v4853_v30  ;;  %vm15859_vm10 = vmor %vm4855_vm8, %vm4856_vm9 }
 0x501   : > { %v15798_v52 = vpop.f32.mrf.mxu1  ;;  %18453 = vst [vmem:[#allocation49_spill] sm:$0xff] %v15802_v22  ;;  %v4867_v22 = vsub.f32 1.0, %v4866_v36  ;;  %10377 = vrcp.f32 %v15778_v9  ;;  %v18458_v63 = vld [vmem:[#allocation19_spill] sm:$0xff]  ;;  %v4881_v13 = vmul.f32 %v15780_v19, %v15681_v11  ;;  %v15840_v30 = vadd.f32 1.0, %v10374_v38  ;;  %v7928_v36 = vld [vmem:[%s18104_s8] sm:$0xff] }
 0x502   : > { %18450 = vst [vmem:[#allocation42_spill] sm:$0xff] %v15798_v52  ;;  %v15830_v25 = vadd.f32 %v18458_v63, %v15699_v62  ;;  %vm15845_vm5 = vcmp.eq.f32.partialorder %v4859_v42, 8.507059e+37  ;;  %v6559_v63 = vsel %vm1460_vm2, %v6527_v33, %v10218_v0  ;;  %8043 = vmatpush.msrb.mxu2 %v7928_v36  ;;  %v4876_v42 = vand.u32 2147483648, %v15630_v32  ;;  %v18464_v52 = vld [vmem:[#allocation102_spill] sm:$0xff] }
 0x503   : > { %18456 = vst [vmem:[#allocation38_spill] sm:$0xff] %v15816_v49  ;;  %8716 = vmatmul.msk.f32.gmra.mxu3 %vm1460_vm2, %v3329_v44  ;;  %6832 = vmatmul.f32.gmra.mxu2 %v18457_v27  ;;  %v15832_v49 = vpop.f32.mrf.mxu0  ;;  %v4848_v44 = vsel %vm15788_vm7, %v4847_v60, %v4843_v55  ;;  %v4861_v27 = vand.u32 2147483648, %v15575_v57  ;;  %v10376_v62 = vpop.eup %10375  ;;  %v6750_v60 = vadd.f32 %v15811_v2, %v18461_v24  ;;  %10379 = vpow2.f32 %v8724_v5  ;;  %v5503_v38 = vld [vmem:[#allocation3 + $0x169] sm:$0xff] }
 0x504   : > { %8760 = vmatmul.msk.f32.gmra.mxu1 %vm1427_vm0, %v5615_v43  ;;  %v4874_v43 = vand.u32 2147483647, %v15630_v32  ;;  %v10222_v12 = vunpack.i.l.bf16 %v15821_v23  ;;  %v6591_v24 = vsel %vm1493_vm1, %v6559_v63, %v6363_v4  ;;  %v5315_v61 = vmul.f32 %v4848_v44, %v18464_v52  ;;  %v6237_v57 = vpop.permute.xlu2 %6236  ;;  %v18476_v26 = vld [vmem:[#allocation22_spill] sm:$0xff] }
 0x505   : > { %v4858_v0 = vsel %vm15859_vm10, %v15657_v48, %v4854_v35  ;;  %v4868_v33 = vmul.f32 %v15742_v47, %v4867_v22  ;;  %v8725_v36 = vmul.f32 -1.442695, %v15830_v25  ;;  %v4882_v21 = vsub.f32 1.0, %v4881_v13  ;;  %v18468_v22 = vld [vmem:[#allocation87_spill] sm:$0xff] }
 0x506   : > { %v15852_v55 = vpop.f32.mrf.mxu3  ;;  %6942 = vmatmul.f32.gmra.mxu0 %v6591_v24  ;;  %10381 = vrcp.f32 %v15840_v30  ;;  %v15873_v5 = vadd.f32 1.0, %v10376_v62  ;;  %v15877_v4 = vadd.f32 %v18465_v3, %v15703_v17  ;;  %v4862_v48 = vor.u32 1.1754944e-38, %v4861_v27  ;;  %v18470_v13 = vld [vmem:[#allocation15_spill] sm:$0xff]  ;;  %v6365_v62 = vpop.permute.xlu0 %6364  ;;  %v18473_v3 = vld [vmem:[#allocation88_spill] sm:$0xff] }
 0x507   : > { %v15881_v44 = vpop.eup %10377  ;;  %vm4870_vm12 = vweird.f32 %v15630_v32  ;;  %v15886_v35 = vadd.f32 %v18468_v22, %v15635_v6  ;;  %v15889_v63 = vadd.f32 %v18470_v13, %v6750_v60  ;;  %vm15891_vm13 = vcmp.eq.f32.partialorder %v4874_v43, 8.507059e+37  ;;  %v15897_v27 = vpop.f32.mrf.mxu2  ;;  %v18479_v13 = vld [vmem:[#allocation52_spill] sm:$0xff] }
 0x508   : > { %18466 = vst [vmem:[#allocation46_spill] sm:$0xff] %v15877_v4  ;;  %v4877_v17 = vor.u32 1.1754944e-38, %v4876_v42  ;;  %v6528_v6 = vsel %vm1427_vm0, %v5503_v38, %v10222_v12  ;;  %v4863_v60 = vsel %vm15845_vm5, %v4862_v48, %v4858_v0  ;;  %v4869_v43 = vadd.f32 %v15742_v47, %v4868_v33  ;;  %v6239_v12 = vpop.permute.xlu1 %6238  ;;  %v18480_v38 = vld [vmem:[#allocation17_spill] sm:$0xff] }
 0x509   : > { %v15879_v52 = vpop.f32.mrf.mxu1  ;;  %18469 = vst [vmem:[#allocation47_spill] sm:$0xff] %v15886_v35  ;;  %vm4871_vm14 = vweird.f32 %v15742_v47  ;;  %10383 = vpow2.f32 %v8725_v36  ;;  %v10380_v42 = vpop.eup %10379  ;;  %v4883_v22 = vmul.f32 %v15780_v19, %v4882_v21  ;;  %v18477_v36 = vld [vmem:[#allocation14_spill] sm:$0xff]  ;;  %v6560_v21 = vsel %vm1460_vm2, %v6528_v6, %v6237_v57 }
 0x50a   : > { %18467 = vst [vmem:[#allocation43_spill] sm:$0xff] %v15879_v52  ;;  %v6753_v52 = vadd.f32 %v15811_v2, %v18473_v3  ;;  %10385 = vrcp.f32 %v15873_v5  ;;  %v15919_v48 = vadd.f32 %v18477_v36, %v15714_v39  ;;  %v15926_v3 = vadd.f32 %v18480_v38, %v18479_v13  ;;  %vm15934_vm15 = vmor %vm4870_vm12, %vm4871_vm14  ;;  %v18484_v36 = vld [vmem:[#allocation75_spill] sm:$0xff] }
 0x50b   : > { %18474 = vst [vmem:[#allocation54_spill] sm:$0xff] %v15897_v27  ;;  %6835 = vmatmul.f32.gmra.mxu2 %v18475_v59  ;;  %8813 = vmatmul.msk.f32.vlgmr.msrb.gmra.mxu3 %vm1460_vm2, %v5315_v61  ;;  %v4896_v59 = vmul.f32 %v15881_v44, %v15778_v9  ;;  %v8726_v61 = vmul.f32 -1.442695, %v15877_v4  ;;  %v15915_v33 = vpop.f32.mrf.mxu0  ;;  %v4889_v39 = vand.u32 2147483647, %v15681_v11  ;;  %v10223_v57 = vunpack.i.h.bf16 %v15821_v23 }
 0x50c   : > { %8761 = vmatmul.msk.f32.gmra.mxu1 %vm1427_vm0, %v5616_v54  ;;  %v15913_v0 = vadd.f32 %v18476_v26, %v6753_v52  ;;  %18481 = vst [vmem:[#allocation51_spill] sm:$0xff] %v15926_v3  ;;  %v15928_v27 = vpop.eup %10381  ;;  %v4891_v26 = vand.u32 2147483648, %v15681_v11  ;;  %v6592_v6 = vsel %vm1493_vm1, %v6560_v21, %v6365_v62  ;;  %v5316_v13 = vmul.f32 %v4863_v60, %v18484_v36  ;;  %v18485_v3 = vld [vmem:[#allocation92_spill] sm:$0xff]  ;;  %v18487_v60 = vld [vmem:[#allocation89_spill] sm:$0xff] }
 0x50d   : > { %v4873_v38 = vsel %vm15934_vm15, %v15742_v47, %v4869_v43  ;;  %v6756_v32 = vadd.f32 %v15811_v2, %v18485_v3  ;;  %v4884_v35 = vadd.f32 %v15780_v19, %v4883_v22  ;;  %vm4886_vm3 = vweird.f32 %v15780_v19  ;;  %v5504_v22 = vld [vmem:[#allocation3 + $0x171] sm:$0xff]  ;;  %v18491_v52 = vld [vmem:[#allocation33_spill] sm:$0xff] }
 0x50e   : > { %v15921_v54 = vpop.f32.mrf.mxu3  ;;  %6945 = vmatmul.f32.gmra.mxu0 %v6592_v6  ;;  %v4897_v4 = vsub.f32 1.0, %v4896_v59  ;;  %10387 = vpow2.f32 %v8726_v61  ;;  %vm4885_vm4 = vweird.f32 %v15681_v11  ;;  %v15957_v47 = vadd.f32 %v18487_v60, %v15638_v50  ;;  %v18492_v36 = vld [vmem:[#allocation97_spill] sm:$0xff] }
 0x50f   : > { %18478 = vst [vmem:[#allocation53_spill] sm:$0xff] %v15921_v54  ;;  %v15948_v54 = vadd.f32 1.0, %v10380_v42  ;;  %v10384_v62 = vpop.eup %10383  ;;  %v4911_v43 = vmul.f32 %v15928_v27, %v15840_v30  ;;  %v6367_v42 = vpop.permute.xlu2 %6366  ;;  %v8727_v21 = vmul.f32 -1.442695, %v15919_v48  ;;  %vm15964_vm6 = vcmp.eq.f32.partialorder %v4889_v39, 8.507059e+37  ;;  %v5617_v60 = vld [vmem:[#allocation3 + $0xca] sm:$0xff]  ;;  %vm15980_vm11 = vmor %vm4885_vm4, %vm4886_vm3 }
 0x510   : > { %18488 = vst [vmem:[#allocation55_spill] sm:$0xff] %v15957_v47  ;;  %v15962_v3 = vpop.eup %10385  ;;  %v4892_v61 = vor.u32 1.1754944e-38, %v4891_v26  ;;  %v15969_v6 = vadd.f32 %v18491_v52, %v6756_v32  ;;  %v6529_v50 = vsel %vm1427_vm0, %v5504_v22, %v10223_v57  ;;  %v18495_v26 = vld [vmem:[#allocation93_spill] sm:$0xff]  ;;  %v4888_v24 = vsel %vm15980_vm11, %v15780_v19, %v4884_v35  ;;  %v18499_v35 = vld [vmem:[#allocation95_spill] sm:$0xff]  ;;  %v18505_v47 = vld [vmem:[#allocation98_spill] sm:$0xff] }
 0x511   : > { %v15952_v23 = vpop.f32.mrf.mxu1  ;;  %v15986_v32 = vadd.f32 %v18495_v26, %v15650_v14  ;;  %10389 = vrcp.f32 %v15948_v54  ;;  %v6561_v57 = vsel %vm1460_vm2, %v6529_v50, %v6239_v12  ;;  %v4898_v11 = vmul.f32 %v15881_v44, %v4897_v4 }
 0x512   : > { %18486 = vst [vmem:[#allocation57_spill] sm:$0xff] %v15952_v23  ;;  %v4878_v23 = vsel %vm15891_vm13, %v4877_v17, %v4873_v38  ;;  %vm4900_vm7 = vweird.f32 %v15778_v9  ;;  %v15996_v17 = vadd.f32 1.0, %v10384_v62  ;;  %v15998_v38 = vpop.f32.mrf.mxu2  ;;  %v4904_v14 = vand.u32 2147483647, %v15778_v9 }
 0x513   : > { %6838 = vmatmul.f32.gmra.mxu2 %v18492_v36  ;;  %8814 = vmatmul.msk.f32.gmra.mxu3 %vm1460_vm2, %v5316_v13  ;;  %v6113_v13 = vpop.permute.xlu0 %6112  ;;  %18496 = vst [vmem:[#allocation59_spill] sm:$0xff] %v15998_v38  ;;  %v4912_v22 = vsub.f32 1.0, %v4911_v43  ;;  %v4926_v12 = vmul.f32 %v15962_v3, %v15873_v5  ;;  %10391 = vpow2.f32 %v8727_v21  ;;  %v18498_v36 = vld [vmem:[#allocation18_spill] sm:$0xff]  ;;  %v4906_v4 = vand.u32 2147483648, %v15778_v9  ;;  %v16014_v26 = vpop.f32.mrf.mxu0  ;;  %v18500_v38 = vld [vmem:[#allocation24_spill] sm:$0xff] }
 0x514   : > { %8762 = vmatmul.msk.f32.gmra.mxu1 %vm1427_vm0, %v5617_v60  ;;  %v10388_v50 = vpop.eup %10387  ;;  %v5317_v19 = vmul.f32 %v4878_v23, %v18498_v36  ;;  %v6759_v62 = vadd.f32 %v15811_v2, %v18499_v35  ;;  %v6241_v60 = vpop.permute.xlu1 %6240  ;;  %v6593_v39 = vsel %vm1493_vm1, %v6561_v57, %v6367_v42  ;;  %v4893_v43 = vsel %vm15964_vm6, %v4892_v61, %v4888_v24  ;;  %v5505_v36 = vld [vmem:[#allocation3 + $0x181] sm:$0xff] }
 0x515   : > { %vm4901_vm8 = vweird.f32 %v15881_v44  ;;  %v4919_v21 = vand.u32 2147483647, %v15840_v30  ;;  %v16018_v23 = vadd.f32 %v18500_v38, %v15729_v53  ;;  %v4899_v35 = vadd.f32 %v15881_v44, %v4898_v11 }
 0x516   : > { %v16003_v52 = vpop.f32.mrf.mxu3  ;;  %6948 = vmatmul.f32.gmra.mxu0 %v6593_v39  ;;  %10393 = vrcp.f32 %v15996_v17  ;;  %v6530_v42 = vsel %vm1427_vm0, %v5505_v36, %v6113_v13  ;;  %vm16028_vm9 = vcmp.eq.f32.partialorder %v4904_v14, 8.507059e+37  ;;  %v4913_v53 = vmul.f32 %v15928_v27, %v4912_v22  ;;  %v18507_v14 = vld [vmem:[#allocation99_spill] sm:$0xff]  ;;  %vm16050_vm10 = vmor %vm4900_vm7, %vm4901_vm8 }
 0x517   : > { %18497 = vst [vmem:[#allocation56_spill] sm:$0xff] %v16003_v52  ;;  %v4921_v52 = vand.u32 2147483648, %v15840_v30  ;;  %v16026_v61 = vpop.eup %10389  ;;  %v4927_v24 = vsub.f32 1.0, %v4926_v12  ;;  %v16033_v38 = vadd.f32 1.0, %v10388_v50  ;;  %v6369_v11 = vpop.permute.xlu2 %6368  ;;  %v4907_v39 = vor.u32 1.1754944e-38, %v4906_v4  ;;  %v18508_v12 = vld [vmem:[#allocation20_spill] sm:$0xff] }
 0x518   : > { %18501 = vst [vmem:[#allocation63_spill] sm:$0xff] %v16018_v23  ;;  %vm4915_vm5 = vweird.f32 %v15840_v30  ;;  %v16038_v13 = vadd.f32 %v18505_v47, %v15653_v34  ;;  %v16041_v36 = vadd.f32 %v15612_v1, %v6759_v62  ;;  %v5318_v50 = vmul.f32 %v4893_v43, %v18508_v12  ;;  %v18513_v43 = vld [vmem:[#allocation100_spill] sm:$0xff] }
 0x519   : > { %v16024_v59 = vpop.f32.mrf.mxu1  ;;  %v10392_v22 = vpop.eup %10391  ;;  %vm16054_vm12 = vcmp.eq.f32.partialorder %v4919_v21, 8.507059e+37  ;;  %v8728_v1 = vmul.f32 -1.442695, %v16018_v23  ;;  %v6562_v47 = vsel %vm1460_vm2, %v6530_v42, %v6241_v60  ;;  %v4922_v62 = vor.u32 1.1754944e-38, %v4921_v52 }
 0x51a   : > { %18502 = vst [vmem:[#allocation58_spill] sm:$0xff] %v16024_v59  ;;  %v5618_v59 = vld [vmem:[#allocation3 + $0xda] sm:$0xff]  ;;  %v4941_v9 = vmul.f32 %v16026_v61, %v15948_v54  ;;  %v6762_v21 = vadd.f32 %v15811_v2, %v18513_v43  ;;  %vm4916_vm13 = vweird.f32 %v15928_v27  ;;  %v4928_v12 = vmul.f32 %v15962_v3, %v4927_v24 }
 0x51b   : > { %18506 = vst [vmem:[#allocation62_spill] sm:$0xff] %v16041_v36  ;;  %6841 = vmatmul.f32.gmra.mxu2 %v18507_v14  ;;  %8815 = vmatmul.msk.f32.gmra.mxu3 %vm1460_vm2, %v5317_v19  ;;  %v4903_v19 = vsel %vm16050_vm10, %v15881_v44, %v4899_v35  ;;  %v4914_v14 = vadd.f32 %v15928_v27, %v4913_v53  ;;  %10395 = vrcp.f32 %v16033_v38  ;;  %v6115_v60 = vpop.permute.xlu0 %6114  ;;  %v16077_v52 = vadd.f32 1.0, %v10392_v22  ;;  %v16079_v35 = vpop.f32.mrf.mxu2  ;;  %v5506_v36 = vld [vmem:[#allocation3 + $0x189] sm:$0xff]  ;;  %vm16093_vm14 = vmor %vm4915_vm5, %vm4916_vm13 }
 0x51c   : > { %8763 = vmatmul.msk.f32.gmra.mxu1 %vm1427_vm0, %v5618_v59  ;;  %v16072_v59 = vpop.eup %10393  ;;  %v16075_v44 = vadd.f32 %v15717_v37, %v6762_v21  ;;  %v6594_v53 = vsel %vm1493_vm1, %v6562_v47, %v6369_v11  ;;  %v4908_v24 = vsel %vm16028_vm9, %v4907_v39, %v4903_v19  ;;  %v4934_v43 = vand.u32 2147483647, %v15873_v5  ;;  %v18516_v11 = vld [vmem:[#allocation101_spill] sm:$0xff]  ;;  %v18517_v39 = vld [vmem:[#allocation32_spill] sm:$0xff]  ;;  %v6243_v47 = vpop.permute.xlu1 %6242 }
 0x51d   : > { %v4936_v23 = vand.u32 2147483648, %v15873_v5  ;;  %10397 = vpow2.f32 %v8728_v1  ;;  %v16099_v57 = vadd.f32 %v18516_v11, %v15664_v29  ;;  %v16103_v22 = vadd.f32 %v18517_v39, %v15733_v41 }
 0x51e   : > { %v4665_v42 = vpop.f32.mrf.mxu3  ;;  %6951 = vmatmul.f32.gmra.mxu0 %v6594_v53  ;;  %v6531_v1 = vsel %vm1427_vm0, %v5506_v36, %v6115_v60  ;;  %v4918_v30 = vsel %vm16093_vm14, %v15928_v27, %v4914_v14  ;;  %v4929_v21 = vadd.f32 %v15962_v3, %v4928_v12  ;;  %vm4931_vm15 = vweird.f32 %v15962_v3  ;;  %v18518_v36 = vld [vmem:[#allocation13_spill] sm:$0xff] }
 0x51f   : > { %v16082_v4 = vadd.f32 %v4665_v42, %v15986_v32  ;;  %v4942_v32 = vsub.f32 1.0, %v4941_v9  ;;  %v4956_v29 = vmul.f32 %v16072_v59, %v15996_v17  ;;  %v16115_v9 = vpop.f32.mrf.mxu0  ;;  %v5319_v41 = vmul.f32 %v4908_v24, %v15604_v31  ;;  %v5619_v42 = vld [vmem:[#allocation3 + $0xe2] sm:$0xff]  ;;  %v6371_v24 = vpop.permute.xlu2 %6370 }
 0x520   : > { %vm4930_vm3 = vweird.f32 %v15873_v5  ;;  %v6765_v60 = vadd.f32 %v15811_v2, %v18518_v36  ;;  %10399 = vrcp.f32 %v16077_v52  ;;  %vm16125_vm4 = vcmp.eq.f32.partialorder %v4934_v43, 8.507059e+37  ;;  %v18521_v53 = vld [vmem:[#allocation73_spill] sm:$0xff] }
 0x521   : > { %v16106_v19 = vpop.f32.mrf.mxu1  ;;  %v16123_v27 = vpop.eup %10395  ;;  %v4937_v12 = vor.u32 1.1754944e-38, %v4936_v23  ;;  %v16131_v31 = vadd.f32 %v18521_v53, %v15677_v8  ;;  %v6563_v5 = vsel %vm1460_vm2, %v6531_v1, %v6243_v47  ;;  %v4923_v37 = vsel %vm16054_vm12, %v4922_v62, %v4918_v30  ;;  %vm16139_vm6 = vmor %vm4930_vm3, %vm4931_vm15 }
 0x522   : > { %v4943_v23 = vmul.f32 %v16026_v61, %v4942_v32  ;;  %v16145_v43 = vadd.f32 %v15832_v49, %v6765_v60  ;;  %v8729_v8 = vmul.f32 -1.442695, %v16103_v22  ;;  %v4933_v39 = vsel %vm16139_vm6, %v15962_v3, %v4929_v21 }
 0x523   : > { %8816 = vmatmul.msk.f32.gmra.mxu3 %vm1460_vm2, %v5318_v50  ;;  %v10398_v11 = vpop.eup %10397  ;;  %v4949_v34 = vand.u32 2147483647, %v15948_v54  ;;  %v4957_v62 = vsub.f32 1.0, %v4956_v29  ;;  %v16154_v1 = vadd.f32 %v15679_v58, %v15751_v45  ;;  %v4951_v32 = vand.u32 2147483648, %v15948_v54  ;;  %v18524_v58 = vld [vmem:[#allocation103_spill] sm:$0xff]  ;;  %v18527_v50 = vld [vmem:[#allocation16_spill] sm:$0xff] }
 0x524   : > { %8764 = vmatmul.msk.f32.gmra.mxu1 %vm1427_vm0, %v5619_v42  ;;  %v4971_v49 = vmul.f32 %v16123_v27, %v16033_v38  ;;  %v6595_v36 = vsel %vm1493_vm1, %v6563_v5, %v6371_v24  ;;  %v16164_v3 = vmul.f32 %v4923_v37, %v15647_v16  ;;  %vm4945_vm11 = vweird.f32 %v15948_v54  ;;  %v16177_v16 = vpop.f32.mrf.mxu2 }
 0x525   : > { %vm4946_vm7 = vweird.f32 %v16026_v61  ;;  %v6768_v45 = vadd.f32 %v15811_v2, %v18524_v58  ;;  %v4938_v29 = vsel %vm16125_vm4, %v4937_v12, %v4933_v39  ;;  %v16175_v60 = vadd.f32 1.0, %v10398_v11  ;;  %v5620_v11 = vld [vmem:[#allocation3 + $0xf2] sm:$0xff] }
 0x526   : > { %v4668_v47 = vpop.f32.mrf.mxu3  ;;  %6954 = vmatmul.f32.gmra.mxu0 %v6595_v36  ;;  %v16170_v21 = vpop.eup %10399  ;;  %10401 = vpow2.f32 %v8729_v8  ;;  %vm16179_vm1 = vcmp.eq.f32.partialorder %v4949_v34, 8.507059e+37  ;;  %v4958_v5 = vmul.f32 %v16072_v59, %v4957_v62  ;;  %v8730_v24 = vmul.f32 -1.442695, %v16154_v1  ;;  %vm16203_vm8 = vmor %vm4945_vm11, %vm4946_vm7 }
 0x527   : > { %v16160_v30 = vadd.f32 %v4668_v47, %v16038_v13  ;;  %v4944_v13 = vadd.f32 %v16026_v61, %v4943_v23  ;;  %v4952_v14 = vor.u32 1.1754944e-38, %v4951_v32  ;;  %v4972_v12 = vsub.f32 1.0, %v4971_v49  ;;  %v16211_v34 = vpop.f32.mrf.mxu0  ;;  %v18530_v47 = vld [vmem:[#allocation25_spill] sm:$0xff] }
 0x528   : > { %v16190_v23 = vadd.f32 %v18527_v50, %v15685_v46  ;;  %v16193_v8 = vadd.f32 %v15915_v33, %v6768_v45  ;;  %v16197_v39 = vmul.f32 %v4938_v29, %v15694_v51  ;;  %vm4960_vm9 = vweird.f32 %v15996_v17 }
 0x529   : > { %v6975_v42 = vpop.f32.mrf.mxu1  ;;  %v4964_v46 = vand.u32 2147483647, %v15996_v17  ;;  %v4986_v33 = vmul.f32 %v16170_v21, %v16077_v52  ;;  %v4948_v51 = vsel %vm16203_vm8, %v16026_v61, %v4944_v13  ;;  %v4966_v54 = vand.u32 2147483648, %v15996_v17 }
 0x52a   : > { %v16186_v37 = vadd.f32 %v6975_v42, %v15889_v63  ;;  %10403 = vrcp.f32 %v16175_v60  ;;  %v4959_v62 = vadd.f32 %v16072_v59, %v4958_v5  ;;  %vm4961_vm5 = vweird.f32 %v16072_v59 }
 0x52b   : > { %8817 = vmatmul.msk.f32.gmra.mxu3 %vm1460_vm2, %v5319_v41  ;;  %v6771_v32 = vadd.f32 %v15811_v2, %v18530_v47  ;;  %10405 = vpow2.f32 %v8730_v24  ;;  %v4973_v58 = vmul.f32 %v16123_v27, %v4972_v12  ;;  %v4979_v61 = vand.u32 2147483647, %v16033_v38  ;;  %vm16238_vm12 = vmor %vm4960_vm9, %vm4961_vm5 }
 0x52c   : > { %8765 = vmatmul.msk.f32.gmra.mxu1 %vm1427_vm0, %v5620_v11  ;;  %v8781_v41 = vmul.f32 -1.442695, %v16186_v37  ;;  %v10402_v36 = vpop.eup %10401  ;;  %v4953_v29 = vsel %vm16179_vm1, %v4952_v14, %v4948_v51  ;;  %vm16231_vm10 = vcmp.eq.f32.partialorder %v4964_v46, 8.507059e+37  ;;  %v4981_v42 = vand.u32 2147483648, %v16033_v38 }
 0x52d   : > { %v4987_v5 = vsub.f32 1.0, %v4986_v33  ;;  %v4967_v12 = vor.u32 1.1754944e-38, %v4966_v54  ;;  %v16247_v53 = vadd.f32 %v16014_v26, %v6771_v32  ;;  %v16251_v14 = vadd.f32 %v15763_v15, %v15761_v56  ;;  %v5621_v33 = vld [vmem:[#allocation3 + $0xfa] sm:$0xff]  ;;  %v5622_v15 = vld [vmem:[#allocation3 + $0x10a] sm:$0xff] }
 0x52e   : > { %v4671_v49 = vpop.f32.mrf.mxu3  ;;  %10407 = vpow2.f32 %v8781_v41  ;;  %v4963_v17 = vsel %vm16238_vm12, %v16072_v59, %v4959_v62  ;;  %vm4975_vm13 = vweird.f32 %v16033_v38  ;;  %v16257_v63 = vadd.f32 1.0, %v10402_v36  ;;  %v16273_v59 = vpop.f32.mrf.mxu2  ;;  %v18539_v62 = vld [vmem:[#allocation26_spill] sm:$0xff] }
 0x52f   : > { %v16227_v45 = vadd.f32 %v4671_v49, %v16099_v57  ;;  %v18535_v57 = vld [vmem:[#allocation12_spill] sm:$0xff]  ;;  %v16265_v26 = vmul.f32 %v4953_v29, %v15771_v10  ;;  %v4974_v56 = vadd.f32 %v16123_v27, %v4973_v58  ;;  %vm4976_vm14 = vweird.f32 %v16123_v27  ;;  %v6892_v13 = vpop.f32.mrf.mxu0 }
 0x530   : > { %v16244_v50 = vadd.f32 %v18535_v57, %v15707_v28  ;;  %v16262_v28 = vpop.eup %10403  ;;  %vm16269_vm15 = vcmp.eq.f32.partialorder %v4979_v61, 8.507059e+37  ;;  %v4982_v51 = vor.u32 1.1754944e-38, %v4981_v42  ;;  %v4988_v54 = vmul.f32 %v16170_v21, %v4987_v5  ;;  %v18538_v10 = vld [vmem:[#allocation28_spill] sm:$0xff]  ;;  %vm16294_vm3 = vmor %vm4975_vm13, %vm4976_vm14 }
 0x531   : > { %v6978_v11 = vpop.f32.mrf.mxu1  ;;  %v6774_v41 = vadd.f32 %v15811_v2, %v18538_v10  ;;  %v16282_v47 = vadd.f32 %v18539_v62, %v15721_v18  ;;  %v4968_v49 = vsel %vm16231_vm10, %v4967_v12, %v4963_v17  ;;  %v4994_v36 = vand.u32 2147483647, %v16077_v52 }
 0x532   : > { %v16260_v46 = vadd.f32 %v6978_v11, %v15913_v0  ;;  %v10406_v0 = vpop.eup %10405  ;;  %v4996_v18 = vand.u32 2147483648, %v16077_v52  ;;  %v5001_v29 = vmul.f32 %v16262_v28, %v16175_v60  ;;  %10409 = vrcp.f32 %v16257_v63 }
 0x533   : > { %8818 = vmatmul.msk.f32.gmra.mxu3 %vm1460_vm2, %v16164_v3  ;;  %v8731_v3 = vmul.f32 -1.442695, %v16251_v14  ;;  %v4978_v24 = vsel %vm16294_vm3, %v16123_v27, %v4974_v56  ;;  %v16307_v38 = vadd.f32 1.0, %v10406_v0  ;;  %v4989_v57 = vadd.f32 %v16170_v21, %v4988_v54  ;;  %v18542_v27 = vld [vmem:[#allocation31_spill] sm:$0xff] }
 0x534   : > { %8766 = vmatmul.msk.f32.gmra.mxu1 %vm1427_vm0, %v5621_v33  ;;  %v10408_v32 = vpop.eup %10407  ;;  %v8782_v58 = vmul.f32 -1.442695, %v16260_v46  ;;  %vm4991_vm4 = vweird.f32 %v16170_v21  ;;  %v16315_v11 = vadd.f32 %v16115_v9, %v6774_v41  ;;  %v16319_v17 = vmul.f32 %v4968_v49, %v15830_v25  ;;  %v18554_v25 = vld [vmem:[#allocation47_spill] sm:$0xff] }
 0x535   : > { %v16302_v42 = vadd.f32 1.0, %v10408_v32  ;;  %vm4990_vm6 = vweird.f32 %v16077_v52  ;;  %v6777_v56 = vadd.f32 %v15811_v2, %v18542_v27  ;;  %v4983_v33 = vsel %vm16269_vm15, %v4982_v51, %v4978_v24  ;;  %v18548_v32 = vld [vmem:[#allocation46_spill] sm:$0xff] }
 0x536   : > { %v4674_v5 = vpop.f32.mrf.mxu3  ;;  %10411 = vpow2.f32 %v8782_v58  ;;  %v5002_v0 = vsub.f32 1.0, %v5001_v29  ;;  %v5011_v54 = vand.u32 2147483648, %v16175_v60  ;;  %vm16330_vm11 = vmor %vm4990_vm6, %vm4991_vm4  ;;  %vm16334_vm7 = vcmp.eq.f32.partialorder %v4994_v36, 8.507059e+37  ;;  %v18549_v36 = vld [vmem:[#allocation30_spill] sm:$0xff] }
 0x537   : > { %v16310_v12 = vadd.f32 %v4674_v5, %v16131_v31  ;;  %10413 = vrcp.f32 %v16302_v42  ;;  %v4997_v52 = vor.u32 1.1754944e-38, %v4996_v18  ;;  %v16340_v41 = vadd.f32 %v15620_v7, %v15725_v20  ;;  %v18552_v18 = vld [vmem:[#allocation37_spill] sm:$0xff] }
 0x538   : > { %10415 = vpow2.f32 %v8731_v3  ;;  %v4993_v51 = vsel %vm16330_vm11, %v16170_v21, %v4989_v57  ;;  %vm5005_vm1 = vweird.f32 %v16175_v60  ;;  %v16352_v62 = vadd.f32 %v16211_v34, %v6777_v56  ;;  %v16365_v3 = vpop.f32.mrf.mxu2 }
 0x539   : > { %v6981_v31 = vpop.f32.mrf.mxu1  ;;  %10417 = vrcp.f32 %v16307_v38  ;;  %v16356_v7 = vadd.f32 %v15852_v55, %v15794_v40  ;;  %v5009_v49 = vand.u32 2147483647, %v16175_v60  ;;  %v6780_v21 = vadd.f32 %v15811_v2, %v18549_v36  ;;  %18550 = vst [vmem:[#allocation64_spill] sm:$0xff] %v16365_v3  ;;  %v18551_v55 = vld [vmem:[#allocation35_spill] sm:$0xff] }
 0x53a   : > { %v16328_v9 = vadd.f32 %v6981_v31, %v15969_v6  ;;  %v16345_v6 = vpop.eup %10409  ;;  %18547 = vst [vmem:[#allocation61_spill] sm:$0xff] %v16352_v62  ;;  %v5003_v61 = vmul.f32 %v16262_v28, %v5002_v0  ;;  %v16369_v40 = vor.u32 1.1754944e-38, %v5011_v54  ;;  %v16373_v29 = vadd.f32 %v18552_v18, %v18551_v55  ;;  %v16386_v54 = vpop.f32.mrf.mxu0  ;;  %v18562_v36 = vld [vmem:[#allocation55_spill] sm:$0xff] }
 0x53b   : > { %8819 = vmatmul.msk.f32.gmra.mxu3 %vm1460_vm2, %v16197_v39  ;;  %v16360_v39 = vmul.f32 %v4983_v33, %v18548_v32  ;;  %v4998_v27 = vsel %vm16334_vm7, %v4997_v52, %v4993_v51  ;;  %vm5006_vm8 = vweird.f32 %v16262_v28  ;;  %v16380_v56 = vadd.f32 %v6892_v13, %v6780_v21  ;;  %v18555_v52 = vld [vmem:[#allocation53_spill] sm:$0xff] }
 0x53c   : > { %8767 = vmatmul.msk.f32.gmra.mxu1 %vm1427_vm0, %v5622_v15  ;;  %v10412_v20 = vpop.eup %10411  ;;  %v8783_v34 = vmul.f32 -1.442695, %v16328_v9  ;;  %v5016_v33 = vmul.f32 %v16345_v6, %v16257_v63  ;;  %v5026_v0 = vand.u32 2147483648, %v16257_v63  ;;  %v8732_v10 = vmul.f32 -1.442695, %v16356_v7  ;;  %vm16427_vm10 = vmor %vm5005_vm1, %vm5006_vm8 }
 0x53d   : > { %v10414_v58 = vpop.eup %10413  ;;  %v16375_v5 = vadd.f32 1.0, %v10412_v20  ;;  %18553 = vst [vmem:[#allocation65_spill] sm:$0xff] %v16380_v56  ;;  %v16394_v51 = vadd.f32 %v18555_v52, %v18554_v25  ;;  %v5004_v32 = vadd.f32 %v16262_v28, %v5003_v61  ;;  %v7210_v55 = vand.u32 2147483648, %v16302_v42 }
 0x53e   : > { %v4677_v24 = vpop.f32.mrf.mxu3  ;;  %v10416_v57 = vpop.eup %10415  ;;  %v7200_v31 = vmul.f32 %v10414_v58, %v16302_v42  ;;  %v16405_v18 = vmul.f32 %v4998_v27, %v15919_v48  ;;  %vm16407_vm9 = vcmp.eq.f32.partialorder %v5009_v49, 8.507059e+37  ;;  %vm7205_vm5 = vweird.f32 %v10414_v58  ;;  %v18558_v27 = vld [vmem:[#allocation34_spill] sm:$0xff] }
 0x53f   : > { %10419 = vrcp.f32 %v16375_v5  ;;  %v16390_v15 = vpop.eup %10417  ;;  %v16397_v20 = vadd.f32 %v4677_v24, %v16190_v23  ;;  %v16401_v21 = vadd.f32 1.0, %v10416_v57  ;;  %v7208_v23 = vand.u32 2147483647, %v16302_v42  ;;  %v5623_v24 = vld [vmem:[#allocation3 + $0x112] sm:$0xff] }
 0x540   : > { %v7201_v13 = vsub.f32 1.0, %v7200_v31  ;;  %10421 = vpow2.f32 %v8783_v34  ;;  %v5017_v61 = vsub.f32 1.0, %v5016_v33  ;;  %v16414_v57 = vor.u32 1.1754944e-38, %v5026_v0 }
 0x541   : > { %v6984_v34 = vpop.f32.mrf.mxu1  ;;  %v5031_v48 = vmul.f32 %v16390_v15, %v16307_v38  ;;  %v16420_v49 = vadd.f32 %v15811_v2, %v18558_v27  ;;  %10423 = vpow2.f32 %v8732_v10  ;;  %vm7204_vm12 = vweird.f32 %v16302_v42 }
 0x542   : > { %v7202_v31 = vmul.f32 %v10414_v58, %v7201_v13  ;;  %v5008_v52 = vsel %vm16427_vm10, %v16262_v28, %v5004_v32  ;;  %10425 = vrcp.f32 %v16401_v21  ;;  %vm7206_vm13 = vmor %vm7204_vm12, %vm7205_vm5  ;;  %v7211_v60 = vor.u32 1.1754944e-38, %v7210_v55  ;;  %v18561_v13 = vld [vmem:[#allocation62_spill] sm:$0xff]  ;;  %v16449_v28 = vpop.f32.mrf.mxu2 }
 0x543   : > { %8820 = vmatmul.msk.f32.gmra.mxu3 %vm1460_vm2, %v16265_v26  ;;  %v8733_v26 = vmul.f32 -1.442695, %v16394_v51  ;;  %vm7209_vm14 = vcmp.eq.f32.partialorder %v7208_v23, 8.507059e+37  ;;  %18565 = vst [vmem:[#allocation10_spill] sm:$0xff] %v16449_v28  ;;  %v5018_v32 = vmul.f32 %v16345_v6, %v5017_v61  ;;  %vm5020_vm15 = vweird.f32 %v16257_v63  ;;  %v18566_v23 = vld [vmem:[#allocation40_spill] sm:$0xff]  ;;  %v16462_v28 = vpop.f32.mrf.mxu0 }
 0x544   : > { %8768 = vmatmul.msk.f32.gmra.mxu1 %vm1427_vm0, %v5623_v24  ;;  %v7203_v33 = vadd.f32 %v10414_v58, %v7202_v31  ;;  %v16441_v24 = vadd.f32 %v6984_v34, %v18561_v13  ;;  %v18563_v31 = vld [vmem:[#allocation56_spill] sm:$0xff]  ;;  %v5032_v55 = vsub.f32 1.0, %v5031_v48  ;;  %vm5021_vm3 = vweird.f32 %v16345_v6 }
 0x545   : > { %v16433_v0 = vpop.eup %10419  ;;  %v16445_v62 = vadd.f32 %v18563_v31, %v18562_v36  ;;  %10427 = vpow2.f32 %v8733_v26  ;;  %v7225_v61 = vand.u32 2147483648, %v16375_v5  ;;  %vm7219_vm11 = vweird.f32 %v16375_v5  ;;  %vm16521_vm8 = vmor %vm5020_vm15, %vm5021_vm3 }
 0x546   : > { %v4680_v10 = vpop.f32.mrf.mxu3  ;;  %v10422_v27 = vpop.eup %10421  ;;  %v7207_v42 = vsel %vm7206_vm13, %v10414_v58, %v7203_v33  ;;  %v7215_v25 = vmul.f32 %v16433_v0, %v16375_v5  ;;  %v8784_v58 = vmul.f32 -1.442695, %v16441_v24  ;;  %v18567_v33 = vld [vmem:[#allocation42_spill] sm:$0xff]  ;;  %vm7220_vm4 = vweird.f32 %v16433_v0 }
 0x547   : > { %18564 = vst [vmem:[#allocation66_spill] sm:$0xff] %v16445_v62  ;;  %v7212_v34 = vsel %vm7209_vm14, %v7211_v60, %v7207_v42  ;;  %v16453_v13 = vadd.f32 1.0, %v10422_v27  ;;  %v16460_v31 = vadd.f32 %v18567_v33, %v18566_v23  ;;  %v10424_v48 = vpop.eup %10423  ;;  %v8734_v26 = vmul.f32 -1.442695, %v16445_v62  ;;  %v5624_v27 = vld [vmem:[#allocation3 + $0x122] sm:$0xff]  ;;  %vm7221_vm7 = vmor %vm7219_vm11, %vm7220_vm4 }
 0x548   : > { %v7679_v3 = vmul.f32 %v7212_v34, %v16186_v37  ;;  %v7216_v36 = vsub.f32 1.0, %v7215_v25  ;;  %v7223_v60 = vand.u32 2147483647, %v16375_v5  ;;  %v16473_v42 = vpop.eup %10425  ;;  %v5013_v25 = vsel %vm16407_vm9, %v16369_v40, %v5008_v52 }
 0x549   : > { %10429 = vrcp.f32 %v16453_v13  ;;  %v5039_v34 = vand.u32 2147483647, %v16307_v38  ;;  %v5019_v23 = vadd.f32 %v16345_v6, %v5018_v32  ;;  %v6987_v40 = vpop.f32.mrf.mxu1  ;;  %v16491_v52 = vadd.f32 1.0, %v10424_v48 }
 0x54a   : > { %v7217_v37 = vmul.f32 %v16433_v0, %v7216_v36  ;;  %8845 = vmatmul.msk.f32.vlgmr.msrb.gmra.mxu2 %vm1427_vm0, %v7679_v3  ;;  %v5041_v36 = vand.u32 2147483648, %v16307_v38  ;;  %10431 = vpow2.f32 %v8784_v58  ;;  %v18568_v3 = vand.u32 2147483647, %v16257_v63  ;;  %v18575_v63 = vld [vmem:[#allocation54_spill] sm:$0xff] }
 0x54b   : > { %8821 = vmatmul.msk.f32.gmra.mxu3 %vm1460_vm2, %v16319_v17  ;;  %v5033_v17 = vmul.f32 %v16390_v15, %v5032_v55  ;;  %v7226_v58 = vor.u32 1.1754944e-38, %v7225_v61  ;;  %v16496_v32 = vadd.f32 %v4680_v10, %v16244_v50  ;;  %v10428_v62 = vpop.eup %10427  ;;  %10433 = vpow2.f32 %v8734_v26 }
 0x54c   : > { %8769 = vmatmul.msk.f32.gmra.mxu1 %vm1427_vm0, %v5624_v27  ;;  %vm16484_vm6 = vcmp.eq.f32.partialorder %v18568_v3, 8.507059e+37  ;;  %v7218_v56 = vadd.f32 %v16433_v0, %v7217_v37  ;;  %v16499_v27 = vadd.f32 %v6987_v40, %v16075_v44  ;;  %vm7224_vm1 = vcmp.eq.f32.partialorder %v7223_v60, 8.507059e+37  ;;  %v18571_v37 = vld [vmem:[#allocation63_spill] sm:$0xff] }
 0x54d   : > { %v5046_v61 = vmul.f32 %v16473_v42, %v16401_v21  ;;  %v16511_v50 = vadd.f32 %v16386_v54, %v16420_v49  ;;  %v16515_v26 = vmul.f32 %v5013_v25, %v18571_v37  ;;  %vm5035_vm9 = vweird.f32 %v16307_v38  ;;  %v16529_v49 = vpop.f32.mrf.mxu2 }
 0x54e   : > { %v4683_v3 = vpop.f32.mrf.mxu3  ;;  %v7222_v55 = vsel %vm7221_vm7, %v16433_v0, %v7218_v56  ;;  %v8785_v10 = vmul.f32 -1.442695, %v16499_v27  ;;  %18574 = vst [vmem:[#allocation69_spill] sm:$0xff] %v16529_v49  ;;  %v5023_v25 = vsel %vm16521_vm8, %v16345_v6, %v5019_v23  ;;  %v5042_v56 = vor.u32 1.1754944e-38, %v5041_v36  ;;  %v5625_v6 = vld [vmem:[#allocation3 + $0x12a] sm:$0xff]  ;;  %v5627_v49 = vld [vmem:[#allocation3 + $0x142] sm:$0xff] }
 0x54f   : > { %v16503_v5 = vadd.f32 %v4683_v3, %v16282_v47  ;;  %v16505_v48 = vpop.eup %10429  ;;  %v7227_v44 = vsel %vm7224_vm1, %v7226_v58, %v7222_v55  ;;  %10435 = vrcp.f32 %v16491_v52  ;;  %v6786_v40 = vadd.f32 %v15811_v2, %v18575_v63  ;;  %v16550_v2 = vpop.f32.mrf.mxu0  ;;  %v18578_v47 = vld [vmem:[#allocation44_spill] sm:$0xff]  ;;  %v18587_v63 = vld [vmem:[#allocation49_spill] sm:$0xff] }
 0x550   : > { %v7680_v0 = vmul.f32 %v7227_v44, %v16260_v46  ;;  %v7230_v54 = vmul.f32 %v16505_v48, %v16453_v13  ;;  %v10432_v60 = vpop.eup %10431  ;;  %v5034_v58 = vadd.f32 %v16390_v15, %v5033_v17  ;;  %vm5036_vm5 = vweird.f32 %v16390_v15  ;;  %v18586_v46 = vld [vmem:[#allocation59_spill] sm:$0xff] }
 0x551   : > { %vm16539_vm10 = vcmp.eq.f32.partialorder %v5039_v34, 8.507059e+37  ;;  %v16543_v55 = vadd.f32 1.0, %v10432_v60  ;;  %v5047_v36 = vsub.f32 1.0, %v5046_v61  ;;  %v16548_v23 = vadd.f32 1.0, %v10428_v62  ;;  %v10434_v34 = vpop.eup %10433  ;;  %vm16571_vm13 = vmor %vm5035_vm9, %vm5036_vm5 }
 0x552   : > { %v7231_v3 = vsub.f32 1.0, %v7230_v54  ;;  %8846 = vmatmul.msk.f32.gmra.mxu2 %vm1427_vm0, %v7680_v0  ;;  %v7240_v17 = vand.u32 2147483648, %v16453_v13  ;;  %10437 = vpow2.f32 %v8785_v10  ;;  %vm7235_vm12 = vweird.f32 %v16505_v48  ;;  %v18579_v10 = vld [vmem:[#allocation43_spill] sm:$0xff] }
 0x553   : > { %8822 = vmatmul.msk.f32.gmra.mxu3 %vm1460_vm2, %v16360_v39  ;;  %v7238_v37 = vand.u32 2147483647, %v16453_v13  ;;  %10439 = vrcp.f32 %v16543_v55  ;;  %v6990_v39 = vpop.f32.mrf.mxu1  ;;  %v5028_v62 = vsel %vm16484_vm6, %v16414_v57, %v5023_v25  ;;  %v5054_v61 = vand.u32 2147483647, %v16401_v21 }
 0x554   : > { %8770 = vmatmul.msk.f32.gmra.mxu1 %vm1427_vm0, %v5625_v6  ;;  %v7232_v44 = vmul.f32 %v16505_v48, %v7231_v3  ;;  %v16564_v0 = vadd.f32 %v18579_v10, %v18578_v47  ;;  %v8735_v54 = vmul.f32 -1.442695, %v16082_v4  ;;  %vm5050_vm14 = vweird.f32 %v16401_v21 }
 0x555   : > { %vm7234_vm15 = vweird.f32 %v16453_v13  ;;  %v16579_v33 = vadd.f32 %v6990_v39, %v16145_v43  ;;  %v16584_v3 = vpop.eup %10435  ;;  %v5038_v38 = vsel %vm16571_vm13, %v16390_v15, %v5034_v58  ;;  %10441 = vrcp.f32 %v16548_v23  ;;  %v16606_v10 = vpop.f32.mrf.mxu2 }
 0x556   : > { %v4686_v60 = vpop.f32.mrf.mxu3  ;;  %v7233_v57 = vadd.f32 %v16505_v48, %v7232_v44  ;;  %v16590_v6 = vadd.f32 1.0, %v10434_v34  ;;  %vm7236_vm3 = vmor %vm7234_vm15, %vm7235_vm12  ;;  %v7241_v13 = vor.u32 1.1754944e-38, %v7240_v17  ;;  %v5048_v43 = vmul.f32 %v16473_v42, %v5047_v36  ;;  %18582 = vst [vmem:[#allocation72_spill] sm:$0xff] %v16606_v10  ;;  %v18593_v10 = vld [vmem:[#allocation58_spill] sm:$0xff] }
 0x557   : > { %v16582_v25 = vadd.f32 %v4686_v60, %v16340_v41  ;;  %vm7239_vm4 = vcmp.eq.f32.partialorder %v7238_v37, 8.507059e+37  ;;  %v8786_v41 = vmul.f32 -1.442695, %v16579_v33  ;;  %v16598_v47 = vmul.f32 %v5028_v62, %v16103_v22  ;;  %v5626_v37 = vld [vmem:[#allocation3 + $0x13a] sm:$0xff] }
 0x558   : > { %v7237_v44 = vsel %vm7236_vm3, %v16505_v48, %v7233_v57  ;;  %v10438_v39 = vpop.eup %10437  ;;  %v5056_v15 = vand.u32 2147483648, %v16401_v21  ;;  %10443 = vpow2.f32 %v8735_v54  ;;  %v5061_v17 = vmul.f32 %v16584_v3, %v16491_v52  ;;  %v18588_v57 = vld [vmem:[#allocation57_spill] sm:$0xff] }
 0x559   : > { %v7242_v58 = vsel %vm7239_vm4, %v7241_v13, %v7237_v44  ;;  %v16601_v34 = vpop.eup %10439  ;;  %v16608_v48 = vadd.f32 1.0, %v10438_v39  ;;  %10445 = vpow2.f32 %v8786_v41  ;;  %v5043_v22 = vsel %vm16539_vm10, %v5042_v56, %v5038_v38  ;;  %v16643_v13 = vpop.f32.mrf.mxu0 }
 0x55a   : > { %v7681_v36 = vmul.f32 %v7242_v58, %v16328_v9  ;;  %vm16614_vm6 = vcmp.eq.f32.partialorder %v5054_v61, 8.507059e+37  ;;  %v16619_v54 = vadd.f32 %v16462_v28, %v6786_v40  ;;  %10447 = vrcp.f32 %v16590_v6  ;;  %v16635_v40 = vld [vmem:[%s18102_s6] ss:$0 sm:$0xff] }
 0x55b   : > { %8823 = vmatmul.msk.f32.gmra.mxu3 %vm1460_vm2, %v16405_v18  ;;  %v7245_v9 = vmul.f32 %v16601_v34, %v16543_v55  ;;  %v5049_v60 = vadd.f32 %v16473_v42, %v5048_v43  ;;  %vm5051_vm11 = vweird.f32 %v16473_v42  ;;  %v5071_v18 = vand.u32 2147483648, %v16491_v52  ;;  %v16630_v56 = vpop.eup %10441 }
 0x55c   : > { %18585 = vst [vmem:[#allocation68_spill] sm:$0xff] %v16619_v54  ;;  %8771 = vmatmul.msk.f32.gmra.mxu1 %vm1427_vm0, %v5626_v37  ;;  %10449 = vrcp.f32 %v16608_v48  ;;  %8847 = vmatmul.msk.f32.gmra.mxu2 %vm1427_vm0, %v7681_v36  ;;  %v5057_v28 = vor.u32 1.1754944e-38, %v5056_v15  ;;  %v6789_v61 = vadd.f32 %v16635_v40, %v18586_v46  ;;  %v16641_v38 = vadd.f32 %v18588_v57, %v18587_v63  ;;  %vm16654_vm7 = vmor %vm5050_vm14, %vm5051_vm11 }
 0x55d   : > { %v7246_v43 = vsub.f32 1.0, %v7245_v9  ;;  %v16646_v44 = vmul.f32 %v5043_v22, %v16154_v1  ;;  %v5062_v41 = vsub.f32 1.0, %v5061_v17  ;;  %v5069_v39 = vand.u32 2147483647, %v16491_v52  ;;  %v6993_v22 = vpop.f32.mrf.mxu1 }
 0x55e   : > { %v7255_v15 = vand.u32 2147483648, %v16543_v55  ;;  %v10444_v58 = vpop.eup %10443  ;;  %v16659_v37 = vadd.f32 %v16550_v2, %v6789_v61  ;;  %vm7250_vm1 = vweird.f32 %v16601_v34  ;;  %v7253_v17 = vand.u32 2147483647, %v16543_v55 }
 0x55f   : > { %v7247_v1 = vmul.f32 %v16601_v34, %v7246_v43  ;;  %v10446_v9 = vpop.eup %10445  ;;  %v5053_v46 = vsel %vm16654_vm7, %v16473_v42, %v5049_v60  ;;  %vm5065_vm8 = vweird.f32 %v16491_v52  ;;  %v16668_v21 = vor.u32 1.1754944e-38, %v5071_v18  ;;  %v18592_v18 = vld [vmem:[#allocation38_spill] sm:$0xff] }
 0x560   : > { %18591 = vst [vmem:[#allocation76_spill] sm:$0xff] %v16659_v37  ;;  %v5076_v2 = vmul.f32 %v16630_v56, %v16548_v23  ;;  %v6792_v61 = vadd.f32 %v16635_v40, %v16079_v35  ;;  %v16674_v63 = vpop.eup %10447  ;;  %v8736_v57 = vmul.f32 -1.442695, %v16160_v30  ;;  %vm7249_vm9 = vweird.f32 %v16543_v55 }
 0x561   : > { %v7248_v43 = vadd.f32 %v16601_v34, %v7247_v1  ;;  %v16679_v36 = vadd.f32 1.0, %v10446_v9  ;;  %v5063_v60 = vmul.f32 %v16584_v3, %v5062_v41  ;;  %v16686_v37 = vadd.f32 %v18593_v10, %v18592_v18  ;;  %vm7251_vm5 = vmor %vm7249_vm9, %vm7250_vm1  ;;  %v16718_v9 = vpop.f32.mrf.mxu0 }
 0x562   : > { %v16681_v42 = vpop.eup %10449  ;;  %v16688_v54 = vadd.f32 1.0, %v10444_v58  ;;  %v7256_v35 = vor.u32 1.1754944e-38, %v7255_v15  ;;  %vm5066_vm10 = vweird.f32 %v16584_v3  ;;  %vm7254_vm12 = vcmp.eq.f32.partialorder %v7253_v17, 8.507059e+37 }
 0x563   : > { %8824 = vmatmul.msk.f32.gmra.mxu3 %vm1460_vm2, %v16515_v26  ;;  %v7252_v55 = vsel %vm7251_vm5, %v16601_v34, %v7248_v43  ;;  %v7260_v41 = vmul.f32 %v16681_v42, %v16608_v48  ;;  %v5058_v10 = vsel %vm16614_vm6, %v5057_v28, %v5053_v46  ;;  %vm16701_vm13 = vcmp.eq.f32.partialorder %v5069_v39, 8.507059e+37  ;;  %v16705_v26 = vpop.f32.mrf.mxu2  ;;  %vm16735_vm3 = vmor %vm5065_vm8, %vm5066_vm10 }
 0x564   : > { %8772 = vmatmul.msk.f32.gmra.mxu1 %vm1427_vm0, %v5627_v49  ;;  %v5077_v15 = vsub.f32 1.0, %v5076_v2  ;;  %v7257_v1 = vsel %vm7254_vm12, %v7256_v35, %v7252_v55  ;;  %10451 = vrcp.f32 %v16679_v36  ;;  %v5091_v34 = vmul.f32 %v16674_v63, %v16590_v6 }
 0x565   : > { %10453 = vpow2.f32 %v8736_v57  ;;  %v7682_v17 = vmul.f32 %v7257_v1, %v16441_v24  ;;  %v7261_v49 = vsub.f32 1.0, %v7260_v41  ;;  %v5064_v62 = vadd.f32 %v16584_v3, %v5063_v60  ;;  %v4689_v57 = vpop.f32.mrf.mxu3  ;;  %v6996_v41 = vpop.f32.mrf.mxu1 }
 0x566   : > { %vm5080_vm14 = vweird.f32 %v16548_v23  ;;  %10455 = vrcp.f32 %v16688_v54  ;;  %v7270_v28 = vand.u32 2147483648, %v16608_v48  ;;  %v16716_v39 = vadd.f32 %v6993_v22, %v16193_v8 }
 0x567   : > { %v8737_v46 = vmul.f32 -1.442695, %v16227_v45  ;;  %v7262_v2 = vmul.f32 %v16681_v42, %v7261_v49  ;;  %vm7265_vm15 = vweird.f32 %v16681_v42  ;;  %v7268_v24 = vand.u32 2147483647, %v16608_v48  ;;  %8848 = vmatmul.msk.f32.gmra.mxu2 %vm1427_vm0, %v7682_v17 }
 0x568   : > { %v16726_v43 = vmul.f32 %v5058_v10, %v16251_v14  ;;  %v5078_v60 = vmul.f32 %v16630_v56, %v5077_v15  ;;  %v5084_v8 = vand.u32 2147483647, %v16548_v23  ;;  %v5086_v22 = vand.u32 2147483648, %v16548_v23 }
 0x569   : > { %v5092_v35 = vsub.f32 1.0, %v5091_v34  ;;  %v16740_v55 = vadd.f32 %v16643_v13, %v6792_v61  ;;  %v7263_v14 = vadd.f32 %v16681_v42, %v7262_v2  ;;  %vm7264_vm4 = vweird.f32 %v16608_v48  ;;  %v5628_v48 = vld [vmem:[#allocation3 + $0x152] sm:$0xff]  ;;  %v16807_v52 = vpop.f32.mrf.mxu0 }
 0x56a   : > { %v16744_v10 = vpop.eup %10451  ;;  %v5068_v15 = vsel %vm16735_vm3, %v16584_v3, %v5064_v62  ;;  %vm16751_vm6 = vmor %vm7264_vm4, %vm7265_vm15  ;;  %v7271_v1 = vor.u32 1.1754944e-38, %v7270_v28  ;;  %v8787_v13 = vmul.f32 -1.442695, %v16716_v39  ;;  %v16757_v61 = vadd.f32 %v4689_v57, %v16373_v29 }
 0x56b   : > { %8825 = vmatmul.msk.f32.gmra.mxu3 %vm1460_vm2, %v16598_v47  ;;  %v10454_v34 = vpop.eup %10453  ;;  %10457 = vpow2.f32 %v8737_v46  ;;  %v7267_v3 = vsel %vm16751_vm6, %v16681_v42, %v7263_v14  ;;  %vm7269_vm11 = vcmp.eq.f32.partialorder %v7268_v24, 8.507059e+37  ;;  %v7275_v17 = vmul.f32 %v16744_v10, %v16679_v36  ;;  %v16783_v18 = vpop.f32.mrf.mxu2 }
 0x56c   : > { %8773 = vmatmul.msk.f32.gmra.mxu1 %vm1427_vm0, %v5628_v48  ;;  %v16767_v49 = vpop.eup %10455  ;;  %v5079_v29 = vadd.f32 %v16630_v56, %v5078_v60  ;;  %vm5081_vm7 = vweird.f32 %v16630_v56  ;;  %v5087_v62 = vor.u32 1.1754944e-38, %v5086_v22  ;;  %v7272_v47 = vsel %vm7269_vm11, %v7271_v1, %v7267_v3 }
 0x56d   : > { %v5073_v28 = vsel %vm16701_vm13, %v16668_v21, %v5068_v15  ;;  %v5093_v42 = vmul.f32 %v16674_v63, %v5092_v35  ;;  %v7683_v46 = vmul.f32 %v7272_v47, %v16499_v27  ;;  %v7276_v2 = vsub.f32 1.0, %v7275_v17  ;;  %vm16790_vm8 = vmor %vm5080_vm14, %vm5081_vm7  ;;  %v4692_v35 = vpop.f32.mrf.mxu3  ;;  %v6999_v48 = vpop.f32.mrf.mxu1  ;;  %v5629_v17 = vld [vmem:[#allocation3 + $0x15a] sm:$0xff] }
 0x56e   : > { %vm16776_vm1 = vcmp.eq.f32.partialorder %v5084_v8, 8.507059e+37  ;;  %v16780_v57 = vadd.f32 1.0, %v10454_v34  ;;  %v7285_v60 = vand.u32 2147483648, %v16679_v36  ;;  %10459 = vpow2.f32 %v8787_v13  ;;  %v18604_v21 = vld [vmem:[#allocation51_spill] sm:$0xff] }
 0x56f   : > { %v16786_v22 = vadd.f32 %v6996_v41, %v16247_v53  ;;  %v5106_v27 = vmul.f32 %v16767_v49, %v16688_v54  ;;  %v7277_v58 = vmul.f32 %v16744_v10, %v7276_v2  ;;  %vm7280_vm9 = vweird.f32 %v16744_v10  ;;  %8849 = vmatmul.msk.f32.gmra.mxu2 %vm1427_vm0, %v7683_v46 }
 0x570   : > { %v7283_v8 = vand.u32 2147483647, %v16679_v36  ;;  %v5083_v53 = vsel %vm16790_vm8, %v16630_v56, %v5079_v29  ;;  %v5099_v23 = vand.u32 2147483647, %v16590_v6  ;;  %v8738_v14 = vmul.f32 -1.442695, %v16310_v12 }
 0x571   : > { %v8788_v41 = vmul.f32 -1.442695, %v16786_v22  ;;  %v10458_v15 = vpop.eup %10457  ;;  %vm5096_vm5 = vweird.f32 %v16674_v63  ;;  %v7278_v1 = vadd.f32 %v16744_v10, %v7277_v58  ;;  %vm7279_vm10 = vweird.f32 %v16679_v36 }
 0x572   : > { %v16812_v13 = vadd.f32 %v4692_v35, %v16460_v31  ;;  %v5094_v56 = vadd.f32 %v16674_v63, %v5093_v42  ;;  %vm7281_vm12 = vmor %vm7279_vm10, %vm7280_vm9  ;;  %v7286_v34 = vor.u32 1.1754944e-38, %v7285_v60  ;;  %v16818_v3 = vadd.f32 %v6999_v48, %v16315_v11  ;;  %v5630_v48 = vld [vmem:[#allocation3 + $0x16a] sm:$0xff] }
 0x573   : > { %10461 = vpow2.f32 %v8788_v41  ;;  %8826 = vmatmul.msk.f32.gmra.mxu3 %vm1460_vm2, %v16646_v44  ;;  %v5107_v29 = vsub.f32 1.0, %v5106_v27  ;;  %v7282_v31 = vsel %vm7281_vm12, %v16744_v10, %v7278_v1  ;;  %vm7284_vm13 = vcmp.eq.f32.partialorder %v7283_v8, 8.507059e+37 }
 0x574   : > { %10463 = vrcp.f32 %v16780_v57  ;;  %8774 = vmatmul.msk.f32.gmra.mxu1 %vm1427_vm0, %v5629_v17  ;;  %v10460_v36 = vpop.eup %10459  ;;  %v16825_v47 = vadd.f32 1.0, %v10458_v15  ;;  %v7287_v42 = vsel %vm7284_vm13, %v7286_v34, %v7282_v31  ;;  %v8789_v11 = vmul.f32 -1.442695, %v16818_v3 }
 0x575   : > { %10465 = vpow2.f32 %v8738_v14  ;;  %v5101_v46 = vand.u32 2147483648, %v16590_v6  ;;  %v8739_v2 = vmul.f32 -1.442695, %v16397_v20  ;;  %v7684_v44 = vmul.f32 %v7287_v42, %v16579_v33  ;;  %v7002_v41 = vpop.f32.mrf.mxu1 }
 0x576   : > { %v16831_v60 = vadd.f32 1.0, %v10460_v36  ;;  %vm5095_vm14 = vweird.f32 %v16590_v6  ;;  %v6795_v10 = vadd.f32 %v16635_v40, %v16177_v16  ;;  %v16838_v27 = vadd.f32 %v16106_v19, %v18604_v21  ;;  %v4695_v19 = vpop.f32.mrf.mxu3 }
 0x577   : > { %10467 = vpow2.f32 %v8789_v11  ;;  %v16841_v58 = vmul.f32 %v5073_v28, %v16356_v7  ;;  %v5088_v8 = vsel %vm16776_vm1, %v5087_v62, %v5083_v53  ;;  %vm16847_vm15 = vmor %vm5095_vm14, %vm5096_vm5  ;;  %vm16851_vm3 = vcmp.eq.f32.partialorder %v5099_v23, 8.507059e+37  ;;  %8850 = vmatmul.msk.f32.gmra.mxu2 %vm1427_vm0, %v7684_v44  ;;  %v16862_v28 = vpop.f32.mrf.mxu2 }
 0x578   : > { %10469 = vrcp.f32 %v16831_v60  ;;  %v5098_v7 = vsel %vm16847_vm15, %v16674_v63, %v5094_v56  ;;  %v5108_v62 = vmul.f32 %v16767_v49, %v5107_v29  ;;  %v16865_v24 = vadd.f32 %v4695_v19, %v16564_v0  ;;  %v6913_v29 = vpop.f32.mrf.mxu0 }
 0x579   : > { %v10462_v16 = vpop.eup %10461  ;;  %10471 = vrcp.f32 %v16825_v47  ;;  %v5102_v53 = vor.u32 1.1754944e-38, %v5101_v46  ;;  %v5116_v23 = vand.u32 2147483648, %v16688_v54  ;;  %vm5110_vm4 = vweird.f32 %v16688_v54 }
 0x57a   : > { %v16867_v35 = vpop.eup %10463  ;;  %10473 = vpow2.f32 %v8739_v2  ;;  %v16870_v14 = vadd.f32 1.0, %v10462_v16  ;;  %v5114_v63 = vand.u32 2147483647, %v16688_v54  ;;  %v16875_v1 = vadd.f32 %v16718_v9, %v6795_v10  ;;  %v18610_v10 = vld [vmem:[#allocation66_spill] sm:$0xff] }
 0x57b   : > { %v10466_v15 = vpop.eup %10465  ;;  %v6798_v0 = vadd.f32 %v16635_v40, %v16273_v59  ;;  %8827 = vmatmul.msk.f32.gmra.mxu3 %vm1460_vm2, %v16726_v43  ;;  %v16882_v56 = vmul.f32 %v5088_v8, %v16394_v51  ;;  %v5103_v34 = vsel %vm16851_vm3, %v5102_v53, %v5098_v7  ;;  %v5131_v17 = vand.u32 2147483648, %v16780_v57  ;;  %v18609_v51 = vld [vmem:[#allocation64_spill] sm:$0xff]  ;;  %v18615_v53 = vld [vmem:[#allocation61_spill] sm:$0xff] }
 0x57c   : > { %10475 = vrcp.f32 %v16870_v14  ;;  %8775 = vmatmul.msk.f32.gmra.mxu1 %vm1427_vm0, %v5630_v48  ;;  %v5109_v59 = vadd.f32 %v16767_v49, %v5108_v62  ;;  %vm5111_vm6 = vweird.f32 %v16767_v49  ;;  %v6801_v31 = vadd.f32 %v16635_v40, %v18609_v51 }
 0x57d   : > { %v10468_v9 = vpop.eup %10467  ;;  %v16892_v43 = vadd.f32 %v16807_v52, %v6798_v0  ;;  %v5117_v42 = vor.u32 1.1754944e-38, %v5116_v23  ;;  %v16898_v11 = vmul.f32 %v16867_v35, %v16780_v57  ;;  %v16900_v46 = vadd.f32 1.0, %v10466_v15  ;;  %vm16921_vm7 = vmor %vm5110_vm4, %vm5111_vm6  ;;  %v18616_v0 = vld [vmem:[#allocation10_spill] sm:$0xff] }
 0x57e   : > { %v10470_v36 = vpop.eup %10469  ;;  %v16902_v2 = vadd.f32 1.0, %v10468_v9  ;;  %v16907_v21 = vmul.f32 %v5103_v34, %v18610_v10  ;;  %vm16909_vm11 = vcmp.eq.f32.partialorder %v5114_v63, 8.507059e+37  ;;  %v16914_v33 = vadd.f32 %v6913_v29, %v6801_v31  ;;  %v4698_v15 = vpop.f32.mrf.mxu3 }
 0x57f   : > { %v16904_v44 = vpop.eup %10471  ;;  %v7290_v6 = vmul.f32 %v10470_v36, %v16831_v60  ;;  %v16925_v7 = vor.u32 1.1754944e-38, %v5131_v17  ;;  %v8740_v62 = vmul.f32 -1.442695, %v16496_v32  ;;  %v16930_v23 = vadd.f32 %v7002_v41, %v18615_v53  ;;  %v16953_v10 = vpop.f32.mrf.mxu2 }
 0x580   : > { %v10474_v19 = vpop.eup %10473  ;;  %10477 = vrcp.f32 %v16902_v2  ;;  %v5113_v63 = vsel %vm16921_vm7, %v16767_v49, %v5109_v59  ;;  %v16937_v54 = vadd.f32 %v16635_v40, %v18616_v0  ;;  %v7298_v34 = vand.u32 2147483647, %v16831_v60  ;;  %v7005_v49 = vpop.f32.mrf.mxu1  ;;  %18617 = vst [vmem:[#allocation48_spill] sm:$0xff] %v16953_v10 }
 0x581   : > { %v7291_v48 = vsub.f32 1.0, %v7290_v6  ;;  %v5122_v29 = vsub.f32 1.0, %v16898_v11  ;;  %v16945_v41 = vmul.f32 %v16904_v44, %v16825_v47  ;;  %10479 = vrcp.f32 %v16900_v46  ;;  %v5631_v6 = vld [vmem:[#allocation3 + $0x172] sm:$0xff] }
 0x582   : > { %v16940_v17 = vpop.eup %10475  ;;  %v7300_v9 = vand.u32 2147483648, %v16831_v60  ;;  %v16949_v59 = vadd.f32 1.0, %v10474_v19  ;;  %vm7295_vm1 = vweird.f32 %v10470_v36  ;;  %10481 = vpow2.f32 %v8740_v62 }
 0x583   : > { %v7292_v51 = vmul.f32 %v10470_v36, %v7291_v48  ;;  %v7305_v31 = vmul.f32 %v16940_v17, %v16870_v14  ;;  %8828 = vmatmul.msk.f32.gmra.mxu3 %vm1460_vm2, %v16841_v58  ;;  %v8741_v11 = vmul.f32 -1.442695, %v16503_v5  ;;  %vm7294_vm8 = vweird.f32 %v16831_v60 }
 0x584   : > { %v8790_v16 = vmul.f32 -1.442695, %v16930_v23  ;;  %8776 = vmatmul.msk.f32.gmra.mxu1 %vm1427_vm0, %v5631_v6  ;;  %vm16961_vm9 = vcmp.eq.f32.partialorder %v7298_v34, 8.507059e+37  ;;  %v16966_v48 = vadd.f32 %v4698_v15, %v16641_v38  ;;  %vm5126_vm5 = vweird.f32 %v16867_v35  ;;  %vm7296_vm10 = vmor %vm7294_vm8, %vm7295_vm1 }
 0x585   : > { %v7293_v19 = vadd.f32 %v10470_v36, %v7292_v51  ;;  %v7306_v0 = vsub.f32 1.0, %v7305_v31  ;;  %v7301_v60 = vor.u32 1.1754944e-38, %v7300_v9  ;;  %v7313_v58 = vand.u32 2147483647, %v16870_v14 }
 0x586   : > { %v16968_v8 = vpop.eup %10477  ;;  %v7315_v62 = vand.u32 2147483648, %v16870_v14  ;;  %10483 = vpow2.f32 %v8790_v16  ;;  %vm7310_vm12 = vweird.f32 %v16940_v17  ;;  %v5118_v31 = vsel %vm16909_vm11, %v5117_v42, %v5113_v63  ;;  %v4701_v6 = vpop.f32.mrf.mxu3 }
 0x587   : > { %v7297_v34 = vsel %vm7296_vm10, %v10470_v36, %v7293_v19  ;;  %v7307_v51 = vmul.f32 %v16940_v17, %v7306_v0  ;;  %v7320_v38 = vmul.f32 %v16968_v8, %v16902_v2  ;;  %v16978_v15 = vpop.eup %10479  ;;  %vm5125_vm13 = vweird.f32 %v16780_v57 }
 0x588   : > { %v5137_v9 = vsub.f32 1.0, %v16945_v41  ;;  %10485 = vrcp.f32 %v16949_v59  ;;  %v7302_v36 = vsel %vm16961_vm9, %v7301_v60, %v7297_v34  ;;  %vm7309_vm14 = vweird.f32 %v16870_v14  ;;  %v10482_v10 = vpop.eup %10481  ;;  %v18622_v41 = vld [vmem:[#allocation65_spill] sm:$0xff]  ;;  %vm17051_vm9 = vmor %vm5125_vm13, %vm5126_vm5 }
 0x589   : > { %v7685_v16 = vmul.f32 %v7302_v36, %v16716_v39  ;;  %v7308_v19 = vadd.f32 %v16940_v17, %v7307_v51  ;;  %v7321_v0 = vsub.f32 1.0, %v7320_v38  ;;  %v5123_v42 = vmul.f32 %v16867_v35, %v5122_v29  ;;  %vm16993_vm15 = vmor %vm7309_vm14, %vm7310_vm12  ;;  %v7008_v39 = vpop.f32.mrf.mxu1 }
 0x58a   : > { %10487 = vpow2.f32 %v8741_v11  ;;  %v7316_v63 = vor.u32 1.1754944e-38, %v7315_v62  ;;  %v16998_v53 = vadd.f32 %v7005_v49, %v18622_v41  ;;  %vm5140_vm3 = vweird.f32 %v16825_v47  ;;  %v5632_v11 = vld [vmem:[#allocation3 + $0x182] sm:$0xff] }
 0x58b   : > { %v7312_v14 = vsel %vm16993_vm15, %v16940_v17, %v7308_v19  ;;  %vm7314_vm4 = vcmp.eq.f32.partialorder %v7313_v58, 8.507059e+37  ;;  %v7322_v29 = vmul.f32 %v16968_v8, %v7321_v0  ;;  %8851 = vmatmul.msk.f32.gmra.mxu2 %vm1427_vm0, %v7685_v16  ;;  %8829 = vmatmul.msk.f32.gmra.mxu3 %vm1460_vm2, %v16882_v56  ;;  %v18623_v49 = vand.u32 2147483647, %v16780_v57  ;;  %v17023_v16 = vpop.f32.mrf.mxu2 }
 0x58c   : > { %v10484_v60 = vpop.eup %10483  ;;  %v5144_v34 = vand.u32 2147483647, %v16825_v47  ;;  %v8742_v17 = vmul.f32 -1.442695, %v16582_v25  ;;  %v7317_v58 = vsel %vm7314_vm4, %v7316_v63, %v7312_v14  ;;  %v8791_v51 = vmul.f32 -1.442695, %v16998_v53  ;;  %8777 = vmatmul.msk.f32.gmra.mxu1 %vm1427_vm0, %v5632_v11 }
 0x58d   : > { %vm17010_vm6 = vcmp.eq.f32.partialorder %v18623_v49, 8.507059e+37  ;;  %v5138_v38 = vmul.f32 %v16904_v44, %v5137_v9  ;;  %v5151_v56 = vmul.f32 %v16978_v15, %v16900_v46  ;;  %v7323_v36 = vadd.f32 %v16968_v8, %v7322_v29 }
 0x58e   : > { %vm7325_vm11 = vweird.f32 %v16968_v8  ;;  %v17025_v19 = vpop.eup %10485  ;;  %v17028_v0 = vmul.f32 %v5118_v31, %v16082_v4  ;;  %v5124_v52 = vadd.f32 %v16867_v35, %v5123_v42  ;;  %v7330_v63 = vand.u32 2147483648, %v16902_v2 }
 0x58f   : > { %v17032_v41 = vadd.f32 1.0, %v10484_v60  ;;  %v7686_v9 = vmul.f32 %v7317_v58, %v16786_v22  ;;  %vm7324_vm7 = vweird.f32 %v16902_v2  ;;  %v7328_v14 = vand.u32 2147483647, %v16902_v2  ;;  %v4704_v22 = vpop.f32.mrf.mxu3  ;;  %v6916_v60 = vpop.f32.mrf.mxu0 }
 0x590   : > { %10489 = vpow2.f32 %v8791_v51  ;;  %v10488_v29 = vpop.eup %10487  ;;  %vm5141_vm1 = vweird.f32 %v16904_v44  ;;  %v5146_v11 = vand.u32 2147483648, %v16825_v47  ;;  %v17039_v4 = vadd.f32 1.0, %v10482_v10  ;;  %vm17043_vm8 = vmor %vm7324_vm7, %vm7325_vm11 }
 0x591   : > { %10491 = vpow2.f32 %v8742_v17  ;;  %v5139_v42 = vadd.f32 %v16904_v44, %v5138_v38  ;;  %v5152_v10 = vsub.f32 1.0, %v5151_v56  ;;  %v7327_v49 = vsel %vm17043_vm8, %v16968_v8, %v7323_v36  ;;  %v7011_v38 = vpop.f32.mrf.mxu1  ;;  %vm17083_vm10 = vmor %vm5140_vm3, %vm5141_vm1 }
 0x592   : > { %10493 = vrcp.f32 %v17032_v41  ;;  %v5128_v17 = vsel %vm17051_vm9, %v16867_v35, %v5124_v52  ;;  %v5166_v57 = vmul.f32 %v17025_v19, %v16949_v59  ;;  %v7331_v58 = vor.u32 1.1754944e-38, %v7330_v63  ;;  %v5633_v35 = vld [vmem:[#allocation3 + $0x18a] sm:$0xff] }
 0x593   : > { %v17066_v51 = vadd.f32 %v4701_v6, %v16686_v37  ;;  %v17068_v56 = vadd.f32 1.0, %v10488_v29  ;;  %vm7329_vm5 = vcmp.eq.f32.partialorder %v7328_v14, 8.507059e+37  ;;  %v17071_v31 = vadd.f32 %v7008_v39, %v16511_v50  ;;  %8852 = vmatmul.msk.f32.gmra.mxu2 %vm1427_vm0, %v7686_v9  ;;  %8830 = vmatmul.msk.f32.gmra.mxu3 %vm1460_vm2, %v16907_v21  ;;  %v17111_v29 = vpop.f32.mrf.mxu2 }
 0x594   : > { %v17075_v8 = vadd.f32 %v4704_v22, %v16838_v27  ;;  %vm17087_vm12 = vcmp.eq.f32.partialorder %v5144_v34, 8.507059e+37  ;;  %v17092_v6 = vadd.f32 %v6916_v60, %v16937_v54  ;;  %10495 = vrcp.f32 %v17039_v4  ;;  %8778 = vmatmul.msk.f32.gmra.mxu1 %vm1427_vm0, %v5633_v35  ;;  %v18634_v60 = vld [vmem:[#allocation69_spill] sm:$0xff] }
 0x595   : > { %v7332_v27 = vsel %vm7329_vm5, %v7331_v58, %v7327_v49  ;;  %v5133_v47 = vsel %vm17010_vm6, %v16925_v7, %v5128_v17  ;;  %v5143_v39 = vsel %vm17083_vm10, %v16904_v44, %v5139_v42  ;;  %v5147_v34 = vor.u32 1.1754944e-38, %v5146_v11  ;;  %v18635_v58 = vld [vmem:[#allocation68_spill] sm:$0xff] }
 0x596   : > { %v10490_v21 = vpop.eup %10489  ;;  %v5153_v36 = vmul.f32 %v16978_v15, %v5152_v10  ;;  %vm5155_vm13 = vweird.f32 %v16900_v46  ;;  %v5161_v54 = vand.u32 2147483648, %v16900_v46  ;;  %v8792_v9 = vmul.f32 -1.442695, %v17071_v31 }
 0x597   : > { %v10492_v52 = vpop.eup %10491  ;;  %v17105_v63 = vadd.f32 1.0, %v10490_v21  ;;  %v5159_v62 = vand.u32 2147483647, %v16900_v46  ;;  %v5167_v7 = vsub.f32 1.0, %v5166_v57  ;;  %10497 = vrcp.f32 %v17068_v56  ;;  %v7832_v42 = vpop.f32.mrf.mxu3 }
 0x598   : > { %v10494_v14 = vpop.eup %10493  ;;  %v7687_v44 = vmul.f32 %v7332_v27, %v16818_v3  ;;  %v17114_v11 = vmul.f32 %v5133_v47, %v16160_v30  ;;  %v5148_v22 = vsel %vm17087_vm12, %v5147_v34, %v5143_v39  ;;  %v17121_v10 = vadd.f32 %v16978_v15, %v5153_v36  ;;  %8141 = vxpose.xlu0.b32.start [1/16] (narrow) %v7832_v42, 64 }
 0x599   : > { %v7335_v2 = vmul.f32 %v10494_v14, %v17032_v41  ;;  %10499 = vrcp.f32 %v17105_v63  ;;  %vm5156_vm14 = vweird.f32 %v16978_v15  ;;  %v6807_v3 = vadd.f32 %v16635_v40, %v18634_v60  ;;  %v7014_v37 = vpop.f32.mrf.mxu1 }
 0x59a   : > { %10501 = vpow2.f32 %v8792_v9  ;;  %v17126_v30 = vpop.eup %10495  ;;  %v17128_v49 = vor.u32 1.1754944e-38, %v5161_v54  ;;  %v17130_v17 = vadd.f32 1.0, %v10492_v52  ;;  %v17133_v35 = vadd.f32 %v7011_v38, %v18635_v58  ;;  %vm17148_vm15 = vmor %vm5155_vm13, %vm5156_vm14  ;;  %v18640_v9 = vld [vmem:[#allocation76_spill] sm:$0xff] }
 0x59b   : > { %v7336_v57 = vsub.f32 1.0, %v7335_v2  ;;  %v17136_v50 = vmul.f32 %v5148_v22, %v16227_v45  ;;  %v5168_v27 = vmul.f32 %v17025_v19, %v5167_v7  ;;  %v7345_v47 = vand.u32 2147483648, %v17032_v41  ;;  %8853 = vmatmul.msk.f32.gmra.mxu2 %vm1427_vm0, %v7687_v44  ;;  %8831 = vmatmul.msk.f32.gmra.mxu3 %vm1460_vm2, %v17028_v0 }
 0x59c   : > { %vm17152_vm3 = vcmp.eq.f32.partialorder %v5159_v62, 8.507059e+37  ;;  %vm7340_vm4 = vweird.f32 %v10494_v14  ;;  %v7343_v34 = vand.u32 2147483647, %v17032_v41  ;;  %v8793_v36 = vmul.f32 -1.442695, %v17133_v35 }
 0x59d   : > { %v7337_v39 = vmul.f32 %v10494_v14, %v7336_v57  ;;  %v17158_v52 = vpop.eup %10497  ;;  %v5158_v46 = vsel %vm17148_vm15, %v16978_v15, %v17121_v10  ;;  %v5176_v0 = vand.u32 2147483648, %v16949_v59  ;;  %v5181_v54 = vmul.f32 %v17126_v30, %v17039_v4 }
 0x59e   : > { %v17168_v62 = vadd.f32 %v7014_v37, %v18640_v9  ;;  %10503 = vrcp.f32 %v17130_v17  ;;  %v8743_v44 = vmul.f32 -1.442695, %v16757_v61  ;;  %vm7339_vm6 = vweird.f32 %v17032_v41  ;;  %v6919_v37 = vpop.f32.mrf.mxu0  ;;  %v17183_v9 = vpop.f32.mrf.mxu2 }
 0x59f   : > { %v10500_v7 = vpop.eup %10499  ;;  %v7338_v22 = vadd.f32 %v10494_v14, %v7337_v39  ;;  %vm7341_vm11 = vmor %vm7339_vm6, %vm7340_vm4  ;;  %v7346_v42 = vor.u32 1.1754944e-38, %v7345_v47  ;;  %10505 = vpow2.f32 %v8793_v36  ;;  %v17176_v60 = vadd.f32 %v17025_v19, %v5168_v27  ;;  %v7835_v58 = vpop.f32.mrf.mxu3 }
 0x5a0   : > { %v10502_v2 = vpop.eup %10501  ;;  %v7350_v15 = vmul.f32 %v10500_v7, %v17105_v63  ;;  %v8794_v10 = vmul.f32 -1.442695, %v17168_v62  ;;  %vm5171_vm7 = vweird.f32 %v17025_v19  ;;  %vm7344_vm1 = vcmp.eq.f32.partialorder %v7343_v34, 8.507059e+37  ;;  %8142 = vxpose.xlu0.b32.cont [2/16] (narrow) %v7835_v58, 64 }
 0x5a1   : > { %v7342_v57 = vsel %vm7341_vm11, %v10494_v14, %v7338_v22  ;;  %v5182_v38 = vsub.f32 1.0, %v5181_v54  ;;  %v17181_v41 = vmul.f32 %v17158_v52, %v17068_v56  ;;  %10507 = vpow2.f32 %v8743_v44  ;;  %v17189_v14 = vpop.f32.mrf.mxu1 }
 0x5a2   : > { %v7347_v47 = vsel %vm7344_vm1, %v7346_v42, %v7342_v57  ;;  %v7351_v39 = vsub.f32 1.0, %v7350_v15  ;;  %v7360_v36 = vand.u32 2147483648, %v17105_v63  ;;  %v17187_v21 = vadd.f32 1.0, %v10502_v2  ;;  %v5634_v2 = vld [vmem:[#allocation3 + $0x19a] sm:$0xff] }
 0x5a3   : > { %v7688_v27 = vmul.f32 %v7347_v47, %v16930_v23  ;;  %vm7355_vm8 = vweird.f32 %v10500_v7  ;;  %v7358_v54 = vand.u32 2147483647, %v17105_v63  ;;  %10509 = vpow2.f32 %v8794_v10  ;;  %8832 = vmatmul.msk.f32.gmra.mxu3 %vm1460_vm2, %v17114_v11  ;;  %8779 = vmatmul.msk.f32.gmra.mxu1 %vm1427_vm0, %v5634_v2 }
 0x5a4   : > { %v7352_v34 = vmul.f32 %v10500_v7, %v7351_v39  ;;  %v17194_v22 = vpop.eup %10503  ;;  %vm5170_vm9 = vweird.f32 %v16949_v59  ;;  %v17197_v44 = vadd.f32 %v6919_v37, %v6807_v3  ;;  %v8744_v23 = vmul.f32 -1.442695, %v16812_v13  ;;  %v18643_v3 = vld [vmem:[#allocation72_spill] sm:$0xff] }
 0x5a5   : > { %10511 = vrcp.f32 %v17187_v21  ;;  %8854 = vmatmul.msk.f32.gmra.mxu2 %vm1427_vm0, %v7688_v27  ;;  %v10506_v42 = vpop.eup %10505  ;;  %v5163_v15 = vsel %vm17152_vm3, %v17128_v49, %v5158_v46  ;;  %vm17207_vm5 = vmor %vm5170_vm9, %vm5171_vm7  ;;  %v17213_v10 = vadd.f32 %v16635_v40, %v18643_v3  ;;  %vm7354_vm10 = vweird.f32 %v17105_v63 }
 0x5a6   : > { %v7353_v57 = vadd.f32 %v10500_v7, %v7352_v34  ;;  %v5173_v49 = vsel %vm17207_vm5, %v17025_v19, %v17176_v60  ;;  %v18644_v45 = vand.u32 2147483647, %v16949_v59  ;;  %v5177_v58 = vor.u32 1.1754944e-38, %v5176_v0  ;;  %vm7356_vm13 = vmor %vm7354_vm10, %vm7355_vm8 }
 0x5a7   : > { %v7361_v37 = vor.u32 1.1754944e-38, %v7360_v36  ;;  %v5183_v47 = vmul.f32 %v17126_v30, %v5182_v38  ;;  %v5197_v63 = vsub.f32 1.0, %v17181_v41  ;;  %vm7359_vm14 = vcmp.eq.f32.partialorder %v7358_v54, 8.507059e+37  ;;  %v10508_v27 = vpop.eup %10507  ;;  %v7838_v34 = vpop.f32.mrf.mxu3 }
 0x5a8   : > { %vm17223_vm12 = vcmp.eq.f32.partialorder %v18644_v45, 8.507059e+37  ;;  %v7357_v39 = vsel %vm7356_vm13, %v10500_v7, %v7353_v57  ;;  %v5211_v19 = vmul.f32 %v17194_v22, %v17130_v17  ;;  %10513 = vpow2.f32 %v8744_v23  ;;  %8143 = vxpose.xlu0.b32.cont [3/16] (narrow) %v7838_v34, 64 }
 0x5a9   : > { %v7362_v59 = vsel %vm7359_vm14, %v7361_v37, %v7357_v39  ;;  %v17232_v60 = vadd.f32 1.0, %v10506_v42  ;;  %v10510_v2 = vpop.eup %10509  ;;  %v5336_v0 = vmul.f32 %v5163_v15, %v16310_v12  ;;  %v5191_v36 = vand.u32 2147483648, %v17039_v4  ;;  %v7020_v42 = vpop.f32.mrf.mxu1 }
 0x5aa   : > { %v17238_v38 = vadd.f32 %v16635_v40, %v16705_v26  ;;  %v7689_v7 = vmul.f32 %v7362_v59, %v16998_v53  ;;  %vm5185_vm15 = vweird.f32 %v17039_v4  ;;  %v5189_v54 = vand.u32 2147483647, %v17039_v4  ;;  %v17249_v26 = vpop.f32.mrf.mxu2 }
 0x5ab   : > { %v10512_v41 = vpop.eup %10511  ;;  %v5206_v23 = vand.u32 2147483648, %v17068_v56  ;;  %10515 = vrcp.f32 %v17232_v60  ;;  %v5178_v12 = vsel %vm17223_vm12, %v5177_v58, %v5173_v49  ;;  %vm5186_vm3 = vweird.f32 %v17126_v30  ;;  %8833 = vmatmul.msk.f32.gmra.mxu3 %vm1460_vm2, %v17136_v50  ;;  %v5635_v49 = vld [vmem:[#allocation3 + $0x1a2] sm:$0xff] }
 0x5ac   : > { %v7365_v40 = vmul.f32 %v10512_v41, %v17187_v21  ;;  %v17251_v53 = vadd.f32 1.0, %v10510_v2  ;;  %v17256_v15 = vadd.f32 %v17126_v30, %v5183_v47  ;;  %v5198_v11 = vmul.f32 %v17158_v52, %v5197_v63  ;;  %8780 = vmatmul.msk.f32.gmra.mxu1 %vm1427_vm0, %v5635_v49  ;;  %vm17281_vm4 = vmor %vm5185_vm15, %vm5186_vm3 }
 0x5ad   : > { %v5212_v3 = vsub.f32 1.0, %v5211_v19  ;;  %v17259_v57 = vadd.f32 1.0, %v10508_v27  ;;  %8855 = vmatmul.msk.f32.gmra.mxu2 %vm1427_vm0, %v7689_v7  ;;  %v17262_v45 = vor.u32 1.1754944e-38, %v5191_v36  ;;  %v5204_v46 = vand.u32 2147483647, %v17068_v56 }
 0x5ae   : > { %v7366_v58 = vsub.f32 1.0, %v7365_v40  ;;  %10517 = vrcp.f32 %v17251_v53  ;;  %v10514_v50 = vpop.eup %10513  ;;  %v17268_v37 = vmul.f32 %v5178_v12, %v16397_v20  ;;  %v17270_v47 = vor.u32 1.1754944e-38, %v5206_v23 }
 0x5af   : > { %v7375_v63 = vand.u32 2147483648, %v17187_v21  ;;  %v17275_v39 = vadd.f32 %v17189_v14, %v16740_v55  ;;  %vm7370_vm6 = vweird.f32 %v10512_v41  ;;  %v7373_v59 = vand.u32 2147483647, %v17187_v21  ;;  %v7841_v2 = vpop.f32.mrf.mxu3 }
 0x5b0   : > { %v7367_v20 = vmul.f32 %v10512_v41, %v7366_v58  ;;  %v5188_v55 = vsel %vm17281_vm4, %v17126_v30, %v17256_v15  ;;  %v17292_v14 = vadd.f32 %v17158_v52, %v5198_v11  ;;  %vm5201_vm11 = vweird.f32 %v17158_v52  ;;  %8144 = vxpose.xlu0.b32.cont [4/16] (narrow) %v7841_v2, 64 }
 0x5b1   : > { %v10516_v34 = vpop.eup %10515  ;;  %v5213_v4 = vmul.f32 %v17194_v22, %v5212_v3  ;;  %10519 = vrcp.f32 %v17259_v57  ;;  %v17297_v36 = vadd.f32 1.0, %v10514_v50  ;;  %vm7369_vm7 = vweird.f32 %v17187_v21  ;;  %v7023_v49 = vpop.f32.mrf.mxu1 }
 0x5b2   : > { %v7368_v7 = vadd.f32 %v10512_v41, %v7367_v20  ;;  %v7380_v23 = vmul.f32 %v10516_v34, %v17232_v60  ;;  %vm5200_vm1 = vweird.f32 %v17068_v56  ;;  %v8745_v12 = vmul.f32 -1.442695, %v16865_v24  ;;  %vm7371_vm8 = vmor %vm7369_vm7, %vm7370_vm6 }
 0x5b3   : > { %v7376_v40 = vor.u32 1.1754944e-38, %v7375_v63  ;;  %v8795_v11 = vmul.f32 -1.442695, %v17275_v39  ;;  %v17306_v3 = vadd.f32 %v7020_v42, %v16875_v1  ;;  %vm7374_vm9 = vcmp.eq.f32.partialorder %v7373_v59, 8.507059e+37  ;;  %8834 = vmatmul.msk.f32.gmra.mxu3 %vm1460_vm2, %v5336_v0  ;;  %vm17351_vm7 = vmor %vm5200_vm1, %vm5201_vm11 }
 0x5b4   : > { %v17308_v58 = vpop.eup %10517  ;;  %v7372_v50 = vsel %vm7371_vm8, %v10512_v41, %v7368_v7  ;;  %v7381_v21 = vsub.f32 1.0, %v7380_v23  ;;  %v17311_v20 = vadd.f32 %v7023_v49, %v16892_v43  ;;  %vm17314_vm5 = vcmp.eq.f32.partialorder %v5189_v54, 8.507059e+37  ;;  %v17323_v43 = vpop.f32.mrf.mxu2 }
 0x5b5   : > { %v7377_v63 = vsel %vm7374_vm9, %v7376_v40, %v7372_v50  ;;  %v7388_v19 = vand.u32 2147483647, %v17232_v60  ;;  %v7390_v1 = vand.u32 2147483648, %v17232_v60  ;;  %v7395_v42 = vmul.f32 %v17308_v58, %v17251_v53  ;;  %v17330_v40 = vpop.f32.mrf.mxu0 }
 0x5b6   : > { %v7690_v41 = vmul.f32 %v7377_v63, %v17071_v31  ;;  %v7382_v59 = vmul.f32 %v10516_v34, %v7381_v21  ;;  %vm7385_vm10 = vweird.f32 %v10516_v34  ;;  %10521 = vpow2.f32 %v8795_v11 }
 0x5b7   : > { %v17325_v0 = vpop.eup %10519  ;;  %10523 = vrcp.f32 %v17297_v36  ;;  %v7396_v54 = vsub.f32 1.0, %v7395_v42  ;;  %v8796_v7 = vmul.f32 -1.442695, %v17306_v3  ;;  %v8797_v23 = vmul.f32 -1.442695, %v17311_v20  ;;  %v7844_v63 = vpop.f32.mrf.mxu3 }
 0x5b8   : > { %vm5216_vm12 = vweird.f32 %v17194_v22  ;;  %10525 = vpow2.f32 %v8745_v12  ;;  %v7383_v31 = vadd.f32 %v10516_v34, %v7382_v59  ;;  %vm7384_vm13 = vweird.f32 %v17232_v60  ;;  %8856 = vmatmul.msk.f32.gmra.mxu2 %vm1427_vm0, %v7690_v41  ;;  %8145 = vxpose.xlu0.b32.cont [5/16] (narrow) %v7844_v63, 64 }
 0x5b9   : > { %vm17335_vm14 = vcmp.eq.f32.partialorder %v5204_v46, 8.507059e+37  ;;  %v5214_v49 = vadd.f32 %v17194_v22, %v5213_v4  ;;  %vm7386_vm15 = vmor %vm7384_vm13, %vm7385_vm10  ;;  %v7391_v50 = vor.u32 1.1754944e-38, %v7390_v1  ;;  %v7397_v21 = vmul.f32 %v17308_v58, %v7396_v54  ;;  %v7026_v41 = vpop.f32.mrf.mxu1 }
 0x5ba   : > { %10527 = vpow2.f32 %v8796_v7  ;;  %v7387_v42 = vsel %vm7386_vm15, %v10516_v34, %v7383_v31  ;;  %vm7389_vm3 = vcmp.eq.f32.partialorder %v7388_v19, 8.507059e+37  ;;  %vm7400_vm6 = vweird.f32 %v17308_v58 }
 0x5bb   : > { %10529 = vpow2.f32 %v8797_v23  ;;  %v5226_v60 = vmul.f32 %v17325_v0, %v17259_v57  ;;  %v7392_v46 = vsel %vm7389_vm3, %v7391_v50, %v7387_v42  ;;  %v7398_v12 = vadd.f32 %v17308_v58, %v7397_v21  ;;  %8835 = vmatmul.msk.f32.gmra.mxu3 %vm1460_vm2, %v17268_v37 }
 0x5bc   : > { %v7405_v4 = vand.u32 2147483648, %v17251_v53  ;;  %v10522_v1 = vpop.eup %10521  ;;  %v7691_v34 = vmul.f32 %v7392_v46, %v17133_v35  ;;  %vm7399_vm8 = vweird.f32 %v17251_v53  ;;  %v7403_v59 = vand.u32 2147483647, %v17251_v53  ;;  %v17404_v42 = vpop.f32.mrf.mxu2 }
 0x5bd   : > { %v17359_v54 = vadd.f32 %v7026_v41, %v16914_v33  ;;  %v17363_v7 = vpop.eup %10523  ;;  %vm5215_vm9 = vweird.f32 %v17130_v17  ;;  %v5219_v56 = vand.u32 2147483647, %v17130_v17  ;;  %v8746_v23 = vmul.f32 -1.442695, %v16966_v48  ;;  %vm17370_vm11 = vmor %vm7399_vm8, %vm7400_vm6 }
 0x5be   : > { %v17374_v53 = vadd.f32 1.0, %v10522_v1  ;;  %v10526_v33 = vpop.eup %10525  ;;  %v5193_v37 = vsel %vm17314_vm5, %v17262_v45, %v5188_v55  ;;  %vm17386_vm1 = vmor %vm5215_vm9, %vm5216_vm12  ;;  %v18659_v50 = vand.u32 2147483648, %v17130_v17  ;;  %v7402_v27 = vsel %vm17370_vm11, %v17308_v58, %v7398_v12  ;;  %v6925_v12 = vpop.f32.mrf.mxu0 }
 0x5bf   : > { %v8798_v63 = vmul.f32 -1.442695, %v17359_v54  ;;  %v5203_v15 = vsel %vm17351_vm7, %v17158_v52, %v17292_v14  ;;  %v5218_v45 = vsel %vm17386_vm1, %v17194_v22, %v5214_v49  ;;  %v7406_v55 = vor.u32 1.1754944e-38, %v7405_v4  ;;  %v7847_v22 = vpop.f32.mrf.mxu3 }
 0x5c0   : > { %v5222_v21 = vor.u32 1.1754944e-38, %v18659_v50  ;;  %v10528_v30 = vpop.eup %10527  ;;  %10531 = vrcp.f32 %v17374_v53  ;;  %v5227_v2 = vsub.f32 1.0, %v5226_v60  ;;  %vm7404_vm4 = vcmp.eq.f32.partialorder %v7403_v59, 8.507059e+37  ;;  %8857 = vmatmul.msk.f32.gmra.mxu2 %vm1427_vm0, %v7691_v34  ;;  %8146 = vxpose.xlu0.b32.cont [6/16] (narrow) %v7847_v22, 64 }
 0x5c1   : > { %v10530_v17 = vpop.eup %10529  ;;  %v17406_v58 = vadd.f32 1.0, %v10528_v30  ;;  %10533 = vpow2.f32 %v8798_v63  ;;  %v5241_v52 = vmul.f32 %v17363_v7, %v17297_v36  ;;  %v7407_v14 = vsel %vm7404_vm4, %v7406_v55, %v7402_v27  ;;  %v7029_v19 = vpop.f32.mrf.mxu1 }
 0x5c2   : > { %10535 = vpow2.f32 %v8746_v23  ;;  %v17411_v46 = vadd.f32 1.0, %v10530_v17  ;;  %v5338_v49 = vmul.f32 %v5193_v37, %v16496_v32  ;;  %v5208_v60 = vsel %vm17335_vm14, %v17270_v47, %v5203_v15 }
 0x5c3   : > { %vm5220_vm5 = vcmp.eq.f32.partialorder %v5219_v56, 8.507059e+37  ;;  %10537 = vrcp.f32 %v17406_v58  ;;  %v5236_v41 = vand.u32 2147483648, %v17259_v57  ;;  %v17419_v1 = vadd.f32 1.0, %v10526_v33 }
 0x5c4   : > { %v5223_v4 = vsel %vm5220_vm5, %v5222_v21, %v5218_v45  ;;  %10539 = vrcp.f32 %v17411_v46  ;;  %v17424_v32 = vadd.f32 %v17330_v40, %v17213_v10  ;;  %v5228_v11 = vmul.f32 %v17325_v0, %v5227_v2  ;;  %8836 = vmatmul.msk.f32.gmra.mxu3 %vm1460_vm2, %v5338_v49  ;;  %v17439_v10 = vld [vmem:[%s18102_s6] ss:$0 sm:$0xff] }
 0x5c5   : > { %v7692_v47 = vmul.f32 %v7407_v14, %v17168_v62  ;;  %v17429_v34 = vadd.f32 %v7029_v19, %v17092_v6  ;;  %v5339_v56 = vmul.f32 %v5208_v60, %v16503_v5  ;;  %v17434_v23 = vadd.f32 %v6925_v12, %v17238_v38 }
 0x5c6   : > { %v10532_v59 = vpop.eup %10531  ;;  %v17443_v40 = vadd.f32 %v17439_v10, %v16783_v18  ;;  %v5242_v62 = vsub.f32 1.0, %v5241_v52  ;;  %v17446_v35 = vmul.f32 %v5223_v4, %v16582_v25  ;;  %v5234_v33 = vand.u32 2147483647, %v17259_v57  ;;  %v17473_v52 = vpop.f32.mrf.mxu2 }
 0x5c7   : > { %v10534_v6 = vpop.eup %10533  ;;  %v7410_v5 = vmul.f32 %v10532_v59, %v17374_v53  ;;  %v8799_v38 = vmul.f32 -1.442695, %v17429_v34  ;;  %v17451_v31 = vor.u32 1.1754944e-38, %v5236_v41  ;;  %10541 = vrcp.f32 %v17419_v1  ;;  %v7850_v55 = vpop.f32.mrf.mxu3 }
 0x5c8   : > { %v10536_v37 = vpop.eup %10535  ;;  %v8747_v50 = vmul.f32 -1.442695, %v17066_v51  ;;  %v17455_v18 = vadd.f32 1.0, %v10534_v6  ;;  %v17460_v25 = vadd.f32 %v17325_v0, %v5228_v11  ;;  %vm5230_vm10 = vweird.f32 %v17259_v57  ;;  %8858 = vmatmul.msk.f32.gmra.mxu2 %vm1427_vm0, %v7692_v47  ;;  %8147 = vxpose.xlu0.b32.cont [7/16] (narrow) %v7850_v55, 64 }
 0x5c9   : > { %v17457_v21 = vpop.eup %10537  ;;  %vm5231_vm12 = vweird.f32 %v17325_v0  ;;  %v7411_v27 = vsub.f32 1.0, %v7410_v5  ;;  %10543 = vpow2.f32 %v8799_v38  ;;  %v5243_v30 = vmul.f32 %v17363_v7, %v5242_v62  ;;  %v7032_v12 = vpop.f32.mrf.mxu1 }
 0x5ca   : > { %v17465_v63 = vpop.eup %10539  ;;  %v7420_v15 = vand.u32 2147483648, %v17374_v53  ;;  %v7425_v45 = vmul.f32 %v17457_v21, %v17406_v58  ;;  %10545 = vrcp.f32 %v17455_v18  ;;  %vm7415_vm13 = vweird.f32 %v10532_v59  ;;  %v6928_v62 = vpop.f32.mrf.mxu0  ;;  %vm17517_vm1 = vmor %vm5230_vm10, %vm5231_vm12 }
 0x5cb   : > { %v7412_v17 = vmul.f32 %v10532_v59, %v7411_v27  ;;  %v7418_v2 = vand.u32 2147483647, %v17374_v53  ;;  %v7440_v14 = vmul.f32 %v17465_v63, %v17411_v46  ;;  %v17477_v22 = vadd.f32 1.0, %v10536_v37 }
 0x5cc   : > { %10547 = vpow2.f32 %v8747_v50  ;;  %v8748_v49 = vmul.f32 -1.442695, %v17075_v8  ;;  %v7426_v60 = vsub.f32 1.0, %v7425_v45  ;;  %vm17480_vm14 = vcmp.eq.f32.partialorder %v5234_v33, 8.507059e+37  ;;  %8837 = vmatmul.msk.f32.gmra.mxu3 %vm1460_vm2, %v5339_v56 }
 0x5cd   : > { %v7413_v41 = vadd.f32 %v10532_v59, %v7412_v17  ;;  %vm7414_vm15 = vweird.f32 %v17374_v53  ;;  %v7441_v19 = vsub.f32 1.0, %v7440_v14  ;;  %v17486_v11 = vadd.f32 %v7032_v12, %v17197_v44  ;;  %v17489_v47 = vpop.eup %10541 }
 0x5ce   : > { %vm5245_vm3 = vweird.f32 %v17297_v36  ;;  %vm7416_vm6 = vmor %vm7414_vm15, %vm7415_vm13  ;;  %v7421_v6 = vor.u32 1.1754944e-38, %v7420_v15  ;;  %v7427_v33 = vmul.f32 %v17457_v21, %v7426_v60  ;;  %vm7430_vm7 = vweird.f32 %v17457_v21  ;;  %v8045_v57 = vpop.f32.mrf.mxu2 }
 0x5cf   : > { %v7435_v53 = vand.u32 2147483648, %v17406_v58  ;;  %v10544_v5 = vpop.eup %10543  ;;  %v7417_v38 = vsel %vm7416_vm6, %v10532_v59, %v7413_v41  ;;  %vm7419_vm8 = vcmp.eq.f32.partialorder %v7418_v2, 8.507059e+37  ;;  %vm7429_vm9 = vweird.f32 %v17406_v58  ;;  %v7853_v12 = vpop.f32.mrf.mxu3  ;;  %8221 = vxpose.xlu2.b32.start [1/16] (narrow) %v8045_v57, 16 }
 0x5d0   : > { %v7433_v44 = vand.u32 2147483647, %v17406_v58  ;;  %v17498_v56 = vpop.eup %10545  ;;  %v7422_v37 = vsel %vm7419_vm8, %v7421_v6, %v7417_v38  ;;  %v7428_v50 = vadd.f32 %v17457_v21, %v7427_v33  ;;  %v17501_v27 = vadd.f32 1.0, %v10544_v5  ;;  %vm17506_vm11 = vmor %vm7429_vm9, %vm7430_vm7  ;;  %8148 = vxpose.xlu0.b32.cont [8/16] (narrow) %v7853_v12, 64 }
 0x5d1   : > { %v8800_v15 = vmul.f32 -1.442695, %v17486_v11  ;;  %10549 = vrcp.f32 %v17477_v22  ;;  %v7693_v45 = vmul.f32 %v7422_v37, %v17275_v39  ;;  %v7442_v55 = vmul.f32 %v17465_v63, %v7441_v19  ;;  %v7035_v33 = vpop.f32.mrf.mxu1 }
 0x5d2   : > { %v7455_v58 = vmul.f32 %v17498_v56, %v17455_v18  ;;  %v10548_v17 = vpop.eup %10547  ;;  %v5249_v39 = vand.u32 2147483647, %v17297_v36  ;;  %v7432_v14 = vsel %vm17506_vm11, %v17457_v21, %v7428_v50  ;;  %v7436_v60 = vor.u32 1.1754944e-38, %v7435_v53 }
 0x5d3   : > { %10551 = vrcp.f32 %v17501_v27  ;;  %v5233_v41 = vsel %vm17517_vm1, %v17325_v0, %v17460_v25  ;;  %vm5246_vm4 = vweird.f32 %v17363_v7  ;;  %vm7434_vm5 = vcmp.eq.f32.partialorder %v7433_v44, 8.507059e+37  ;;  %8859 = vmatmul.msk.f32.gmra.mxu2 %vm1427_vm0, %v7693_v45 }
 0x5d4   : > { %10553 = vpow2.f32 %v8748_v49  ;;  %v5244_v19 = vadd.f32 %v17363_v7, %v5243_v30  ;;  %v5256_v21 = vmul.f32 %v17489_v47, %v17419_v1  ;;  %v7437_v6 = vsel %vm7434_vm5, %v7436_v60, %v7432_v14  ;;  %8838 = vmatmul.msk.f32.gmra.mxu3 %vm1460_vm2, %v17446_v35  ;;  %vm17555_vm12 = vmor %vm5245_vm3, %vm5246_vm4 }
 0x5d5   : > { %10555 = vpow2.f32 %v8800_v15  ;;  %v7443_v53 = vadd.f32 %v17465_v63, %v7442_v55  ;;  %vm7445_vm10 = vweird.f32 %v17465_v63  ;;  %v7456_v0 = vsub.f32 1.0, %v7455_v58  ;;  %v17568_v15 = vpop.f32.mrf.mxu0 }
 0x5d6   : > { %v17538_v25 = vadd.f32 %v7035_v33, %v17424_v32  ;;  %v5238_v30 = vsel %vm17480_vm14, %v17451_v31, %v5233_v41  ;;  %v5251_v49 = vand.u32 2147483648, %v17297_v36  ;;  %v17546_v5 = vadd.f32 1.0, %v10548_v17 }
 0x5d7   : > { %v7450_v38 = vand.u32 2147483648, %v17411_v46  ;;  %v17549_v44 = vpop.eup %10549  ;;  %v7694_v35 = vmul.f32 %v7437_v6, %v17306_v3  ;;  %vm7444_vm13 = vweird.f32 %v17411_v46  ;;  %v7448_v31 = vand.u32 2147483647, %v17411_v46  ;;  %v7856_v14 = vpop.f32.mrf.mxu3 }
 0x5d8   : > { %v8801_v4 = vmul.f32 -1.442695, %v17538_v25  ;;  %v17566_v50 = vadd.f32 %v6928_v62, %v17443_v40  ;;  %v5248_v36 = vsel %vm17555_vm12, %v17363_v7, %v5244_v19  ;;  %vm17573_vm14 = vcmp.eq.f32.partialorder %v5249_v39, 8.507059e+37  ;;  %vm17579_vm15 = vmor %vm7444_vm13, %vm7445_vm10  ;;  %8149 = vxpose.xlu0.b32.cont [9/16] (narrow) %v7856_v14, 64  ;;  %v8048_v6 = vpop.f32.mrf.mxu2 }
 0x5d9   : > { %v17563_v37 = vpop.eup %10551  ;;  %v5257_v3 = vsub.f32 1.0, %v5256_v21  ;;  %v7447_v40 = vsel %vm17579_vm15, %v17465_v63, %v7443_v53  ;;  %v7457_v62 = vmul.f32 %v17498_v56, %v7456_v0  ;;  %v5341_v58 = vmul.f32 %v5238_v30, %v16757_v61  ;;  %v7038_v57 = vpop.f32.mrf.mxu1  ;;  %8222 = vxpose.xlu2.b32.cont [2/16] (narrow) %v8048_v6, 16 }
 0x5da   : > { %v10554_v59 = vpop.eup %10553  ;;  %v7470_v7 = vmul.f32 %v17563_v37, %v17501_v27  ;;  %10557 = vpow2.f32 %v8801_v4  ;;  %v5252_v17 = vor.u32 1.1754944e-38, %v5251_v49  ;;  %v5271_v2 = vmul.f32 %v17549_v44, %v17477_v22 }
 0x5db   : > { %v10556_v55 = vpop.eup %10555  ;;  %v7451_v39 = vor.u32 1.1754944e-38, %v7450_v38  ;;  %vm5260_vm3 = vweird.f32 %v17419_v1  ;;  %10559 = vrcp.f32 %v17546_v5  ;;  %vm7449_vm6 = vcmp.eq.f32.partialorder %v7448_v31, 8.507059e+37  ;;  %8860 = vmatmul.msk.f32.gmra.mxu2 %vm1427_vm0, %v7694_v35 }
 0x5dc   : > { %v17594_v63 = vadd.f32 1.0, %v10556_v55  ;;  %v5253_v60 = vsel %vm17573_vm14, %v5252_v17, %v5248_v36  ;;  %v5258_v61 = vmul.f32 %v17489_v47, %v5257_v3  ;;  %v17600_v12 = vadd.f32 1.0, %v10554_v59  ;;  %8839 = vmatmul.msk.f32.gmra.mxu3 %vm1460_vm2, %v5341_v58 }
 0x5dd   : > { %v7452_v41 = vsel %vm7449_vm6, %v7451_v39, %v7447_v40  ;;  %v7458_v19 = vadd.f32 %v17498_v56, %v7457_v62  ;;  %vm7460_vm7 = vweird.f32 %v17498_v56  ;;  %v7471_v21 = vsub.f32 1.0, %v7470_v7  ;;  %v17634_v3 = vpop.f32.mrf.mxu0 }
 0x5de   : > { %10561 = vrcp.f32 %v17594_v63  ;;  %v5264_v33 = vand.u32 2147483647, %v17419_v1  ;;  %v5272_v53 = vsub.f32 1.0, %v5271_v2  ;;  %v7465_v0 = vand.u32 2147483648, %v17455_v18 }
 0x5df   : > { %v17609_v30 = vadd.f32 %v7038_v57, %v17434_v23  ;;  %v5266_v38 = vand.u32 2147483648, %v17419_v1  ;;  %v7695_v32 = vmul.f32 %v7452_v41, %v17311_v20  ;;  %vm7459_vm8 = vweird.f32 %v17455_v18  ;;  %v7859_v62 = vpop.f32.mrf.mxu3 }
 0x5e0   : > { %v10558_v49 = vpop.eup %10557  ;;  %v7463_v35 = vand.u32 2147483647, %v17455_v18  ;;  %v5342_v31 = vmul.f32 %v5253_v60, %v16812_v13  ;;  %vm5261_vm9 = vweird.f32 %v17489_v47  ;;  %vm17619_vm11 = vmor %vm7459_vm8, %vm7460_vm7  ;;  %v5259_v20 = vadd.f32 %v17489_v47, %v5258_v61  ;;  %8150 = vxpose.xlu0.b32.cont [10/16] (narrow) %v7859_v62, 64  ;;  %v8051_v57 = vpop.f32.mrf.mxu2 }
 0x5e1   : > { %v17623_v23 = vadd.f32 1.0, %v10558_v49  ;;  %v8802_v36 = vmul.f32 -1.442695, %v17609_v30  ;;  %v17626_v45 = vpop.eup %10559  ;;  %10563 = vrcp.f32 %v17600_v12  ;;  %v7462_v13 = vsel %vm17619_vm11, %v17498_v56, %v7458_v19  ;;  %vm17650_vm5 = vmor %vm5260_vm3, %vm5261_vm9  ;;  %v7041_v60 = vpop.f32.mrf.mxu1  ;;  %8223 = vxpose.xlu2.b32.cont [3/16] (narrow) %v8051_v57, 16 }
 0x5e2   : > { %v7472_v18 = vmul.f32 %v17563_v37, %v7471_v21  ;;  %vm17636_vm1 = vcmp.eq.f32.partialorder %v5264_v33, 8.507059e+37  ;;  %v5273_v59 = vmul.f32 %v17549_v44, %v5272_v53  ;;  %v7466_v40 = vor.u32 1.1754944e-38, %v7465_v0 }
 0x5e3   : > { %10565 = vrcp.f32 %v17623_v23  ;;  %v5267_v55 = vor.u32 1.1754944e-38, %v5266_v38  ;;  %v5279_v58 = vand.u32 2147483647, %v17477_v22  ;;  %vm7464_vm4 = vcmp.eq.f32.partialorder %v7463_v35, 8.507059e+37  ;;  %8861 = vmatmul.msk.f32.gmra.mxu2 %vm1427_vm0, %v7695_v32 }
 0x5e4   : > { %v17642_v7 = vpop.eup %10561  ;;  %10567 = vpow2.f32 %v8802_v36  ;;  %v5281_v17 = vand.u32 2147483648, %v17477_v22  ;;  %v5286_v2 = vmul.f32 %v17626_v45, %v17546_v5  ;;  %v7467_v39 = vsel %vm7464_vm4, %v7466_v40, %v7462_v13  ;;  %8840 = vmatmul.msk.f32.gmra.mxu3 %vm1460_vm2, %v5342_v31 }
 0x5e5   : > { %v7485_v14 = vmul.f32 %v17642_v7, %v17594_v63  ;;  %v5263_v61 = vsel %vm17650_vm5, %v17489_v47, %v5259_v20  ;;  %v7473_v1 = vadd.f32 %v17563_v37, %v7472_v18  ;;  %vm7475_vm10 = vweird.f32 %v17563_v37 }
 0x5e6   : > { %v17665_v41 = vadd.f32 %v7041_v60, %v17566_v50  ;;  %v5274_v19 = vadd.f32 %v17549_v44, %v5273_v59  ;;  %vm5276_vm12 = vweird.f32 %v17549_v44  ;;  %v7480_v21 = vand.u32 2147483648, %v17501_v27  ;;  %v17714_v59 = vpop.f32.mrf.mxu0 }
 0x5e7   : > { %v7486_v6 = vsub.f32 1.0, %v7485_v14  ;;  %v17671_v33 = vpop.eup %10563  ;;  %v7696_v47 = vmul.f32 %v7467_v39, %v17359_v54  ;;  %vm7474_vm13 = vweird.f32 %v17501_v27  ;;  %v7478_v50 = vand.u32 2147483647, %v17501_v27  ;;  %v7862_v13 = vpop.f32.mrf.mxu3 }
 0x5e8   : > { %v8803_v53 = vmul.f32 -1.442695, %v17665_v41  ;;  %v6819_v49 = vadd.f32 %v17439_v10, %v16862_v28  ;;  %v5268_v38 = vsel %vm17636_vm1, %v5267_v55, %v5263_v61  ;;  %vm5275_vm14 = vweird.f32 %v17477_v22  ;;  %vm17686_vm15 = vmor %vm7474_vm13, %vm7475_vm10  ;;  %8151 = vxpose.xlu0.b32.cont [11/16] (narrow) %v7862_v13, 64 }
 0x5e9   : > { %v17677_v0 = vpop.eup %10565  ;;  %v5287_v32 = vsub.f32 1.0, %v5286_v2  ;;  %v7477_v35 = vsel %vm17686_vm15, %v17563_v37, %v7473_v1  ;;  %v7487_v31 = vmul.f32 %v17642_v7, %v7486_v6  ;;  %vm17699_vm3 = vmor %vm5275_vm14, %vm5276_vm12  ;;  %vm17703_vm6 = vcmp.eq.f32.partialorder %v5279_v58, 8.507059e+37  ;;  %v18684_v2 = vld [vmem:[#allocation48_spill] sm:$0xff] }
 0x5ea   : > { %v10568_v27 = vpop.eup %10567  ;;  %v7500_v28 = vmul.f32 %v17677_v0, %v17623_v23  ;;  %10569 = vpow2.f32 %v8803_v53  ;;  %v6932_v22 = vadd.f32 %v17568_v15, %v6819_v49  ;;  %v7481_v20 = vor.u32 1.1754944e-38, %v7480_v21 }
 0x5eb   : > { %v17707_v37 = vadd.f32 1.0, %v10568_v27  ;;  %v5343_v18 = vmul.f32 %v5268_v38, %v16865_v24  ;;  %v5278_v15 = vsel %vm17699_vm3, %v17549_v44, %v5274_v19  ;;  %v5282_v46 = vor.u32 1.1754944e-38, %v5281_v17  ;;  %8862 = vmatmul.msk.f32.gmra.mxu2 %vm1427_vm0, %v7696_v47  ;;  %v7044_v24 = vpop.f32.mrf.mxu1  ;;  %v8054_v17 = vpop.f32.mrf.mxu2 }
 0x5ec   : > { %vm7479_vm7 = vcmp.eq.f32.partialorder %v7478_v50, 8.507059e+37  ;;  %v5288_v40 = vmul.f32 %v17626_v45, %v5287_v32  ;;  %v5301_v62 = vmul.f32 %v17671_v33, %v17600_v12  ;;  %v7488_v58 = vadd.f32 %v17642_v7, %v7487_v31  ;;  %8224 = vxpose.xlu2.b32.cont [4/16] (narrow) %v8054_v17, 16 }
 0x5ed   : > { %v7482_v55 = vsel %vm7479_vm7, %v7481_v20, %v7477_v35  ;;  %10571 = vrcp.f32 %v17707_v37  ;;  %vm7490_vm8 = vweird.f32 %v17642_v7  ;;  %v7501_v44 = vsub.f32 1.0, %v7500_v28  ;;  %8841 = vmatmul.msk.f32.gmra.mxu3 %vm1460_vm2, %v5343_v18 }
 0x5ee   : > { %v17722_v56 = vadd.f32 %v7044_v24, %v6932_v22  ;;  %v6822_v39 = vadd.f32 %v17439_v10, %v18684_v2  ;;  %v5283_v14 = vsel %vm17703_vm6, %v5282_v46, %v5278_v15  ;;  %v7495_v60 = vand.u32 2147483648, %v17594_v63  ;;  %v17776_v18 = vpop.f32.mrf.mxu0 }
 0x5ef   : > { %v7697_v1 = vmul.f32 %v7482_v55, %v17429_v34  ;;  %vm7489_vm9 = vweird.f32 %v17594_v63  ;;  %v7493_v57 = vand.u32 2147483647, %v17594_v63  ;;  %v5289_v21 = vadd.f32 %v17626_v45, %v5288_v40  ;;  %v7865_v54 = vpop.f32.mrf.mxu3 }
 0x5f0   : > { %v10570_v61 = vpop.eup %10569  ;;  %v8804_v19 = vmul.f32 -1.442695, %v17722_v56  ;;  %vm5291_vm11 = vweird.f32 %v17626_v45  ;;  %v5302_v6 = vsub.f32 1.0, %v5301_v62  ;;  %vm17738_vm1 = vmor %vm7489_vm9, %vm7490_vm8  ;;  %vm5290_vm4 = vweird.f32 %v17546_v5  ;;  %8152 = vxpose.xlu0.b32.cont [12/16] (narrow) %v7865_v54, 64 }
 0x5f1   : > { %v17742_v50 = vadd.f32 1.0, %v10570_v61  ;;  %v7492_v34 = vsel %vm17738_vm1, %v17642_v7, %v7488_v58  ;;  %v7502_v63 = vmul.f32 %v17677_v0, %v7501_v44  ;;  %v5294_v49 = vand.u32 2147483647, %v17546_v5  ;;  %vm17758_vm5 = vmor %vm5290_vm4, %vm5291_vm11 }
 0x5f2   : > { %10573 = vpow2.f32 %v8804_v19  ;;  %v5296_v38 = vand.u32 2147483648, %v17546_v5  ;;  %v7496_v32 = vor.u32 1.1754944e-38, %v7495_v60  ;;  %v6935_v27 = vadd.f32 %v17634_v3, %v6822_v39 }
 0x5f3   : > { %v17749_v53 = vpop.eup %10571  ;;  %10575 = vrcp.f32 %v17742_v50  ;;  %v5344_v35 = vmul.f32 %v5283_v14, %v16966_v48  ;;  %vm7494_vm10 = vcmp.eq.f32.partialorder %v7493_v57, 8.507059e+37  ;;  %8863 = vmatmul.msk.f32.gmra.mxu2 %vm1427_vm0, %v7697_v1  ;;  %v6825_v5 = vadd.f32 %v17439_v10, %v17023_v16  ;;  %v7047_v22 = vpop.f32.mrf.mxu1 }
 0x5f4   : > { %v7515_v31 = vmul.f32 %v17749_v53, %v17707_v37  ;;  %v5293_v48 = vsel %vm17758_vm5, %v17626_v45, %v5289_v21  ;;  %v5303_v3 = vmul.f32 %v17671_v33, %v5302_v6  ;;  %v7497_v28 = vsel %vm7494_vm10, %v7496_v32, %v7492_v34  ;;  %v8057_v13 = vpop.f32.mrf.mxu2 }
 0x5f5   : > { %v7503_v4 = vadd.f32 %v17677_v0, %v7502_v63  ;;  %vm7505_vm12 = vweird.f32 %v17677_v0  ;;  %v17773_v20 = vadd.f32 %v7047_v22, %v6935_v27  ;;  %8842 = vmatmul.msk.f32.gmra.mxu3 %vm1460_vm2, %v5344_v35  ;;  %vm5295_vm13 = vcmp.eq.f32.partialorder %v5294_v49, 8.507059e+37  ;;  %8225 = vxpose.xlu2.b32.cont [5/16] (narrow) %v8057_v13, 16 }
 0x5f6   : > { %v7516_v36 = vsub.f32 1.0, %v7515_v31  ;;  %v5297_v16 = vor.u32 1.1754944e-38, %v5296_v38  ;;  %vm5305_vm14 = vweird.f32 %v17600_v12  ;;  %v7510_v45 = vand.u32 2147483648, %v17623_v23  ;;  %v6943_v35 = vpop.f32.mrf.mxu0 }
 0x5f7   : > { %v7698_v46 = vmul.f32 %v7497_v28, %v17486_v11  ;;  %vm7504_vm15 = vweird.f32 %v17623_v23  ;;  %v7508_v40 = vand.u32 2147483647, %v17623_v23  ;;  %v8805_v62 = vmul.f32 -1.442695, %v17773_v20  ;;  %v7868_v61 = vpop.f32.mrf.mxu3 }
 0x5f8   : > { %v10574_v15 = vpop.eup %10573  ;;  %v5298_v24 = vsel %vm5295_vm13, %v5297_v16, %v5293_v48  ;;  %v5304_v58 = vadd.f32 %v17671_v33, %v5303_v3  ;;  %vm5306_vm3 = vweird.f32 %v17671_v33  ;;  %vm17790_vm6 = vmor %vm7504_vm15, %vm7505_vm12  ;;  %v7517_v17 = vmul.f32 %v17749_v53, %v7516_v36  ;;  %8153 = vxpose.xlu0.b32.cont [13/16] (narrow) %v7868_v61, 64 }
 0x5f9   : > { %v17784_v55 = vpop.eup %10575  ;;  %v17794_v11 = vadd.f32 1.0, %v10574_v15  ;;  %v7507_v23 = vsel %vm17790_vm6, %v17677_v0, %v7503_v4  ;;  %10577 = vpow2.f32 %v8805_v62  ;;  %v5309_v39 = vand.u32 2147483647, %v17600_v12  ;;  %vm17809_vm7 = vmor %vm5305_vm14, %vm5306_vm3 }
 0x5fa   : > { %v7530_v2 = vmul.f32 %v17784_v55, %v17742_v50  ;;  %v5311_v14 = vand.u32 2147483648, %v17600_v12  ;;  %v7511_v60 = vor.u32 1.1754944e-38, %v7510_v45  ;;  %v6938_v1 = vadd.f32 %v17714_v59, %v6825_v5 }
 0x5fb   : > { %10579 = vrcp.f32 %v17794_v11  ;;  %v5345_v57 = vmul.f32 %v5298_v24, %v17066_v51  ;;  %vm7509_vm8 = vcmp.eq.f32.partialorder %v7508_v40, 8.507059e+37  ;;  %8864 = vmatmul.msk.f32.gmra.mxu2 %vm1427_vm0, %v7698_v46  ;;  %v5308_v19 = vsel %vm17809_vm7, %v17671_v33, %v5304_v58  ;;  %v7050_v6 = vpop.f32.mrf.mxu1 }
 0x5fc   : > { %v7512_v21 = vsel %vm7509_vm8, %v7511_v60, %v7507_v23  ;;  %v7518_v59 = vadd.f32 %v17749_v53, %v7517_v17  ;;  %vm7520_vm9 = vweird.f32 %v17749_v53  ;;  %v7531_v51 = vsub.f32 1.0, %v7530_v2  ;;  %v8060_v47 = vpop.f32.mrf.mxu2 }
 0x5fd   : > { %v17819_v12 = vadd.f32 %v7050_v6, %v6938_v1  ;;  %8843 = vmatmul.msk.f32.gmra.mxu3 %vm1460_vm2, %v5345_v57  ;;  %vm5310_vm11 = vcmp.eq.f32.partialorder %v5309_v39, 8.507059e+37  ;;  %v5312_v34 = vor.u32 1.1754944e-38, %v5311_v14  ;;  %v7525_v63 = vand.u32 2147483648, %v17707_v37  ;;  %8226 = vxpose.xlu2.b32.cont [6/16] (narrow) %v8060_v47, 16 }
 0x5fe   : > { %v7699_v33 = vmul.f32 %v7512_v21, %v17538_v25  ;;  %vm7519_vm1 = vweird.f32 %v17707_v37  ;;  %v7523_v38 = vand.u32 2147483647, %v17707_v37  ;;  %v6828_v27 = vadd.f32 %v17439_v10, %v17111_v29  ;;  %v6946_v44 = vpop.f32.mrf.mxu0 }
 0x5ff   : > { %v10578_v49 = vpop.eup %10577  ;;  %v8806_v32 = vmul.f32 -1.442695, %v17819_v12  ;;  %v5313_v7 = vsel %vm5310_vm11, %v5312_v34, %v5308_v19  ;;  %vm7521_vm4 = vmor %vm7519_vm1, %vm7520_vm9  ;;  %v7532_v5 = vmul.f32 %v17784_v55, %v7531_v51  ;;  %v7526_v48 = vor.u32 1.1754944e-38, %v7525_v63  ;;  %v7871_v3 = vpop.f32.mrf.mxu3 }
 0x600   : > { %v17833_v31 = vadd.f32 1.0, %v10578_v49  ;;  %v7522_v25 = vsel %vm7521_vm4, %v17749_v53, %v7518_v59  ;;  %v6941_v29 = vadd.f32 %v17776_v18, %v6828_v27  ;;  %v5346_v28 = vmul.f32 %v5313_v7, %v17075_v8  ;;  %8154 = vxpose.xlu0.b32.cont [14/16] (narrow) %v7871_v3, 64 }
 0x601   : > { %v17827_v54 = vpop.eup %10579  ;;  %10581 = vpow2.f32 %v8806_v32  ;;  %vm7524_vm5 = vcmp.eq.f32.partialorder %v7523_v38, 8.507059e+37  ;;  %v7533_v4 = vadd.f32 %v17784_v55, %v7532_v5  ;;  %vm7535_vm10 = vweird.f32 %v17784_v55 }
 0x602   : > { %v7545_v37 = vmul.f32 %v17827_v54, %v17794_v11  ;;  %10583 = vrcp.f32 %v17833_v31  ;;  %v7527_v22 = vsel %vm7524_vm5, %v7526_v48, %v7522_v25  ;;  %v7540_v16 = vand.u32 2147483648, %v17742_v50 }
 0x603   : > { %8865 = vmatmul.msk.f32.gmra.mxu2 %vm1427_vm0, %v7699_v33  ;;  %v7053_v53 = vpop.f32.mrf.mxu1  ;;  %v7700_v8 = vmul.f32 %v7527_v22, %v17609_v30  ;;  %vm7534_vm12 = vweird.f32 %v17742_v50  ;;  %v7538_v45 = vand.u32 2147483647, %v17742_v50  ;;  %v6831_v40 = vadd.f32 %v17439_v10, %v17183_v9 }
 0x604   : > { %v7546_v36 = vsub.f32 1.0, %v7545_v37  ;;  %v17845_v13 = vadd.f32 %v7053_v53, %v6941_v29  ;;  %vm7536_vm13 = vmor %vm7534_vm12, %vm7535_vm10  ;;  %v7541_v50 = vor.u32 1.1754944e-38, %v7540_v16  ;;  %vm7550_vm14 = vweird.f32 %v17827_v54 }
 0x605   : > { %8844 = vmatmul.msk.f32.gmra.mxu3 %vm1460_vm2, %v5346_v28  ;;  %v7537_v24 = vsel %vm7536_vm13, %v17784_v55, %v7533_v4  ;;  %v6944_v17 = vadd.f32 %v6943_v35, %v6831_v40  ;;  %vm7539_vm2 = vcmp.eq.f32.partialorder %v7538_v45, 8.507059e+37  ;;  %v7555_v60 = vand.u32 2147483648, %v17794_v11 }
 0x606   : > { %v8807_v15 = vmul.f32 -1.442695, %v17845_v13  ;;  %v7547_v58 = vmul.f32 %v17827_v54, %v7546_v36  ;;  %v7542_v9 = vsel %vm7539_vm2, %v7541_v50, %v7537_v24  ;;  %vm7549_vm15 = vweird.f32 %v17794_v11  ;;  %v6949_v49 = vpop.f32.mrf.mxu0 }
 0x607   : > { %v10582_v18 = vpop.eup %10581  ;;  %v7874_v23 = vpop.f32.mrf.mxu3  ;;  %v7701_v1 = vmul.f32 %v7542_v9, %v17665_v41  ;;  %v7553_v57 = vand.u32 2147483647, %v17794_v11  ;;  %v6834_v21 = vadd.f32 %v17439_v10, %v17249_v26  ;;  %vm17878_vm3 = vmor %vm7549_vm15, %vm7550_vm14  ;;  %v7556_v34 = vor.u32 1.1754944e-38, %v7555_v60 }
 0x608   : > { %v17853_v46 = vpop.eup %10583  ;;  %v17857_v62 = vadd.f32 1.0, %v10582_v18  ;;  %10585 = vpow2.f32 %v8807_v15  ;;  %8155 = vxpose.xlu0.b32.cont [15/16] (narrow) %v7874_v23, 64  ;;  %v7548_v55 = vadd.f32 %v17827_v54, %v7547_v58  ;;  %v7570_v35 = vand.u32 2147483648, %v17833_v31 }
 0x609   : > { %v7560_v30 = vmul.f32 %v17853_v46, %v17833_v31  ;;  %v6947_v63 = vadd.f32 %v6946_v44, %v6834_v21  ;;  %vm7554_vm6 = vcmp.eq.f32.partialorder %v7553_v57, 8.507059e+37  ;;  %vm7565_vm7 = vweird.f32 %v17853_v46 }
 0x60a   : > { %10587 = vrcp.f32 %v17857_v62  ;;  %v7552_v41 = vsel %vm17878_vm3, %v17827_v54, %v7548_v55  ;;  %vm7564_vm8 = vweird.f32 %v17833_v31  ;;  %v7568_v5 = vand.u32 2147483647, %v17833_v31 }
 0x60b   : > { %8866 = vmatmul.msk.f32.gmra.mxu2 %vm1427_vm0, %v7700_v8  ;;  %v7056_v2 = vpop.f32.mrf.mxu1  ;;  %v7561_v39 = vsub.f32 1.0, %v7560_v30  ;;  %v7557_v33 = vsel %vm7554_vm6, %v7556_v34, %v7552_v41  ;;  %v6837_v3 = vadd.f32 %v17439_v10, %v17323_v43  ;;  %vm17905_vm9 = vmor %vm7564_vm8, %vm7565_vm7  ;;  %v7571_v4 = vor.u32 1.1754944e-38, %v7570_v35 }
 0x60c   : > { %v17867_v14 = vadd.f32 %v7056_v2, %v6944_v17  ;;  %v7702_v25 = vmul.f32 %v7557_v33, %v17722_v56  ;;  %vm7569_vm11 = vcmp.eq.f32.partialorder %v7568_v5, 8.507059e+37  ;;  %v7585_v40 = vand.u32 2147483648, %v17857_v62 }
 0x60d   : > { %v7562_v11 = vmul.f32 %v17853_v46, %v7561_v39  ;;  %v6950_v36 = vadd.f32 %v6949_v49, %v6837_v3  ;;  %vm7579_vm4 = vweird.f32 %v17857_v62  ;;  %v7583_v30 = vand.u32 2147483647, %v17857_v62 }
 0x60e   : > { %v10586_v61 = vpop.eup %10585  ;;  %v8808_v0 = vmul.f32 -1.442695, %v17867_v14  ;;  %v8063_v51 = vpop.f32.mrf.mxu2  ;;  %v6840_v23 = vadd.f32 %v17439_v10, %v17404_v42  ;;  %v7586_v39 = vor.u32 1.1754944e-38, %v7585_v40  ;;  %v6843_v34 = vadd.f32 %v17439_v10, %v17473_v52 }
 0x60f   : > { %v17882_v59 = vadd.f32 1.0, %v10586_v61  ;;  %8227 = vxpose.xlu2.b32.cont [7/16] (narrow) %v8063_v51, 16  ;;  %v7877_v26 = vpop.f32.mrf.mxu3  ;;  %v7563_v32 = vadd.f32 %v17853_v46, %v7562_v11  ;;  %vm7584_vm10 = vcmp.eq.f32.partialorder %v7583_v30, 8.507059e+37 }
 0x610   : > { %v17874_v19 = vpop.eup %10587  ;;  %10589 = vpow2.f32 %v8808_v0  ;;  %8156 = vxpose.xlu0.b32.end [16/16] (narrow) %v7877_v26, 64 }
 0x611   : > { %v7575_v47 = vmul.f32 %v17874_v19, %v17857_v62  ;;  %10591 = vrcp.f32 %v17882_v59  ;;  %v7567_v56 = vsel %vm17905_vm9, %v17853_v46, %v7563_v32  ;;  %vm7580_vm1 = vweird.f32 %v17874_v19  ;;  %v6952_v46 = vpop.f32.mrf.mxu0 }
 0x612   : > { %v7572_v16 = vsel %vm7569_vm11, %v7571_v4, %v7567_v56  ;;  %vm17932_vm5 = vmor %vm7579_vm4, %vm7580_vm1  ;;  %v6953_v60 = vadd.f32 %v6952_v46, %v6840_v23  ;;  %v7600_v21 = vand.u32 2147483648, %v17882_v59  ;;  %vm7594_vm13 = vweird.f32 %v17882_v59 }
 0x613   : > { %8867 = vmatmul.msk.f32.gmra.mxu2 %vm1427_vm0, %v7701_v1  ;;  %v7059_v38 = vpop.f32.mrf.mxu1  ;;  %v7576_v54 = vsub.f32 1.0, %v7575_v47  ;;  %v7703_v58 = vmul.f32 %v7572_v16, %v17773_v20  ;;  %v7598_v41 = vand.u32 2147483647, %v17882_v59 }
 0x614   : > { %v17894_v27 = vadd.f32 %v7059_v38, %v6947_v63  ;;  %v7601_v32 = vor.u32 1.1754944e-38, %v7600_v21 }
 0x615   : > { %v7577_v31 = vmul.f32 %v17874_v19, %v7576_v54  ;;  %vm7599_vm14 = vcmp.eq.f32.partialorder %v7598_v41, 8.507059e+37 }
 0x616   : > { %v10590_v7 = vpop.eup %10589  ;;  %v8809_v37 = vmul.f32 -1.442695, %v17894_v27  ;;  %v8066_v22 = vpop.f32.mrf.mxu2 }
 0x617   : > { %v17901_v48 = vpop.eup %10591  ;;  %v17909_v28 = vadd.f32 1.0, %v10590_v7  ;;  %8228 = vxpose.xlu2.b32.cont [8/16] (narrow) %v8066_v22, 16  ;;  %v7880_v43 = vpop.f32.mrf.mxu3  ;;  %v7578_v8 = vadd.f32 %v17874_v19, %v7577_v31 }
 0x618   : > { %v7590_v53 = vmul.f32 %v17901_v48, %v17882_v59  ;;  %10593 = vpow2.f32 %v8809_v37  ;;  %8173 = vxpose.xlu1.b32.start [1/16] (narrow) %v7880_v43, 64  ;;  %vm7595_vm12 = vweird.f32 %v17901_v48 }
 0x619   : > { %10595 = vrcp.f32 %v17909_v28  ;;  %v7582_v20 = vsel %vm17932_vm5, %v17874_v19, %v7578_v8  ;;  %v6955_v26 = vpop.f32.mrf.mxu0  ;;  %vm17959_vm2 = vmor %vm7594_vm13, %vm7595_vm12  ;;  %v7615_v37 = vand.u32 2147483648, %v17909_v28  ;;  %vm7609_vm3 = vweird.f32 %v17909_v28 }
 0x61a   : > { %v7591_v45 = vsub.f32 1.0, %v7590_v53  ;;  %v7587_v61 = vsel %vm7584_vm10, %v7586_v39, %v7582_v20  ;;  %v6956_v52 = vadd.f32 %v6955_v26, %v6843_v34  ;;  %v7613_v29 = vand.u32 2147483647, %v17909_v28 }
 0x61b   : > { %8868 = vmatmul.msk.f32.gmra.mxu2 %vm1427_vm0, %v7702_v25  ;;  %v7062_v18 = vpop.f32.mrf.mxu1  ;;  %v7704_v51 = vmul.f32 %v7587_v61, %v17819_v12  ;;  %v7616_v16 = vor.u32 1.1754944e-38, %v7615_v37 }
 0x61c   : > { %v17921_v15 = vadd.f32 %v7062_v18, %v6950_v36  ;;  %v7592_v62 = vmul.f32 %v17901_v48, %v7591_v45  ;;  %vm7614_vm7 = vcmp.eq.f32.partialorder %v7613_v29, 8.507059e+37 }
 0x61e   : > { %v10594_v24 = vpop.eup %10593  ;;  %v8810_v44 = vmul.f32 -1.442695, %v17921_v15  ;;  %v8069_v2 = vpop.f32.mrf.mxu2  ;;  %v7593_v57 = vadd.f32 %v17901_v48, %v7592_v62 }
 0x61f   : > { %v17928_v50 = vpop.eup %10595  ;;  %v17936_v9 = vadd.f32 1.0, %v10594_v24  ;;  %8229 = vxpose.xlu2.b32.cont [9/16] (narrow) %v8069_v2, 16  ;;  %v7883_v42 = vpop.f32.mrf.mxu3 }
 0x620   : > { %v7605_v55 = vmul.f32 %v17928_v50, %v17909_v28  ;;  %10597 = vpow2.f32 %v8810_v44  ;;  %8174 = vxpose.xlu1.b32.cont [2/16] (narrow) %v7883_v42, 64  ;;  %v7597_v12 = vsel %vm17959_vm2, %v17901_v48, %v7593_v57  ;;  %vm7610_vm15 = vweird.f32 %v17928_v50 }
 0x621   : > { %10599 = vrcp.f32 %v17936_v9  ;;  %v7602_v54 = vsel %vm7599_vm14, %v7601_v32, %v7597_v12  ;;  %vm7611_vm6 = vmor %vm7609_vm3, %vm7610_vm15  ;;  %v7630_v45 = vand.u32 2147483648, %v17936_v9  ;;  %vm7624_vm9 = vweird.f32 %v17936_v9 }
 0x622   : > { %v7606_v0 = vsub.f32 1.0, %v7605_v55  ;;  %v7705_v3 = vmul.f32 %v7602_v54, %v17845_v13  ;;  %v7628_v24 = vand.u32 2147483647, %v17936_v9 }
 0x623   : > { %8869 = vmatmul.msk.f32.gmra.mxu2 %vm1427_vm0, %v7703_v58  ;;  %v7065_v1 = vpop.f32.mrf.mxu1  ;;  %v7631_v17 = vor.u32 1.1754944e-38, %v7630_v45 }
 0x624   : > { %v17948_v19 = vadd.f32 %v7065_v1, %v6953_v60  ;;  %v7607_v59 = vmul.f32 %v17928_v50, %v7606_v0  ;;  %vm7629_vm1 = vcmp.eq.f32.partialorder %v7628_v24, 8.507059e+37 }
 0x626   : > { %v10598_v6 = vpop.eup %10597  ;;  %v8811_v11 = vmul.f32 -1.442695, %v17948_v19  ;;  %v7608_v7 = vadd.f32 %v17928_v50, %v7607_v59 }
 0x627   : > { %v17955_v47 = vpop.eup %10599  ;;  %v17963_v49 = vadd.f32 1.0, %v10598_v6  ;;  %v7886_v10 = vpop.f32.mrf.mxu3 }
 0x628   : > { %v7620_v33 = vmul.f32 %v17955_v47, %v17936_v9  ;;  %v8072_v38 = vpop.f32.mrf.mxu2  ;;  %10601 = vpow2.f32 %v8811_v11  ;;  %8175 = vxpose.xlu1.b32.cont [3/16] (narrow) %v7886_v10, 64  ;;  %v7612_v53 = vsel %vm7611_vm6, %v17928_v50, %v7608_v7  ;;  %vm7625_vm8 = vweird.f32 %v17955_v47 }
 0x629   : > { %10603 = vrcp.f32 %v17963_v49  ;;  %8230 = vxpose.xlu2.b32.cont [10/16] (narrow) %v8072_v38, 16  ;;  %v7617_v28 = vsel %vm7614_vm7, %v7616_v16, %v7612_v53  ;;  %vm7626_vm11 = vmor %vm7624_vm9, %vm7625_vm8  ;;  %v7645_v55 = vand.u32 2147483648, %v17963_v49  ;;  %vm7639_vm5 = vweird.f32 %v17963_v49 }
 0x62a   : > { %v7621_v25 = vsub.f32 1.0, %v7620_v33  ;;  %v7706_v40 = vmul.f32 %v7617_v28, %v17867_v14  ;;  %v7643_v42 = vand.u32 2147483647, %v17963_v49 }
 0x62b   : > { %8870 = vmatmul.msk.f32.gmra.mxu2 %vm1427_vm0, %v7704_v51  ;;  %v7068_v35 = vpop.f32.mrf.mxu1  ;;  %v7646_v0 = vor.u32 1.1754944e-38, %v7645_v55 }
 0x62c   : > { %v17975_v5 = vadd.f32 %v7068_v35, %v6956_v52  ;;  %v7622_v4 = vmul.f32 %v17955_v47, %v7621_v25  ;;  %vm7644_vm12 = vcmp.eq.f32.partialorder %v7643_v42, 8.507059e+37 }
 0x62e   : > { %v10602_v48 = vpop.eup %10601  ;;  %v8812_v22 = vmul.f32 -1.442695, %v17975_v5  ;;  %v7623_v18 = vadd.f32 %v17955_v47, %v7622_v4 }
 0x62f   : > { %v10604_v56 = vpop.eup %10603  ;;  %v17982_v31 = vadd.f32 1.0, %v10602_v48  ;;  %v7889_v13 = vpop.f32.mrf.mxu3 }
 0x630   : > { %v7635_v43 = vmul.f32 %v10604_v56, %v17963_v49  ;;  %v8075_v36 = vpop.f32.mrf.mxu2  ;;  %10605 = vpow2.f32 %v8812_v22  ;;  %8176 = vxpose.xlu1.b32.cont [4/16] (narrow) %v7889_v13, 64  ;;  %v7627_v44 = vsel %vm7626_vm11, %v17955_v47, %v7623_v18  ;;  %vm7640_vm4 = vweird.f32 %v10604_v56 }
 0x631   : > { %10607 = vrcp.f32 %v17982_v31  ;;  %8231 = vxpose.xlu2.b32.cont [11/16] (narrow) %v8075_v36, 16  ;;  %v7632_v14 = vsel %vm7629_vm1, %v7631_v17, %v7627_v44  ;;  %vm7641_vm10 = vmor %vm7639_vm5, %vm7640_vm4  ;;  %v7660_v11 = vand.u32 2147483648, %v17982_v31  ;;  %vm7654_vm2 = vweird.f32 %v17982_v31 }
 0x632   : > { %v7636_v8 = vsub.f32 1.0, %v7635_v43  ;;  %v7707_v39 = vmul.f32 %v7632_v14, %v17894_v27  ;;  %v7658_v34 = vand.u32 2147483647, %v17982_v31 }
 0x633   : > { %8871 = vmatmul.msk.f32.gmra.mxu2 %vm1427_vm0, %v7705_v3  ;;  %v7661_v49 = vor.u32 1.1754944e-38, %v7660_v11 }
 0x634   : > { %v7637_v50 = vmul.f32 %v10604_v56, %v7636_v8  ;;  %vm7659_vm15 = vcmp.eq.f32.partialorder %v7658_v34, 8.507059e+37 }
 0x636   : > { %v10606_v46 = vpop.eup %10605  ;;  %v7638_v62 = vadd.f32 %v10604_v56, %v7637_v50 }
 0x637   : > { %v10608_v58 = vpop.eup %10607  ;;  %v7198_v30 = vadd.f32 1.0, %v10606_v46  ;;  %v7892_v2 = vpop.f32.mrf.mxu3 }
 0x638   : > { %v7650_v23 = vmul.f32 %v10608_v58, %v17982_v31  ;;  %8177 = vxpose.xlu1.b32.cont [5/16] (narrow) %v7892_v2, 64  ;;  %v7642_v61 = vsel %vm7641_vm10, %v10604_v56, %v7638_v62  ;;  %vm7655_vm13 = vweird.f32 %v10608_v58 }
 0x639   : > { %10609 = vrcp.f32 %v7198_v30  ;;  %v7647_v6 = vsel %vm7644_vm12, %v7646_v0, %v7642_v61  ;;  %vm7656_vm14 = vmor %vm7654_vm2, %vm7655_vm13  ;;  %v7675_v32 = vand.u32 2147483648, %v7198_v30  ;;  %vm7669_vm6 = vweird.f32 %v7198_v30 }
 0x63a   : > { %v7651_v9 = vsub.f32 1.0, %v7650_v23  ;;  %v7708_v47 = vmul.f32 %v7647_v6, %v17921_v15  ;;  %v7673_v10 = vand.u32 2147483647, %v7198_v30 }
 0x63b   : > { %8872 = vmatmul.msk.f32.gmra.mxu2 %vm1427_vm0, %v7706_v40  ;;  %v8078_v20 = vpop.f32.mrf.mxu2  ;;  %v7676_v54 = vor.u32 1.1754944e-38, %v7675_v32 }
 0x63c   : > { %8232 = vxpose.xlu2.b32.cont [12/16] (narrow) %v8078_v20, 16  ;;  %v7652_v1 = vmul.f32 %v10608_v58, %v7651_v9  ;;  %vm7674_vm8 = vcmp.eq.f32.partialorder %v7673_v10, 8.507059e+37  ;;  %v8157_v46 = vpop.trf.xlu0 }
 0x63d   : > { %8205 = vst [vmem:[%s18016_s30] sm:$0xff] %v8157_v46 }
 0x63e   : > { %v7653_v41 = vadd.f32 %v10608_v58, %v7652_v1 }
 0x63f   : > { %v10610_v60 = vpop.eup %10609  ;;  %v7895_v21 = vpop.f32.mrf.mxu3 }
 0x640   : > { %v7665_v57 = vmul.f32 %v10610_v60, %v7198_v30  ;;  %8178 = vxpose.xlu1.b32.cont [6/16] (narrow) %v7895_v21, 64  ;;  %v7657_v26 = vsel %vm7656_vm14, %v10608_v58, %v7653_v41  ;;  %vm7670_vm3 = vweird.f32 %v10610_v60 }
 0x641   : > { %v7662_v59 = vsel %vm7659_vm15, %v7661_v49, %v7657_v26  ;;  %vm7671_vm7 = vmor %vm7669_vm6, %vm7670_vm3 }
 0x642   : > { %v7666_v27 = vsub.f32 1.0, %v7665_v57  ;;  %v7709_v15 = vmul.f32 %v7662_v59, %v17948_v19 }
 0x643   : > { %8873 = vmatmul.msk.f32.gmra.mxu2 %vm1427_vm0, %v7707_v39  ;;  %v8081_v51 = vpop.f32.mrf.mxu2 }
 0x644   : > { %8233 = vxpose.xlu2.b32.cont [13/16] (narrow) %v8081_v51, 16  ;;  %v7667_v63 = vmul.f32 %v10610_v60, %v7666_v27  ;;  %v8158_v24 = vpop.trf.xlu0 }
 0x645   : > { %8207 = vst [vmem:[%s18016_s30 + $0x10] sm:$0xff] %v8158_v24 }
 0x646   : > { %v7668_v38 = vadd.f32 %v10610_v60, %v7667_v63 }
 0x647   : > { %v7898_v12 = vpop.f32.mrf.mxu3 }
 0x648   : > { %8179 = vxpose.xlu1.b32.cont [7/16] (narrow) %v7898_v12, 64  ;;  %v7672_v52 = vsel %vm7671_vm7, %v10610_v60, %v7668_v38 }
 0x649   : > { %v7677_v7 = vsel %vm7674_vm8, %v7676_v54, %v7672_v52 }
 0x64a   : > { %v7710_v37 = vmul.f32 %v7677_v7, %v17975_v5 }
 0x64b   : > { %8874 = vmatmul.msk.f32.gmra.mxu2 %vm1427_vm0, %v7708_v47  ;;  %v8084_v33 = vpop.f32.mrf.mxu2 }
 0x64c   : > { %8234 = vxpose.xlu2.b32.cont [14/16] (narrow) %v8084_v33, 16  ;;  %v8159_v30 = vpop.trf.xlu0 }
 0x64d   : > { %8209 = vst [vmem:[%s18016_s30 + $0x20] sm:$0xff] %v8159_v30 }
 0x64f   : > { %v7901_v35 = vpop.f32.mrf.mxu3 }
 0x650   : > { %8180 = vxpose.xlu1.b32.cont [8/16] (narrow) %v7901_v35, 64 }
 0x653   : > { %8875 = vmatmul.msk.f32.gmra.mxu2 %vm1427_vm0, %v7709_v15 }
 0x654   : > { %v8160_v23 = vpop.trf.xlu0 }
 0x655   : > { %8211 = vst [vmem:[%s18016_s30 + $0x30] sm:$0xff] %v8160_v23 }
 0x656   : > { %v8087_v25 = vpop.f32.mrf.mxu2 }
 0x657   : > { %8235 = vxpose.xlu2.b32.cont [15/16] (narrow) %v8087_v25, 16  ;;  %v7904_v48 = vpop.f32.mrf.mxu3 }
 0x658   : > { %8181 = vxpose.xlu1.b32.cont [9/16] (narrow) %v7904_v48, 64 }
 0x65b   : > { %8876 = vmatmul.msk.f32.gmra.mxu2 %vm1427_vm0, %v7710_v37 }
 0x65c   : > { %v8161_v14 = vpop.trf.xlu0 }
 0x65d   : > { %8213 = vst [vmem:[%s18016_s30 + $0x40] sm:$0xff] %v8161_v14 }
 0x65e   : > { %v8090_v19 = vpop.f32.mrf.mxu2 }
 0x65f   : > { %8236 = vxpose.xlu2.b32.end [16/16] (narrow) %v8090_v19, 16  ;;  %v7907_v3 = vpop.f32.mrf.mxu3 }
 0x660   : > { %8182 = vxpose.xlu1.b32.cont [10/16] (narrow) %v7907_v3, 64 }
 0x664   : > { %v8162_v55 = vpop.trf.xlu0 }
 0x665   : > { %8215 = vst [vmem:[%s18016_s30 + $0x50] sm:$0xff] %v8162_v55 }
 0x666   : > { %v8093_v29 = vpop.f32.mrf.mxu2 }
 0x667   : > { %8253 = vxpose.xlu0.b32.start [1/16] (narrow) %v8093_v29, 16  ;;  %v7910_v22 = vpop.f32.mrf.mxu3 }
 0x668   : > { %8183 = vxpose.xlu1.b32.cont [11/16] (narrow) %v7910_v22, 64 }
 0x66c   : > { %v8163_v60 = vpop.trf.xlu0 }
 0x66d   : > { %8217 = vst [vmem:[%s18016_s30 + $0x60] sm:$0xff] %v8163_v60 }
 0x66e   : > { %v8096_v56 = vpop.f32.mrf.mxu2 }
 0x66f   : > { %8254 = vxpose.xlu0.b32.cont [2/16] (narrow) %v8096_v56, 16  ;;  %v7913_v31 = vpop.f32.mrf.mxu3 }
 0x670   : > { %8184 = vxpose.xlu1.b32.cont [12/16] (narrow) %v7913_v31, 64 }
 0x674   : > { %v8164_v57 = vpop.trf.xlu0 }
 0x675   : > { %8219 = vst [vmem:[%s18016_s30 + $0x70] sm:$0xff] %v8164_v57 }
 0x676   : > { %v8099_v53 = vpop.f32.mrf.mxu2 }
 0x677   : > { %8255 = vxpose.xlu0.b32.cont [3/16] (narrow) %v8099_v53, 16  ;;  %v7916_v5 = vpop.f32.mrf.mxu3 }
 0x678   : > { %8185 = vxpose.xlu1.b32.cont [13/16] (narrow) %v7916_v5, 64 }
 0x67e   : > { %v8102_v4 = vpop.f32.mrf.mxu2 }
 0x67f   : > { %8256 = vxpose.xlu0.b32.cont [4/16] (narrow) %v8102_v4, 16  ;;  %v7919_v43 = vpop.f32.mrf.mxu3 }
 0x680   : > { %8186 = vxpose.xlu1.b32.cont [14/16] (narrow) %v7919_v43, 64  ;;  %v8237_v20 = vpop.trf.xlu2 }
 0x681   : > { %8285 = vst [vmem:[%s18026_s12] sm:$0xff] %v8237_v20 }
 0x686   : > { %v8105_v36 = vpop.f32.mrf.mxu2 }
 0x687   : > { %8257 = vxpose.xlu0.b32.cont [5/16] (narrow) %v8105_v36, 16  ;;  %v7922_v16 = vpop.f32.mrf.mxu3 }
 0x688   : > { %8187 = vxpose.xlu1.b32.cont [15/16] (narrow) %v7922_v16, 64  ;;  %v8238_v21 = vpop.trf.xlu2 }
 0x689   : > { %8287 = vst [vmem:[%s18026_s12 + $0x10] sm:$0xff] %v8238_v21 }
 0x68e   : > { %v8108_v13 = vpop.f32.mrf.mxu2 }
 0x68f   : > { %8258 = vxpose.xlu0.b32.cont [6/16] (narrow) %v8108_v13, 16  ;;  %v7925_v28 = vpop.f32.mrf.mxu3 }
 0x690   : > { %8188 = vxpose.xlu1.b32.end [16/16] (narrow) %v7925_v28, 64 }
 0x696   : > { %v8111_v18 = vpop.f32.mrf.mxu2 }
 0x697   : > { %8259 = vxpose.xlu0.b32.cont [7/16] (narrow) %v8111_v18, 16 }
 0x69e   : > { %v8114_v8 = vpop.f32.mrf.mxu2 }
 0x69f   : > { %8260 = vxpose.xlu0.b32.cont [8/16] (narrow) %v8114_v8, 16 }
 0x6a6   : > { %v8117_v45 = vpop.f32.mrf.mxu2 }
 0x6a7   : > { %8261 = vxpose.xlu0.b32.cont [9/16] (narrow) %v8117_v45, 16 }
 0x6ae   : > { %v8120_v40 = vpop.f32.mrf.mxu2 }
 0x6af   : > { %8262 = vxpose.xlu0.b32.cont [10/16] (narrow) %v8120_v40, 16 }
 0x6b6   : > { %v8123_v58 = vpop.f32.mrf.mxu2 }
 0x6b7   : > { %8263 = vxpose.xlu0.b32.cont [11/16] (narrow) %v8123_v58, 16 }
 0x6bc   : > { %v8189_v50 = vpop.trf.xlu1 }
 0x6bd   : > { %8206 = vst [vmem:[%s18016_s30 + $0x8] sm:$0xff] %v8189_v50 }
 0x6be   : > { %v8126_v44 = vpop.f32.mrf.mxu2 }
 0x6bf   : > { %8264 = vxpose.xlu0.b32.cont [12/16] (narrow) %v8126_v44, 16 }
 0x6c4   : > { %v8190_v2 = vpop.trf.xlu1 }
 0x6c5   : > { %8208 = vst [vmem:[%s18016_s30 + $0x18] sm:$0xff] %v8190_v2 }
 0x6c6   : > { %v8129_v17 = vpop.f32.mrf.mxu2 }
 0x6c7   : > { %8265 = vxpose.xlu0.b32.cont [13/16] (narrow) %v8129_v17, 16 }
 0x6cc   : > { %v8191_v9 = vpop.trf.xlu1 }
 0x6cd   : > { %8210 = vst [vmem:[%s18016_s30 + $0x28] sm:$0xff] %v8191_v9 }
 0x6ce   : > { %v8132_v62 = vpop.f32.mrf.mxu2 }
 0x6cf   : > { %8266 = vxpose.xlu0.b32.cont [14/16] (narrow) %v8132_v62, 16 }
 0x6d4   : > { %v8192_v42 = vpop.trf.xlu1 }
 0x6d5   : > { %8212 = vst [vmem:[%s18016_s30 + $0x38] sm:$0xff] %v8192_v42 }
 0x6d6   : > { %v8135_v39 = vpop.f32.mrf.mxu2 }
 0x6d7   : > { %8267 = vxpose.xlu0.b32.cont [15/16] (narrow) %v8135_v39, 16 }
 0x6dc   : > { %v8193_v1 = vpop.trf.xlu1 }
 0x6dd   : > { %8214 = vst [vmem:[%s18016_s30 + $0x48] sm:$0xff] %v8193_v1 }
 0x6de   : > { %v8138_v61 = vpop.f32.mrf.mxu2 }
 0x6df   : > { %8268 = vxpose.xlu0.b32.end [16/16] (narrow) %v8138_v61, 16 }
 0x6e4   : > { %v8194_v0 = vpop.trf.xlu1 }
 0x6e5   : > { %8216 = vst [vmem:[%s18016_s30 + $0x58] sm:$0xff] %v8194_v0 }
 0x6ec   : > { %v8195_v6 = vpop.trf.xlu1 }
 0x6ed   : > { %8218 = vst [vmem:[%s18016_s30 + $0x68] sm:$0xff] %v8195_v6 }
 0x6f4   : > { %v8196_v51 = vpop.trf.xlu1 }
 0x6f5   : > { %8220 = vst [vmem:[%s18016_s30 + $0x78] sm:$0xff] %v8196_v51 }
 0x6f6   : > { %10644 = shalt.err (!%p10641_p3)
}
 0x6f7   : > { %s10717_s30 = smov 256   ;;  %s10718_s18 = smov 16  }
 0x6f8   : > { %8924 = dma.vmem_to_hbm [thread:$0]  (%p10812_p5), %s8308_s21, 2048, %s8310_s25, %s8290_s27, %s10717_s30, %s10717_s30, %s10718_s18  }
 0x6f9   : > { %s8886_s1 = sshll.u32 %s10795_s17, 5  ;;  %s8324_s20 = sshll.u32 %s18026_s12, 4  ;;  %s8325_s20 = int_to_ptr.vmem [resolvable:$true] %s8324_s20 }
 0x6fa   : > { %s8323_s3 = scalar_lea.hbm %s18106_s10, %s8886_s1  ;;  %s8295_s28 = scalar_lea.sflag [#allocation7], %s18013_s26 }
 0x6fb   : > { %s8326_s11 = sshll.u32 %s8323_s3, 4  ;;  %s10665_s25 = scalar_lea.hbm %s18106_s10, 64  ;;  %s8327_s11 = int_to_ptr.hbm [resolvable:$true] %s8326_s11 }
 0x6fc   : > { %s10659_s29 = sshra.s32 %s8327_s11, 4  ;;  %s10660_s29 = int_to_ptr.hbm [resolvable:$true] %s10659_s29 }
 0x6fd   : > { %s10661_s4 = scalar_lea.hbm %s10660_s29, 32  ;;  %p10666_p9 = scmp.lt.s32.totalorder %s10660_s29, %s18106_s10 }
 0x6fe   : > { %p10662_p4 = scmp.ne.s32.totalorder %s10660_s29, %s10661_s4  ;;  %p10667_p10 = scmp.lt.s32.totalorder %s10665_s25, %s10661_s4 }
 0x700   : > { %p10663_p7 = pnand %p10662_p4, %p10812_p5  ;;  %p10668_p11 = por %p10667_p10, %p10666_p9 }
 0x702   : > { %p10664_p8 = pneg %p10663_p7 }
 0x704   : > { %p10669_p12 = pnand %p10668_p11, %p10664_p8 }
 0x70b   : > { %v8269_v41 = vpop.trf.xlu0 }
 0x70c   : > { %8286 = vst [vmem:[%s18026_s12 + $0x8] sm:$0xff] %v8269_v41 }
 0x713   : > { %v8270_v27 = vpop.trf.xlu0 }
 0x714   : > { %8288 = vst [vmem:[%s18026_s12 + $0x18] sm:$0xff] %v8270_v27 }
 0x715   : > { %10672 = shalt.err (!%p10669_p12)
}
 0x716   : > { %8925 = dma.vmem_to_hbm [thread:$0]  (%p10812_p5), %s8325_s20, 512, %s8327_s11, %s8295_s28, %s10717_s30, %s10717_s30, %s10718_s18  }
 0x717 PF: > { %p8935_p13 = scmp.ge.s32.totalorder %s10711_s16, 2  ;;  %s8341_s26 = sand.u32 1, %s10699_s13  }
 0x718   : > { %s8342_s12 = scalar_lea.sflag [#allocation5], %s8341_s26 }
 0x719   : > { %p8929_p0 = pnand %p8935_p13, %p10816_p6 }
 0x71b   : > { %p8930_p1 = pneg %p8929_p0 }
 0x71d   : > { %10690 = dma.done.wait (%p8930_p1), %s8342_s12, 2048  }
 0x71e   : > { %10692 = vsyncadd (%p8930_p1), %s8342_s12, 4294965248  ;;  %s8352_s4 = scalar_lea.sflag [#allocation7], %s8341_s26 }
 0x71f   : > { %10694 = dma.done.wait (%p8930_p1), %s8352_s4, 512  }
 0x720   : > { %10696 = vsyncadd (%p8930_p1), %s8352_s4, 4294966784  ;;  %p24_p5 = scmp.ge.s32.totalorder %s10799_s19, 4   ;;  %s18701_s13 = smov %s10703_s14 }
 0x721   : > { %s18702_s14 = smov %s10707_s15  ;;  %s18703_s15 = smov %s10810_s22 }
 0x722   : > { %s18704_s16 = smov %s10799_s19  ;;  %26 = sbr.rel (!%p24_p5) target bundleno = 11 (0xb), region = 114 }
 0x727   :  { %8358 = vsyncpa [#allocation5], 1 }
 0x728   :  { %8360 = vsyncpa [#allocation5 + $0x1], 1 }
 0x729   :  { %8361 = vsyncpa [#allocation7], 1 }
 0x72a   :  { %8363 = vsyncpa [#allocation7 + $0x1], 1 }

</bundles_post_ra>
